<compile_context>
chip_gen: v7x
topology: tpu7x:2x2x1
jax: 0.10.0
libtpu: 0.0.40
codegen_flags: <defaults>
</compile_context>

<pallas_src>
import functools

import jax
import jax.numpy as jnp
from jax.experimental import pallas as pl
from jax.experimental.pallas import tpu as pltpu


def output_length(input_length, kernel_size, stride):
    # Matches LocalConv.output_length.
    return (input_length - kernel_size + 1 + stride - 1) // stride


# ---------------------------------------------------------------------------
# Fused kernel: L2-normalize -> LocalConv (im2col in VMEM) -> BN (batch stats) -> ReLU
# ---------------------------------------------------------------------------
def _ffrf_fused_kernel(x_ref, w_ref, g_ref, b_ref, o_ref, xw_ref,
                       *, kh, kw, sh, sw, Ho, Wo):
    """
    x_ref : (B, C_in, H, W)   input, NCHW
    w_ref : (K, C_out, P)     LocalConv weight, K = C_in*kh*kw (torch (C,kh,kw) order), P = Ho*Wo
    g_ref : (1, C_out, 1)     BN gamma
    b_ref : (1, C_out, 1)     BN beta
    o_ref : (B, C_out, P)     output (wrapper reshapes to NCHW)
    xw_ref: (B, C_in, P)      VMEM scratch: flattened windows for one kernel tap
    """
    B, C_in, H, W = x_ref.shape
    K, C_out, P = w_ref.shape

    # ---- per-sample L2 norm over (C,H,W): scale = 1 / (||x||_2 + 1e-7) ----
    x = x_ref[...]
    ss = jnp.sum(x * x, axis=3)                    # (B, C, H)  lane reduce
    ss = jnp.sum(ss, axis=2)                       # (B, C)
    ss = jnp.sum(ss, axis=1, keepdims=True)        # (B, 1)
    # eps placement matches torch: 1/(sqrt(sumsq) + 1e-7).  Only B reciprocals are
    # computed (scale is folded into the conv output), so exact reciprocal is free.
    inv_nrm = pl.reciprocal(jnp.sqrt(ss) + 1e-7, approx=False)   # (B, 1)

    # ---- locally-connected conv with im2col fused in VMEM (VPU contraction) ----
    acc = jnp.zeros((B, C_out, P), jnp.float32)
    for i in range(kh):
        for j in range(kw):
            # xw[b, c, oh*Wo + ow] = x[b, c, oh*sh + i, ow*sw + j]   (this tap's windows)
            for oh in range(Ho):
                col = pl.ds(j, Wo) if sw == 1 else pl.ds(j, Wo, sw)
                xw_ref[:, :, pl.ds(oh * Wo, Wo)] = x_ref[:, :, oh * sh + i, col]
            xw = xw_ref[...]                                         # (B, C_in, P)
            for c in range(C_in):
                k = (c * kh + i) * kw + j                            # torch feature order (C, kh, kw)
                acc = acc + xw[:, c:c + 1, :] * w_ref[k][None, :, :]  # (B,1,P)*(1,C_out,P)

    # fold the per-sample L2 scale into the (linear) conv output
    acc = acc * inv_nrm[:, :, None]                                  # (B, C_out, P)

    # TODO(synk): dropout (train-mode stochastic) treated as identity here.

    # ---- BatchNorm2d: train-mode batch stats (biased var, eps=1e-5), then ReLU ----
    n = float(B * P)
    s1 = jnp.sum(acc, axis=2, keepdims=True)                         # (B, C_out, 1)
    s1 = jnp.sum(s1, axis=0, keepdims=True)                          # (1, C_out, 1)
    s2 = jnp.sum(acc * acc, axis=2, keepdims=True)
    s2 = jnp.sum(s2, axis=0, keepdims=True)                          # (1, C_out, 1)
    mean = s1 * (1.0 / n)
    var = s2 * (1.0 / n) - mean * mean                               # one-pass biased variance
    scale = g_ref[...] * jax.lax.rsqrt(var + 1e-5)                   # (1, C_out, 1)
    shift = b_ref[...] - mean * scale
    o_ref[...] = jnp.maximum(acc * scale + shift, 0.0).astype(o_ref.dtype)


# ---------------------------------------------------------------------------
# Wrapper
# ---------------------------------------------------------------------------
def ffrf_forward(x, lc_kernel, bn_gamma, bn_beta, kernel_size, strides):
    B, C_in, H, W = x.shape
    kh, kw = kernel_size
    sh, sw = strides
    Ho = output_length(H, kh, sh)
    Wo = output_length(W, kw, sw)
    P = Ho * Wo
    K = C_in * kh * kw
    C_out = lc_kernel.shape[-1]
    assert lc_kernel.shape == (P, K, C_out)

    # One-time parameter layout transform (hoisted to init in a real model):
    # (P, K, C_out) -> (K, C_out, P) puts P on the lane axis for lane-dense loads.
    w_r = jnp.transpose(lc_kernel, (1, 2, 0)).astype(jnp.float32)
    g = bn_gamma.reshape(1, C_out, 1).astype(jnp.float32)
    b = bn_beta.reshape(1, C_out, 1).astype(jnp.float32)

    kern = functools.partial(_ffrf_fused_kernel,
                             kh=kh, kw=kw, sh=sh, sw=sw, Ho=Ho, Wo=Wo)

    out = pl.pallas_call(
        kern,
        out_shape=jax.ShapeDtypeStruct((B, C_out, P), jnp.float32),
        grid=(1,),
        in_specs=[
            pl.BlockSpec((B, C_in, H, W), lambda i: (0, 0, 0, 0)),
            pl.BlockSpec((K, C_out, P), lambda i: (0, 0, 0)),
            pl.BlockSpec((1, C_out, 1), lambda i: (0, 0, 0)),
            pl.BlockSpec((1, C_out, 1), lambda i: (0, 0, 0)),
        ],
        out_specs=pl.BlockSpec((B, C_out, P), lambda i: (0, 0, 0)),
        scratch_shapes=[pltpu.VMEM((B, C_in, P), jnp.float32)],
        compiler_params=pltpu.CompilerParams(dimension_semantics=("arbitrary",)),
    )(x.astype(jnp.float32), w_r, g, b)

    return out.reshape(B, C_out, Ho, Wo)


# ---------------------------------------------------------------------------
# Pure-JAX reference (mirrors the PyTorch module) for a correctness check.
# ---------------------------------------------------------------------------
def _reference(x, lc_kernel, gamma, beta, kernel_size, strides):
    B, C, H, W = x.shape
    kh, kw = kernel_size
    sh, sw = strides
    Ho = output_length(H, kh, sh)
    Wo = output_length(W, kw, sw)
    nrm = jnp.sqrt(jnp.sum(x * x, axis=(1, 2, 3), keepdims=True))
    xn = x / (nrm + 1e-7)
    ii = (jnp.arange(Ho) * sh)[:, None] + jnp.arange(kh)[None, :]
    jj = (jnp.arange(Wo) * sw)[:, None] + jnp.arange(kw)[None, :]
    xw = xn[:, :, ii[:, None, :, None], jj[None, :, None, :]]        # (B,C,Ho,Wo,kh,kw)
    xw = jnp.transpose(xw, (2, 3, 0, 1, 4, 5)).reshape(Ho * Wo, B, C * kh * kw)
    out = jnp.sum(xw[:, :, :, None] * lc_kernel[:, None, :, :], axis=2)   # (P,B,C_out)
    out = out.reshape(Ho, Wo, B, -1).transpose(2, 3, 0, 1)                # (B,C_out,Ho,Wo)
    mean = out.mean(axis=(0, 2, 3), keepdims=True)
    var = ((out - mean) ** 2).mean(axis=(0, 2, 3), keepdims=True)
    y = (out - mean) / jnp.sqrt(var + 1e-5)
    y = y * gamma.reshape(1, -1, 1, 1) + beta.reshape(1, -1, 1, 1)
    return jnp.maximum(y, 0.0)


if __name__ == "__main__":
    # Small, module-consistent shapes.
    B, C_in, H, W = 2, 4, 16, 16
    C_out = 8
    kernel_size = (3, 3)
    strides = (1, 1)

    Ho = output_length(H, kernel_size[0], strides[0])
    Wo = output_length(W, kernel_size[1], strides[1])
    P = Ho * Wo
    K = C_in * kernel_size[0] * kernel_size[1]

    key = jax.random.PRNGKey(0)
    kx, kw_ = jax.random.split(key)
    x = jax.random.normal(kx, (B, C_in, H, W), dtype=jnp.float32)
    # LocalConv kernel parameter ~ torch.randn(kernel_shape); deterministic synthetic init.
    lc_kernel = jax.random.normal(kw_, (P, K, C_out), dtype=jnp.float32)
    # BatchNorm2d default init: gamma=1, beta=0.
    bn_gamma = jnp.ones((C_out,), dtype=jnp.float32)
    bn_beta = jnp.zeros((C_out,), dtype=jnp.float32)

    out = ffrf_forward(x, lc_kernel, bn_gamma, bn_beta, kernel_size, strides)
    out = jax.block_until_ready(out)
    assert out.shape == (B, C_out, Ho, Wo)

    ref = jax.block_until_ready(
        _reference(x, lc_kernel, bn_gamma, bn_beta, kernel_size, strides))
    assert bool(jnp.allclose(out, ref, rtol=1e-3, atol=1e-4)), "mismatch vs reference"

    print("KERNEL_OK")
</pallas_src>

<mosaic_0001>
module attributes {stable_mosaic.version = 11 : i64} {
  func.func @_ffrf_fused_kernel(%arg0: i32, %arg1: memref<2x4x16x16xf32, #tpu.memory_space<vmem>>, %arg2: memref<36x8x196xf32, #tpu.memory_space<vmem>>, %arg3: memref<1x8x1xf32, #tpu.memory_space<vmem>>, %arg4: memref<1x8x1xf32, #tpu.memory_space<vmem>>, %arg5: memref<2x8x196xf32, #tpu.memory_space<vmem>>, %arg6: memref<2x4x196xf32, #tpu.memory_space<vmem>>) attributes {dimension_semantics = [#tpu.dimension_semantics<arbitrary>], iteration_bounds = array<i64: 1>, scalar_prefetch = 0 : i64, scratch_operands = 1 : i64, tpu.core_type = #tpu.core_type<tc>, window_params = [{pipeline_mode = #tpu.pipeline_mode<synchronous>, transform_indices = @transform_0, window_bounds = array<i64: 2, 4, 16, 16>}, {pipeline_mode = #tpu.pipeline_mode<synchronous>, transform_indices = @transform_1, window_bounds = array<i64: 36, 8, 196>}, {pipeline_mode = #tpu.pipeline_mode<synchronous>, transform_indices = @transform_2, window_bounds = array<i64: 1, 8, 1>}, {pipeline_mode = #tpu.pipeline_mode<synchronous>, transform_indices = @transform_3, window_bounds = array<i64: 1, 8, 1>}, {pipeline_mode = #tpu.pipeline_mode<synchronous>, transform_indices = @transform_4, window_bounds = array<i64: 2, 8, 196>}]} {
    %c0 = arith.constant 0 : index
    %c0_0 = arith.constant 0 : index
    %c0_1 = arith.constant 0 : index
    %c0_2 = arith.constant 0 : index
    %0 = vector.load %arg1[%c0, %c0_0, %c0_1, %c0_2] : memref<2x4x16x16xf32, #tpu.memory_space<vmem>>, vector<2x4x16x16xf32>
    %1 = arith.mulf %0, %0 : vector<2x4x16x16xf32>
    %cst = arith.constant dense<0.000000e+00> : vector<2x4x16xf32>
    %2 = vector.multi_reduction <add>, %1, %cst [3] : vector<2x4x16x16xf32> to vector<2x4x16xf32>
    %cst_3 = arith.constant dense<0.000000e+00> : vector<2x4xf32>
    %3 = vector.multi_reduction <add>, %2, %cst_3 [2] : vector<2x4x16xf32> to vector<2x4xf32>
    %cst_4 = arith.constant dense<0.000000e+00> : vector<2xf32>
    %4 = vector.multi_reduction <add>, %3, %cst_4 [1] : vector<2x4xf32> to vector<2xf32>
    %5 = vector.shape_cast %4 : vector<2xf32> to vector<2x1xf32>
    %6 = math.sqrt %5 : vector<2x1xf32>
    %cst_5 = arith.constant 1.000000e-07 : f32
    %7 = vector.broadcast %cst_5 : f32 to vector<2x1xf32>
    %8 = arith.addf %6, %7 : vector<2x1xf32>
    %9 = tpu.reciprocal %8 : vector<2x1xf32> -> vector<2x1xf32>
    %cst_6 = arith.constant 0.000000e+00 : f32
    %10 = vector.broadcast %cst_6 : f32 to vector<2x8x196xf32>
    %c0_7 = arith.constant 0 : index
    %c0_8 = arith.constant 0 : index
    %c0_9 = arith.constant 0 : index
    %c0_10 = arith.constant 0 : index
    %11 = vector.load %arg1[%c0_7, %c0_8, %c0_9, %c0_10] : memref<2x4x16x16xf32, #tpu.memory_space<vmem>>, vector<2x4x1x14xf32>
    %12 = vector.shape_cast %11 : vector<2x4x1x14xf32> to vector<2x4x14xf32>
    %c0_11 = arith.constant 0 : index
    %c0_12 = arith.constant 0 : index
    %c0_13 = arith.constant 0 : index
    %13 = vector.load %arg6[%c0_11, %c0_12, %c0_13] : memref<2x4x196xf32, #tpu.memory_space<vmem>>, vector<2x4x14xf32>
    tpu.vector_store %arg6[%c0_11, %c0_12, %c0_13], %12 {strides = array<i32>} : memref<2x4x196xf32, #tpu.memory_space<vmem>>, vector<2x4x14xf32>,
    %c0_14 = arith.constant 0 : index
    %c0_15 = arith.constant 0 : index
    %c1 = arith.constant 1 : index
    %c0_16 = arith.constant 0 : index
    %14 = vector.load %arg1[%c0_14, %c0_15, %c1, %c0_16] : memref<2x4x16x16xf32, #tpu.memory_space<vmem>>, vector<2x4x1x14xf32>
    %15 = vector.shape_cast %14 : vector<2x4x1x14xf32> to vector<2x4x14xf32>
    %c0_17 = arith.constant 0 : index
    %c0_18 = arith.constant 0 : index
    %c14 = arith.constant 14 : index
    %16 = vector.load %arg6[%c0_17, %c0_18, %c14] : memref<2x4x196xf32, #tpu.memory_space<vmem>>, vector<2x4x14xf32>
    tpu.vector_store %arg6[%c0_17, %c0_18, %c14], %15 {strides = array<i32>} : memref<2x4x196xf32, #tpu.memory_space<vmem>>, vector<2x4x14xf32>,
    %c0_19 = arith.constant 0 : index
    %c0_20 = arith.constant 0 : index
    %c2 = arith.constant 2 : index
    %c0_21 = arith.constant 0 : index
    %17 = vector.load %arg1[%c0_19, %c0_20, %c2, %c0_21] : memref<2x4x16x16xf32, #tpu.memory_space<vmem>>, vector<2x4x1x14xf32>
    %18 = vector.shape_cast %17 : vector<2x4x1x14xf32> to vector<2x4x14xf32>
    %c0_22 = arith.constant 0 : index
    %c0_23 = arith.constant 0 : index
    %c28 = arith.constant 28 : index
    %19 = vector.load %arg6[%c0_22, %c0_23, %c28] : memref<2x4x196xf32, #tpu.memory_space<vmem>>, vector<2x4x14xf32>
    tpu.vector_store %arg6[%c0_22, %c0_23, %c28], %18 {strides = array<i32>} : memref<2x4x196xf32, #tpu.memory_space<vmem>>, vector<2x4x14xf32>,
    %c0_24 = arith.constant 0 : index
    %c0_25 = arith.constant 0 : index
    %c3 = arith.constant 3 : index
    %c0_26 = arith.constant 0 : index
    %20 = vector.load %arg1[%c0_24, %c0_25, %c3, %c0_26] : memref<2x4x16x16xf32, #tpu.memory_space<vmem>>, vector<2x4x1x14xf32>
    %21 = vector.shape_cast %20 : vector<2x4x1x14xf32> to vector<2x4x14xf32>
    %c0_27 = arith.constant 0 : index
    %c0_28 = arith.constant 0 : index
    %c42 = arith.constant 42 : index
    %22 = vector.load %arg6[%c0_27, %c0_28, %c42] : memref<2x4x196xf32, #tpu.memory_space<vmem>>, vector<2x4x14xf32>
    tpu.vector_store %arg6[%c0_27, %c0_28, %c42], %21 {strides = array<i32>} : memref<2x4x196xf32, #tpu.memory_space<vmem>>, vector<2x4x14xf32>,
    %c0_29 = arith.constant 0 : index
    %c0_30 = arith.constant 0 : index
    %c4 = arith.constant 4 : index
    %c0_31 = arith.constant 0 : index
    %23 = vector.load %arg1[%c0_29, %c0_30, %c4, %c0_31] : memref<2x4x16x16xf32, #tpu.memory_space<vmem>>, vector<2x4x1x14xf32>
    %24 = vector.shape_cast %23 : vector<2x4x1x14xf32> to vector<2x4x14xf32>
    %c0_32 = arith.constant 0 : index
    %c0_33 = arith.constant 0 : index
    %c56 = arith.constant 56 : index
    %25 = vector.load %arg6[%c0_32, %c0_33, %c56] : memref<2x4x196xf32, #tpu.memory_space<vmem>>, vector<2x4x14xf32>
    tpu.vector_store %arg6[%c0_32, %c0_33, %c56], %24 {strides = array<i32>} : memref<2x4x196xf32, #tpu.memory_space<vmem>>, vector<2x4x14xf32>,
    %c0_34 = arith.constant 0 : index
    %c0_35 = arith.constant 0 : index
    %c5 = arith.constant 5 : index
    %c0_36 = arith.constant 0 : index
    %26 = vector.load %arg1[%c0_34, %c0_35, %c5, %c0_36] : memref<2x4x16x16xf32, #tpu.memory_space<vmem>>, vector<2x4x1x14xf32>
    %27 = vector.shape_cast %26 : vector<2x4x1x14xf32> to vector<2x4x14xf32>
    %c0_37 = arith.constant 0 : index
    %c0_38 = arith.constant 0 : index
    %c70 = arith.constant 70 : index
    %28 = vector.load %arg6[%c0_37, %c0_38, %c70] : memref<2x4x196xf32, #tpu.memory_space<vmem>>, vector<2x4x14xf32>
    tpu.vector_store %arg6[%c0_37, %c0_38, %c70], %27 {strides = array<i32>} : memref<2x4x196xf32, #tpu.memory_space<vmem>>, vector<2x4x14xf32>,
    %c0_39 = arith.constant 0 : index
    %c0_40 = arith.constant 0 : index
    %c6 = arith.constant 6 : index
    %c0_41 = arith.constant 0 : index
    %29 = vector.load %arg1[%c0_39, %c0_40, %c6, %c0_41] : memref<2x4x16x16xf32, #tpu.memory_space<vmem>>, vector<2x4x1x14xf32>
    %30 = vector.shape_cast %29 : vector<2x4x1x14xf32> to vector<2x4x14xf32>
    %c0_42 = arith.constant 0 : index
    %c0_43 = arith.constant 0 : index
    %c84 = arith.constant 84 : index
    %31 = vector.load %arg6[%c0_42, %c0_43, %c84] : memref<2x4x196xf32, #tpu.memory_space<vmem>>, vector<2x4x14xf32>
    tpu.vector_store %arg6[%c0_42, %c0_43, %c84], %30 {strides = array<i32>} : memref<2x4x196xf32, #tpu.memory_space<vmem>>, vector<2x4x14xf32>,
    %c0_44 = arith.constant 0 : index
    %c0_45 = arith.constant 0 : index
    %c7 = arith.constant 7 : index
    %c0_46 = arith.constant 0 : index
    %32 = vector.load %arg1[%c0_44, %c0_45, %c7, %c0_46] : memref<2x4x16x16xf32, #tpu.memory_space<vmem>>, vector<2x4x1x14xf32>
    %33 = vector.shape_cast %32 : vector<2x4x1x14xf32> to vector<2x4x14xf32>
    %c0_47 = arith.constant 0 : index
    %c0_48 = arith.constant 0 : index
    %c98 = arith.constant 98 : index
    %34 = vector.load %arg6[%c0_47, %c0_48, %c98] : memref<2x4x196xf32, #tpu.memory_space<vmem>>, vector<2x4x14xf32>
    tpu.vector_store %arg6[%c0_47, %c0_48, %c98], %33 {strides = array<i32>} : memref<2x4x196xf32, #tpu.memory_space<vmem>>, vector<2x4x14xf32>,
    %c0_49 = arith.constant 0 : index
    %c0_50 = arith.constant 0 : index
    %c8 = arith.constant 8 : index
    %c0_51 = arith.constant 0 : index
    %35 = vector.load %arg1[%c0_49, %c0_50, %c8, %c0_51] : memref<2x4x16x16xf32, #tpu.memory_space<vmem>>, vector<2x4x1x14xf32>
    %36 = vector.shape_cast %35 : vector<2x4x1x14xf32> to vector<2x4x14xf32>
    %c0_52 = arith.constant 0 : index
    %c0_53 = arith.constant 0 : index
    %c112 = arith.constant 112 : index
    %37 = vector.load %arg6[%c0_52, %c0_53, %c112] : memref<2x4x196xf32, #tpu.memory_space<vmem>>, vector<2x4x14xf32>
    tpu.vector_store %arg6[%c0_52, %c0_53, %c112], %36 {strides = array<i32>} : memref<2x4x196xf32, #tpu.memory_space<vmem>>, vector<2x4x14xf32>,
    %c0_54 = arith.constant 0 : index
    %c0_55 = arith.constant 0 : index
    %c9 = arith.constant 9 : index
    %c0_56 = arith.constant 0 : index
    %38 = vector.load %arg1[%c0_54, %c0_55, %c9, %c0_56] : memref<2x4x16x16xf32, #tpu.memory_space<vmem>>, vector<2x4x1x14xf32>
    %39 = vector.shape_cast %38 : vector<2x4x1x14xf32> to vector<2x4x14xf32>
    %c0_57 = arith.constant 0 : index
    %c0_58 = arith.constant 0 : index
    %c126 = arith.constant 126 : index
    %40 = vector.load %arg6[%c0_57, %c0_58, %c126] : memref<2x4x196xf32, #tpu.memory_space<vmem>>, vector<2x4x14xf32>
    tpu.vector_store %arg6[%c0_57, %c0_58, %c126], %39 {strides = array<i32>} : memref<2x4x196xf32, #tpu.memory_space<vmem>>, vector<2x4x14xf32>,
    %c0_59 = arith.constant 0 : index
    %c0_60 = arith.constant 0 : index
    %c10 = arith.constant 10 : index
    %c0_61 = arith.constant 0 : index
    %41 = vector.load %arg1[%c0_59, %c0_60, %c10, %c0_61] : memref<2x4x16x16xf32, #tpu.memory_space<vmem>>, vector<2x4x1x14xf32>
    %42 = vector.shape_cast %41 : vector<2x4x1x14xf32> to vector<2x4x14xf32>
    %c0_62 = arith.constant 0 : index
    %c0_63 = arith.constant 0 : index
    %c140 = arith.constant 140 : index
    %43 = vector.load %arg6[%c0_62, %c0_63, %c140] : memref<2x4x196xf32, #tpu.memory_space<vmem>>, vector<2x4x14xf32>
    tpu.vector_store %arg6[%c0_62, %c0_63, %c140], %42 {strides = array<i32>} : memref<2x4x196xf32, #tpu.memory_space<vmem>>, vector<2x4x14xf32>,
    %c0_64 = arith.constant 0 : index
    %c0_65 = arith.constant 0 : index
    %c11 = arith.constant 11 : index
    %c0_66 = arith.constant 0 : index
    %44 = vector.load %arg1[%c0_64, %c0_65, %c11, %c0_66] : memref<2x4x16x16xf32, #tpu.memory_space<vmem>>, vector<2x4x1x14xf32>
    %45 = vector.shape_cast %44 : vector<2x4x1x14xf32> to vector<2x4x14xf32>
    %c0_67 = arith.constant 0 : index
    %c0_68 = arith.constant 0 : index
    %c154 = arith.constant 154 : index
    %46 = vector.load %arg6[%c0_67, %c0_68, %c154] : memref<2x4x196xf32, #tpu.memory_space<vmem>>, vector<2x4x14xf32>
    tpu.vector_store %arg6[%c0_67, %c0_68, %c154], %45 {strides = array<i32>} : memref<2x4x196xf32, #tpu.memory_space<vmem>>, vector<2x4x14xf32>,
    %c0_69 = arith.constant 0 : index
    %c0_70 = arith.constant 0 : index
    %c12 = arith.constant 12 : index
    %c0_71 = arith.constant 0 : index
    %47 = vector.load %arg1[%c0_69, %c0_70, %c12, %c0_71] : memref<2x4x16x16xf32, #tpu.memory_space<vmem>>, vector<2x4x1x14xf32>
    %48 = vector.shape_cast %47 : vector<2x4x1x14xf32> to vector<2x4x14xf32>
    %c0_72 = arith.constant 0 : index
    %c0_73 = arith.constant 0 : index
    %c168 = arith.constant 168 : index
    %49 = vector.load %arg6[%c0_72, %c0_73, %c168] : memref<2x4x196xf32, #tpu.memory_space<vmem>>, vector<2x4x14xf32>
    tpu.vector_store %arg6[%c0_72, %c0_73, %c168], %48 {strides = array<i32>} : memref<2x4x196xf32, #tpu.memory_space<vmem>>, vector<2x4x14xf32>,
    %c0_74 = arith.constant 0 : index
    %c0_75 = arith.constant 0 : index
    %c13 = arith.constant 13 : index
    %c0_76 = arith.constant 0 : index
    %50 = vector.load %arg1[%c0_74, %c0_75, %c13, %c0_76] : memref<2x4x16x16xf32, #tpu.memory_space<vmem>>, vector<2x4x1x14xf32>
    %51 = vector.shape_cast %50 : vector<2x4x1x14xf32> to vector<2x4x14xf32>
    %c0_77 = arith.constant 0 : index
    %c0_78 = arith.constant 0 : index
    %c182 = arith.constant 182 : index
    %52 = vector.load %arg6[%c0_77, %c0_78, %c182] : memref<2x4x196xf32, #tpu.memory_space<vmem>>, vector<2x4x14xf32>
    tpu.vector_store %arg6[%c0_77, %c0_78, %c182], %51 {strides = array<i32>} : memref<2x4x196xf32, #tpu.memory_space<vmem>>, vector<2x4x14xf32>,
    %c0_79 = arith.constant 0 : index
    %c0_80 = arith.constant 0 : index
    %c0_81 = arith.constant 0 : index
    %53 = vector.load %arg6[%c0_79, %c0_80, %c0_81] : memref<2x4x196xf32, #tpu.memory_space<vmem>>, vector<2x4x196xf32>
    %54 = vector.extract_strided_slice %53 {offsets = [0, 0, 0], sizes = [2, 1, 196], strides = [1, 1, 1]} : vector<2x4x196xf32> to vector<2x1x196xf32>
    %c0_82 = arith.constant 0 : index
    %c0_83 = arith.constant 0 : index
    %c0_84 = arith.constant 0 : index
    %55 = vector.load %arg2[%c0_82, %c0_83, %c0_84] : memref<36x8x196xf32, #tpu.memory_space<vmem>>, vector<1x8x196xf32>
    %56 = vector.shape_cast %55 : vector<1x8x196xf32> to vector<8x196xf32>
    %57 = vector.shape_cast %56 : vector<8x196xf32> to vector<1x8x196xf32>
    %58 = vector.broadcast %54 : vector<2x1x196xf32> to vector<2x8x196xf32>
    %59 = vector.broadcast %57 : vector<1x8x196xf32> to vector<2x8x196xf32>
    %60 = arith.mulf %58, %59 : vector<2x8x196xf32>
    %61 = arith.addf %10, %60 : vector<2x8x196xf32>
    %62 = vector.extract_strided_slice %53 {offsets = [0, 1, 0], sizes = [2, 1, 196], strides = [1, 1, 1]} : vector<2x4x196xf32> to vector<2x1x196xf32>
    %c9_85 = arith.constant 9 : index
    %c0_86 = arith.constant 0 : index
    %c0_87 = arith.constant 0 : index
    %63 = vector.load %arg2[%c9_85, %c0_86, %c0_87] : memref<36x8x196xf32, #tpu.memory_space<vmem>>, vector<1x8x196xf32>
    %64 = vector.shape_cast %63 : vector<1x8x196xf32> to vector<8x196xf32>
    %65 = vector.shape_cast %64 : vector<8x196xf32> to vector<1x8x196xf32>
    %66 = vector.broadcast %62 : vector<2x1x196xf32> to vector<2x8x196xf32>
    %67 = vector.broadcast %65 : vector<1x8x196xf32> to vector<2x8x196xf32>
    %68 = arith.mulf %66, %67 : vector<2x8x196xf32>
    %69 = arith.addf %61, %68 : vector<2x8x196xf32>
    %70 = vector.extract_strided_slice %53 {offsets = [0, 2, 0], sizes = [2, 1, 196], strides = [1, 1, 1]} : vector<2x4x196xf32> to vector<2x1x196xf32>
    %c18 = arith.constant 18 : index
    %c0_88 = arith.constant 0 : index
    %c0_89 = arith.constant 0 : index
    %71 = vector.load %arg2[%c18, %c0_88, %c0_89] : memref<36x8x196xf32, #tpu.memory_space<vmem>>, vector<1x8x196xf32>
    %72 = vector.shape_cast %71 : vector<1x8x196xf32> to vector<8x196xf32>
    %73 = vector.shape_cast %72 : vector<8x196xf32> to vector<1x8x196xf32>
    %74 = vector.broadcast %70 : vector<2x1x196xf32> to vector<2x8x196xf32>
    %75 = vector.broadcast %73 : vector<1x8x196xf32> to vector<2x8x196xf32>
    %76 = arith.mulf %74, %75 : vector<2x8x196xf32>
    %77 = arith.addf %69, %76 : vector<2x8x196xf32>
    %78 = vector.extract_strided_slice %53 {offsets = [0, 3, 0], sizes = [2, 1, 196], strides = [1, 1, 1]} : vector<2x4x196xf32> to vector<2x1x196xf32>
    %c27 = arith.constant 27 : index
    %c0_90 = arith.constant 0 : index
    %c0_91 = arith.constant 0 : index
    %79 = vector.load %arg2[%c27, %c0_90, %c0_91] : memref<36x8x196xf32, #tpu.memory_space<vmem>>, vector<1x8x196xf32>
    %80 = vector.shape_cast %79 : vector<1x8x196xf32> to vector<8x196xf32>
    %81 = vector.shape_cast %80 : vector<8x196xf32> to vector<1x8x196xf32>
    %82 = vector.broadcast %78 : vector<2x1x196xf32> to vector<2x8x196xf32>
    %83 = vector.broadcast %81 : vector<1x8x196xf32> to vector<2x8x196xf32>
    %84 = arith.mulf %82, %83 : vector<2x8x196xf32>
    %85 = arith.addf %77, %84 : vector<2x8x196xf32>
    %c0_92 = arith.constant 0 : index
    %c0_93 = arith.constant 0 : index
    %c0_94 = arith.constant 0 : index
    %c1_95 = arith.constant 1 : index
    %86 = vector.load %arg1[%c0_92, %c0_93, %c0_94, %c1_95] : memref<2x4x16x16xf32, #tpu.memory_space<vmem>>, vector<2x4x1x14xf32>
    %87 = vector.shape_cast %86 : vector<2x4x1x14xf32> to vector<2x4x14xf32>
    %c0_96 = arith.constant 0 : index
    %c0_97 = arith.constant 0 : index
    %c0_98 = arith.constant 0 : index
    %88 = vector.load %arg6[%c0_96, %c0_97, %c0_98] : memref<2x4x196xf32, #tpu.memory_space<vmem>>, vector<2x4x14xf32>
    tpu.vector_store %arg6[%c0_96, %c0_97, %c0_98], %87 {strides = array<i32>} : memref<2x4x196xf32, #tpu.memory_space<vmem>>, vector<2x4x14xf32>,
    %c0_99 = arith.constant 0 : index
    %c0_100 = arith.constant 0 : index
    %c1_101 = arith.constant 1 : index
    %c1_102 = arith.constant 1 : index
    %89 = vector.load %arg1[%c0_99, %c0_100, %c1_101, %c1_102] : memref<2x4x16x16xf32, #tpu.memory_space<vmem>>, vector<2x4x1x14xf32>
    %90 = vector.shape_cast %89 : vector<2x4x1x14xf32> to vector<2x4x14xf32>
    %c0_103 = arith.constant 0 : index
    %c0_104 = arith.constant 0 : index
    %c14_105 = arith.constant 14 : index
    %91 = vector.load %arg6[%c0_103, %c0_104, %c14_105] : memref<2x4x196xf32, #tpu.memory_space<vmem>>, vector<2x4x14xf32>
    tpu.vector_store %arg6[%c0_103, %c0_104, %c14_105], %90 {strides = array<i32>} : memref<2x4x196xf32, #tpu.memory_space<vmem>>, vector<2x4x14xf32>,
    %c0_106 = arith.constant 0 : index
    %c0_107 = arith.constant 0 : index
    %c2_108 = arith.constant 2 : index
    %c1_109 = arith.constant 1 : index
    %92 = vector.load %arg1[%c0_106, %c0_107, %c2_108, %c1_109] : memref<2x4x16x16xf32, #tpu.memory_space<vmem>>, vector<2x4x1x14xf32>
    %93 = vector.shape_cast %92 : vector<2x4x1x14xf32> to vector<2x4x14xf32>
    %c0_110 = arith.constant 0 : index
    %c0_111 = arith.constant 0 : index
    %c28_112 = arith.constant 28 : index
    %94 = vector.load %arg6[%c0_110, %c0_111, %c28_112] : memref<2x4x196xf32, #tpu.memory_space<vmem>>, vector<2x4x14xf32>
    tpu.vector_store %arg6[%c0_110, %c0_111, %c28_112], %93 {strides = array<i32>} : memref<2x4x196xf32, #tpu.memory_space<vmem>>, vector<2x4x14xf32>,
    %c0_113 = arith.constant 0 : index
    %c0_114 = arith.constant 0 : index
    %c3_115 = arith.constant 3 : index
    %c1_116 = arith.constant 1 : index
    %95 = vector.load %arg1[%c0_113, %c0_114, %c3_115, %c1_116] : memref<2x4x16x16xf32, #tpu.memory_space<vmem>>, vector<2x4x1x14xf32>
    %96 = vector.shape_cast %95 : vector<2x4x1x14xf32> to vector<2x4x14xf32>
    %c0_117 = arith.constant 0 : index
    %c0_118 = arith.constant 0 : index
    %c42_119 = arith.constant 42 : index
    %97 = vector.load %arg6[%c0_117, %c0_118, %c42_119] : memref<2x4x196xf32, #tpu.memory_space<vmem>>, vector<2x4x14xf32>
    tpu.vector_store %arg6[%c0_117, %c0_118, %c42_119], %96 {strides = array<i32>} : memref<2x4x196xf32, #tpu.memory_space<vmem>>, vector<2x4x14xf32>,
    %c0_120 = arith.constant 0 : index
    %c0_121 = arith.constant 0 : index
    %c4_122 = arith.constant 4 : index
    %c1_123 = arith.constant 1 : index
    %98 = vector.load %arg1[%c0_120, %c0_121, %c4_122, %c1_123] : memref<2x4x16x16xf32, #tpu.memory_space<vmem>>, vector<2x4x1x14xf32>
    %99 = vector.shape_cast %98 : vector<2x4x1x14xf32> to vector<2x4x14xf32>
    %c0_124 = arith.constant 0 : index
    %c0_125 = arith.constant 0 : index
    %c56_126 = arith.constant 56 : index
    %100 = vector.load %arg6[%c0_124, %c0_125, %c56_126] : memref<2x4x196xf32, #tpu.memory_space<vmem>>, vector<2x4x14xf32>
    tpu.vector_store %arg6[%c0_124, %c0_125, %c56_126], %99 {strides = array<i32>} : memref<2x4x196xf32, #tpu.memory_space<vmem>>, vector<2x4x14xf32>,
    %c0_127 = arith.constant 0 : index
    %c0_128 = arith.constant 0 : index
    %c5_129 = arith.constant 5 : index
    %c1_130 = arith.constant 1 : index
    %101 = vector.load %arg1[%c0_127, %c0_128, %c5_129, %c1_130] : memref<2x4x16x16xf32, #tpu.memory_space<vmem>>, vector<2x4x1x14xf32>
    %102 = vector.shape_cast %101 : vector<2x4x1x14xf32> to vector<2x4x14xf32>
    %c0_131 = arith.constant 0 : index
    %c0_132 = arith.constant 0 : index
    %c70_133 = arith.constant 70 : index
    %103 = vector.load %arg6[%c0_131, %c0_132, %c70_133] : memref<2x4x196xf32, #tpu.memory_space<vmem>>, vector<2x4x14xf32>
    tpu.vector_store %arg6[%c0_131, %c0_132, %c70_133], %102 {strides = array<i32>} : memref<2x4x196xf32, #tpu.memory_space<vmem>>, vector<2x4x14xf32>,
    %c0_134 = arith.constant 0 : index
    %c0_135 = arith.constant 0 : index
    %c6_136 = arith.constant 6 : index
    %c1_137 = arith.constant 1 : index
    %104 = vector.load %arg1[%c0_134, %c0_135, %c6_136, %c1_137] : memref<2x4x16x16xf32, #tpu.memory_space<vmem>>, vector<2x4x1x14xf32>
    %105 = vector.shape_cast %104 : vector<2x4x1x14xf32> to vector<2x4x14xf32>
    %c0_138 = arith.constant 0 : index
    %c0_139 = arith.constant 0 : index
    %c84_140 = arith.constant 84 : index
    %106 = vector.load %arg6[%c0_138, %c0_139, %c84_140] : memref<2x4x196xf32, #tpu.memory_space<vmem>>, vector<2x4x14xf32>
    tpu.vector_store %arg6[%c0_138, %c0_139, %c84_140], %105 {strides = array<i32>} : memref<2x4x196xf32, #tpu.memory_space<vmem>>, vector<2x4x14xf32>,
    %c0_141 = arith.constant 0 : index
    %c0_142 = arith.constant 0 : index
    %c7_143 = arith.constant 7 : index
    %c1_144 = arith.constant 1 : index
    %107 = vector.load %arg1[%c0_141, %c0_142, %c7_143, %c1_144] : memref<2x4x16x16xf32, #tpu.memory_space<vmem>>, vector<2x4x1x14xf32>
    %108 = vector.shape_cast %107 : vector<2x4x1x14xf32> to vector<2x4x14xf32>
    %c0_145 = arith.constant 0 : index
    %c0_146 = arith.constant 0 : index
    %c98_147 = arith.constant 98 : index
    %109 = vector.load %arg6[%c0_145, %c0_146, %c98_147] : memref<2x4x196xf32, #tpu.memory_space<vmem>>, vector<2x4x14xf32>
    tpu.vector_store %arg6[%c0_145, %c0_146, %c98_147], %108 {strides = array<i32>} : memref<2x4x196xf32, #tpu.memory_space<vmem>>, vector<2x4x14xf32>,
    %c0_148 = arith.constant 0 : index
    %c0_149 = arith.constant 0 : index
    %c8_150 = arith.constant 8 : index
    %c1_151 = arith.constant 1 : index
    %110 = vector.load %arg1[%c0_148, %c0_149, %c8_150, %c1_151] : memref<2x4x16x16xf32, #tpu.memory_space<vmem>>, vector<2x4x1x14xf32>
    %111 = vector.shape_cast %110 : vector<2x4x1x14xf32> to vector<2x4x14xf32>
    %c0_152 = arith.constant 0 : index
    %c0_153 = arith.constant 0 : index
    %c112_154 = arith.constant 112 : index
    %112 = vector.load %arg6[%c0_152, %c0_153, %c112_154] : memref<2x4x196xf32, #tpu.memory_space<vmem>>, vector<2x4x14xf32>
    tpu.vector_store %arg6[%c0_152, %c0_153, %c112_154], %111 {strides = array<i32>} : memref<2x4x196xf32, #tpu.memory_space<vmem>>, vector<2x4x14xf32>,
    %c0_155 = arith.constant 0 : index
    %c0_156 = arith.constant 0 : index
    %c9_157 = arith.constant 9 : index
    %c1_158 = arith.constant 1 : index
    %113 = vector.load %arg1[%c0_155, %c0_156, %c9_157, %c1_158] : memref<2x4x16x16xf32, #tpu.memory_space<vmem>>, vector<2x4x1x14xf32>
    %114 = vector.shape_cast %113 : vector<2x4x1x14xf32> to vector<2x4x14xf32>
    %c0_159 = arith.constant 0 : index
    %c0_160 = arith.constant 0 : index
    %c126_161 = arith.constant 126 : index
    %115 = vector.load %arg6[%c0_159, %c0_160, %c126_161] : memref<2x4x196xf32, #tpu.memory_space<vmem>>, vector<2x4x14xf32>
    tpu.vector_store %arg6[%c0_159, %c0_160, %c126_161], %114 {strides = array<i32>} : memref<2x4x196xf32, #tpu.memory_space<vmem>>, vector<2x4x14xf32>,
    %c0_162 = arith.constant 0 : index
    %c0_163 = arith.constant 0 : index
    %c10_164 = arith.constant 10 : index
    %c1_165 = arith.constant 1 : index
    %116 = vector.load %arg1[%c0_162, %c0_163, %c10_164, %c1_165] : memref<2x4x16x16xf32, #tpu.memory_space<vmem>>, vector<2x4x1x14xf32>
    %117 = vector.shape_cast %116 : vector<2x4x1x14xf32> to vector<2x4x14xf32>
    %c0_166 = arith.constant 0 : index
    %c0_167 = arith.constant 0 : index
    %c140_168 = arith.constant 140 : index
    %118 = vector.load %arg6[%c0_166, %c0_167, %c140_168] : memref<2x4x196xf32, #tpu.memory_space<vmem>>, vector<2x4x14xf32>
    tpu.vector_store %arg6[%c0_166, %c0_167, %c140_168], %117 {strides = array<i32>} : memref<2x4x196xf32, #tpu.memory_space<vmem>>, vector<2x4x14xf32>,
    %c0_169 = arith.constant 0 : index
    %c0_170 = arith.constant 0 : index
    %c11_171 = arith.constant 11 : index
    %c1_172 = arith.constant 1 : index
    %119 = vector.load %arg1[%c0_169, %c0_170, %c11_171, %c1_172] : memref<2x4x16x16xf32, #tpu.memory_space<vmem>>, vector<2x4x1x14xf32>
    %120 = vector.shape_cast %119 : vector<2x4x1x14xf32> to vector<2x4x14xf32>
    %c0_173 = arith.constant 0 : index
    %c0_174 = arith.constant 0 : index
    %c154_175 = arith.constant 154 : index
    %121 = vector.load %arg6[%c0_173, %c0_174, %c154_175] : memref<2x4x196xf32, #tpu.memory_space<vmem>>, vector<2x4x14xf32>
    tpu.vector_store %arg6[%c0_173, %c0_174, %c154_175], %120 {strides = array<i32>} : memref<2x4x196xf32, #tpu.memory_space<vmem>>, vector<2x4x14xf32>,
    %c0_176 = arith.constant 0 : index
    %c0_177 = arith.constant 0 : index
    %c12_178 = arith.constant 12 : index
    %c1_179 = arith.constant 1 : index
    %122 = vector.load %arg1[%c0_176, %c0_177, %c12_178, %c1_179] : memref<2x4x16x16xf32, #tpu.memory_space<vmem>>, vector<2x4x1x14xf32>
    %123 = vector.shape_cast %122 : vector<2x4x1x14xf32> to vector<2x4x14xf32>
    %c0_180 = arith.constant 0 : index
    %c0_181 = arith.constant 0 : index
    %c168_182 = arith.constant 168 : index
    %124 = vector.load %arg6[%c0_180, %c0_181, %c168_182] : memref<2x4x196xf32, #tpu.memory_space<vmem>>, vector<2x4x14xf32>
    tpu.vector_store %arg6[%c0_180, %c0_181, %c168_182], %123 {strides = array<i32>} : memref<2x4x196xf32, #tpu.memory_space<vmem>>, vector<2x4x14xf32>,
    %c0_183 = arith.constant 0 : index
    %c0_184 = arith.constant 0 : index
    %c13_185 = arith.constant 13 : index
    %c1_186 = arith.constant 1 : index
    %125 = vector.load %arg1[%c0_183, %c0_184, %c13_185, %c1_186] : memref<2x4x16x16xf32, #tpu.memory_space<vmem>>, vector<2x4x1x14xf32>
    %126 = vector.shape_cast %125 : vector<2x4x1x14xf32> to vector<2x4x14xf32>
    %c0_187 = arith.constant 0 : index
    %c0_188 = arith.constant 0 : index
    %c182_189 = arith.constant 182 : index
    %127 = vector.load %arg6[%c0_187, %c0_188, %c182_189] : memref<2x4x196xf32, #tpu.memory_space<vmem>>, vector<2x4x14xf32>
    tpu.vector_store %arg6[%c0_187, %c0_188, %c182_189], %126 {strides = array<i32>} : memref<2x4x196xf32, #tpu.memory_space<vmem>>, vector<2x4x14xf32>,
    %c0_190 = arith.constant 0 : index
    %c0_191 = arith.constant 0 : index
    %c0_192 = arith.constant 0 : index
    %128 = vector.load %arg6[%c0_190, %c0_191, %c0_192] : memref<2x4x196xf32, #tpu.memory_space<vmem>>, vector<2x4x196xf32>
    %129 = vector.extract_strided_slice %128 {offsets = [0, 0, 0], sizes = [2, 1, 196], strides = [1, 1, 1]} : vector<2x4x196xf32> to vector<2x1x196xf32>
    %c1_193 = arith.constant 1 : index
    %c0_194 = arith.constant 0 : index
    %c0_195 = arith.constant 0 : index
    %130 = vector.load %arg2[%c1_193, %c0_194, %c0_195] : memref<36x8x196xf32, #tpu.memory_space<vmem>>, vector<1x8x196xf32>
    %131 = vector.shape_cast %130 : vector<1x8x196xf32> to vector<8x196xf32>
    %132 = vector.shape_cast %131 : vector<8x196xf32> to vector<1x8x196xf32>
    %133 = vector.broadcast %129 : vector<2x1x196xf32> to vector<2x8x196xf32>
    %134 = vector.broadcast %132 : vector<1x8x196xf32> to vector<2x8x196xf32>
    %135 = arith.mulf %133, %134 : vector<2x8x196xf32>
    %136 = arith.addf %85, %135 : vector<2x8x196xf32>
    %137 = vector.extract_strided_slice %128 {offsets = [0, 1, 0], sizes = [2, 1, 196], strides = [1, 1, 1]} : vector<2x4x196xf32> to vector<2x1x196xf32>
    %c10_196 = arith.constant 10 : index
    %c0_197 = arith.constant 0 : index
    %c0_198 = arith.constant 0 : index
    %138 = vector.load %arg2[%c10_196, %c0_197, %c0_198] : memref<36x8x196xf32, #tpu.memory_space<vmem>>, vector<1x8x196xf32>
    %139 = vector.shape_cast %138 : vector<1x8x196xf32> to vector<8x196xf32>
    %140 = vector.shape_cast %139 : vector<8x196xf32> to vector<1x8x196xf32>
    %141 = vector.broadcast %137 : vector<2x1x196xf32> to vector<2x8x196xf32>
    %142 = vector.broadcast %140 : vector<1x8x196xf32> to vector<2x8x196xf32>
    %143 = arith.mulf %141, %142 : vector<2x8x196xf32>
    %144 = arith.addf %136, %143 : vector<2x8x196xf32>
    %145 = vector.extract_strided_slice %128 {offsets = [0, 2, 0], sizes = [2, 1, 196], strides = [1, 1, 1]} : vector<2x4x196xf32> to vector<2x1x196xf32>
    %c19 = arith.constant 19 : index
    %c0_199 = arith.constant 0 : index
    %c0_200 = arith.constant 0 : index
    %146 = vector.load %arg2[%c19, %c0_199, %c0_200] : memref<36x8x196xf32, #tpu.memory_space<vmem>>, vector<1x8x196xf32>
    %147 = vector.shape_cast %146 : vector<1x8x196xf32> to vector<8x196xf32>
    %148 = vector.shape_cast %147 : vector<8x196xf32> to vector<1x8x196xf32>
    %149 = vector.broadcast %145 : vector<2x1x196xf32> to vector<2x8x196xf32>
    %150 = vector.broadcast %148 : vector<1x8x196xf32> to vector<2x8x196xf32>
    %151 = arith.mulf %149, %150 : vector<2x8x196xf32>
    %152 = arith.addf %144, %151 : vector<2x8x196xf32>
    %153 = vector.extract_strided_slice %128 {offsets = [0, 3, 0], sizes = [2, 1, 196], strides = [1, 1, 1]} : vector<2x4x196xf32> to vector<2x1x196xf32>
    %c28_201 = arith.constant 28 : index
    %c0_202 = arith.constant 0 : index
    %c0_203 = arith.constant 0 : index
    %154 = vector.load %arg2[%c28_201, %c0_202, %c0_203] : memref<36x8x196xf32, #tpu.memory_space<vmem>>, vector<1x8x196xf32>
    %155 = vector.shape_cast %154 : vector<1x8x196xf32> to vector<8x196xf32>
    %156 = vector.shape_cast %155 : vector<8x196xf32> to vector<1x8x196xf32>
    %157 = vector.broadcast %153 : vector<2x1x196xf32> to vector<2x8x196xf32>
    %158 = vector.broadcast %156 : vector<1x8x196xf32> to vector<2x8x196xf32>
    %159 = arith.mulf %157, %158 : vector<2x8x196xf32>
    %160 = arith.addf %152, %159 : vector<2x8x196xf32>
    %c0_204 = arith.constant 0 : index
    %c0_205 = arith.constant 0 : index
    %c0_206 = arith.constant 0 : index
    %c2_207 = arith.constant 2 : index
    %161 = vector.load %arg1[%c0_204, %c0_205, %c0_206, %c2_207] : memref<2x4x16x16xf32, #tpu.memory_space<vmem>>, vector<2x4x1x14xf32>
    %162 = vector.shape_cast %161 : vector<2x4x1x14xf32> to vector<2x4x14xf32>
    %c0_208 = arith.constant 0 : index
    %c0_209 = arith.constant 0 : index
    %c0_210 = arith.constant 0 : index
    %163 = vector.load %arg6[%c0_208, %c0_209, %c0_210] : memref<2x4x196xf32, #tpu.memory_space<vmem>>, vector<2x4x14xf32>
    tpu.vector_store %arg6[%c0_208, %c0_209, %c0_210], %162 {strides = array<i32>} : memref<2x4x196xf32, #tpu.memory_space<vmem>>, vector<2x4x14xf32>,
    %c0_211 = arith.constant 0 : index
    %c0_212 = arith.constant 0 : index
    %c1_213 = arith.constant 1 : index
    %c2_214 = arith.constant 2 : index
    %164 = vector.load %arg1[%c0_211, %c0_212, %c1_213, %c2_214] : memref<2x4x16x16xf32, #tpu.memory_space<vmem>>, vector<2x4x1x14xf32>
    %165 = vector.shape_cast %164 : vector<2x4x1x14xf32> to vector<2x4x14xf32>
    %c0_215 = arith.constant 0 : index
    %c0_216 = arith.constant 0 : index
    %c14_217 = arith.constant 14 : index
    %166 = vector.load %arg6[%c0_215, %c0_216, %c14_217] : memref<2x4x196xf32, #tpu.memory_space<vmem>>, vector<2x4x14xf32>
    tpu.vector_store %arg6[%c0_215, %c0_216, %c14_217], %165 {strides = array<i32>} : memref<2x4x196xf32, #tpu.memory_space<vmem>>, vector<2x4x14xf32>,
    %c0_218 = arith.constant 0 : index
    %c0_219 = arith.constant 0 : index
    %c2_220 = arith.constant 2 : index
    %c2_221 = arith.constant 2 : index
    %167 = vector.load %arg1[%c0_218, %c0_219, %c2_220, %c2_221] : memref<2x4x16x16xf32, #tpu.memory_space<vmem>>, vector<2x4x1x14xf32>
    %168 = vector.shape_cast %167 : vector<2x4x1x14xf32> to vector<2x4x14xf32>
    %c0_222 = arith.constant 0 : index
    %c0_223 = arith.constant 0 : index
    %c28_224 = arith.constant 28 : index
    %169 = vector.load %arg6[%c0_222, %c0_223, %c28_224] : memref<2x4x196xf32, #tpu.memory_space<vmem>>, vector<2x4x14xf32>
    tpu.vector_store %arg6[%c0_222, %c0_223, %c28_224], %168 {strides = array<i32>} : memref<2x4x196xf32, #tpu.memory_space<vmem>>, vector<2x4x14xf32>,
    %c0_225 = arith.constant 0 : index
    %c0_226 = arith.constant 0 : index
    %c3_227 = arith.constant 3 : index
    %c2_228 = arith.constant 2 : index
    %170 = vector.load %arg1[%c0_225, %c0_226, %c3_227, %c2_228] : memref<2x4x16x16xf32, #tpu.memory_space<vmem>>, vector<2x4x1x14xf32>
    %171 = vector.shape_cast %170 : vector<2x4x1x14xf32> to vector<2x4x14xf32>
    %c0_229 = arith.constant 0 : index
    %c0_230 = arith.constant 0 : index
    %c42_231 = arith.constant 42 : index
    %172 = vector.load %arg6[%c0_229, %c0_230, %c42_231] : memref<2x4x196xf32, #tpu.memory_space<vmem>>, vector<2x4x14xf32>
    tpu.vector_store %arg6[%c0_229, %c0_230, %c42_231], %171 {strides = array<i32>} : memref<2x4x196xf32, #tpu.memory_space<vmem>>, vector<2x4x14xf32>,
    %c0_232 = arith.constant 0 : index
    %c0_233 = arith.constant 0 : index
    %c4_234 = arith.constant 4 : index
    %c2_235 = arith.constant 2 : index
    %173 = vector.load %arg1[%c0_232, %c0_233, %c4_234, %c2_235] : memref<2x4x16x16xf32, #tpu.memory_space<vmem>>, vector<2x4x1x14xf32>
    %174 = vector.shape_cast %173 : vector<2x4x1x14xf32> to vector<2x4x14xf32>
    %c0_236 = arith.constant 0 : index
    %c0_237 = arith.constant 0 : index
    %c56_238 = arith.constant 56 : index
    %175 = vector.load %arg6[%c0_236, %c0_237, %c56_238] : memref<2x4x196xf32, #tpu.memory_space<vmem>>, vector<2x4x14xf32>
    tpu.vector_store %arg6[%c0_236, %c0_237, %c56_238], %174 {strides = array<i32>} : memref<2x4x196xf32, #tpu.memory_space<vmem>>, vector<2x4x14xf32>,
    %c0_239 = arith.constant 0 : index
    %c0_240 = arith.constant 0 : index
    %c5_241 = arith.constant 5 : index
    %c2_242 = arith.constant 2 : index
    %176 = vector.load %arg1[%c0_239, %c0_240, %c5_241, %c2_242] : memref<2x4x16x16xf32, #tpu.memory_space<vmem>>, vector<2x4x1x14xf32>
    %177 = vector.shape_cast %176 : vector<2x4x1x14xf32> to vector<2x4x14xf32>
    %c0_243 = arith.constant 0 : index
    %c0_244 = arith.constant 0 : index
    %c70_245 = arith.constant 70 : index
    %178 = vector.load %arg6[%c0_243, %c0_244, %c70_245] : memref<2x4x196xf32, #tpu.memory_space<vmem>>, vector<2x4x14xf32>
    tpu.vector_store %arg6[%c0_243, %c0_244, %c70_245], %177 {strides = array<i32>} : memref<2x4x196xf32, #tpu.memory_space<vmem>>, vector<2x4x14xf32>,
    %c0_246 = arith.constant 0 : index
    %c0_247 = arith.constant 0 : index
    %c6_248 = arith.constant 6 : index
    %c2_249 = arith.constant 2 : index
    %179 = vector.load %arg1[%c0_246, %c0_247, %c6_248, %c2_249] : memref<2x4x16x16xf32, #tpu.memory_space<vmem>>, vector<2x4x1x14xf32>
    %180 = vector.shape_cast %179 : vector<2x4x1x14xf32> to vector<2x4x14xf32>
    %c0_250 = arith.constant 0 : index
    %c0_251 = arith.constant 0 : index
    %c84_252 = arith.constant 84 : index
    %181 = vector.load %arg6[%c0_250, %c0_251, %c84_252] : memref<2x4x196xf32, #tpu.memory_space<vmem>>, vector<2x4x14xf32>
    tpu.vector_store %arg6[%c0_250, %c0_251, %c84_252], %180 {strides = array<i32>} : memref<2x4x196xf32, #tpu.memory_space<vmem>>, vector<2x4x14xf32>,
    %c0_253 = arith.constant 0 : index
    %c0_254 = arith.constant 0 : index
    %c7_255 = arith.constant 7 : index
    %c2_256 = arith.constant 2 : index
    %182 = vector.load %arg1[%c0_253, %c0_254, %c7_255, %c2_256] : memref<2x4x16x16xf32, #tpu.memory_space<vmem>>, vector<2x4x1x14xf32>
    %183 = vector.shape_cast %182 : vector<2x4x1x14xf32> to vector<2x4x14xf32>
    %c0_257 = arith.constant 0 : index
    %c0_258 = arith.constant 0 : index
    %c98_259 = arith.constant 98 : index
    %184 = vector.load %arg6[%c0_257, %c0_258, %c98_259] : memref<2x4x196xf32, #tpu.memory_space<vmem>>, vector<2x4x14xf32>
    tpu.vector_store %arg6[%c0_257, %c0_258, %c98_259], %183 {strides = array<i32>} : memref<2x4x196xf32, #tpu.memory_space<vmem>>, vector<2x4x14xf32>,
    %c0_260 = arith.constant 0 : index
    %c0_261 = arith.constant 0 : index
    %c8_262 = arith.constant 8 : index
    %c2_263 = arith.constant 2 : index
    %185 = vector.load %arg1[%c0_260, %c0_261, %c8_262, %c2_263] : memref<2x4x16x16xf32, #tpu.memory_space<vmem>>, vector<2x4x1x14xf32>
    %186 = vector.shape_cast %185 : vector<2x4x1x14xf32> to vector<2x4x14xf32>
    %c0_264 = arith.constant 0 : index
    %c0_265 = arith.constant 0 : index
    %c112_266 = arith.constant 112 : index
    %187 = vector.load %arg6[%c0_264, %c0_265, %c112_266] : memref<2x4x196xf32, #tpu.memory_space<vmem>>, vector<2x4x14xf32>
    tpu.vector_store %arg6[%c0_264, %c0_265, %c112_266], %186 {strides = array<i32>} : memref<2x4x196xf32, #tpu.memory_space<vmem>>, vector<2x4x14xf32>,
    %c0_267 = arith.constant 0 : index
    %c0_268 = arith.constant 0 : index
    %c9_269 = arith.constant 9 : index
    %c2_270 = arith.constant 2 : index
    %188 = vector.load %arg1[%c0_267, %c0_268, %c9_269, %c2_270] : memref<2x4x16x16xf32, #tpu.memory_space<vmem>>, vector<2x4x1x14xf32>
    %189 = vector.shape_cast %188 : vector<2x4x1x14xf32> to vector<2x4x14xf32>
    %c0_271 = arith.constant 0 : index
    %c0_272 = arith.constant 0 : index
    %c126_273 = arith.constant 126 : index
    %190 = vector.load %arg6[%c0_271, %c0_272, %c126_273] : memref<2x4x196xf32, #tpu.memory_space<vmem>>, vector<2x4x14xf32>
    tpu.vector_store %arg6[%c0_271, %c0_272, %c126_273], %189 {strides = array<i32>} : memref<2x4x196xf32, #tpu.memory_space<vmem>>, vector<2x4x14xf32>,
    %c0_274 = arith.constant 0 : index
    %c0_275 = arith.constant 0 : index
    %c10_276 = arith.constant 10 : index
    %c2_277 = arith.constant 2 : index
    %191 = vector.load %arg1[%c0_274, %c0_275, %c10_276, %c2_277] : memref<2x4x16x16xf32, #tpu.memory_space<vmem>>, vector<2x4x1x14xf32>
    %192 = vector.shape_cast %191 : vector<2x4x1x14xf32> to vector<2x4x14xf32>
    %c0_278 = arith.constant 0 : index
    %c0_279 = arith.constant 0 : index
    %c140_280 = arith.constant 140 : index
    %193 = vector.load %arg6[%c0_278, %c0_279, %c140_280] : memref<2x4x196xf32, #tpu.memory_space<vmem>>, vector<2x4x14xf32>
    tpu.vector_store %arg6[%c0_278, %c0_279, %c140_280], %192 {strides = array<i32>} : memref<2x4x196xf32, #tpu.memory_space<vmem>>, vector<2x4x14xf32>,
    %c0_281 = arith.constant 0 : index
    %c0_282 = arith.constant 0 : index
    %c11_283 = arith.constant 11 : index
    %c2_284 = arith.constant 2 : index
    %194 = vector.load %arg1[%c0_281, %c0_282, %c11_283, %c2_284] : memref<2x4x16x16xf32, #tpu.memory_space<vmem>>, vector<2x4x1x14xf32>
    %195 = vector.shape_cast %194 : vector<2x4x1x14xf32> to vector<2x4x14xf32>
    %c0_285 = arith.constant 0 : index
    %c0_286 = arith.constant 0 : index
    %c154_287 = arith.constant 154 : index
    %196 = vector.load %arg6[%c0_285, %c0_286, %c154_287] : memref<2x4x196xf32, #tpu.memory_space<vmem>>, vector<2x4x14xf32>
    tpu.vector_store %arg6[%c0_285, %c0_286, %c154_287], %195 {strides = array<i32>} : memref<2x4x196xf32, #tpu.memory_space<vmem>>, vector<2x4x14xf32>,
    %c0_288 = arith.constant 0 : index
    %c0_289 = arith.constant 0 : index
    %c12_290 = arith.constant 12 : index
    %c2_291 = arith.constant 2 : index
    %197 = vector.load %arg1[%c0_288, %c0_289, %c12_290, %c2_291] : memref<2x4x16x16xf32, #tpu.memory_space<vmem>>, vector<2x4x1x14xf32>
    %198 = vector.shape_cast %197 : vector<2x4x1x14xf32> to vector<2x4x14xf32>
    %c0_292 = arith.constant 0 : index
    %c0_293 = arith.constant 0 : index
    %c168_294 = arith.constant 168 : index
    %199 = vector.load %arg6[%c0_292, %c0_293, %c168_294] : memref<2x4x196xf32, #tpu.memory_space<vmem>>, vector<2x4x14xf32>
    tpu.vector_store %arg6[%c0_292, %c0_293, %c168_294], %198 {strides = array<i32>} : memref<2x4x196xf32, #tpu.memory_space<vmem>>, vector<2x4x14xf32>,
    %c0_295 = arith.constant 0 : index
    %c0_296 = arith.constant 0 : index
    %c13_297 = arith.constant 13 : index
    %c2_298 = arith.constant 2 : index
    %200 = vector.load %arg1[%c0_295, %c0_296, %c13_297, %c2_298] : memref<2x4x16x16xf32, #tpu.memory_space<vmem>>, vector<2x4x1x14xf32>
    %201 = vector.shape_cast %200 : vector<2x4x1x14xf32> to vector<2x4x14xf32>
    %c0_299 = arith.constant 0 : index
    %c0_300 = arith.constant 0 : index
    %c182_301 = arith.constant 182 : index
    %202 = vector.load %arg6[%c0_299, %c0_300, %c182_301] : memref<2x4x196xf32, #tpu.memory_space<vmem>>, vector<2x4x14xf32>
    tpu.vector_store %arg6[%c0_299, %c0_300, %c182_301], %201 {strides = array<i32>} : memref<2x4x196xf32, #tpu.memory_space<vmem>>, vector<2x4x14xf32>,
    %c0_302 = arith.constant 0 : index
    %c0_303 = arith.constant 0 : index
    %c0_304 = arith.constant 0 : index
    %203 = vector.load %arg6[%c0_302, %c0_303, %c0_304] : memref<2x4x196xf32, #tpu.memory_space<vmem>>, vector<2x4x196xf32>
    %204 = vector.extract_strided_slice %203 {offsets = [0, 0, 0], sizes = [2, 1, 196], strides = [1, 1, 1]} : vector<2x4x196xf32> to vector<2x1x196xf32>
    %c2_305 = arith.constant 2 : index
    %c0_306 = arith.constant 0 : index
    %c0_307 = arith.constant 0 : index
    %205 = vector.load %arg2[%c2_305, %c0_306, %c0_307] : memref<36x8x196xf32, #tpu.memory_space<vmem>>, vector<1x8x196xf32>
    %206 = vector.shape_cast %205 : vector<1x8x196xf32> to vector<8x196xf32>
    %207 = vector.shape_cast %206 : vector<8x196xf32> to vector<1x8x196xf32>
    %208 = vector.broadcast %204 : vector<2x1x196xf32> to vector<2x8x196xf32>
    %209 = vector.broadcast %207 : vector<1x8x196xf32> to vector<2x8x196xf32>
    %210 = arith.mulf %208, %209 : vector<2x8x196xf32>
    %211 = arith.addf %160, %210 : vector<2x8x196xf32>
    %212 = vector.extract_strided_slice %203 {offsets = [0, 1, 0], sizes = [2, 1, 196], strides = [1, 1, 1]} : vector<2x4x196xf32> to vector<2x1x196xf32>
    %c11_308 = arith.constant 11 : index
    %c0_309 = arith.constant 0 : index
    %c0_310 = arith.constant 0 : index
    %213 = vector.load %arg2[%c11_308, %c0_309, %c0_310] : memref<36x8x196xf32, #tpu.memory_space<vmem>>, vector<1x8x196xf32>
    %214 = vector.shape_cast %213 : vector<1x8x196xf32> to vector<8x196xf32>
    %215 = vector.shape_cast %214 : vector<8x196xf32> to vector<1x8x196xf32>
    %216 = vector.broadcast %212 : vector<2x1x196xf32> to vector<2x8x196xf32>
    %217 = vector.broadcast %215 : vector<1x8x196xf32> to vector<2x8x196xf32>
    %218 = arith.mulf %216, %217 : vector<2x8x196xf32>
    %219 = arith.addf %211, %218 : vector<2x8x196xf32>
    %220 = vector.extract_strided_slice %203 {offsets = [0, 2, 0], sizes = [2, 1, 196], strides = [1, 1, 1]} : vector<2x4x196xf32> to vector<2x1x196xf32>
    %c20 = arith.constant 20 : index
    %c0_311 = arith.constant 0 : index
    %c0_312 = arith.constant 0 : index
    %221 = vector.load %arg2[%c20, %c0_311, %c0_312] : memref<36x8x196xf32, #tpu.memory_space<vmem>>, vector<1x8x196xf32>
    %222 = vector.shape_cast %221 : vector<1x8x196xf32> to vector<8x196xf32>
    %223 = vector.shape_cast %222 : vector<8x196xf32> to vector<1x8x196xf32>
    %224 = vector.broadcast %220 : vector<2x1x196xf32> to vector<2x8x196xf32>
    %225 = vector.broadcast %223 : vector<1x8x196xf32> to vector<2x8x196xf32>
    %226 = arith.mulf %224, %225 : vector<2x8x196xf32>
    %227 = arith.addf %219, %226 : vector<2x8x196xf32>
    %228 = vector.extract_strided_slice %203 {offsets = [0, 3, 0], sizes = [2, 1, 196], strides = [1, 1, 1]} : vector<2x4x196xf32> to vector<2x1x196xf32>
    %c29 = arith.constant 29 : index
    %c0_313 = arith.constant 0 : index
    %c0_314 = arith.constant 0 : index
    %229 = vector.load %arg2[%c29, %c0_313, %c0_314] : memref<36x8x196xf32, #tpu.memory_space<vmem>>, vector<1x8x196xf32>
    %230 = vector.shape_cast %229 : vector<1x8x196xf32> to vector<8x196xf32>
    %231 = vector.shape_cast %230 : vector<8x196xf32> to vector<1x8x196xf32>
    %232 = vector.broadcast %228 : vector<2x1x196xf32> to vector<2x8x196xf32>
    %233 = vector.broadcast %231 : vector<1x8x196xf32> to vector<2x8x196xf32>
    %234 = arith.mulf %232, %233 : vector<2x8x196xf32>
    %235 = arith.addf %227, %234 : vector<2x8x196xf32>
    %c0_315 = arith.constant 0 : index
    %c0_316 = arith.constant 0 : index
    %c1_317 = arith.constant 1 : index
    %c0_318 = arith.constant 0 : index
    %236 = vector.load %arg1[%c0_315, %c0_316, %c1_317, %c0_318] : memref<2x4x16x16xf32, #tpu.memory_space<vmem>>, vector<2x4x1x14xf32>
    %237 = vector.shape_cast %236 : vector<2x4x1x14xf32> to vector<2x4x14xf32>
    %c0_319 = arith.constant 0 : index
    %c0_320 = arith.constant 0 : index
    %c0_321 = arith.constant 0 : index
    %238 = vector.load %arg6[%c0_319, %c0_320, %c0_321] : memref<2x4x196xf32, #tpu.memory_space<vmem>>, vector<2x4x14xf32>
    tpu.vector_store %arg6[%c0_319, %c0_320, %c0_321], %237 {strides = array<i32>} : memref<2x4x196xf32, #tpu.memory_space<vmem>>, vector<2x4x14xf32>,
    %c0_322 = arith.constant 0 : index
    %c0_323 = arith.constant 0 : index
    %c2_324 = arith.constant 2 : index
    %c0_325 = arith.constant 0 : index
    %239 = vector.load %arg1[%c0_322, %c0_323, %c2_324, %c0_325] : memref<2x4x16x16xf32, #tpu.memory_space<vmem>>, vector<2x4x1x14xf32>
    %240 = vector.shape_cast %239 : vector<2x4x1x14xf32> to vector<2x4x14xf32>
    %c0_326 = arith.constant 0 : index
    %c0_327 = arith.constant 0 : index
    %c14_328 = arith.constant 14 : index
    %241 = vector.load %arg6[%c0_326, %c0_327, %c14_328] : memref<2x4x196xf32, #tpu.memory_space<vmem>>, vector<2x4x14xf32>
    tpu.vector_store %arg6[%c0_326, %c0_327, %c14_328], %240 {strides = array<i32>} : memref<2x4x196xf32, #tpu.memory_space<vmem>>, vector<2x4x14xf32>,
    %c0_329 = arith.constant 0 : index
    %c0_330 = arith.constant 0 : index
    %c3_331 = arith.constant 3 : index
    %c0_332 = arith.constant 0 : index
    %242 = vector.load %arg1[%c0_329, %c0_330, %c3_331, %c0_332] : memref<2x4x16x16xf32, #tpu.memory_space<vmem>>, vector<2x4x1x14xf32>
    %243 = vector.shape_cast %242 : vector<2x4x1x14xf32> to vector<2x4x14xf32>
    %c0_333 = arith.constant 0 : index
    %c0_334 = arith.constant 0 : index
    %c28_335 = arith.constant 28 : index
    %244 = vector.load %arg6[%c0_333, %c0_334, %c28_335] : memref<2x4x196xf32, #tpu.memory_space<vmem>>, vector<2x4x14xf32>
    tpu.vector_store %arg6[%c0_333, %c0_334, %c28_335], %243 {strides = array<i32>} : memref<2x4x196xf32, #tpu.memory_space<vmem>>, vector<2x4x14xf32>,
    %c0_336 = arith.constant 0 : index
    %c0_337 = arith.constant 0 : index
    %c4_338 = arith.constant 4 : index
    %c0_339 = arith.constant 0 : index
    %245 = vector.load %arg1[%c0_336, %c0_337, %c4_338, %c0_339] : memref<2x4x16x16xf32, #tpu.memory_space<vmem>>, vector<2x4x1x14xf32>
    %246 = vector.shape_cast %245 : vector<2x4x1x14xf32> to vector<2x4x14xf32>
    %c0_340 = arith.constant 0 : index
    %c0_341 = arith.constant 0 : index
    %c42_342 = arith.constant 42 : index
    %247 = vector.load %arg6[%c0_340, %c0_341, %c42_342] : memref<2x4x196xf32, #tpu.memory_space<vmem>>, vector<2x4x14xf32>
    tpu.vector_store %arg6[%c0_340, %c0_341, %c42_342], %246 {strides = array<i32>} : memref<2x4x196xf32, #tpu.memory_space<vmem>>, vector<2x4x14xf32>,
    %c0_343 = arith.constant 0 : index
    %c0_344 = arith.constant 0 : index
    %c5_345 = arith.constant 5 : index
    %c0_346 = arith.constant 0 : index
    %248 = vector.load %arg1[%c0_343, %c0_344, %c5_345, %c0_346] : memref<2x4x16x16xf32, #tpu.memory_space<vmem>>, vector<2x4x1x14xf32>
    %249 = vector.shape_cast %248 : vector<2x4x1x14xf32> to vector<2x4x14xf32>
    %c0_347 = arith.constant 0 : index
    %c0_348 = arith.constant 0 : index
    %c56_349 = arith.constant 56 : index
    %250 = vector.load %arg6[%c0_347, %c0_348, %c56_349] : memref<2x4x196xf32, #tpu.memory_space<vmem>>, vector<2x4x14xf32>
    tpu.vector_store %arg6[%c0_347, %c0_348, %c56_349], %249 {strides = array<i32>} : memref<2x4x196xf32, #tpu.memory_space<vmem>>, vector<2x4x14xf32>,
    %c0_350 = arith.constant 0 : index
    %c0_351 = arith.constant 0 : index
    %c6_352 = arith.constant 6 : index
    %c0_353 = arith.constant 0 : index
    %251 = vector.load %arg1[%c0_350, %c0_351, %c6_352, %c0_353] : memref<2x4x16x16xf32, #tpu.memory_space<vmem>>, vector<2x4x1x14xf32>
    %252 = vector.shape_cast %251 : vector<2x4x1x14xf32> to vector<2x4x14xf32>
    %c0_354 = arith.constant 0 : index
    %c0_355 = arith.constant 0 : index
    %c70_356 = arith.constant 70 : index
    %253 = vector.load %arg6[%c0_354, %c0_355, %c70_356] : memref<2x4x196xf32, #tpu.memory_space<vmem>>, vector<2x4x14xf32>
    tpu.vector_store %arg6[%c0_354, %c0_355, %c70_356], %252 {strides = array<i32>} : memref<2x4x196xf32, #tpu.memory_space<vmem>>, vector<2x4x14xf32>,
    %c0_357 = arith.constant 0 : index
    %c0_358 = arith.constant 0 : index
    %c7_359 = arith.constant 7 : index
    %c0_360 = arith.constant 0 : index
    %254 = vector.load %arg1[%c0_357, %c0_358, %c7_359, %c0_360] : memref<2x4x16x16xf32, #tpu.memory_space<vmem>>, vector<2x4x1x14xf32>
    %255 = vector.shape_cast %254 : vector<2x4x1x14xf32> to vector<2x4x14xf32>
    %c0_361 = arith.constant 0 : index
    %c0_362 = arith.constant 0 : index
    %c84_363 = arith.constant 84 : index
    %256 = vector.load %arg6[%c0_361, %c0_362, %c84_363] : memref<2x4x196xf32, #tpu.memory_space<vmem>>, vector<2x4x14xf32>
    tpu.vector_store %arg6[%c0_361, %c0_362, %c84_363], %255 {strides = array<i32>} : memref<2x4x196xf32, #tpu.memory_space<vmem>>, vector<2x4x14xf32>,
    %c0_364 = arith.constant 0 : index
    %c0_365 = arith.constant 0 : index
    %c8_366 = arith.constant 8 : index
    %c0_367 = arith.constant 0 : index
    %257 = vector.load %arg1[%c0_364, %c0_365, %c8_366, %c0_367] : memref<2x4x16x16xf32, #tpu.memory_space<vmem>>, vector<2x4x1x14xf32>
    %258 = vector.shape_cast %257 : vector<2x4x1x14xf32> to vector<2x4x14xf32>
    %c0_368 = arith.constant 0 : index
    %c0_369 = arith.constant 0 : index
    %c98_370 = arith.constant 98 : index
    %259 = vector.load %arg6[%c0_368, %c0_369, %c98_370] : memref<2x4x196xf32, #tpu.memory_space<vmem>>, vector<2x4x14xf32>
    tpu.vector_store %arg6[%c0_368, %c0_369, %c98_370], %258 {strides = array<i32>} : memref<2x4x196xf32, #tpu.memory_space<vmem>>, vector<2x4x14xf32>,
    %c0_371 = arith.constant 0 : index
    %c0_372 = arith.constant 0 : index
    %c9_373 = arith.constant 9 : index
    %c0_374 = arith.constant 0 : index
    %260 = vector.load %arg1[%c0_371, %c0_372, %c9_373, %c0_374] : memref<2x4x16x16xf32, #tpu.memory_space<vmem>>, vector<2x4x1x14xf32>
    %261 = vector.shape_cast %260 : vector<2x4x1x14xf32> to vector<2x4x14xf32>
    %c0_375 = arith.constant 0 : index
    %c0_376 = arith.constant 0 : index
    %c112_377 = arith.constant 112 : index
    %262 = vector.load %arg6[%c0_375, %c0_376, %c112_377] : memref<2x4x196xf32, #tpu.memory_space<vmem>>, vector<2x4x14xf32>
    tpu.vector_store %arg6[%c0_375, %c0_376, %c112_377], %261 {strides = array<i32>} : memref<2x4x196xf32, #tpu.memory_space<vmem>>, vector<2x4x14xf32>,
    %c0_378 = arith.constant 0 : index
    %c0_379 = arith.constant 0 : index
    %c10_380 = arith.constant 10 : index
    %c0_381 = arith.constant 0 : index
    %263 = vector.load %arg1[%c0_378, %c0_379, %c10_380, %c0_381] : memref<2x4x16x16xf32, #tpu.memory_space<vmem>>, vector<2x4x1x14xf32>
    %264 = vector.shape_cast %263 : vector<2x4x1x14xf32> to vector<2x4x14xf32>
    %c0_382 = arith.constant 0 : index
    %c0_383 = arith.constant 0 : index
    %c126_384 = arith.constant 126 : index
    %265 = vector.load %arg6[%c0_382, %c0_383, %c126_384] : memref<2x4x196xf32, #tpu.memory_space<vmem>>, vector<2x4x14xf32>
    tpu.vector_store %arg6[%c0_382, %c0_383, %c126_384], %264 {strides = array<i32>} : memref<2x4x196xf32, #tpu.memory_space<vmem>>, vector<2x4x14xf32>,
    %c0_385 = arith.constant 0 : index
    %c0_386 = arith.constant 0 : index
    %c11_387 = arith.constant 11 : index
    %c0_388 = arith.constant 0 : index
    %266 = vector.load %arg1[%c0_385, %c0_386, %c11_387, %c0_388] : memref<2x4x16x16xf32, #tpu.memory_space<vmem>>, vector<2x4x1x14xf32>
    %267 = vector.shape_cast %266 : vector<2x4x1x14xf32> to vector<2x4x14xf32>
    %c0_389 = arith.constant 0 : index
    %c0_390 = arith.constant 0 : index
    %c140_391 = arith.constant 140 : index
    %268 = vector.load %arg6[%c0_389, %c0_390, %c140_391] : memref<2x4x196xf32, #tpu.memory_space<vmem>>, vector<2x4x14xf32>
    tpu.vector_store %arg6[%c0_389, %c0_390, %c140_391], %267 {strides = array<i32>} : memref<2x4x196xf32, #tpu.memory_space<vmem>>, vector<2x4x14xf32>,
    %c0_392 = arith.constant 0 : index
    %c0_393 = arith.constant 0 : index
    %c12_394 = arith.constant 12 : index
    %c0_395 = arith.constant 0 : index
    %269 = vector.load %arg1[%c0_392, %c0_393, %c12_394, %c0_395] : memref<2x4x16x16xf32, #tpu.memory_space<vmem>>, vector<2x4x1x14xf32>
    %270 = vector.shape_cast %269 : vector<2x4x1x14xf32> to vector<2x4x14xf32>
    %c0_396 = arith.constant 0 : index
    %c0_397 = arith.constant 0 : index
    %c154_398 = arith.constant 154 : index
    %271 = vector.load %arg6[%c0_396, %c0_397, %c154_398] : memref<2x4x196xf32, #tpu.memory_space<vmem>>, vector<2x4x14xf32>
    tpu.vector_store %arg6[%c0_396, %c0_397, %c154_398], %270 {strides = array<i32>} : memref<2x4x196xf32, #tpu.memory_space<vmem>>, vector<2x4x14xf32>,
    %c0_399 = arith.constant 0 : index
    %c0_400 = arith.constant 0 : index
    %c13_401 = arith.constant 13 : index
    %c0_402 = arith.constant 0 : index
    %272 = vector.load %arg1[%c0_399, %c0_400, %c13_401, %c0_402] : memref<2x4x16x16xf32, #tpu.memory_space<vmem>>, vector<2x4x1x14xf32>
    %273 = vector.shape_cast %272 : vector<2x4x1x14xf32> to vector<2x4x14xf32>
    %c0_403 = arith.constant 0 : index
    %c0_404 = arith.constant 0 : index
    %c168_405 = arith.constant 168 : index
    %274 = vector.load %arg6[%c0_403, %c0_404, %c168_405] : memref<2x4x196xf32, #tpu.memory_space<vmem>>, vector<2x4x14xf32>
    tpu.vector_store %arg6[%c0_403, %c0_404, %c168_405], %273 {strides = array<i32>} : memref<2x4x196xf32, #tpu.memory_space<vmem>>, vector<2x4x14xf32>,
    %c0_406 = arith.constant 0 : index
    %c0_407 = arith.constant 0 : index
    %c14_408 = arith.constant 14 : index
    %c0_409 = arith.constant 0 : index
    %275 = vector.load %arg1[%c0_406, %c0_407, %c14_408, %c0_409] : memref<2x4x16x16xf32, #tpu.memory_space<vmem>>, vector<2x4x1x14xf32>
    %276 = vector.shape_cast %275 : vector<2x4x1x14xf32> to vector<2x4x14xf32>
    %c0_410 = arith.constant 0 : index
    %c0_411 = arith.constant 0 : index
    %c182_412 = arith.constant 182 : index
    %277 = vector.load %arg6[%c0_410, %c0_411, %c182_412] : memref<2x4x196xf32, #tpu.memory_space<vmem>>, vector<2x4x14xf32>
    tpu.vector_store %arg6[%c0_410, %c0_411, %c182_412], %276 {strides = array<i32>} : memref<2x4x196xf32, #tpu.memory_space<vmem>>, vector<2x4x14xf32>,
    %c0_413 = arith.constant 0 : index
    %c0_414 = arith.constant 0 : index
    %c0_415 = arith.constant 0 : index
    %278 = vector.load %arg6[%c0_413, %c0_414, %c0_415] : memref<2x4x196xf32, #tpu.memory_space<vmem>>, vector<2x4x196xf32>
    %279 = vector.extract_strided_slice %278 {offsets = [0, 0, 0], sizes = [2, 1, 196], strides = [1, 1, 1]} : vector<2x4x196xf32> to vector<2x1x196xf32>
    %c3_416 = arith.constant 3 : index
    %c0_417 = arith.constant 0 : index
    %c0_418 = arith.constant 0 : index
    %280 = vector.load %arg2[%c3_416, %c0_417, %c0_418] : memref<36x8x196xf32, #tpu.memory_space<vmem>>, vector<1x8x196xf32>
    %281 = vector.shape_cast %280 : vector<1x8x196xf32> to vector<8x196xf32>
    %282 = vector.shape_cast %281 : vector<8x196xf32> to vector<1x8x196xf32>
    %283 = vector.broadcast %279 : vector<2x1x196xf32> to vector<2x8x196xf32>
    %284 = vector.broadcast %282 : vector<1x8x196xf32> to vector<2x8x196xf32>
    %285 = arith.mulf %283, %284 : vector<2x8x196xf32>
    %286 = arith.addf %235, %285 : vector<2x8x196xf32>
    %287 = vector.extract_strided_slice %278 {offsets = [0, 1, 0], sizes = [2, 1, 196], strides = [1, 1, 1]} : vector<2x4x196xf32> to vector<2x1x196xf32>
    %c12_419 = arith.constant 12 : index
    %c0_420 = arith.constant 0 : index
    %c0_421 = arith.constant 0 : index
    %288 = vector.load %arg2[%c12_419, %c0_420, %c0_421] : memref<36x8x196xf32, #tpu.memory_space<vmem>>, vector<1x8x196xf32>
    %289 = vector.shape_cast %288 : vector<1x8x196xf32> to vector<8x196xf32>
    %290 = vector.shape_cast %289 : vector<8x196xf32> to vector<1x8x196xf32>
    %291 = vector.broadcast %287 : vector<2x1x196xf32> to vector<2x8x196xf32>
    %292 = vector.broadcast %290 : vector<1x8x196xf32> to vector<2x8x196xf32>
    %293 = arith.mulf %291, %292 : vector<2x8x196xf32>
    %294 = arith.addf %286, %293 : vector<2x8x196xf32>
    %295 = vector.extract_strided_slice %278 {offsets = [0, 2, 0], sizes = [2, 1, 196], strides = [1, 1, 1]} : vector<2x4x196xf32> to vector<2x1x196xf32>
    %c21 = arith.constant 21 : index
    %c0_422 = arith.constant 0 : index
    %c0_423 = arith.constant 0 : index
    %296 = vector.load %arg2[%c21, %c0_422, %c0_423] : memref<36x8x196xf32, #tpu.memory_space<vmem>>, vector<1x8x196xf32>
    %297 = vector.shape_cast %296 : vector<1x8x196xf32> to vector<8x196xf32>
    %298 = vector.shape_cast %297 : vector<8x196xf32> to vector<1x8x196xf32>
    %299 = vector.broadcast %295 : vector<2x1x196xf32> to vector<2x8x196xf32>
    %300 = vector.broadcast %298 : vector<1x8x196xf32> to vector<2x8x196xf32>
    %301 = arith.mulf %299, %300 : vector<2x8x196xf32>
    %302 = arith.addf %294, %301 : vector<2x8x196xf32>
    %303 = vector.extract_strided_slice %278 {offsets = [0, 3, 0], sizes = [2, 1, 196], strides = [1, 1, 1]} : vector<2x4x196xf32> to vector<2x1x196xf32>
    %c30 = arith.constant 30 : index
    %c0_424 = arith.constant 0 : index
    %c0_425 = arith.constant 0 : index
    %304 = vector.load %arg2[%c30, %c0_424, %c0_425] : memref<36x8x196xf32, #tpu.memory_space<vmem>>, vector<1x8x196xf32>
    %305 = vector.shape_cast %304 : vector<1x8x196xf32> to vector<8x196xf32>
    %306 = vector.shape_cast %305 : vector<8x196xf32> to vector<1x8x196xf32>
    %307 = vector.broadcast %303 : vector<2x1x196xf32> to vector<2x8x196xf32>
    %308 = vector.broadcast %306 : vector<1x8x196xf32> to vector<2x8x196xf32>
    %309 = arith.mulf %307, %308 : vector<2x8x196xf32>
    %310 = arith.addf %302, %309 : vector<2x8x196xf32>
    %c0_426 = arith.constant 0 : index
    %c0_427 = arith.constant 0 : index
    %c1_428 = arith.constant 1 : index
    %c1_429 = arith.constant 1 : index
    %311 = vector.load %arg1[%c0_426, %c0_427, %c1_428, %c1_429] : memref<2x4x16x16xf32, #tpu.memory_space<vmem>>, vector<2x4x1x14xf32>
    %312 = vector.shape_cast %311 : vector<2x4x1x14xf32> to vector<2x4x14xf32>
    %c0_430 = arith.constant 0 : index
    %c0_431 = arith.constant 0 : index
    %c0_432 = arith.constant 0 : index
    %313 = vector.load %arg6[%c0_430, %c0_431, %c0_432] : memref<2x4x196xf32, #tpu.memory_space<vmem>>, vector<2x4x14xf32>
    tpu.vector_store %arg6[%c0_430, %c0_431, %c0_432], %312 {strides = array<i32>} : memref<2x4x196xf32, #tpu.memory_space<vmem>>, vector<2x4x14xf32>,
    %c0_433 = arith.constant 0 : index
    %c0_434 = arith.constant 0 : index
    %c2_435 = arith.constant 2 : index
    %c1_436 = arith.constant 1 : index
    %314 = vector.load %arg1[%c0_433, %c0_434, %c2_435, %c1_436] : memref<2x4x16x16xf32, #tpu.memory_space<vmem>>, vector<2x4x1x14xf32>
    %315 = vector.shape_cast %314 : vector<2x4x1x14xf32> to vector<2x4x14xf32>
    %c0_437 = arith.constant 0 : index
    %c0_438 = arith.constant 0 : index
    %c14_439 = arith.constant 14 : index
    %316 = vector.load %arg6[%c0_437, %c0_438, %c14_439] : memref<2x4x196xf32, #tpu.memory_space<vmem>>, vector<2x4x14xf32>
    tpu.vector_store %arg6[%c0_437, %c0_438, %c14_439], %315 {strides = array<i32>} : memref<2x4x196xf32, #tpu.memory_space<vmem>>, vector<2x4x14xf32>,
    %c0_440 = arith.constant 0 : index
    %c0_441 = arith.constant 0 : index
    %c3_442 = arith.constant 3 : index
    %c1_443 = arith.constant 1 : index
    %317 = vector.load %arg1[%c0_440, %c0_441, %c3_442, %c1_443] : memref<2x4x16x16xf32, #tpu.memory_space<vmem>>, vector<2x4x1x14xf32>
    %318 = vector.shape_cast %317 : vector<2x4x1x14xf32> to vector<2x4x14xf32>
    %c0_444 = arith.constant 0 : index
    %c0_445 = arith.constant 0 : index
    %c28_446 = arith.constant 28 : index
    %319 = vector.load %arg6[%c0_444, %c0_445, %c28_446] : memref<2x4x196xf32, #tpu.memory_space<vmem>>, vector<2x4x14xf32>
    tpu.vector_store %arg6[%c0_444, %c0_445, %c28_446], %318 {strides = array<i32>} : memref<2x4x196xf32, #tpu.memory_space<vmem>>, vector<2x4x14xf32>,
    %c0_447 = arith.constant 0 : index
    %c0_448 = arith.constant 0 : index
    %c4_449 = arith.constant 4 : index
    %c1_450 = arith.constant 1 : index
    %320 = vector.load %arg1[%c0_447, %c0_448, %c4_449, %c1_450] : memref<2x4x16x16xf32, #tpu.memory_space<vmem>>, vector<2x4x1x14xf32>
    %321 = vector.shape_cast %320 : vector<2x4x1x14xf32> to vector<2x4x14xf32>
    %c0_451 = arith.constant 0 : index
    %c0_452 = arith.constant 0 : index
    %c42_453 = arith.constant 42 : index
    %322 = vector.load %arg6[%c0_451, %c0_452, %c42_453] : memref<2x4x196xf32, #tpu.memory_space<vmem>>, vector<2x4x14xf32>
    tpu.vector_store %arg6[%c0_451, %c0_452, %c42_453], %321 {strides = array<i32>} : memref<2x4x196xf32, #tpu.memory_space<vmem>>, vector<2x4x14xf32>,
    %c0_454 = arith.constant 0 : index
    %c0_455 = arith.constant 0 : index
    %c5_456 = arith.constant 5 : index
    %c1_457 = arith.constant 1 : index
    %323 = vector.load %arg1[%c0_454, %c0_455, %c5_456, %c1_457] : memref<2x4x16x16xf32, #tpu.memory_space<vmem>>, vector<2x4x1x14xf32>
    %324 = vector.shape_cast %323 : vector<2x4x1x14xf32> to vector<2x4x14xf32>
    %c0_458 = arith.constant 0 : index
    %c0_459 = arith.constant 0 : index
    %c56_460 = arith.constant 56 : index
    %325 = vector.load %arg6[%c0_458, %c0_459, %c56_460] : memref<2x4x196xf32, #tpu.memory_space<vmem>>, vector<2x4x14xf32>
    tpu.vector_store %arg6[%c0_458, %c0_459, %c56_460], %324 {strides = array<i32>} : memref<2x4x196xf32, #tpu.memory_space<vmem>>, vector<2x4x14xf32>,
    %c0_461 = arith.constant 0 : index
    %c0_462 = arith.constant 0 : index
    %c6_463 = arith.constant 6 : index
    %c1_464 = arith.constant 1 : index
    %326 = vector.load %arg1[%c0_461, %c0_462, %c6_463, %c1_464] : memref<2x4x16x16xf32, #tpu.memory_space<vmem>>, vector<2x4x1x14xf32>
    %327 = vector.shape_cast %326 : vector<2x4x1x14xf32> to vector<2x4x14xf32>
    %c0_465 = arith.constant 0 : index
    %c0_466 = arith.constant 0 : index
    %c70_467 = arith.constant 70 : index
    %328 = vector.load %arg6[%c0_465, %c0_466, %c70_467] : memref<2x4x196xf32, #tpu.memory_space<vmem>>, vector<2x4x14xf32>
    tpu.vector_store %arg6[%c0_465, %c0_466, %c70_467], %327 {strides = array<i32>} : memref<2x4x196xf32, #tpu.memory_space<vmem>>, vector<2x4x14xf32>,
    %c0_468 = arith.constant 0 : index
    %c0_469 = arith.constant 0 : index
    %c7_470 = arith.constant 7 : index
    %c1_471 = arith.constant 1 : index
    %329 = vector.load %arg1[%c0_468, %c0_469, %c7_470, %c1_471] : memref<2x4x16x16xf32, #tpu.memory_space<vmem>>, vector<2x4x1x14xf32>
    %330 = vector.shape_cast %329 : vector<2x4x1x14xf32> to vector<2x4x14xf32>
    %c0_472 = arith.constant 0 : index
    %c0_473 = arith.constant 0 : index
    %c84_474 = arith.constant 84 : index
    %331 = vector.load %arg6[%c0_472, %c0_473, %c84_474] : memref<2x4x196xf32, #tpu.memory_space<vmem>>, vector<2x4x14xf32>
    tpu.vector_store %arg6[%c0_472, %c0_473, %c84_474], %330 {strides = array<i32>} : memref<2x4x196xf32, #tpu.memory_space<vmem>>, vector<2x4x14xf32>,
    %c0_475 = arith.constant 0 : index
    %c0_476 = arith.constant 0 : index
    %c8_477 = arith.constant 8 : index
    %c1_478 = arith.constant 1 : index
    %332 = vector.load %arg1[%c0_475, %c0_476, %c8_477, %c1_478] : memref<2x4x16x16xf32, #tpu.memory_space<vmem>>, vector<2x4x1x14xf32>
    %333 = vector.shape_cast %332 : vector<2x4x1x14xf32> to vector<2x4x14xf32>
    %c0_479 = arith.constant 0 : index
    %c0_480 = arith.constant 0 : index
    %c98_481 = arith.constant 98 : index
    %334 = vector.load %arg6[%c0_479, %c0_480, %c98_481] : memref<2x4x196xf32, #tpu.memory_space<vmem>>, vector<2x4x14xf32>
    tpu.vector_store %arg6[%c0_479, %c0_480, %c98_481], %333 {strides = array<i32>} : memref<2x4x196xf32, #tpu.memory_space<vmem>>, vector<2x4x14xf32>,
    %c0_482 = arith.constant 0 : index
    %c0_483 = arith.constant 0 : index
    %c9_484 = arith.constant 9 : index
    %c1_485 = arith.constant 1 : index
    %335 = vector.load %arg1[%c0_482, %c0_483, %c9_484, %c1_485] : memref<2x4x16x16xf32, #tpu.memory_space<vmem>>, vector<2x4x1x14xf32>
    %336 = vector.shape_cast %335 : vector<2x4x1x14xf32> to vector<2x4x14xf32>
    %c0_486 = arith.constant 0 : index
    %c0_487 = arith.constant 0 : index
    %c112_488 = arith.constant 112 : index
    %337 = vector.load %arg6[%c0_486, %c0_487, %c112_488] : memref<2x4x196xf32, #tpu.memory_space<vmem>>, vector<2x4x14xf32>
    tpu.vector_store %arg6[%c0_486, %c0_487, %c112_488], %336 {strides = array<i32>} : memref<2x4x196xf32, #tpu.memory_space<vmem>>, vector<2x4x14xf32>,
    %c0_489 = arith.constant 0 : index
    %c0_490 = arith.constant 0 : index
    %c10_491 = arith.constant 10 : index
    %c1_492 = arith.constant 1 : index
    %338 = vector.load %arg1[%c0_489, %c0_490, %c10_491, %c1_492] : memref<2x4x16x16xf32, #tpu.memory_space<vmem>>, vector<2x4x1x14xf32>
    %339 = vector.shape_cast %338 : vector<2x4x1x14xf32> to vector<2x4x14xf32>
    %c0_493 = arith.constant 0 : index
    %c0_494 = arith.constant 0 : index
    %c126_495 = arith.constant 126 : index
    %340 = vector.load %arg6[%c0_493, %c0_494, %c126_495] : memref<2x4x196xf32, #tpu.memory_space<vmem>>, vector<2x4x14xf32>
    tpu.vector_store %arg6[%c0_493, %c0_494, %c126_495], %339 {strides = array<i32>} : memref<2x4x196xf32, #tpu.memory_space<vmem>>, vector<2x4x14xf32>,
    %c0_496 = arith.constant 0 : index
    %c0_497 = arith.constant 0 : index
    %c11_498 = arith.constant 11 : index
    %c1_499 = arith.constant 1 : index
    %341 = vector.load %arg1[%c0_496, %c0_497, %c11_498, %c1_499] : memref<2x4x16x16xf32, #tpu.memory_space<vmem>>, vector<2x4x1x14xf32>
    %342 = vector.shape_cast %341 : vector<2x4x1x14xf32> to vector<2x4x14xf32>
    %c0_500 = arith.constant 0 : index
    %c0_501 = arith.constant 0 : index
    %c140_502 = arith.constant 140 : index
    %343 = vector.load %arg6[%c0_500, %c0_501, %c140_502] : memref<2x4x196xf32, #tpu.memory_space<vmem>>, vector<2x4x14xf32>
    tpu.vector_store %arg6[%c0_500, %c0_501, %c140_502], %342 {strides = array<i32>} : memref<2x4x196xf32, #tpu.memory_space<vmem>>, vector<2x4x14xf32>,
    %c0_503 = arith.constant 0 : index
    %c0_504 = arith.constant 0 : index
    %c12_505 = arith.constant 12 : index
    %c1_506 = arith.constant 1 : index
    %344 = vector.load %arg1[%c0_503, %c0_504, %c12_505, %c1_506] : memref<2x4x16x16xf32, #tpu.memory_space<vmem>>, vector<2x4x1x14xf32>
    %345 = vector.shape_cast %344 : vector<2x4x1x14xf32> to vector<2x4x14xf32>
    %c0_507 = arith.constant 0 : index
    %c0_508 = arith.constant 0 : index
    %c154_509 = arith.constant 154 : index
    %346 = vector.load %arg6[%c0_507, %c0_508, %c154_509] : memref<2x4x196xf32, #tpu.memory_space<vmem>>, vector<2x4x14xf32>
    tpu.vector_store %arg6[%c0_507, %c0_508, %c154_509], %345 {strides = array<i32>} : memref<2x4x196xf32, #tpu.memory_space<vmem>>, vector<2x4x14xf32>,
    %c0_510 = arith.constant 0 : index
    %c0_511 = arith.constant 0 : index
    %c13_512 = arith.constant 13 : index
    %c1_513 = arith.constant 1 : index
    %347 = vector.load %arg1[%c0_510, %c0_511, %c13_512, %c1_513] : memref<2x4x16x16xf32, #tpu.memory_space<vmem>>, vector<2x4x1x14xf32>
    %348 = vector.shape_cast %347 : vector<2x4x1x14xf32> to vector<2x4x14xf32>
    %c0_514 = arith.constant 0 : index
    %c0_515 = arith.constant 0 : index
    %c168_516 = arith.constant 168 : index
    %349 = vector.load %arg6[%c0_514, %c0_515, %c168_516] : memref<2x4x196xf32, #tpu.memory_space<vmem>>, vector<2x4x14xf32>
    tpu.vector_store %arg6[%c0_514, %c0_515, %c168_516], %348 {strides = array<i32>} : memref<2x4x196xf32, #tpu.memory_space<vmem>>, vector<2x4x14xf32>,
    %c0_517 = arith.constant 0 : index
    %c0_518 = arith.constant 0 : index
    %c14_519 = arith.constant 14 : index
    %c1_520 = arith.constant 1 : index
    %350 = vector.load %arg1[%c0_517, %c0_518, %c14_519, %c1_520] : memref<2x4x16x16xf32, #tpu.memory_space<vmem>>, vector<2x4x1x14xf32>
    %351 = vector.shape_cast %350 : vector<2x4x1x14xf32> to vector<2x4x14xf32>
    %c0_521 = arith.constant 0 : index
    %c0_522 = arith.constant 0 : index
    %c182_523 = arith.constant 182 : index
    %352 = vector.load %arg6[%c0_521, %c0_522, %c182_523] : memref<2x4x196xf32, #tpu.memory_space<vmem>>, vector<2x4x14xf32>
    tpu.vector_store %arg6[%c0_521, %c0_522, %c182_523], %351 {strides = array<i32>} : memref<2x4x196xf32, #tpu.memory_space<vmem>>, vector<2x4x14xf32>,
    %c0_524 = arith.constant 0 : index
    %c0_525 = arith.constant 0 : index
    %c0_526 = arith.constant 0 : index
    %353 = vector.load %arg6[%c0_524, %c0_525, %c0_526] : memref<2x4x196xf32, #tpu.memory_space<vmem>>, vector<2x4x196xf32>
    %354 = vector.extract_strided_slice %353 {offsets = [0, 0, 0], sizes = [2, 1, 196], strides = [1, 1, 1]} : vector<2x4x196xf32> to vector<2x1x196xf32>
    %c4_527 = arith.constant 4 : index
    %c0_528 = arith.constant 0 : index
    %c0_529 = arith.constant 0 : index
    %355 = vector.load %arg2[%c4_527, %c0_528, %c0_529] : memref<36x8x196xf32, #tpu.memory_space<vmem>>, vector<1x8x196xf32>
    %356 = vector.shape_cast %355 : vector<1x8x196xf32> to vector<8x196xf32>
    %357 = vector.shape_cast %356 : vector<8x196xf32> to vector<1x8x196xf32>
    %358 = vector.broadcast %354 : vector<2x1x196xf32> to vector<2x8x196xf32>
    %359 = vector.broadcast %357 : vector<1x8x196xf32> to vector<2x8x196xf32>
    %360 = arith.mulf %358, %359 : vector<2x8x196xf32>
    %361 = arith.addf %310, %360 : vector<2x8x196xf32>
    %362 = vector.extract_strided_slice %353 {offsets = [0, 1, 0], sizes = [2, 1, 196], strides = [1, 1, 1]} : vector<2x4x196xf32> to vector<2x1x196xf32>
    %c13_530 = arith.constant 13 : index
    %c0_531 = arith.constant 0 : index
    %c0_532 = arith.constant 0 : index
    %363 = vector.load %arg2[%c13_530, %c0_531, %c0_532] : memref<36x8x196xf32, #tpu.memory_space<vmem>>, vector<1x8x196xf32>
    %364 = vector.shape_cast %363 : vector<1x8x196xf32> to vector<8x196xf32>
    %365 = vector.shape_cast %364 : vector<8x196xf32> to vector<1x8x196xf32>
    %366 = vector.broadcast %362 : vector<2x1x196xf32> to vector<2x8x196xf32>
    %367 = vector.broadcast %365 : vector<1x8x196xf32> to vector<2x8x196xf32>
    %368 = arith.mulf %366, %367 : vector<2x8x196xf32>
    %369 = arith.addf %361, %368 : vector<2x8x196xf32>
    %370 = vector.extract_strided_slice %353 {offsets = [0, 2, 0], sizes = [2, 1, 196], strides = [1, 1, 1]} : vector<2x4x196xf32> to vector<2x1x196xf32>
    %c22 = arith.constant 22 : index
    %c0_533 = arith.constant 0 : index
    %c0_534 = arith.constant 0 : index
    %371 = vector.load %arg2[%c22, %c0_533, %c0_534] : memref<36x8x196xf32, #tpu.memory_space<vmem>>, vector<1x8x196xf32>
    %372 = vector.shape_cast %371 : vector<1x8x196xf32> to vector<8x196xf32>
    %373 = vector.shape_cast %372 : vector<8x196xf32> to vector<1x8x196xf32>
    %374 = vector.broadcast %370 : vector<2x1x196xf32> to vector<2x8x196xf32>
    %375 = vector.broadcast %373 : vector<1x8x196xf32> to vector<2x8x196xf32>
    %376 = arith.mulf %374, %375 : vector<2x8x196xf32>
    %377 = arith.addf %369, %376 : vector<2x8x196xf32>
    %378 = vector.extract_strided_slice %353 {offsets = [0, 3, 0], sizes = [2, 1, 196], strides = [1, 1, 1]} : vector<2x4x196xf32> to vector<2x1x196xf32>
    %c31 = arith.constant 31 : index
    %c0_535 = arith.constant 0 : index
    %c0_536 = arith.constant 0 : index
    %379 = vector.load %arg2[%c31, %c0_535, %c0_536] : memref<36x8x196xf32, #tpu.memory_space<vmem>>, vector<1x8x196xf32>
    %380 = vector.shape_cast %379 : vector<1x8x196xf32> to vector<8x196xf32>
    %381 = vector.shape_cast %380 : vector<8x196xf32> to vector<1x8x196xf32>
    %382 = vector.broadcast %378 : vector<2x1x196xf32> to vector<2x8x196xf32>
    %383 = vector.broadcast %381 : vector<1x8x196xf32> to vector<2x8x196xf32>
    %384 = arith.mulf %382, %383 : vector<2x8x196xf32>
    %385 = arith.addf %377, %384 : vector<2x8x196xf32>
    %c0_537 = arith.constant 0 : index
    %c0_538 = arith.constant 0 : index
    %c1_539 = arith.constant 1 : index
    %c2_540 = arith.constant 2 : index
    %386 = vector.load %arg1[%c0_537, %c0_538, %c1_539, %c2_540] : memref<2x4x16x16xf32, #tpu.memory_space<vmem>>, vector<2x4x1x14xf32>
    %387 = vector.shape_cast %386 : vector<2x4x1x14xf32> to vector<2x4x14xf32>
    %c0_541 = arith.constant 0 : index
    %c0_542 = arith.constant 0 : index
    %c0_543 = arith.constant 0 : index
    %388 = vector.load %arg6[%c0_541, %c0_542, %c0_543] : memref<2x4x196xf32, #tpu.memory_space<vmem>>, vector<2x4x14xf32>
    tpu.vector_store %arg6[%c0_541, %c0_542, %c0_543], %387 {strides = array<i32>} : memref<2x4x196xf32, #tpu.memory_space<vmem>>, vector<2x4x14xf32>,
    %c0_544 = arith.constant 0 : index
    %c0_545 = arith.constant 0 : index
    %c2_546 = arith.constant 2 : index
    %c2_547 = arith.constant 2 : index
    %389 = vector.load %arg1[%c0_544, %c0_545, %c2_546, %c2_547] : memref<2x4x16x16xf32, #tpu.memory_space<vmem>>, vector<2x4x1x14xf32>
    %390 = vector.shape_cast %389 : vector<2x4x1x14xf32> to vector<2x4x14xf32>
    %c0_548 = arith.constant 0 : index
    %c0_549 = arith.constant 0 : index
    %c14_550 = arith.constant 14 : index
    %391 = vector.load %arg6[%c0_548, %c0_549, %c14_550] : memref<2x4x196xf32, #tpu.memory_space<vmem>>, vector<2x4x14xf32>
    tpu.vector_store %arg6[%c0_548, %c0_549, %c14_550], %390 {strides = array<i32>} : memref<2x4x196xf32, #tpu.memory_space<vmem>>, vector<2x4x14xf32>,
    %c0_551 = arith.constant 0 : index
    %c0_552 = arith.constant 0 : index
    %c3_553 = arith.constant 3 : index
    %c2_554 = arith.constant 2 : index
    %392 = vector.load %arg1[%c0_551, %c0_552, %c3_553, %c2_554] : memref<2x4x16x16xf32, #tpu.memory_space<vmem>>, vector<2x4x1x14xf32>
    %393 = vector.shape_cast %392 : vector<2x4x1x14xf32> to vector<2x4x14xf32>
    %c0_555 = arith.constant 0 : index
    %c0_556 = arith.constant 0 : index
    %c28_557 = arith.constant 28 : index
    %394 = vector.load %arg6[%c0_555, %c0_556, %c28_557] : memref<2x4x196xf32, #tpu.memory_space<vmem>>, vector<2x4x14xf32>
    tpu.vector_store %arg6[%c0_555, %c0_556, %c28_557], %393 {strides = array<i32>} : memref<2x4x196xf32, #tpu.memory_space<vmem>>, vector<2x4x14xf32>,
    %c0_558 = arith.constant 0 : index
    %c0_559 = arith.constant 0 : index
    %c4_560 = arith.constant 4 : index
    %c2_561 = arith.constant 2 : index
    %395 = vector.load %arg1[%c0_558, %c0_559, %c4_560, %c2_561] : memref<2x4x16x16xf32, #tpu.memory_space<vmem>>, vector<2x4x1x14xf32>
    %396 = vector.shape_cast %395 : vector<2x4x1x14xf32> to vector<2x4x14xf32>
    %c0_562 = arith.constant 0 : index
    %c0_563 = arith.constant 0 : index
    %c42_564 = arith.constant 42 : index
    %397 = vector.load %arg6[%c0_562, %c0_563, %c42_564] : memref<2x4x196xf32, #tpu.memory_space<vmem>>, vector<2x4x14xf32>
    tpu.vector_store %arg6[%c0_562, %c0_563, %c42_564], %396 {strides = array<i32>} : memref<2x4x196xf32, #tpu.memory_space<vmem>>, vector<2x4x14xf32>,
    %c0_565 = arith.constant 0 : index
    %c0_566 = arith.constant 0 : index
    %c5_567 = arith.constant 5 : index
    %c2_568 = arith.constant 2 : index
    %398 = vector.load %arg1[%c0_565, %c0_566, %c5_567, %c2_568] : memref<2x4x16x16xf32, #tpu.memory_space<vmem>>, vector<2x4x1x14xf32>
    %399 = vector.shape_cast %398 : vector<2x4x1x14xf32> to vector<2x4x14xf32>
    %c0_569 = arith.constant 0 : index
    %c0_570 = arith.constant 0 : index
    %c56_571 = arith.constant 56 : index
    %400 = vector.load %arg6[%c0_569, %c0_570, %c56_571] : memref<2x4x196xf32, #tpu.memory_space<vmem>>, vector<2x4x14xf32>
    tpu.vector_store %arg6[%c0_569, %c0_570, %c56_571], %399 {strides = array<i32>} : memref<2x4x196xf32, #tpu.memory_space<vmem>>, vector<2x4x14xf32>,
    %c0_572 = arith.constant 0 : index
    %c0_573 = arith.constant 0 : index
    %c6_574 = arith.constant 6 : index
    %c2_575 = arith.constant 2 : index
    %401 = vector.load %arg1[%c0_572, %c0_573, %c6_574, %c2_575] : memref<2x4x16x16xf32, #tpu.memory_space<vmem>>, vector<2x4x1x14xf32>
    %402 = vector.shape_cast %401 : vector<2x4x1x14xf32> to vector<2x4x14xf32>
    %c0_576 = arith.constant 0 : index
    %c0_577 = arith.constant 0 : index
    %c70_578 = arith.constant 70 : index
    %403 = vector.load %arg6[%c0_576, %c0_577, %c70_578] : memref<2x4x196xf32, #tpu.memory_space<vmem>>, vector<2x4x14xf32>
    tpu.vector_store %arg6[%c0_576, %c0_577, %c70_578], %402 {strides = array<i32>} : memref<2x4x196xf32, #tpu.memory_space<vmem>>, vector<2x4x14xf32>,
    %c0_579 = arith.constant 0 : index
    %c0_580 = arith.constant 0 : index
    %c7_581 = arith.constant 7 : index
    %c2_582 = arith.constant 2 : index
    %404 = vector.load %arg1[%c0_579, %c0_580, %c7_581, %c2_582] : memref<2x4x16x16xf32, #tpu.memory_space<vmem>>, vector<2x4x1x14xf32>
    %405 = vector.shape_cast %404 : vector<2x4x1x14xf32> to vector<2x4x14xf32>
    %c0_583 = arith.constant 0 : index
    %c0_584 = arith.constant 0 : index
    %c84_585 = arith.constant 84 : index
    %406 = vector.load %arg6[%c0_583, %c0_584, %c84_585] : memref<2x4x196xf32, #tpu.memory_space<vmem>>, vector<2x4x14xf32>
    tpu.vector_store %arg6[%c0_583, %c0_584, %c84_585], %405 {strides = array<i32>} : memref<2x4x196xf32, #tpu.memory_space<vmem>>, vector<2x4x14xf32>,
    %c0_586 = arith.constant 0 : index
    %c0_587 = arith.constant 0 : index
    %c8_588 = arith.constant 8 : index
    %c2_589 = arith.constant 2 : index
    %407 = vector.load %arg1[%c0_586, %c0_587, %c8_588, %c2_589] : memref<2x4x16x16xf32, #tpu.memory_space<vmem>>, vector<2x4x1x14xf32>
    %408 = vector.shape_cast %407 : vector<2x4x1x14xf32> to vector<2x4x14xf32>
    %c0_590 = arith.constant 0 : index
    %c0_591 = arith.constant 0 : index
    %c98_592 = arith.constant 98 : index
    %409 = vector.load %arg6[%c0_590, %c0_591, %c98_592] : memref<2x4x196xf32, #tpu.memory_space<vmem>>, vector<2x4x14xf32>
    tpu.vector_store %arg6[%c0_590, %c0_591, %c98_592], %408 {strides = array<i32>} : memref<2x4x196xf32, #tpu.memory_space<vmem>>, vector<2x4x14xf32>,
    %c0_593 = arith.constant 0 : index
    %c0_594 = arith.constant 0 : index
    %c9_595 = arith.constant 9 : index
    %c2_596 = arith.constant 2 : index
    %410 = vector.load %arg1[%c0_593, %c0_594, %c9_595, %c2_596] : memref<2x4x16x16xf32, #tpu.memory_space<vmem>>, vector<2x4x1x14xf32>
    %411 = vector.shape_cast %410 : vector<2x4x1x14xf32> to vector<2x4x14xf32>
    %c0_597 = arith.constant 0 : index
    %c0_598 = arith.constant 0 : index
    %c112_599 = arith.constant 112 : index
    %412 = vector.load %arg6[%c0_597, %c0_598, %c112_599] : memref<2x4x196xf32, #tpu.memory_space<vmem>>, vector<2x4x14xf32>
    tpu.vector_store %arg6[%c0_597, %c0_598, %c112_599], %411 {strides = array<i32>} : memref<2x4x196xf32, #tpu.memory_space<vmem>>, vector<2x4x14xf32>,
    %c0_600 = arith.constant 0 : index
    %c0_601 = arith.constant 0 : index
    %c10_602 = arith.constant 10 : index
    %c2_603 = arith.constant 2 : index
    %413 = vector.load %arg1[%c0_600, %c0_601, %c10_602, %c2_603] : memref<2x4x16x16xf32, #tpu.memory_space<vmem>>, vector<2x4x1x14xf32>
    %414 = vector.shape_cast %413 : vector<2x4x1x14xf32> to vector<2x4x14xf32>
    %c0_604 = arith.constant 0 : index
    %c0_605 = arith.constant 0 : index
    %c126_606 = arith.constant 126 : index
    %415 = vector.load %arg6[%c0_604, %c0_605, %c126_606] : memref<2x4x196xf32, #tpu.memory_space<vmem>>, vector<2x4x14xf32>
    tpu.vector_store %arg6[%c0_604, %c0_605, %c126_606], %414 {strides = array<i32>} : memref<2x4x196xf32, #tpu.memory_space<vmem>>, vector<2x4x14xf32>,
    %c0_607 = arith.constant 0 : index
    %c0_608 = arith.constant 0 : index
    %c11_609 = arith.constant 11 : index
    %c2_610 = arith.constant 2 : index
    %416 = vector.load %arg1[%c0_607, %c0_608, %c11_609, %c2_610] : memref<2x4x16x16xf32, #tpu.memory_space<vmem>>, vector<2x4x1x14xf32>
    %417 = vector.shape_cast %416 : vector<2x4x1x14xf32> to vector<2x4x14xf32>
    %c0_611 = arith.constant 0 : index
    %c0_612 = arith.constant 0 : index
    %c140_613 = arith.constant 140 : index
    %418 = vector.load %arg6[%c0_611, %c0_612, %c140_613] : memref<2x4x196xf32, #tpu.memory_space<vmem>>, vector<2x4x14xf32>
    tpu.vector_store %arg6[%c0_611, %c0_612, %c140_613], %417 {strides = array<i32>} : memref<2x4x196xf32, #tpu.memory_space<vmem>>, vector<2x4x14xf32>,
    %c0_614 = arith.constant 0 : index
    %c0_615 = arith.constant 0 : index
    %c12_616 = arith.constant 12 : index
    %c2_617 = arith.constant 2 : index
    %419 = vector.load %arg1[%c0_614, %c0_615, %c12_616, %c2_617] : memref<2x4x16x16xf32, #tpu.memory_space<vmem>>, vector<2x4x1x14xf32>
    %420 = vector.shape_cast %419 : vector<2x4x1x14xf32> to vector<2x4x14xf32>
    %c0_618 = arith.constant 0 : index
    %c0_619 = arith.constant 0 : index
    %c154_620 = arith.constant 154 : index
    %421 = vector.load %arg6[%c0_618, %c0_619, %c154_620] : memref<2x4x196xf32, #tpu.memory_space<vmem>>, vector<2x4x14xf32>
    tpu.vector_store %arg6[%c0_618, %c0_619, %c154_620], %420 {strides = array<i32>} : memref<2x4x196xf32, #tpu.memory_space<vmem>>, vector<2x4x14xf32>,
    %c0_621 = arith.constant 0 : index
    %c0_622 = arith.constant 0 : index
    %c13_623 = arith.constant 13 : index
    %c2_624 = arith.constant 2 : index
    %422 = vector.load %arg1[%c0_621, %c0_622, %c13_623, %c2_624] : memref<2x4x16x16xf32, #tpu.memory_space<vmem>>, vector<2x4x1x14xf32>
    %423 = vector.shape_cast %422 : vector<2x4x1x14xf32> to vector<2x4x14xf32>
    %c0_625 = arith.constant 0 : index
    %c0_626 = arith.constant 0 : index
    %c168_627 = arith.constant 168 : index
    %424 = vector.load %arg6[%c0_625, %c0_626, %c168_627] : memref<2x4x196xf32, #tpu.memory_space<vmem>>, vector<2x4x14xf32>
    tpu.vector_store %arg6[%c0_625, %c0_626, %c168_627], %423 {strides = array<i32>} : memref<2x4x196xf32, #tpu.memory_space<vmem>>, vector<2x4x14xf32>,
    %c0_628 = arith.constant 0 : index
    %c0_629 = arith.constant 0 : index
    %c14_630 = arith.constant 14 : index
    %c2_631 = arith.constant 2 : index
    %425 = vector.load %arg1[%c0_628, %c0_629, %c14_630, %c2_631] : memref<2x4x16x16xf32, #tpu.memory_space<vmem>>, vector<2x4x1x14xf32>
    %426 = vector.shape_cast %425 : vector<2x4x1x14xf32> to vector<2x4x14xf32>
    %c0_632 = arith.constant 0 : index
    %c0_633 = arith.constant 0 : index
    %c182_634 = arith.constant 182 : index
    %427 = vector.load %arg6[%c0_632, %c0_633, %c182_634] : memref<2x4x196xf32, #tpu.memory_space<vmem>>, vector<2x4x14xf32>
    tpu.vector_store %arg6[%c0_632, %c0_633, %c182_634], %426 {strides = array<i32>} : memref<2x4x196xf32, #tpu.memory_space<vmem>>, vector<2x4x14xf32>,
    %c0_635 = arith.constant 0 : index
    %c0_636 = arith.constant 0 : index
    %c0_637 = arith.constant 0 : index
    %428 = vector.load %arg6[%c0_635, %c0_636, %c0_637] : memref<2x4x196xf32, #tpu.memory_space<vmem>>, vector<2x4x196xf32>
    %429 = vector.extract_strided_slice %428 {offsets = [0, 0, 0], sizes = [2, 1, 196], strides = [1, 1, 1]} : vector<2x4x196xf32> to vector<2x1x196xf32>
    %c5_638 = arith.constant 5 : index
    %c0_639 = arith.constant 0 : index
    %c0_640 = arith.constant 0 : index
    %430 = vector.load %arg2[%c5_638, %c0_639, %c0_640] : memref<36x8x196xf32, #tpu.memory_space<vmem>>, vector<1x8x196xf32>
    %431 = vector.shape_cast %430 : vector<1x8x196xf32> to vector<8x196xf32>
    %432 = vector.shape_cast %431 : vector<8x196xf32> to vector<1x8x196xf32>
    %433 = vector.broadcast %429 : vector<2x1x196xf32> to vector<2x8x196xf32>
    %434 = vector.broadcast %432 : vector<1x8x196xf32> to vector<2x8x196xf32>
    %435 = arith.mulf %433, %434 : vector<2x8x196xf32>
    %436 = arith.addf %385, %435 : vector<2x8x196xf32>
    %437 = vector.extract_strided_slice %428 {offsets = [0, 1, 0], sizes = [2, 1, 196], strides = [1, 1, 1]} : vector<2x4x196xf32> to vector<2x1x196xf32>
    %c14_641 = arith.constant 14 : index
    %c0_642 = arith.constant 0 : index
    %c0_643 = arith.constant 0 : index
    %438 = vector.load %arg2[%c14_641, %c0_642, %c0_643] : memref<36x8x196xf32, #tpu.memory_space<vmem>>, vector<1x8x196xf32>
    %439 = vector.shape_cast %438 : vector<1x8x196xf32> to vector<8x196xf32>
    %440 = vector.shape_cast %439 : vector<8x196xf32> to vector<1x8x196xf32>
    %441 = vector.broadcast %437 : vector<2x1x196xf32> to vector<2x8x196xf32>
    %442 = vector.broadcast %440 : vector<1x8x196xf32> to vector<2x8x196xf32>
    %443 = arith.mulf %441, %442 : vector<2x8x196xf32>
    %444 = arith.addf %436, %443 : vector<2x8x196xf32>
    %445 = vector.extract_strided_slice %428 {offsets = [0, 2, 0], sizes = [2, 1, 196], strides = [1, 1, 1]} : vector<2x4x196xf32> to vector<2x1x196xf32>
    %c23 = arith.constant 23 : index
    %c0_644 = arith.constant 0 : index
    %c0_645 = arith.constant 0 : index
    %446 = vector.load %arg2[%c23, %c0_644, %c0_645] : memref<36x8x196xf32, #tpu.memory_space<vmem>>, vector<1x8x196xf32>
    %447 = vector.shape_cast %446 : vector<1x8x196xf32> to vector<8x196xf32>
    %448 = vector.shape_cast %447 : vector<8x196xf32> to vector<1x8x196xf32>
    %449 = vector.broadcast %445 : vector<2x1x196xf32> to vector<2x8x196xf32>
    %450 = vector.broadcast %448 : vector<1x8x196xf32> to vector<2x8x196xf32>
    %451 = arith.mulf %449, %450 : vector<2x8x196xf32>
    %452 = arith.addf %444, %451 : vector<2x8x196xf32>
    %453 = vector.extract_strided_slice %428 {offsets = [0, 3, 0], sizes = [2, 1, 196], strides = [1, 1, 1]} : vector<2x4x196xf32> to vector<2x1x196xf32>
    %c32 = arith.constant 32 : index
    %c0_646 = arith.constant 0 : index
    %c0_647 = arith.constant 0 : index
    %454 = vector.load %arg2[%c32, %c0_646, %c0_647] : memref<36x8x196xf32, #tpu.memory_space<vmem>>, vector<1x8x196xf32>
    %455 = vector.shape_cast %454 : vector<1x8x196xf32> to vector<8x196xf32>
    %456 = vector.shape_cast %455 : vector<8x196xf32> to vector<1x8x196xf32>
    %457 = vector.broadcast %453 : vector<2x1x196xf32> to vector<2x8x196xf32>
    %458 = vector.broadcast %456 : vector<1x8x196xf32> to vector<2x8x196xf32>
    %459 = arith.mulf %457, %458 : vector<2x8x196xf32>
    %460 = arith.addf %452, %459 : vector<2x8x196xf32>
    %c0_648 = arith.constant 0 : index
    %c0_649 = arith.constant 0 : index
    %c2_650 = arith.constant 2 : index
    %c0_651 = arith.constant 0 : index
    %461 = vector.load %arg1[%c0_648, %c0_649, %c2_650, %c0_651] : memref<2x4x16x16xf32, #tpu.memory_space<vmem>>, vector<2x4x1x14xf32>
    %462 = vector.shape_cast %461 : vector<2x4x1x14xf32> to vector<2x4x14xf32>
    %c0_652 = arith.constant 0 : index
    %c0_653 = arith.constant 0 : index
    %c0_654 = arith.constant 0 : index
    %463 = vector.load %arg6[%c0_652, %c0_653, %c0_654] : memref<2x4x196xf32, #tpu.memory_space<vmem>>, vector<2x4x14xf32>
    tpu.vector_store %arg6[%c0_652, %c0_653, %c0_654], %462 {strides = array<i32>} : memref<2x4x196xf32, #tpu.memory_space<vmem>>, vector<2x4x14xf32>,
    %c0_655 = arith.constant 0 : index
    %c0_656 = arith.constant 0 : index
    %c3_657 = arith.constant 3 : index
    %c0_658 = arith.constant 0 : index
    %464 = vector.load %arg1[%c0_655, %c0_656, %c3_657, %c0_658] : memref<2x4x16x16xf32, #tpu.memory_space<vmem>>, vector<2x4x1x14xf32>
    %465 = vector.shape_cast %464 : vector<2x4x1x14xf32> to vector<2x4x14xf32>
    %c0_659 = arith.constant 0 : index
    %c0_660 = arith.constant 0 : index
    %c14_661 = arith.constant 14 : index
    %466 = vector.load %arg6[%c0_659, %c0_660, %c14_661] : memref<2x4x196xf32, #tpu.memory_space<vmem>>, vector<2x4x14xf32>
    tpu.vector_store %arg6[%c0_659, %c0_660, %c14_661], %465 {strides = array<i32>} : memref<2x4x196xf32, #tpu.memory_space<vmem>>, vector<2x4x14xf32>,
    %c0_662 = arith.constant 0 : index
    %c0_663 = arith.constant 0 : index
    %c4_664 = arith.constant 4 : index
    %c0_665 = arith.constant 0 : index
    %467 = vector.load %arg1[%c0_662, %c0_663, %c4_664, %c0_665] : memref<2x4x16x16xf32, #tpu.memory_space<vmem>>, vector<2x4x1x14xf32>
    %468 = vector.shape_cast %467 : vector<2x4x1x14xf32> to vector<2x4x14xf32>
    %c0_666 = arith.constant 0 : index
    %c0_667 = arith.constant 0 : index
    %c28_668 = arith.constant 28 : index
    %469 = vector.load %arg6[%c0_666, %c0_667, %c28_668] : memref<2x4x196xf32, #tpu.memory_space<vmem>>, vector<2x4x14xf32>
    tpu.vector_store %arg6[%c0_666, %c0_667, %c28_668], %468 {strides = array<i32>} : memref<2x4x196xf32, #tpu.memory_space<vmem>>, vector<2x4x14xf32>,
    %c0_669 = arith.constant 0 : index
    %c0_670 = arith.constant 0 : index
    %c5_671 = arith.constant 5 : index
    %c0_672 = arith.constant 0 : index
    %470 = vector.load %arg1[%c0_669, %c0_670, %c5_671, %c0_672] : memref<2x4x16x16xf32, #tpu.memory_space<vmem>>, vector<2x4x1x14xf32>
    %471 = vector.shape_cast %470 : vector<2x4x1x14xf32> to vector<2x4x14xf32>
    %c0_673 = arith.constant 0 : index
    %c0_674 = arith.constant 0 : index
    %c42_675 = arith.constant 42 : index
    %472 = vector.load %arg6[%c0_673, %c0_674, %c42_675] : memref<2x4x196xf32, #tpu.memory_space<vmem>>, vector<2x4x14xf32>
    tpu.vector_store %arg6[%c0_673, %c0_674, %c42_675], %471 {strides = array<i32>} : memref<2x4x196xf32, #tpu.memory_space<vmem>>, vector<2x4x14xf32>,
    %c0_676 = arith.constant 0 : index
    %c0_677 = arith.constant 0 : index
    %c6_678 = arith.constant 6 : index
    %c0_679 = arith.constant 0 : index
    %473 = vector.load %arg1[%c0_676, %c0_677, %c6_678, %c0_679] : memref<2x4x16x16xf32, #tpu.memory_space<vmem>>, vector<2x4x1x14xf32>
    %474 = vector.shape_cast %473 : vector<2x4x1x14xf32> to vector<2x4x14xf32>
    %c0_680 = arith.constant 0 : index
    %c0_681 = arith.constant 0 : index
    %c56_682 = arith.constant 56 : index
    %475 = vector.load %arg6[%c0_680, %c0_681, %c56_682] : memref<2x4x196xf32, #tpu.memory_space<vmem>>, vector<2x4x14xf32>
    tpu.vector_store %arg6[%c0_680, %c0_681, %c56_682], %474 {strides = array<i32>} : memref<2x4x196xf32, #tpu.memory_space<vmem>>, vector<2x4x14xf32>,
    %c0_683 = arith.constant 0 : index
    %c0_684 = arith.constant 0 : index
    %c7_685 = arith.constant 7 : index
    %c0_686 = arith.constant 0 : index
    %476 = vector.load %arg1[%c0_683, %c0_684, %c7_685, %c0_686] : memref<2x4x16x16xf32, #tpu.memory_space<vmem>>, vector<2x4x1x14xf32>
    %477 = vector.shape_cast %476 : vector<2x4x1x14xf32> to vector<2x4x14xf32>
    %c0_687 = arith.constant 0 : index
    %c0_688 = arith.constant 0 : index
    %c70_689 = arith.constant 70 : index
    %478 = vector.load %arg6[%c0_687, %c0_688, %c70_689] : memref<2x4x196xf32, #tpu.memory_space<vmem>>, vector<2x4x14xf32>
    tpu.vector_store %arg6[%c0_687, %c0_688, %c70_689], %477 {strides = array<i32>} : memref<2x4x196xf32, #tpu.memory_space<vmem>>, vector<2x4x14xf32>,
    %c0_690 = arith.constant 0 : index
    %c0_691 = arith.constant 0 : index
    %c8_692 = arith.constant 8 : index
    %c0_693 = arith.constant 0 : index
    %479 = vector.load %arg1[%c0_690, %c0_691, %c8_692, %c0_693] : memref<2x4x16x16xf32, #tpu.memory_space<vmem>>, vector<2x4x1x14xf32>
    %480 = vector.shape_cast %479 : vector<2x4x1x14xf32> to vector<2x4x14xf32>
    %c0_694 = arith.constant 0 : index
    %c0_695 = arith.constant 0 : index
    %c84_696 = arith.constant 84 : index
    %481 = vector.load %arg6[%c0_694, %c0_695, %c84_696] : memref<2x4x196xf32, #tpu.memory_space<vmem>>, vector<2x4x14xf32>
    tpu.vector_store %arg6[%c0_694, %c0_695, %c84_696], %480 {strides = array<i32>} : memref<2x4x196xf32, #tpu.memory_space<vmem>>, vector<2x4x14xf32>,
    %c0_697 = arith.constant 0 : index
    %c0_698 = arith.constant 0 : index
    %c9_699 = arith.constant 9 : index
    %c0_700 = arith.constant 0 : index
    %482 = vector.load %arg1[%c0_697, %c0_698, %c9_699, %c0_700] : memref<2x4x16x16xf32, #tpu.memory_space<vmem>>, vector<2x4x1x14xf32>
    %483 = vector.shape_cast %482 : vector<2x4x1x14xf32> to vector<2x4x14xf32>
    %c0_701 = arith.constant 0 : index
    %c0_702 = arith.constant 0 : index
    %c98_703 = arith.constant 98 : index
    %484 = vector.load %arg6[%c0_701, %c0_702, %c98_703] : memref<2x4x196xf32, #tpu.memory_space<vmem>>, vector<2x4x14xf32>
    tpu.vector_store %arg6[%c0_701, %c0_702, %c98_703], %483 {strides = array<i32>} : memref<2x4x196xf32, #tpu.memory_space<vmem>>, vector<2x4x14xf32>,
    %c0_704 = arith.constant 0 : index
    %c0_705 = arith.constant 0 : index
    %c10_706 = arith.constant 10 : index
    %c0_707 = arith.constant 0 : index
    %485 = vector.load %arg1[%c0_704, %c0_705, %c10_706, %c0_707] : memref<2x4x16x16xf32, #tpu.memory_space<vmem>>, vector<2x4x1x14xf32>
    %486 = vector.shape_cast %485 : vector<2x4x1x14xf32> to vector<2x4x14xf32>
    %c0_708 = arith.constant 0 : index
    %c0_709 = arith.constant 0 : index
    %c112_710 = arith.constant 112 : index
    %487 = vector.load %arg6[%c0_708, %c0_709, %c112_710] : memref<2x4x196xf32, #tpu.memory_space<vmem>>, vector<2x4x14xf32>
    tpu.vector_store %arg6[%c0_708, %c0_709, %c112_710], %486 {strides = array<i32>} : memref<2x4x196xf32, #tpu.memory_space<vmem>>, vector<2x4x14xf32>,
    %c0_711 = arith.constant 0 : index
    %c0_712 = arith.constant 0 : index
    %c11_713 = arith.constant 11 : index
    %c0_714 = arith.constant 0 : index
    %488 = vector.load %arg1[%c0_711, %c0_712, %c11_713, %c0_714] : memref<2x4x16x16xf32, #tpu.memory_space<vmem>>, vector<2x4x1x14xf32>
    %489 = vector.shape_cast %488 : vector<2x4x1x14xf32> to vector<2x4x14xf32>
    %c0_715 = arith.constant 0 : index
    %c0_716 = arith.constant 0 : index
    %c126_717 = arith.constant 126 : index
    %490 = vector.load %arg6[%c0_715, %c0_716, %c126_717] : memref<2x4x196xf32, #tpu.memory_space<vmem>>, vector<2x4x14xf32>
    tpu.vector_store %arg6[%c0_715, %c0_716, %c126_717], %489 {strides = array<i32>} : memref<2x4x196xf32, #tpu.memory_space<vmem>>, vector<2x4x14xf32>,
    %c0_718 = arith.constant 0 : index
    %c0_719 = arith.constant 0 : index
    %c12_720 = arith.constant 12 : index
    %c0_721 = arith.constant 0 : index
    %491 = vector.load %arg1[%c0_718, %c0_719, %c12_720, %c0_721] : memref<2x4x16x16xf32, #tpu.memory_space<vmem>>, vector<2x4x1x14xf32>
    %492 = vector.shape_cast %491 : vector<2x4x1x14xf32> to vector<2x4x14xf32>
    %c0_722 = arith.constant 0 : index
    %c0_723 = arith.constant 0 : index
    %c140_724 = arith.constant 140 : index
    %493 = vector.load %arg6[%c0_722, %c0_723, %c140_724] : memref<2x4x196xf32, #tpu.memory_space<vmem>>, vector<2x4x14xf32>
    tpu.vector_store %arg6[%c0_722, %c0_723, %c140_724], %492 {strides = array<i32>} : memref<2x4x196xf32, #tpu.memory_space<vmem>>, vector<2x4x14xf32>,
    %c0_725 = arith.constant 0 : index
    %c0_726 = arith.constant 0 : index
    %c13_727 = arith.constant 13 : index
    %c0_728 = arith.constant 0 : index
    %494 = vector.load %arg1[%c0_725, %c0_726, %c13_727, %c0_728] : memref<2x4x16x16xf32, #tpu.memory_space<vmem>>, vector<2x4x1x14xf32>
    %495 = vector.shape_cast %494 : vector<2x4x1x14xf32> to vector<2x4x14xf32>
    %c0_729 = arith.constant 0 : index
    %c0_730 = arith.constant 0 : index
    %c154_731 = arith.constant 154 : index
    %496 = vector.load %arg6[%c0_729, %c0_730, %c154_731] : memref<2x4x196xf32, #tpu.memory_space<vmem>>, vector<2x4x14xf32>
    tpu.vector_store %arg6[%c0_729, %c0_730, %c154_731], %495 {strides = array<i32>} : memref<2x4x196xf32, #tpu.memory_space<vmem>>, vector<2x4x14xf32>,
    %c0_732 = arith.constant 0 : index
    %c0_733 = arith.constant 0 : index
    %c14_734 = arith.constant 14 : index
    %c0_735 = arith.constant 0 : index
    %497 = vector.load %arg1[%c0_732, %c0_733, %c14_734, %c0_735] : memref<2x4x16x16xf32, #tpu.memory_space<vmem>>, vector<2x4x1x14xf32>
    %498 = vector.shape_cast %497 : vector<2x4x1x14xf32> to vector<2x4x14xf32>
    %c0_736 = arith.constant 0 : index
    %c0_737 = arith.constant 0 : index
    %c168_738 = arith.constant 168 : index
    %499 = vector.load %arg6[%c0_736, %c0_737, %c168_738] : memref<2x4x196xf32, #tpu.memory_space<vmem>>, vector<2x4x14xf32>
    tpu.vector_store %arg6[%c0_736, %c0_737, %c168_738], %498 {strides = array<i32>} : memref<2x4x196xf32, #tpu.memory_space<vmem>>, vector<2x4x14xf32>,
    %c0_739 = arith.constant 0 : index
    %c0_740 = arith.constant 0 : index
    %c15 = arith.constant 15 : index
    %c0_741 = arith.constant 0 : index
    %500 = vector.load %arg1[%c0_739, %c0_740, %c15, %c0_741] : memref<2x4x16x16xf32, #tpu.memory_space<vmem>>, vector<2x4x1x14xf32>
    %501 = vector.shape_cast %500 : vector<2x4x1x14xf32> to vector<2x4x14xf32>
    %c0_742 = arith.constant 0 : index
    %c0_743 = arith.constant 0 : index
    %c182_744 = arith.constant 182 : index
    %502 = vector.load %arg6[%c0_742, %c0_743, %c182_744] : memref<2x4x196xf32, #tpu.memory_space<vmem>>, vector<2x4x14xf32>
    tpu.vector_store %arg6[%c0_742, %c0_743, %c182_744], %501 {strides = array<i32>} : memref<2x4x196xf32, #tpu.memory_space<vmem>>, vector<2x4x14xf32>,
    %c0_745 = arith.constant 0 : index
    %c0_746 = arith.constant 0 : index
    %c0_747 = arith.constant 0 : index
    %503 = vector.load %arg6[%c0_745, %c0_746, %c0_747] : memref<2x4x196xf32, #tpu.memory_space<vmem>>, vector<2x4x196xf32>
    %504 = vector.extract_strided_slice %503 {offsets = [0, 0, 0], sizes = [2, 1, 196], strides = [1, 1, 1]} : vector<2x4x196xf32> to vector<2x1x196xf32>
    %c6_748 = arith.constant 6 : index
    %c0_749 = arith.constant 0 : index
    %c0_750 = arith.constant 0 : index
    %505 = vector.load %arg2[%c6_748, %c0_749, %c0_750] : memref<36x8x196xf32, #tpu.memory_space<vmem>>, vector<1x8x196xf32>
    %506 = vector.shape_cast %505 : vector<1x8x196xf32> to vector<8x196xf32>
    %507 = vector.shape_cast %506 : vector<8x196xf32> to vector<1x8x196xf32>
    %508 = vector.broadcast %504 : vector<2x1x196xf32> to vector<2x8x196xf32>
    %509 = vector.broadcast %507 : vector<1x8x196xf32> to vector<2x8x196xf32>
    %510 = arith.mulf %508, %509 : vector<2x8x196xf32>
    %511 = arith.addf %460, %510 : vector<2x8x196xf32>
    %512 = vector.extract_strided_slice %503 {offsets = [0, 1, 0], sizes = [2, 1, 196], strides = [1, 1, 1]} : vector<2x4x196xf32> to vector<2x1x196xf32>
    %c15_751 = arith.constant 15 : index
    %c0_752 = arith.constant 0 : index
    %c0_753 = arith.constant 0 : index
    %513 = vector.load %arg2[%c15_751, %c0_752, %c0_753] : memref<36x8x196xf32, #tpu.memory_space<vmem>>, vector<1x8x196xf32>
    %514 = vector.shape_cast %513 : vector<1x8x196xf32> to vector<8x196xf32>
    %515 = vector.shape_cast %514 : vector<8x196xf32> to vector<1x8x196xf32>
    %516 = vector.broadcast %512 : vector<2x1x196xf32> to vector<2x8x196xf32>
    %517 = vector.broadcast %515 : vector<1x8x196xf32> to vector<2x8x196xf32>
    %518 = arith.mulf %516, %517 : vector<2x8x196xf32>
    %519 = arith.addf %511, %518 : vector<2x8x196xf32>
    %520 = vector.extract_strided_slice %503 {offsets = [0, 2, 0], sizes = [2, 1, 196], strides = [1, 1, 1]} : vector<2x4x196xf32> to vector<2x1x196xf32>
    %c24 = arith.constant 24 : index
    %c0_754 = arith.constant 0 : index
    %c0_755 = arith.constant 0 : index
    %521 = vector.load %arg2[%c24, %c0_754, %c0_755] : memref<36x8x196xf32, #tpu.memory_space<vmem>>, vector<1x8x196xf32>
    %522 = vector.shape_cast %521 : vector<1x8x196xf32> to vector<8x196xf32>
    %523 = vector.shape_cast %522 : vector<8x196xf32> to vector<1x8x196xf32>
    %524 = vector.broadcast %520 : vector<2x1x196xf32> to vector<2x8x196xf32>
    %525 = vector.broadcast %523 : vector<1x8x196xf32> to vector<2x8x196xf32>
    %526 = arith.mulf %524, %525 : vector<2x8x196xf32>
    %527 = arith.addf %519, %526 : vector<2x8x196xf32>
    %528 = vector.extract_strided_slice %503 {offsets = [0, 3, 0], sizes = [2, 1, 196], strides = [1, 1, 1]} : vector<2x4x196xf32> to vector<2x1x196xf32>
    %c33 = arith.constant 33 : index
    %c0_756 = arith.constant 0 : index
    %c0_757 = arith.constant 0 : index
    %529 = vector.load %arg2[%c33, %c0_756, %c0_757] : memref<36x8x196xf32, #tpu.memory_space<vmem>>, vector<1x8x196xf32>
    %530 = vector.shape_cast %529 : vector<1x8x196xf32> to vector<8x196xf32>
    %531 = vector.shape_cast %530 : vector<8x196xf32> to vector<1x8x196xf32>
    %532 = vector.broadcast %528 : vector<2x1x196xf32> to vector<2x8x196xf32>
    %533 = vector.broadcast %531 : vector<1x8x196xf32> to vector<2x8x196xf32>
    %534 = arith.mulf %532, %533 : vector<2x8x196xf32>
    %535 = arith.addf %527, %534 : vector<2x8x196xf32>
    %c0_758 = arith.constant 0 : index
    %c0_759 = arith.constant 0 : index
    %c2_760 = arith.constant 2 : index
    %c1_761 = arith.constant 1 : index
    %536 = vector.load %arg1[%c0_758, %c0_759, %c2_760, %c1_761] : memref<2x4x16x16xf32, #tpu.memory_space<vmem>>, vector<2x4x1x14xf32>
    %537 = vector.shape_cast %536 : vector<2x4x1x14xf32> to vector<2x4x14xf32>
    %c0_762 = arith.constant 0 : index
    %c0_763 = arith.constant 0 : index
    %c0_764 = arith.constant 0 : index
    %538 = vector.load %arg6[%c0_762, %c0_763, %c0_764] : memref<2x4x196xf32, #tpu.memory_space<vmem>>, vector<2x4x14xf32>
    tpu.vector_store %arg6[%c0_762, %c0_763, %c0_764], %537 {strides = array<i32>} : memref<2x4x196xf32, #tpu.memory_space<vmem>>, vector<2x4x14xf32>,
    %c0_765 = arith.constant 0 : index
    %c0_766 = arith.constant 0 : index
    %c3_767 = arith.constant 3 : index
    %c1_768 = arith.constant 1 : index
    %539 = vector.load %arg1[%c0_765, %c0_766, %c3_767, %c1_768] : memref<2x4x16x16xf32, #tpu.memory_space<vmem>>, vector<2x4x1x14xf32>
    %540 = vector.shape_cast %539 : vector<2x4x1x14xf32> to vector<2x4x14xf32>
    %c0_769 = arith.constant 0 : index
    %c0_770 = arith.constant 0 : index
    %c14_771 = arith.constant 14 : index
    %541 = vector.load %arg6[%c0_769, %c0_770, %c14_771] : memref<2x4x196xf32, #tpu.memory_space<vmem>>, vector<2x4x14xf32>
    tpu.vector_store %arg6[%c0_769, %c0_770, %c14_771], %540 {strides = array<i32>} : memref<2x4x196xf32, #tpu.memory_space<vmem>>, vector<2x4x14xf32>,
    %c0_772 = arith.constant 0 : index
    %c0_773 = arith.constant 0 : index
    %c4_774 = arith.constant 4 : index
    %c1_775 = arith.constant 1 : index
    %542 = vector.load %arg1[%c0_772, %c0_773, %c4_774, %c1_775] : memref<2x4x16x16xf32, #tpu.memory_space<vmem>>, vector<2x4x1x14xf32>
    %543 = vector.shape_cast %542 : vector<2x4x1x14xf32> to vector<2x4x14xf32>
    %c0_776 = arith.constant 0 : index
    %c0_777 = arith.constant 0 : index
    %c28_778 = arith.constant 28 : index
    %544 = vector.load %arg6[%c0_776, %c0_777, %c28_778] : memref<2x4x196xf32, #tpu.memory_space<vmem>>, vector<2x4x14xf32>
    tpu.vector_store %arg6[%c0_776, %c0_777, %c28_778], %543 {strides = array<i32>} : memref<2x4x196xf32, #tpu.memory_space<vmem>>, vector<2x4x14xf32>,
    %c0_779 = arith.constant 0 : index
    %c0_780 = arith.constant 0 : index
    %c5_781 = arith.constant 5 : index
    %c1_782 = arith.constant 1 : index
    %545 = vector.load %arg1[%c0_779, %c0_780, %c5_781, %c1_782] : memref<2x4x16x16xf32, #tpu.memory_space<vmem>>, vector<2x4x1x14xf32>
    %546 = vector.shape_cast %545 : vector<2x4x1x14xf32> to vector<2x4x14xf32>
    %c0_783 = arith.constant 0 : index
    %c0_784 = arith.constant 0 : index
    %c42_785 = arith.constant 42 : index
    %547 = vector.load %arg6[%c0_783, %c0_784, %c42_785] : memref<2x4x196xf32, #tpu.memory_space<vmem>>, vector<2x4x14xf32>
    tpu.vector_store %arg6[%c0_783, %c0_784, %c42_785], %546 {strides = array<i32>} : memref<2x4x196xf32, #tpu.memory_space<vmem>>, vector<2x4x14xf32>,
    %c0_786 = arith.constant 0 : index
    %c0_787 = arith.constant 0 : index
    %c6_788 = arith.constant 6 : index
    %c1_789 = arith.constant 1 : index
    %548 = vector.load %arg1[%c0_786, %c0_787, %c6_788, %c1_789] : memref<2x4x16x16xf32, #tpu.memory_space<vmem>>, vector<2x4x1x14xf32>
    %549 = vector.shape_cast %548 : vector<2x4x1x14xf32> to vector<2x4x14xf32>
    %c0_790 = arith.constant 0 : index
    %c0_791 = arith.constant 0 : index
    %c56_792 = arith.constant 56 : index
    %550 = vector.load %arg6[%c0_790, %c0_791, %c56_792] : memref<2x4x196xf32, #tpu.memory_space<vmem>>, vector<2x4x14xf32>
    tpu.vector_store %arg6[%c0_790, %c0_791, %c56_792], %549 {strides = array<i32>} : memref<2x4x196xf32, #tpu.memory_space<vmem>>, vector<2x4x14xf32>,
    %c0_793 = arith.constant 0 : index
    %c0_794 = arith.constant 0 : index
    %c7_795 = arith.constant 7 : index
    %c1_796 = arith.constant 1 : index
    %551 = vector.load %arg1[%c0_793, %c0_794, %c7_795, %c1_796] : memref<2x4x16x16xf32, #tpu.memory_space<vmem>>, vector<2x4x1x14xf32>
    %552 = vector.shape_cast %551 : vector<2x4x1x14xf32> to vector<2x4x14xf32>
    %c0_797 = arith.constant 0 : index
    %c0_798 = arith.constant 0 : index
    %c70_799 = arith.constant 70 : index
    %553 = vector.load %arg6[%c0_797, %c0_798, %c70_799] : memref<2x4x196xf32, #tpu.memory_space<vmem>>, vector<2x4x14xf32>
    tpu.vector_store %arg6[%c0_797, %c0_798, %c70_799], %552 {strides = array<i32>} : memref<2x4x196xf32, #tpu.memory_space<vmem>>, vector<2x4x14xf32>,
    %c0_800 = arith.constant 0 : index
    %c0_801 = arith.constant 0 : index
    %c8_802 = arith.constant 8 : index
    %c1_803 = arith.constant 1 : index
    %554 = vector.load %arg1[%c0_800, %c0_801, %c8_802, %c1_803] : memref<2x4x16x16xf32, #tpu.memory_space<vmem>>, vector<2x4x1x14xf32>
    %555 = vector.shape_cast %554 : vector<2x4x1x14xf32> to vector<2x4x14xf32>
    %c0_804 = arith.constant 0 : index
    %c0_805 = arith.constant 0 : index
    %c84_806 = arith.constant 84 : index
    %556 = vector.load %arg6[%c0_804, %c0_805, %c84_806] : memref<2x4x196xf32, #tpu.memory_space<vmem>>, vector<2x4x14xf32>
    tpu.vector_store %arg6[%c0_804, %c0_805, %c84_806], %555 {strides = array<i32>} : memref<2x4x196xf32, #tpu.memory_space<vmem>>, vector<2x4x14xf32>,
    %c0_807 = arith.constant 0 : index
    %c0_808 = arith.constant 0 : index
    %c9_809 = arith.constant 9 : index
    %c1_810 = arith.constant 1 : index
    %557 = vector.load %arg1[%c0_807, %c0_808, %c9_809, %c1_810] : memref<2x4x16x16xf32, #tpu.memory_space<vmem>>, vector<2x4x1x14xf32>
    %558 = vector.shape_cast %557 : vector<2x4x1x14xf32> to vector<2x4x14xf32>
    %c0_811 = arith.constant 0 : index
    %c0_812 = arith.constant 0 : index
    %c98_813 = arith.constant 98 : index
    %559 = vector.load %arg6[%c0_811, %c0_812, %c98_813] : memref<2x4x196xf32, #tpu.memory_space<vmem>>, vector<2x4x14xf32>
    tpu.vector_store %arg6[%c0_811, %c0_812, %c98_813], %558 {strides = array<i32>} : memref<2x4x196xf32, #tpu.memory_space<vmem>>, vector<2x4x14xf32>,
    %c0_814 = arith.constant 0 : index
    %c0_815 = arith.constant 0 : index
    %c10_816 = arith.constant 10 : index
    %c1_817 = arith.constant 1 : index
    %560 = vector.load %arg1[%c0_814, %c0_815, %c10_816, %c1_817] : memref<2x4x16x16xf32, #tpu.memory_space<vmem>>, vector<2x4x1x14xf32>
    %561 = vector.shape_cast %560 : vector<2x4x1x14xf32> to vector<2x4x14xf32>
    %c0_818 = arith.constant 0 : index
    %c0_819 = arith.constant 0 : index
    %c112_820 = arith.constant 112 : index
    %562 = vector.load %arg6[%c0_818, %c0_819, %c112_820] : memref<2x4x196xf32, #tpu.memory_space<vmem>>, vector<2x4x14xf32>
    tpu.vector_store %arg6[%c0_818, %c0_819, %c112_820], %561 {strides = array<i32>} : memref<2x4x196xf32, #tpu.memory_space<vmem>>, vector<2x4x14xf32>,
    %c0_821 = arith.constant 0 : index
    %c0_822 = arith.constant 0 : index
    %c11_823 = arith.constant 11 : index
    %c1_824 = arith.constant 1 : index
    %563 = vector.load %arg1[%c0_821, %c0_822, %c11_823, %c1_824] : memref<2x4x16x16xf32, #tpu.memory_space<vmem>>, vector<2x4x1x14xf32>
    %564 = vector.shape_cast %563 : vector<2x4x1x14xf32> to vector<2x4x14xf32>
    %c0_825 = arith.constant 0 : index
    %c0_826 = arith.constant 0 : index
    %c126_827 = arith.constant 126 : index
    %565 = vector.load %arg6[%c0_825, %c0_826, %c126_827] : memref<2x4x196xf32, #tpu.memory_space<vmem>>, vector<2x4x14xf32>
    tpu.vector_store %arg6[%c0_825, %c0_826, %c126_827], %564 {strides = array<i32>} : memref<2x4x196xf32, #tpu.memory_space<vmem>>, vector<2x4x14xf32>,
    %c0_828 = arith.constant 0 : index
    %c0_829 = arith.constant 0 : index
    %c12_830 = arith.constant 12 : index
    %c1_831 = arith.constant 1 : index
    %566 = vector.load %arg1[%c0_828, %c0_829, %c12_830, %c1_831] : memref<2x4x16x16xf32, #tpu.memory_space<vmem>>, vector<2x4x1x14xf32>
    %567 = vector.shape_cast %566 : vector<2x4x1x14xf32> to vector<2x4x14xf32>
    %c0_832 = arith.constant 0 : index
    %c0_833 = arith.constant 0 : index
    %c140_834 = arith.constant 140 : index
    %568 = vector.load %arg6[%c0_832, %c0_833, %c140_834] : memref<2x4x196xf32, #tpu.memory_space<vmem>>, vector<2x4x14xf32>
    tpu.vector_store %arg6[%c0_832, %c0_833, %c140_834], %567 {strides = array<i32>} : memref<2x4x196xf32, #tpu.memory_space<vmem>>, vector<2x4x14xf32>,
    %c0_835 = arith.constant 0 : index
    %c0_836 = arith.constant 0 : index
    %c13_837 = arith.constant 13 : index
    %c1_838 = arith.constant 1 : index
    %569 = vector.load %arg1[%c0_835, %c0_836, %c13_837, %c1_838] : memref<2x4x16x16xf32, #tpu.memory_space<vmem>>, vector<2x4x1x14xf32>
    %570 = vector.shape_cast %569 : vector<2x4x1x14xf32> to vector<2x4x14xf32>
    %c0_839 = arith.constant 0 : index
    %c0_840 = arith.constant 0 : index
    %c154_841 = arith.constant 154 : index
    %571 = vector.load %arg6[%c0_839, %c0_840, %c154_841] : memref<2x4x196xf32, #tpu.memory_space<vmem>>, vector<2x4x14xf32>
    tpu.vector_store %arg6[%c0_839, %c0_840, %c154_841], %570 {strides = array<i32>} : memref<2x4x196xf32, #tpu.memory_space<vmem>>, vector<2x4x14xf32>,
    %c0_842 = arith.constant 0 : index
    %c0_843 = arith.constant 0 : index
    %c14_844 = arith.constant 14 : index
    %c1_845 = arith.constant 1 : index
    %572 = vector.load %arg1[%c0_842, %c0_843, %c14_844, %c1_845] : memref<2x4x16x16xf32, #tpu.memory_space<vmem>>, vector<2x4x1x14xf32>
    %573 = vector.shape_cast %572 : vector<2x4x1x14xf32> to vector<2x4x14xf32>
    %c0_846 = arith.constant 0 : index
    %c0_847 = arith.constant 0 : index
    %c168_848 = arith.constant 168 : index
    %574 = vector.load %arg6[%c0_846, %c0_847, %c168_848] : memref<2x4x196xf32, #tpu.memory_space<vmem>>, vector<2x4x14xf32>
    tpu.vector_store %arg6[%c0_846, %c0_847, %c168_848], %573 {strides = array<i32>} : memref<2x4x196xf32, #tpu.memory_space<vmem>>, vector<2x4x14xf32>,
    %c0_849 = arith.constant 0 : index
    %c0_850 = arith.constant 0 : index
    %c15_851 = arith.constant 15 : index
    %c1_852 = arith.constant 1 : index
    %575 = vector.load %arg1[%c0_849, %c0_850, %c15_851, %c1_852] : memref<2x4x16x16xf32, #tpu.memory_space<vmem>>, vector<2x4x1x14xf32>
    %576 = vector.shape_cast %575 : vector<2x4x1x14xf32> to vector<2x4x14xf32>
    %c0_853 = arith.constant 0 : index
    %c0_854 = arith.constant 0 : index
    %c182_855 = arith.constant 182 : index
    %577 = vector.load %arg6[%c0_853, %c0_854, %c182_855] : memref<2x4x196xf32, #tpu.memory_space<vmem>>, vector<2x4x14xf32>
    tpu.vector_store %arg6[%c0_853, %c0_854, %c182_855], %576 {strides = array<i32>} : memref<2x4x196xf32, #tpu.memory_space<vmem>>, vector<2x4x14xf32>,
    %c0_856 = arith.constant 0 : index
    %c0_857 = arith.constant 0 : index
    %c0_858 = arith.constant 0 : index
    %578 = vector.load %arg6[%c0_856, %c0_857, %c0_858] : memref<2x4x196xf32, #tpu.memory_space<vmem>>, vector<2x4x196xf32>
    %579 = vector.extract_strided_slice %578 {offsets = [0, 0, 0], sizes = [2, 1, 196], strides = [1, 1, 1]} : vector<2x4x196xf32> to vector<2x1x196xf32>
    %c7_859 = arith.constant 7 : index
    %c0_860 = arith.constant 0 : index
    %c0_861 = arith.constant 0 : index
    %580 = vector.load %arg2[%c7_859, %c0_860, %c0_861] : memref<36x8x196xf32, #tpu.memory_space<vmem>>, vector<1x8x196xf32>
    %581 = vector.shape_cast %580 : vector<1x8x196xf32> to vector<8x196xf32>
    %582 = vector.shape_cast %581 : vector<8x196xf32> to vector<1x8x196xf32>
    %583 = vector.broadcast %579 : vector<2x1x196xf32> to vector<2x8x196xf32>
    %584 = vector.broadcast %582 : vector<1x8x196xf32> to vector<2x8x196xf32>
    %585 = arith.mulf %583, %584 : vector<2x8x196xf32>
    %586 = arith.addf %535, %585 : vector<2x8x196xf32>
    %587 = vector.extract_strided_slice %578 {offsets = [0, 1, 0], sizes = [2, 1, 196], strides = [1, 1, 1]} : vector<2x4x196xf32> to vector<2x1x196xf32>
    %c16 = arith.constant 16 : index
    %c0_862 = arith.constant 0 : index
    %c0_863 = arith.constant 0 : index
    %588 = vector.load %arg2[%c16, %c0_862, %c0_863] : memref<36x8x196xf32, #tpu.memory_space<vmem>>, vector<1x8x196xf32>
    %589 = vector.shape_cast %588 : vector<1x8x196xf32> to vector<8x196xf32>
    %590 = vector.shape_cast %589 : vector<8x196xf32> to vector<1x8x196xf32>
    %591 = vector.broadcast %587 : vector<2x1x196xf32> to vector<2x8x196xf32>
    %592 = vector.broadcast %590 : vector<1x8x196xf32> to vector<2x8x196xf32>
    %593 = arith.mulf %591, %592 : vector<2x8x196xf32>
    %594 = arith.addf %586, %593 : vector<2x8x196xf32>
    %595 = vector.extract_strided_slice %578 {offsets = [0, 2, 0], sizes = [2, 1, 196], strides = [1, 1, 1]} : vector<2x4x196xf32> to vector<2x1x196xf32>
    %c25 = arith.constant 25 : index
    %c0_864 = arith.constant 0 : index
    %c0_865 = arith.constant 0 : index
    %596 = vector.load %arg2[%c25, %c0_864, %c0_865] : memref<36x8x196xf32, #tpu.memory_space<vmem>>, vector<1x8x196xf32>
    %597 = vector.shape_cast %596 : vector<1x8x196xf32> to vector<8x196xf32>
    %598 = vector.shape_cast %597 : vector<8x196xf32> to vector<1x8x196xf32>
    %599 = vector.broadcast %595 : vector<2x1x196xf32> to vector<2x8x196xf32>
    %600 = vector.broadcast %598 : vector<1x8x196xf32> to vector<2x8x196xf32>
    %601 = arith.mulf %599, %600 : vector<2x8x196xf32>
    %602 = arith.addf %594, %601 : vector<2x8x196xf32>
    %603 = vector.extract_strided_slice %578 {offsets = [0, 3, 0], sizes = [2, 1, 196], strides = [1, 1, 1]} : vector<2x4x196xf32> to vector<2x1x196xf32>
    %c34 = arith.constant 34 : index
    %c0_866 = arith.constant 0 : index
    %c0_867 = arith.constant 0 : index
    %604 = vector.load %arg2[%c34, %c0_866, %c0_867] : memref<36x8x196xf32, #tpu.memory_space<vmem>>, vector<1x8x196xf32>
    %605 = vector.shape_cast %604 : vector<1x8x196xf32> to vector<8x196xf32>
    %606 = vector.shape_cast %605 : vector<8x196xf32> to vector<1x8x196xf32>
    %607 = vector.broadcast %603 : vector<2x1x196xf32> to vector<2x8x196xf32>
    %608 = vector.broadcast %606 : vector<1x8x196xf32> to vector<2x8x196xf32>
    %609 = arith.mulf %607, %608 : vector<2x8x196xf32>
    %610 = arith.addf %602, %609 : vector<2x8x196xf32>
    %c0_868 = arith.constant 0 : index
    %c0_869 = arith.constant 0 : index
    %c2_870 = arith.constant 2 : index
    %c2_871 = arith.constant 2 : index
    %611 = vector.load %arg1[%c0_868, %c0_869, %c2_870, %c2_871] : memref<2x4x16x16xf32, #tpu.memory_space<vmem>>, vector<2x4x1x14xf32>
    %612 = vector.shape_cast %611 : vector<2x4x1x14xf32> to vector<2x4x14xf32>
    %c0_872 = arith.constant 0 : index
    %c0_873 = arith.constant 0 : index
    %c0_874 = arith.constant 0 : index
    %613 = vector.load %arg6[%c0_872, %c0_873, %c0_874] : memref<2x4x196xf32, #tpu.memory_space<vmem>>, vector<2x4x14xf32>
    tpu.vector_store %arg6[%c0_872, %c0_873, %c0_874], %612 {strides = array<i32>} : memref<2x4x196xf32, #tpu.memory_space<vmem>>, vector<2x4x14xf32>,
    %c0_875 = arith.constant 0 : index
    %c0_876 = arith.constant 0 : index
    %c3_877 = arith.constant 3 : index
    %c2_878 = arith.constant 2 : index
    %614 = vector.load %arg1[%c0_875, %c0_876, %c3_877, %c2_878] : memref<2x4x16x16xf32, #tpu.memory_space<vmem>>, vector<2x4x1x14xf32>
    %615 = vector.shape_cast %614 : vector<2x4x1x14xf32> to vector<2x4x14xf32>
    %c0_879 = arith.constant 0 : index
    %c0_880 = arith.constant 0 : index
    %c14_881 = arith.constant 14 : index
    %616 = vector.load %arg6[%c0_879, %c0_880, %c14_881] : memref<2x4x196xf32, #tpu.memory_space<vmem>>, vector<2x4x14xf32>
    tpu.vector_store %arg6[%c0_879, %c0_880, %c14_881], %615 {strides = array<i32>} : memref<2x4x196xf32, #tpu.memory_space<vmem>>, vector<2x4x14xf32>,
    %c0_882 = arith.constant 0 : index
    %c0_883 = arith.constant 0 : index
    %c4_884 = arith.constant 4 : index
    %c2_885 = arith.constant 2 : index
    %617 = vector.load %arg1[%c0_882, %c0_883, %c4_884, %c2_885] : memref<2x4x16x16xf32, #tpu.memory_space<vmem>>, vector<2x4x1x14xf32>
    %618 = vector.shape_cast %617 : vector<2x4x1x14xf32> to vector<2x4x14xf32>
    %c0_886 = arith.constant 0 : index
    %c0_887 = arith.constant 0 : index
    %c28_888 = arith.constant 28 : index
    %619 = vector.load %arg6[%c0_886, %c0_887, %c28_888] : memref<2x4x196xf32, #tpu.memory_space<vmem>>, vector<2x4x14xf32>
    tpu.vector_store %arg6[%c0_886, %c0_887, %c28_888], %618 {strides = array<i32>} : memref<2x4x196xf32, #tpu.memory_space<vmem>>, vector<2x4x14xf32>,
    %c0_889 = arith.constant 0 : index
    %c0_890 = arith.constant 0 : index
    %c5_891 = arith.constant 5 : index
    %c2_892 = arith.constant 2 : index
    %620 = vector.load %arg1[%c0_889, %c0_890, %c5_891, %c2_892] : memref<2x4x16x16xf32, #tpu.memory_space<vmem>>, vector<2x4x1x14xf32>
    %621 = vector.shape_cast %620 : vector<2x4x1x14xf32> to vector<2x4x14xf32>
    %c0_893 = arith.constant 0 : index
    %c0_894 = arith.constant 0 : index
    %c42_895 = arith.constant 42 : index
    %622 = vector.load %arg6[%c0_893, %c0_894, %c42_895] : memref<2x4x196xf32, #tpu.memory_space<vmem>>, vector<2x4x14xf32>
    tpu.vector_store %arg6[%c0_893, %c0_894, %c42_895], %621 {strides = array<i32>} : memref<2x4x196xf32, #tpu.memory_space<vmem>>, vector<2x4x14xf32>,
    %c0_896 = arith.constant 0 : index
    %c0_897 = arith.constant 0 : index
    %c6_898 = arith.constant 6 : index
    %c2_899 = arith.constant 2 : index
    %623 = vector.load %arg1[%c0_896, %c0_897, %c6_898, %c2_899] : memref<2x4x16x16xf32, #tpu.memory_space<vmem>>, vector<2x4x1x14xf32>
    %624 = vector.shape_cast %623 : vector<2x4x1x14xf32> to vector<2x4x14xf32>
    %c0_900 = arith.constant 0 : index
    %c0_901 = arith.constant 0 : index
    %c56_902 = arith.constant 56 : index
    %625 = vector.load %arg6[%c0_900, %c0_901, %c56_902] : memref<2x4x196xf32, #tpu.memory_space<vmem>>, vector<2x4x14xf32>
    tpu.vector_store %arg6[%c0_900, %c0_901, %c56_902], %624 {strides = array<i32>} : memref<2x4x196xf32, #tpu.memory_space<vmem>>, vector<2x4x14xf32>,
    %c0_903 = arith.constant 0 : index
    %c0_904 = arith.constant 0 : index
    %c7_905 = arith.constant 7 : index
    %c2_906 = arith.constant 2 : index
    %626 = vector.load %arg1[%c0_903, %c0_904, %c7_905, %c2_906] : memref<2x4x16x16xf32, #tpu.memory_space<vmem>>, vector<2x4x1x14xf32>
    %627 = vector.shape_cast %626 : vector<2x4x1x14xf32> to vector<2x4x14xf32>
    %c0_907 = arith.constant 0 : index
    %c0_908 = arith.constant 0 : index
    %c70_909 = arith.constant 70 : index
    %628 = vector.load %arg6[%c0_907, %c0_908, %c70_909] : memref<2x4x196xf32, #tpu.memory_space<vmem>>, vector<2x4x14xf32>
    tpu.vector_store %arg6[%c0_907, %c0_908, %c70_909], %627 {strides = array<i32>} : memref<2x4x196xf32, #tpu.memory_space<vmem>>, vector<2x4x14xf32>,
    %c0_910 = arith.constant 0 : index
    %c0_911 = arith.constant 0 : index
    %c8_912 = arith.constant 8 : index
    %c2_913 = arith.constant 2 : index
    %629 = vector.load %arg1[%c0_910, %c0_911, %c8_912, %c2_913] : memref<2x4x16x16xf32, #tpu.memory_space<vmem>>, vector<2x4x1x14xf32>
    %630 = vector.shape_cast %629 : vector<2x4x1x14xf32> to vector<2x4x14xf32>
    %c0_914 = arith.constant 0 : index
    %c0_915 = arith.constant 0 : index
    %c84_916 = arith.constant 84 : index
    %631 = vector.load %arg6[%c0_914, %c0_915, %c84_916] : memref<2x4x196xf32, #tpu.memory_space<vmem>>, vector<2x4x14xf32>
    tpu.vector_store %arg6[%c0_914, %c0_915, %c84_916], %630 {strides = array<i32>} : memref<2x4x196xf32, #tpu.memory_space<vmem>>, vector<2x4x14xf32>,
    %c0_917 = arith.constant 0 : index
    %c0_918 = arith.constant 0 : index
    %c9_919 = arith.constant 9 : index
    %c2_920 = arith.constant 2 : index
    %632 = vector.load %arg1[%c0_917, %c0_918, %c9_919, %c2_920] : memref<2x4x16x16xf32, #tpu.memory_space<vmem>>, vector<2x4x1x14xf32>
    %633 = vector.shape_cast %632 : vector<2x4x1x14xf32> to vector<2x4x14xf32>
    %c0_921 = arith.constant 0 : index
    %c0_922 = arith.constant 0 : index
    %c98_923 = arith.constant 98 : index
    %634 = vector.load %arg6[%c0_921, %c0_922, %c98_923] : memref<2x4x196xf32, #tpu.memory_space<vmem>>, vector<2x4x14xf32>
    tpu.vector_store %arg6[%c0_921, %c0_922, %c98_923], %633 {strides = array<i32>} : memref<2x4x196xf32, #tpu.memory_space<vmem>>, vector<2x4x14xf32>,
    %c0_924 = arith.constant 0 : index
    %c0_925 = arith.constant 0 : index
    %c10_926 = arith.constant 10 : index
    %c2_927 = arith.constant 2 : index
    %635 = vector.load %arg1[%c0_924, %c0_925, %c10_926, %c2_927] : memref<2x4x16x16xf32, #tpu.memory_space<vmem>>, vector<2x4x1x14xf32>
    %636 = vector.shape_cast %635 : vector<2x4x1x14xf32> to vector<2x4x14xf32>
    %c0_928 = arith.constant 0 : index
    %c0_929 = arith.constant 0 : index
    %c112_930 = arith.constant 112 : index
    %637 = vector.load %arg6[%c0_928, %c0_929, %c112_930] : memref<2x4x196xf32, #tpu.memory_space<vmem>>, vector<2x4x14xf32>
    tpu.vector_store %arg6[%c0_928, %c0_929, %c112_930], %636 {strides = array<i32>} : memref<2x4x196xf32, #tpu.memory_space<vmem>>, vector<2x4x14xf32>,
    %c0_931 = arith.constant 0 : index
    %c0_932 = arith.constant 0 : index
    %c11_933 = arith.constant 11 : index
    %c2_934 = arith.constant 2 : index
    %638 = vector.load %arg1[%c0_931, %c0_932, %c11_933, %c2_934] : memref<2x4x16x16xf32, #tpu.memory_space<vmem>>, vector<2x4x1x14xf32>
    %639 = vector.shape_cast %638 : vector<2x4x1x14xf32> to vector<2x4x14xf32>
    %c0_935 = arith.constant 0 : index
    %c0_936 = arith.constant 0 : index
    %c126_937 = arith.constant 126 : index
    %640 = vector.load %arg6[%c0_935, %c0_936, %c126_937] : memref<2x4x196xf32, #tpu.memory_space<vmem>>, vector<2x4x14xf32>
    tpu.vector_store %arg6[%c0_935, %c0_936, %c126_937], %639 {strides = array<i32>} : memref<2x4x196xf32, #tpu.memory_space<vmem>>, vector<2x4x14xf32>,
    %c0_938 = arith.constant 0 : index
    %c0_939 = arith.constant 0 : index
    %c12_940 = arith.constant 12 : index
    %c2_941 = arith.constant 2 : index
    %641 = vector.load %arg1[%c0_938, %c0_939, %c12_940, %c2_941] : memref<2x4x16x16xf32, #tpu.memory_space<vmem>>, vector<2x4x1x14xf32>
    %642 = vector.shape_cast %641 : vector<2x4x1x14xf32> to vector<2x4x14xf32>
    %c0_942 = arith.constant 0 : index
    %c0_943 = arith.constant 0 : index
    %c140_944 = arith.constant 140 : index
    %643 = vector.load %arg6[%c0_942, %c0_943, %c140_944] : memref<2x4x196xf32, #tpu.memory_space<vmem>>, vector<2x4x14xf32>
    tpu.vector_store %arg6[%c0_942, %c0_943, %c140_944], %642 {strides = array<i32>} : memref<2x4x196xf32, #tpu.memory_space<vmem>>, vector<2x4x14xf32>,
    %c0_945 = arith.constant 0 : index
    %c0_946 = arith.constant 0 : index
    %c13_947 = arith.constant 13 : index
    %c2_948 = arith.constant 2 : index
    %644 = vector.load %arg1[%c0_945, %c0_946, %c13_947, %c2_948] : memref<2x4x16x16xf32, #tpu.memory_space<vmem>>, vector<2x4x1x14xf32>
    %645 = vector.shape_cast %644 : vector<2x4x1x14xf32> to vector<2x4x14xf32>
    %c0_949 = arith.constant 0 : index
    %c0_950 = arith.constant 0 : index
    %c154_951 = arith.constant 154 : index
    %646 = vector.load %arg6[%c0_949, %c0_950, %c154_951] : memref<2x4x196xf32, #tpu.memory_space<vmem>>, vector<2x4x14xf32>
    tpu.vector_store %arg6[%c0_949, %c0_950, %c154_951], %645 {strides = array<i32>} : memref<2x4x196xf32, #tpu.memory_space<vmem>>, vector<2x4x14xf32>,
    %c0_952 = arith.constant 0 : index
    %c0_953 = arith.constant 0 : index
    %c14_954 = arith.constant 14 : index
    %c2_955 = arith.constant 2 : index
    %647 = vector.load %arg1[%c0_952, %c0_953, %c14_954, %c2_955] : memref<2x4x16x16xf32, #tpu.memory_space<vmem>>, vector<2x4x1x14xf32>
    %648 = vector.shape_cast %647 : vector<2x4x1x14xf32> to vector<2x4x14xf32>
    %c0_956 = arith.constant 0 : index
    %c0_957 = arith.constant 0 : index
    %c168_958 = arith.constant 168 : index
    %649 = vector.load %arg6[%c0_956, %c0_957, %c168_958] : memref<2x4x196xf32, #tpu.memory_space<vmem>>, vector<2x4x14xf32>
    tpu.vector_store %arg6[%c0_956, %c0_957, %c168_958], %648 {strides = array<i32>} : memref<2x4x196xf32, #tpu.memory_space<vmem>>, vector<2x4x14xf32>,
    %c0_959 = arith.constant 0 : index
    %c0_960 = arith.constant 0 : index
    %c15_961 = arith.constant 15 : index
    %c2_962 = arith.constant 2 : index
    %650 = vector.load %arg1[%c0_959, %c0_960, %c15_961, %c2_962] : memref<2x4x16x16xf32, #tpu.memory_space<vmem>>, vector<2x4x1x14xf32>
    %651 = vector.shape_cast %650 : vector<2x4x1x14xf32> to vector<2x4x14xf32>
    %c0_963 = arith.constant 0 : index
    %c0_964 = arith.constant 0 : index
    %c182_965 = arith.constant 182 : index
    %652 = vector.load %arg6[%c0_963, %c0_964, %c182_965] : memref<2x4x196xf32, #tpu.memory_space<vmem>>, vector<2x4x14xf32>
    tpu.vector_store %arg6[%c0_963, %c0_964, %c182_965], %651 {strides = array<i32>} : memref<2x4x196xf32, #tpu.memory_space<vmem>>, vector<2x4x14xf32>,
    %c0_966 = arith.constant 0 : index
    %c0_967 = arith.constant 0 : index
    %c0_968 = arith.constant 0 : index
    %653 = vector.load %arg6[%c0_966, %c0_967, %c0_968] : memref<2x4x196xf32, #tpu.memory_space<vmem>>, vector<2x4x196xf32>
    %654 = vector.extract_strided_slice %653 {offsets = [0, 0, 0], sizes = [2, 1, 196], strides = [1, 1, 1]} : vector<2x4x196xf32> to vector<2x1x196xf32>
    %c8_969 = arith.constant 8 : index
    %c0_970 = arith.constant 0 : index
    %c0_971 = arith.constant 0 : index
    %655 = vector.load %arg2[%c8_969, %c0_970, %c0_971] : memref<36x8x196xf32, #tpu.memory_space<vmem>>, vector<1x8x196xf32>
    %656 = vector.shape_cast %655 : vector<1x8x196xf32> to vector<8x196xf32>
    %657 = vector.shape_cast %656 : vector<8x196xf32> to vector<1x8x196xf32>
    %658 = vector.broadcast %654 : vector<2x1x196xf32> to vector<2x8x196xf32>
    %659 = vector.broadcast %657 : vector<1x8x196xf32> to vector<2x8x196xf32>
    %660 = arith.mulf %658, %659 : vector<2x8x196xf32>
    %661 = arith.addf %610, %660 : vector<2x8x196xf32>
    %662 = vector.extract_strided_slice %653 {offsets = [0, 1, 0], sizes = [2, 1, 196], strides = [1, 1, 1]} : vector<2x4x196xf32> to vector<2x1x196xf32>
    %c17 = arith.constant 17 : index
    %c0_972 = arith.constant 0 : index
    %c0_973 = arith.constant 0 : index
    %663 = vector.load %arg2[%c17, %c0_972, %c0_973] : memref<36x8x196xf32, #tpu.memory_space<vmem>>, vector<1x8x196xf32>
    %664 = vector.shape_cast %663 : vector<1x8x196xf32> to vector<8x196xf32>
    %665 = vector.shape_cast %664 : vector<8x196xf32> to vector<1x8x196xf32>
    %666 = vector.broadcast %662 : vector<2x1x196xf32> to vector<2x8x196xf32>
    %667 = vector.broadcast %665 : vector<1x8x196xf32> to vector<2x8x196xf32>
    %668 = arith.mulf %666, %667 : vector<2x8x196xf32>
    %669 = arith.addf %661, %668 : vector<2x8x196xf32>
    %670 = vector.extract_strided_slice %653 {offsets = [0, 2, 0], sizes = [2, 1, 196], strides = [1, 1, 1]} : vector<2x4x196xf32> to vector<2x1x196xf32>
    %c26 = arith.constant 26 : index
    %c0_974 = arith.constant 0 : index
    %c0_975 = arith.constant 0 : index
    %671 = vector.load %arg2[%c26, %c0_974, %c0_975] : memref<36x8x196xf32, #tpu.memory_space<vmem>>, vector<1x8x196xf32>
    %672 = vector.shape_cast %671 : vector<1x8x196xf32> to vector<8x196xf32>
    %673 = vector.shape_cast %672 : vector<8x196xf32> to vector<1x8x196xf32>
    %674 = vector.broadcast %670 : vector<2x1x196xf32> to vector<2x8x196xf32>
    %675 = vector.broadcast %673 : vector<1x8x196xf32> to vector<2x8x196xf32>
    %676 = arith.mulf %674, %675 : vector<2x8x196xf32>
    %677 = arith.addf %669, %676 : vector<2x8x196xf32>
    %678 = vector.extract_strided_slice %653 {offsets = [0, 3, 0], sizes = [2, 1, 196], strides = [1, 1, 1]} : vector<2x4x196xf32> to vector<2x1x196xf32>
    %c35 = arith.constant 35 : index
    %c0_976 = arith.constant 0 : index
    %c0_977 = arith.constant 0 : index
    %679 = vector.load %arg2[%c35, %c0_976, %c0_977] : memref<36x8x196xf32, #tpu.memory_space<vmem>>, vector<1x8x196xf32>
    %680 = vector.shape_cast %679 : vector<1x8x196xf32> to vector<8x196xf32>
    %681 = vector.shape_cast %680 : vector<8x196xf32> to vector<1x8x196xf32>
    %682 = vector.broadcast %678 : vector<2x1x196xf32> to vector<2x8x196xf32>
    %683 = vector.broadcast %681 : vector<1x8x196xf32> to vector<2x8x196xf32>
    %684 = arith.mulf %682, %683 : vector<2x8x196xf32>
    %685 = arith.addf %677, %684 : vector<2x8x196xf32>
    %686 = vector.shape_cast %9 : vector<2x1xf32> to vector<2x1x1xf32>
    %687 = vector.broadcast %686 : vector<2x1x1xf32> to vector<2x8x196xf32>
    %688 = arith.mulf %685, %687 : vector<2x8x196xf32>
    %cst_978 = arith.constant dense<0.000000e+00> : vector<2x8xf32>
    %689 = vector.multi_reduction <add>, %688, %cst_978 [2] : vector<2x8x196xf32> to vector<2x8xf32>
    %690 = vector.shape_cast %689 : vector<2x8xf32> to vector<2x8x1xf32>
    %cst_979 = arith.constant dense<0.000000e+00> : vector<8x1xf32>
    %691 = vector.multi_reduction <add>, %690, %cst_979 [0] : vector<2x8x1xf32> to vector<8x1xf32>
    %692 = vector.shape_cast %691 : vector<8x1xf32> to vector<1x8x1xf32>
    %693 = arith.mulf %688, %688 : vector<2x8x196xf32>
    %cst_980 = arith.constant dense<0.000000e+00> : vector<2x8xf32>
    %694 = vector.multi_reduction <add>, %693, %cst_980 [2] : vector<2x8x196xf32> to vector<2x8xf32>
    %695 = vector.shape_cast %694 : vector<2x8xf32> to vector<2x8x1xf32>
    %cst_981 = arith.constant dense<0.000000e+00> : vector<8x1xf32>
    %696 = vector.multi_reduction <add>, %695, %cst_981 [0] : vector<2x8x1xf32> to vector<8x1xf32>
    %697 = vector.shape_cast %696 : vector<8x1xf32> to vector<1x8x1xf32>
    %cst_982 = arith.constant 0.00255102036 : f32
    %698 = vector.broadcast %cst_982 : f32 to vector<1x8x1xf32>
    %699 = arith.mulf %692, %698 : vector<1x8x1xf32>
    %cst_983 = arith.constant 0.00255102036 : f32
    %700 = vector.broadcast %cst_983 : f32 to vector<1x8x1xf32>
    %701 = arith.mulf %697, %700 : vector<1x8x1xf32>
    %702 = arith.mulf %699, %699 : vector<1x8x1xf32>
    %703 = arith.subf %701, %702 : vector<1x8x1xf32>
    %c0_984 = arith.constant 0 : index
    %c0_985 = arith.constant 0 : index
    %c0_986 = arith.constant 0 : index
    %704 = vector.load %arg3[%c0_984, %c0_985, %c0_986] : memref<1x8x1xf32, #tpu.memory_space<vmem>>, vector<1x8x1xf32>
    %cst_987 = arith.constant 9.99999974E-6 : f32
    %705 = vector.broadcast %cst_987 : f32 to vector<1x8x1xf32>
    %706 = arith.addf %703, %705 : vector<1x8x1xf32>
    %707 = math.rsqrt %706 : vector<1x8x1xf32>
    %708 = arith.mulf %704, %707 : vector<1x8x1xf32>
    %c0_988 = arith.constant 0 : index
    %c0_989 = arith.constant 0 : index
    %c0_990 = arith.constant 0 : index
    %709 = vector.load %arg4[%c0_988, %c0_989, %c0_990] : memref<1x8x1xf32, #tpu.memory_space<vmem>>, vector<1x8x1xf32>
    %710 = arith.mulf %699, %708 : vector<1x8x1xf32>
    %711 = arith.subf %709, %710 : vector<1x8x1xf32>
    %712 = vector.broadcast %708 : vector<1x8x1xf32> to vector<2x8x196xf32>
    %713 = arith.mulf %688, %712 : vector<2x8x196xf32>
    %714 = vector.broadcast %711 : vector<1x8x1xf32> to vector<2x8x196xf32>
    %715 = arith.addf %713, %714 : vector<2x8x196xf32>
    %cst_991 = arith.constant 0.000000e+00 : f32
    %716 = vector.broadcast %cst_991 : f32 to vector<2x8x196xf32>
    %717 = arith.maximumf %715, %716 : vector<2x8x196xf32>
    %c0_992 = arith.constant 0 : index
    %c0_993 = arith.constant 0 : index
    %c0_994 = arith.constant 0 : index
    %718 = vector.load %arg5[%c0_992, %c0_993, %c0_994] : memref<2x8x196xf32, #tpu.memory_space<vmem>>, vector<2x8x196xf32>
    tpu.vector_store %arg5[%c0_992, %c0_993, %c0_994], %717 {strides = array<i32>} : memref<2x8x196xf32, #tpu.memory_space<vmem>>, vector<2x8x196xf32>,
    return
  }
  func.func @transform_0(%arg0: i32) -> (i32, i32, i32, i32) {
    %c0_i32 = arith.constant 0 : i32
    %c0_i32_0 = arith.constant 0 : i32
    %c0_i32_1 = arith.constant 0 : i32
    %c0_i32_2 = arith.constant 0 : i32
    %c0_i32_3 = arith.constant 0 : i32
    return %c0_i32, %c0_i32_0, %c0_i32_1, %c0_i32_2 : i32, i32, i32, i32
  }
  func.func @transform_1(%arg0: i32) -> (i32, i32, i32) {
    %c0_i32 = arith.constant 0 : i32
    %c0_i32_0 = arith.constant 0 : i32
    %c0_i32_1 = arith.constant 0 : i32
    %c0_i32_2 = arith.constant 0 : i32
    return %c0_i32, %c0_i32_0, %c0_i32_1 : i32, i32, i32
  }
  func.func @transform_2(%arg0: i32) -> (i32, i32, i32) {
    %c0_i32 = arith.constant 0 : i32
    %c0_i32_0 = arith.constant 0 : i32
    %c0_i32_1 = arith.constant 0 : i32
    %c0_i32_2 = arith.constant 0 : i32
    return %c0_i32, %c0_i32_0, %c0_i32_1 : i32, i32, i32
  }
  func.func @transform_3(%arg0: i32) -> (i32, i32, i32) {
    %c0_i32 = arith.constant 0 : i32
    %c0_i32_0 = arith.constant 0 : i32
    %c0_i32_1 = arith.constant 0 : i32
    %c0_i32_2 = arith.constant 0 : i32
    return %c0_i32, %c0_i32_0, %c0_i32_1 : i32, i32, i32
  }
  func.func @transform_4(%arg0: i32) -> (i32, i32, i32) {
    %c0_i32 = arith.constant 0 : i32
    %c0_i32_0 = arith.constant 0 : i32
    %c0_i32_1 = arith.constant 0 : i32
    %c0_i32_2 = arith.constant 0 : i32
    return %c0_i32, %c0_i32_0, %c0_i32_1 : i32, i32, i32
  }
}

</mosaic_0001>

<bundles_post_ra>
// kernel: tpu_custom_call.1
= control target key start
LH: loop header
LB: loop body
LE: loop exit
PB: predicated region body
PF: predicated region fallthrough
CT: control target
= control target key end

     0   :  { %9 = vsyncpa [#allocation4], 0  ;;  %s13187_s0 = inlined_call_operand.hbm [shape: f32[2,4,16,16], index: 0, kind: input, shape index: {}]   ;;  %s13188_s1 = inlined_call_operand.hbm [shape: f32[36,8,196], index: 1, kind: input, shape index: {}]   ;;  %s13189_s2 = inlined_call_operand.vmem [shape: f32[1,8,1], index: 2, kind: input, shape index: {}]   ;;  %s13190_s3 = inlined_call_operand.vmem [shape: f32[1,8,1], index: 3, kind: input, shape index: {}]   ;;  %s13191_s4 = inlined_call_operand.hbm [shape: f32[2,8,196], index: 4, kind: output, shape index: {}]  }
   0x1   :  { %10 = vsyncpa [#allocation7], 0 }
   0x2   :  { %11 = vsyncpa [#allocation5], 0  ;;  %s7544_s15 = smov [#allocation3]   ;;  %s7472_s19 = scalar_lea.hbm %s13187_s0, 2048 }
   0x3   :  { %s17_s16 = sshll.u32 %s7544_s15, 4  ;;  %p7473_p0 = scmp.ne.s32.totalorder %s13187_s0, %s7472_s19  ;;  %s18_s16 = int_to_ptr.vmem [resolvable:$true] %s17_s16 }
   0x4   :  { %p7476_p1 = scmp.lt.u32.totalorder %s7472_s19, %s13187_s0 }
   0x6   :  { %p7478_p2 = pnand %p7476_p1, %p7473_p0 }
   0x8   :  { %7481 = shalt.err (!%p7478_p2)
}
   0x9   :  { %s7482_s24 = scalar_lea.vmem %s18_s16, 2048  ;;  %p7487_p4 = scmp.lt.s32.totalorder %s18_s16, %s18_s16 }
   0xa   :  { %p7483_p3 = scmp.ne.s32.totalorder %s18_s16, %s7482_s24  ;;  %p7488_p5 = scmp.lt.s32.totalorder %s7482_s24, %s7482_s24 }
   0xc   :  { %p7489_p6 = por %p7488_p5, %p7487_p4 }
   0xe   :  { %p7490_p7 = pnand %p7489_p6, %p7483_p3 }
  0x10   :  { %7493 = shalt.err (!%p7490_p7)
}
  0x11   :  { %s7545_s25 = smov 128   ;;  %s7546_s26 = smov 8  }
  0x12   :  { %23 = dma.hbm_to_vmem [thread:$0]  %s13187_s0, 2048, %s18_s16, [#allocation4], %s7545_s25, %s7545_s25, %s7546_s26  }
  0x13   :  { %s7547_s29 = smov [#allocation6]   ;;  %s7494_s7 = scalar_lea.hbm %s13188_s1, 9216 }
  0x14   :  { %s29_s30 = sshll.u32 %s7547_s29, 4  ;;  %p7495_p8 = scmp.ne.s32.totalorder %s13188_s1, %s7494_s7  ;;  %s30_s30 = int_to_ptr.vmem [resolvable:$true] %s29_s30 }
  0x15   :  { %p7498_p9 = scmp.lt.u32.totalorder %s7494_s7, %s13188_s1 }
  0x17   :  { %p7500_p10 = pnand %p7498_p9, %p7495_p8 }
  0x19   :  { %7503 = shalt.err (!%p7500_p10)
}
  0x1a   :  { %s7504_s12 = scalar_lea.vmem %s30_s30, 9216  ;;  %p7509_p12 = scmp.lt.s32.totalorder %s30_s30, %s30_s30 }
  0x1b   :  { %p7505_p11 = scmp.ne.s32.totalorder %s30_s30, %s7504_s12  ;;  %p7510_p13 = scmp.lt.s32.totalorder %s7504_s12, %s7504_s12 }
  0x1d   :  { %p7511_p0 = por %p7510_p13, %p7509_p12 }
  0x1f   :  { %p7512_p1 = pnand %p7511_p0, %p7505_p11 }
  0x21   :  { %7515 = shalt.err (!%p7512_p1)
}
  0x22   :  { %s13192_s0 = smov 256   ;;  %s13199_s13 = smov 16  }
  0x23   :  { %35 = dma.hbm_to_vmem [thread:$0]  %s13188_s1, 9216, %s30_s30, [#allocation7], %s13192_s0, %s13192_s0, %s13199_s13  }
  0x24   :  { %7538 = dma.done.wait [#allocation4], 2048  }
  0x25   :  { %7539 = vsyncadd [#allocation4], 4294965248 }
  0x26   :  { %7540 = dma.done.wait [#allocation7], 9216  }
  0x27   :  { %7541 = vsyncadd [#allocation7], 4294958080  ;;  %v48_v0 = vld [vmem:[#allocation3 + $0x10] sm:$0xff]  ;;  %vm78_vm0 = vcmask 130048   ;;  %v46_v1 = vld [vmem:[#allocation3] sm:$0xff]  ;;  %vm219_vm1 = vcmask 1041409  }
  0x28   :  { %v49_v2 = vld [vmem:[#allocation3 + $0x18] sm:$0xff]  ;;  %v64_v3 = vmul.f32 %v48_v0, %v48_v0  ;;  %v62_v4 = vmul.f32 %v46_v1, %v46_v1  ;;  %v47_v6 = vld [vmem:[#allocation3 + $0x8] sm:$0xff]  ;;  %v50_v9 = vld [vmem:[#allocation3 + $0x20] sm:$0xff]  ;;  %vm221_vm2 = vcmask 1042434   ;;  %vm280_vm3 = vcmask 1045509   ;;  %s7550_s1 = smov 14  }
  0x29   :  { %v65_v5 = vmul.f32 %v49_v2, %v49_v2  ;;  %v51_v7 = vld [vmem:[#allocation3 + $0x28] sm:$0xff]  ;;  %v63_v8 = vmul.f32 %v47_v6, %v47_v6  ;;  %v66_v15 = vmul.f32 %v50_v9, %v50_v9  ;;  %v53_v16 = vld [vmem:[#allocation3 + $0x38] sm:$0xff]  ;;  %v52_v17 = vld [vmem:[#allocation3 + $0x30] sm:$0xff]  ;;  %vm284_vm4 = vcmask 1046534   ;;  %s7551_s16 = smov 28   ;;  %s7552_s17 = smov 42  }
  0x2a   :  { %v85_v10 = vsel %vm78_vm0, %v64_v3, 0.0  ;;  %v79_v11 = vsel %vm78_vm0, %v62_v4, 0.0  ;;  %v67_v12 = vmul.f32 %v51_v7, %v51_v7  ;;  %v55_v18 = vld [vmem:[#allocation3 + $0x48] sm:$0xff]  ;;  %v54_v19 = vld [vmem:[#allocation3 + $0x40] sm:$0xff]  ;;  %v305_v20 = vld [vmem:[#allocation3 + $0x11] sm:$0x1]  ;;  %v69_v24 = vmul.f32 %v53_v16, %v53_v16 }
  0x2b   :  { %86 = vadd.xlane.f32.xlu1 %v85_v10  ;;  %80 = vadd.xlane.f32.xlu0 %v79_v11  ;;  %v88_v13 = vsel %vm78_vm0, %v65_v5, 0.0  ;;  %v82_v14 = vsel %vm78_vm0, %v63_v8, 0.0  ;;  %v57_v21 = vld [vmem:[#allocation3 + $0x58] sm:$0xff]  ;;  %v56_v22 = vld [vmem:[#allocation3 + $0x50] sm:$0xff]  ;;  %v68_v25 = vmul.f32 %v52_v17, %v52_v17  ;;  %v59_v26 = vld [vmem:[#allocation3 + $0x68] sm:$0xff]  ;;  %v91_v28 = vsel %vm78_vm0, %v66_v15, 0.0 }
  0x2c   :  { %v94_v23 = vsel %vm78_vm0, %v67_v12, 0.0  ;;  %v58_v27 = vld [vmem:[#allocation3 + $0x60] sm:$0xff]  ;;  %v71_v29 = vmul.f32 %v55_v18, %v55_v18  ;;  %v70_v30 = vmul.f32 %v54_v19, %v54_v19  ;;  %v320_v31 = vrot.slane %v305_v20, 7  ;;  %v348_v35 = vld [vmem:[#allocation3 + $0x12] sm:$0x1]  ;;  %v61_v38 = vld [vmem:[#allocation3 + $0x78] sm:$0xff] }
  0x2d   :  { %v73_v32 = vmul.f32 %v57_v21, %v57_v21  ;;  %v72_v33 = vmul.f32 %v56_v22, %v56_v22  ;;  %v304_v34 = vld [vmem:[#allocation3 + $0x1] sm:$0x1]  ;;  %v75_v36 = vmul.f32 %v59_v26, %v59_v26  ;;  %v74_v37 = vmul.f32 %v58_v27, %v58_v27  ;;  %v309_v39 = vld [vmem:[#allocation3 + $0x51] sm:$0x1]  ;;  %v352_v48 = vld [vmem:[#allocation3 + $0x52] sm:$0x1] }
  0x2e   :  { %v100_v40 = vsel %vm78_vm0, %v69_v24, 0.0  ;;  %v97_v41 = vsel %vm78_vm0, %v68_v25, 0.0  ;;  %v306_v42 = vld [vmem:[#allocation3 + $0x21] sm:$0x1]  ;;  %v106_v43 = vsel %vm78_vm0, %v71_v29, 0.0  ;;  %v103_v44 = vsel %vm78_vm0, %v70_v30, 0.0 }
  0x2f   :  { %89 = vadd.xlane.f32.xlu1 %v88_v13  ;;  %83 = vadd.xlane.f32.xlu0 %v82_v14  ;;  %v7650_v45 = vld [vmem:[#allocation3 + $0x31] sm:$0x1]  ;;  %v321_v46 = vsel %vm219_vm1, %v320_v31, %v304_v34  ;;  %v363_v47 = vrot.slane %v348_v35, 7  ;;  %v112_v49 = vsel %vm78_vm0, %v73_v32, 0.0  ;;  %v109_v50 = vsel %vm78_vm0, %v72_v33, 0.0  ;;  %s7553_s18 = smov 56  }
  0x30   :  { %v77_v51 = vmul.f32 %v61_v38, %v61_v38  ;;  %v60_v52 = vld [vmem:[#allocation3 + $0x70] sm:$0xff]  ;;  %vm223_vm5 = vcmask 1043459   ;;  %v347_v53 = vld [vmem:[#allocation3 + $0x2] sm:$0x1]  ;;  %v329_v54 = vrot.slane %v309_v39, 7  ;;  %v7656_v55 = vsel %vm78_vm0, %v75_v36, 0.0 }
  0x31   :  { %v7659_v56 = vsel %vm78_vm0, %v74_v37, 0.0  ;;  %v323_v57 = vrot.slane %v306_v42, 6  ;;  %v308_v58 = vld [vmem:[#allocation3 + $0x41] sm:$0x1]  ;;  %v372_v59 = vrot.slane %v352_v48, 7  ;;  %v322_v60 = vsel %vm280_vm3, %v320_v31, %v321_v46  ;;  %s7554_s19 = smov 70  }
  0x32   :  { %v349_v61 = vld [vmem:[#allocation3 + $0x22] sm:$0x1]  ;;  %v395_v63 = vld [vmem:[#allocation3 + $0x53] sm:$0x1]  ;;  %v364_v0 = vsel %vm219_vm1, %v363_v47, %v347_v53  ;;  %v310_v1 = vld [vmem:[#allocation3 + $0x61] sm:$0x1]  ;;  %v76_v5 = vmul.f32 %v60_v52, %v60_v52  ;;  %v330_v8 = vsel %vm219_vm1, %v329_v54, %v308_v58 }
  0x33   :  { %95 = vadd.xlane.f32.xlu1 %v94_v23  ;;  %92 = vadd.xlane.f32.xlu0 %v91_v28  ;;  %v351_v62 = vld [vmem:[#allocation3 + $0x42] sm:$0x1]  ;;  %v391_v3 = vld [vmem:[#allocation3 + $0x13] sm:$0x1]  ;;  %v7664_v4 = vsel %vm78_vm0, %v77_v51, 0.0  ;;  %vm288_vm6 = vcmask 1047559   ;;  %v324_v9 = vsel %vm221_vm2, %v323_v57, %v322_v60  ;;  %v365_v15 = vsel %vm280_vm3, %v363_v47, %v364_v0 }
  0x34   :  { %v353_v2 = vld [vmem:[#allocation3 + $0x62] sm:$0x1]  ;;  %v326_v6 = vrot.slane %v7650_v45, 5  ;;  %v7667_v7 = vld [vmem:[#allocation3 + $0x32] sm:$0x1]  ;;  %v366_v10 = vrot.slane %v349_v61, 6  ;;  %v373_v12 = vsel %vm219_vm1, %v372_v59, %v351_v62  ;;  %v331_v20 = vsel %vm280_vm3, %v329_v54, %v330_v8 }
  0x35   :  { %v7671_v11 = vld [vmem:[#allocation3 + $0x71] sm:$0x1]  ;;  %v415_v13 = vrot.slane %v395_v63, 7  ;;  %v438_v14 = vld [vmem:[#allocation3 + $0x54] sm:$0x1]  ;;  %v332_v16 = vrot.slane %v310_v1, 6  ;;  %v325_v25 = vsel %vm284_vm4, %v323_v57, %v324_v9  ;;  %v374_v26 = vsel %vm280_vm3, %v372_v59, %v373_v12 }
  0x36   :  { %v375_v17 = vrot.slane %v353_v2, 6  ;;  %v394_v18 = vld [vmem:[#allocation3 + $0x43] sm:$0x1]  ;;  %v406_v19 = vrot.slane %v391_v3, 7  ;;  %v434_v23 = vld [vmem:[#allocation3 + $0x14] sm:$0x1]  ;;  %v367_v28 = vsel %vm221_vm2, %v366_v10, %v365_v15  ;;  %v143_v2 = vlaneseq }
  0x37   :  { %101 = vadd.xlane.f32.xlu1 %v100_v40  ;;  %98 = vadd.xlane.f32.xlu0 %v97_v41  ;;  %v7676_v21 = vld [vmem:[#allocation3 + $0x63] sm:$0x1]  ;;  %v121_v24 = vsel %vm78_vm0, %v76_v5, 0.0  ;;  %v458_v27 = vrot.slane %v438_v14, 7  ;;  %v369_v29 = vrot.slane %v7667_v7, 5  ;;  %v335_v30 = vrot.slane %v7671_v11, 5 }
  0x38   :  { %v390_v22 = vld [vmem:[#allocation3 + $0x3] sm:$0x1]  ;;  %v416_v31 = vsel %vm219_vm1, %v415_v13, %v394_v18  ;;  %v437_v33 = vld [vmem:[#allocation3 + $0x44] sm:$0x1]  ;;  %v333_v34 = vsel %vm221_vm2, %v332_v16, %v331_v20  ;;  %v7686_v35 = vld [vmem:[#allocation3 + $0x72] sm:$0x1]  ;;  %v327_v40 = vsel %vm223_vm5, %v326_v6, %v325_v25  ;;  %v376_v41 = vsel %vm221_vm2, %v375_v17, %v374_v26 }
  0x39   :  { %v392_v32 = vld [vmem:[#allocation3 + $0x23] sm:$0x1]  ;;  %v418_v36 = vrot.slane %v7676_v21, 6  ;;  %v407_v37 = vsel %vm219_vm1, %v406_v19, %v390_v22  ;;  %v449_v38 = vrot.slane %v434_v23, 7  ;;  %v481_v39 = vld [vmem:[#allocation3 + $0x55] sm:$0x1]  ;;  %v368_v45 = vsel %vm284_vm4, %v366_v10, %v367_v28 }
  0x3a   :  { %v439_v42 = vld [vmem:[#allocation3 + $0x64] sm:$0x1]  ;;  %v417_v46 = vsel %vm280_vm3, %v415_v13, %v416_v31  ;;  %v409_v47 = vrot.slane %v392_v32, 6  ;;  %v459_v48 = vsel %vm219_vm1, %v458_v27, %v437_v33  ;;  %v408_v51 = vsel %vm280_vm3, %v406_v19, %v407_v37  ;;  %v7703_v57 = vld [vmem:[#allocation3 + $0x73] sm:$0x1]  ;;  %s7555_s20 = smov 84  }
  0x3b   :  { %107 = vadd.xlane.f32.xlu1 %v106_v43  ;;  %104 = vadd.xlane.f32.xlu0 %v103_v44  ;;  %v433_v43 = vld [vmem:[#allocation3 + $0x4] sm:$0x1]  ;;  %v477_v44 = vld [vmem:[#allocation3 + $0x15] sm:$0x1]  ;;  %v501_v53 = vrot.slane %v481_v39, 7  ;;  %v377_v54 = vsel %vm284_vm4, %v375_v17, %v376_v41  ;;  %v461_v58 = vrot.slane %v439_v42, 6  ;;  %v7707_v62 = vsel %vm288_vm6, %v326_v6, %v327_v40 }
  0x3c   :  { %v7698_v52 = vld [vmem:[#allocation3 + $0x24] sm:$0x1]  ;;  %v450_v59 = vsel %vm219_vm1, %v449_v38, %v433_v43  ;;  %v480_v60 = vld [vmem:[#allocation3 + $0x45] sm:$0x1]  ;;  %v492_v61 = vrot.slane %v477_v44, 7  ;;  %v419_v63 = vsel %vm221_vm2, %v418_v36, %v417_v46  ;;  %v370_v3 = vsel %vm223_vm5, %v369_v29, %v368_v45  ;;  %s7556_s21 = smov 98  }
  0x3d   :  { %v7710_v0 = vld [vmem:[#allocation3 + $0x33] sm:$0x1]  ;;  %v7712_v1 = vld [vmem:[#allocation3 + $0x74] sm:$0x1]  ;;  %v410_v6 = vsel %vm221_vm2, %v409_v47, %v408_v51  ;;  %v452_v8 = vrot.slane %v7698_v52, 6  ;;  %v421_v13 = vrot.slane %v7703_v57, 5  ;;  %v451_v14 = vsel %vm280_vm3, %v449_v38, %v450_v59 }
  0x3e   :  { %v482_v9 = vld [vmem:[#allocation3 + $0x65] sm:$0x1]  ;;  %v524_v10 = vld [vmem:[#allocation3 + $0x56] sm:$0x1]  ;;  %v502_v15 = vsel %vm219_vm1, %v501_v53, %v480_v60  ;;  %v420_v18 = vsel %vm284_vm4, %v418_v36, %v419_v63  ;;  %v412_v19 = vrot.slane %v7710_v0, 5  ;;  %v411_v25 = vsel %vm284_vm4, %v409_v47, %v410_v6  ;;  %s7557_s22 = smov 112  }
  0x3f   :  { %113 = vadd.xlane.f32.xlu1 %v112_v49  ;;  %110 = vadd.xlane.f32.xlu0 %v109_v50  ;;  %v334_v49 = vsel %vm284_vm4, %v332_v16, %v333_v34  ;;  %v378_v50 = vrot.slane %v7686_v35, 5  ;;  %v478_v16 = vld [vmem:[#allocation3 + $0x25] sm:$0x1]  ;;  %v520_v17 = vld [vmem:[#allocation3 + $0x16] sm:$0x1]  ;;  %v464_v26 = vrot.slane %v7712_v1, 5  ;;  %v503_v31 = vsel %vm280_vm3, %v501_v53, %v502_v15 }
  0x40   :  { %v336_v5 = vsel %vm223_vm5, %v335_v30, %v334_v49  ;;  %v7731_v21 = vld [vmem:[#allocation3 + $0x34] sm:$0x1]  ;;  %v567_v23 = vld [vmem:[#allocation3 + $0x57] sm:$0x1]  ;;  %v544_v28 = vrot.slane %v524_v10, 7  ;;  %v495_v32 = vrot.slane %v478_v16, 6  ;;  %v7748_v41 = vsel %vm288_vm6, %v369_v29, %v370_v3 }
  0x41   :  { %v379_v12 = vsel %vm223_vm5, %v378_v50, %v377_v54  ;;  %v523_v33 = vld [vmem:[#allocation3 + $0x46] sm:$0x1]  ;;  %v535_v34 = vrot.slane %v520_v17, 7  ;;  %v455_v36 = vrot.slane %v7731_v21, 5  ;;  %v7742_v37 = vld [vmem:[#allocation3 + $0x35] sm:$0x1]  ;;  %v7753_v42 = vsel %vm288_vm6, %v335_v30, %v336_v5 }
  0x42   :  { %v519_v39 = vld [vmem:[#allocation3 + $0x6] sm:$0x1]  ;;  %v587_v40 = vrot.slane %v567_v23, 7  ;;  %v7756_v43 = vsel %vm288_vm6, %v378_v50, %v379_v12  ;;  %v422_v44 = vsel %vm223_vm5, %v421_v13, %v420_v18  ;;  %v566_v46 = vld [vmem:[#allocation3 + $0x47] sm:$0x1]  ;;  %v413_v7 = vsel %vm223_vm5, %v412_v19, %v411_v25  ;;  %s7558_s23 = smov 126  }
  0x43   :  { %119 = vadd.xlane.f32.xlu1 %v7656_v55  ;;  %116 = vadd.xlane.f32.xlu0 %v7659_v56  ;;  %v460_v55 = vsel %vm280_vm3, %v458_v27, %v459_v48  ;;  %v476_v56 = vld [vmem:[#allocation3 + $0x5] sm:$0x1]  ;;  %v504_v27 = vrot.slane %v482_v9, 6  ;;  %v525_v45 = vld [vmem:[#allocation3 + $0x66] sm:$0x1]  ;;  %v545_v11 = vsel %vm219_vm1, %v544_v28, %v523_v33  ;;  %v536_v52 = vsel %vm219_vm1, %v535_v34, %v519_v39  ;;  %s7559_s24 = smov 12  }
  0x44   :  { %v462_v20 = vsel %vm221_vm2, %v461_v58, %v460_v55  ;;  %v493_v22 = vsel %vm219_vm1, %v492_v61, %v476_v56  ;;  %v563_v47 = vld [vmem:[#allocation3 + $0x17] sm:$0x1]  ;;  %v521_v30 = vld [vmem:[#allocation3 + $0x26] sm:$0x1]  ;;  %v568_v53 = vld [vmem:[#allocation3 + $0x67] sm:$0x1]  ;;  %v588_v60 = vsel %vm219_vm1, %v587_v40, %v566_v46  ;;  %v546_v56 = vsel %vm280_vm3, %v544_v28, %v545_v11 }
  0x45   :  { %v463_v35 = vsel %vm284_vm4, %v461_v58, %v462_v20  ;;  %v494_v38 = vsel %vm280_vm3, %v492_v61, %v493_v22  ;;  %v505_v48 = vsel %vm221_vm2, %v504_v27, %v503_v31  ;;  %v610_v54 = vld [vmem:[#allocation3 + $0x58] sm:$0x1]  ;;  %v498_v58 = vrot.slane %v7742_v37, 5  ;;  %v7773_v55 = vld [vmem:[#allocation3 + $0x76] sm:$0x1]  ;;  %s7560_s25 = smov 26  }
  0x46   :  { %v465_v49 = vsel %vm223_vm5, %v464_v26, %v463_v35  ;;  %v496_v51 = vsel %vm221_vm2, %v495_v32, %v494_v38  ;;  %v547_v59 = vrot.slane %v525_v45, 6  ;;  %v578_v61 = vrot.slane %v563_v47, 7  ;;  %v606_v63 = vld [vmem:[#allocation3 + $0x18] sm:$0x1]  ;;  %v562_v5 = vld [vmem:[#allocation3 + $0x7] sm:$0x1] }
  0x47   :  { %125 = vadd.xlane.f32.xlu1 %v7664_v4  ;;  %122 = vadd.xlane.f32.xlu0 %v121_v24  ;;  %v453_v4 = vsel %vm221_vm2, %v452_v8, %v451_v14  ;;  %v7737_v24 = vld [vmem:[#allocation3 + $0x75] sm:$0x1]  ;;  %v506_v1 = vsel %vm284_vm4, %v504_v27, %v505_v48  ;;  %v538_v3 = vrot.slane %v521_v30, 6  ;;  %v497_v6 = vsel %vm284_vm4, %v495_v32, %v496_v51  ;;  %v564_v17 = vld [vmem:[#allocation3 + $0x27] sm:$0x1]  ;;  %s7561_s26 = smov 40  }
  0x48   :  { %v454_v29 = vsel %vm284_vm4, %v452_v8, %v453_v4  ;;  %v507_v50 = vrot.slane %v7737_v24, 5  ;;  %v7777_v8 = vld [vmem:[#allocation3 + $0x36] sm:$0x1]  ;;  %v537_v9 = vsel %vm280_vm3, %v535_v34, %v536_v52  ;;  %v590_v10 = vrot.slane %v568_v53, 6  ;;  %v609_v18 = vld [vmem:[#allocation3 + $0x48] sm:$0x1] }
  0x49   :  { %v456_v0 = vsel %vm223_vm5, %v455_v36, %v454_v29  ;;  %v630_v12 = vrot.slane %v610_v54, 7  ;;  %v7783_v14 = vsel %vm288_vm6, %v421_v13, %v422_v44  ;;  %v7786_v15 = vsel %vm288_vm6, %v412_v19, %v413_v7  ;;  %v605_v25 = vld [vmem:[#allocation3 + $0x8] sm:$0x1]  ;;  %v653_v13 = vld [vmem:[#allocation3 + $0x59] sm:$0x1]  ;;  %s7562_s27 = smov 54  }
  0x4a   :  { %v589_v16 = vsel %vm280_vm3, %v587_v40, %v588_v60  ;;  %v621_v20 = vrot.slane %v606_v63, 7  ;;  %v7790_v21 = vsel %vm288_vm6, %v464_v26, %v465_v49  ;;  %v548_v22 = vsel %vm221_vm2, %v547_v59, %v546_v56  ;;  %v7805_v4 = vld [vmem:[#allocation3 + $0x77] sm:$0x1]  ;;  %v611_v31 = vld [vmem:[#allocation3 + $0x68] sm:$0x1]  ;;  %s7563_s28 = smov 127  }
  0x4b   :  { %v550_v23 = vrot.slane %v7773_v55, 5  ;;  %v579_v57 = vsel %vm219_vm1, %v578_v61, %v562_v5  ;;  %v7796_v27 = vsel %vm288_vm6, %v455_v36, %v456_v0  ;;  %v508_v19 = vsel %vm223_vm5, %v507_v50, %v506_v1  ;;  %v649_v32 = vld [vmem:[#allocation3 + $0x19] sm:$0x1]  ;;  %v607_v38 = vld [vmem:[#allocation3 + $0x28] sm:$0x1]  ;;  %s7564_s29 = smov 13  }
  0x4c   :  { %v499_v26 = vsel %vm223_vm5, %v498_v58, %v497_v6  ;;  %v539_v28 = vsel %vm221_vm2, %v538_v3, %v537_v9  ;;  %v541_v33 = vrot.slane %v7777_v8, 5  ;;  %v591_v34 = vsel %vm221_vm2, %v590_v10, %v589_v16  ;;  %v703_v39 = vld [vmem:[#allocation3 + $0x5a] sm:$0x1]  ;;  %v7811_v44 = vld [vmem:[#allocation3 + $0x37] sm:$0x1]  ;;  %s7565_s30 = smov 27  }
  0x4d   :  { %v581_v35 = vrot.slane %v564_v17, 6  ;;  %v631_v36 = vsel %vm219_vm1, %v630_v12, %v609_v18  ;;  %v549_v40 = vsel %vm284_vm4, %v547_v59, %v548_v22  ;;  %v580_v45 = vsel %vm280_vm3, %v578_v61, %v579_v57  ;;  %v652_v11 = vld [vmem:[#allocation3 + $0x49] sm:$0x1]  ;;  %v7818_v51 = vld [vmem:[#allocation3 + $0x78] sm:$0x1]  ;;  %s7566_s5 = smov 41  }
  0x4e   :  { %v622_v46 = vsel %vm219_vm1, %v621_v20, %v605_v25  ;;  %v673_v47 = vrot.slane %v653_v13, 7  ;;  %v540_v7 = vsel %vm284_vm4, %v538_v3, %v539_v28  ;;  %v593_v29 = vrot.slane %v7805_v4, 5  ;;  %v648_v54 = vld [vmem:[#allocation3 + $0x9] sm:$0x1]  ;;  %v702_v56 = vld [vmem:[#allocation3 + $0x4a] sm:$0x1] }
  0x4f   :  { %v633_v48 = vrot.slane %v611_v31, 6  ;;  %v664_v30 = vrot.slane %v649_v32, 7  ;;  %v592_v49 = vsel %vm284_vm4, %v590_v10, %v591_v34  ;;  %v632_v52 = vsel %vm280_vm3, %v630_v12, %v631_v36  ;;  %v7831_v1 = vld [vmem:[#allocation3 + $0x69] sm:$0x1]  ;;  %v7847_v9 = vld [vmem:[#allocation3 + $0x1a] sm:$0x1] }
  0x50   :  { %v624_v53 = vrot.slane %v607_v38, 6  ;;  %v723_v59 = vrot.slane %v703_v39, 7  ;;  %v7826_v60 = vsel %vm288_vm6, %v507_v50, %v508_v19  ;;  %v582_v61 = vsel %vm221_vm2, %v581_v35, %v580_v45  ;;  %v7844_v50 = vld [vmem:[#allocation3 + $0x38] sm:$0x1]  ;;  %v650_v6 = vld [vmem:[#allocation3 + $0x29] sm:$0x1] }
  0x51   :  { %v584_v63 = vrot.slane %v7811_v44, 5  ;;  %v623_v0 = vsel %vm280_vm3, %v621_v20, %v622_v46  ;;  %v7836_v3 = vsel %vm288_vm6, %v498_v58, %v499_v26  ;;  %v542_v24 = vsel %vm223_vm5, %v541_v33, %v540_v7  ;;  %v704_v16 = vld [vmem:[#allocation3 + $0x6a] sm:$0x1]  ;;  %v7853_v17 = vld [vmem:[#allocation3 + $0x5b] sm:$0x1]  ;;  %s7567_s6 = smov 55  }
  0x52   :  { %v674_v5 = vsel %vm219_vm1, %v673_v47, %v652_v11  ;;  %v594_v37 = vsel %vm223_vm5, %v593_v29, %v592_v49  ;;  %v634_v58 = vsel %vm221_vm2, %v633_v48, %v632_v52  ;;  %v636_v10 = vrot.slane %v7818_v51, 5  ;;  %v7859_v25 = vld [vmem:[#allocation3 + $0x1b] sm:$0x1]  ;;  %v7869_v31 = vld [vmem:[#allocation3 + $0x79] sm:$0x1]  ;;  %s13237_s7 = smov 69  }
  0x53   :  { %v665_v12 = vsel %vm219_vm1, %v664_v30, %v648_v54  ;;  %v583_v18 = vsel %vm284_vm4, %v581_v35, %v582_v61  ;;  %v625_v20 = vsel %vm221_vm2, %v624_v53, %v623_v0  ;;  %v676_v22 = vrot.slane %v7831_v1, 6  ;;  %v698_v35 = vld [vmem:[#allocation3 + $0xa] sm:$0x1]  ;;  %v7879_v39 = vld [vmem:[#allocation3 + $0x39] sm:$0x1]  ;;  %s13226_s8 = smov 83  }
  0x54   :  { %v724_v57 = vsel %vm219_vm1, %v723_v59, %v702_v56  ;;  %v627_v13 = vrot.slane %v7844_v50, 5  ;;  %v675_v19 = vsel %vm280_vm3, %v673_v47, %v674_v5  ;;  %v667_v26 = vrot.slane %v650_v6, 6  ;;  %v7895_v7 = vld [vmem:[#allocation3 + $0x2a] sm:$0x1]  ;;  %v7897_v11 = vld [vmem:[#allocation3 + $0x5c] sm:$0x1] }
  0x55   :  { %v714_v28 = vrot.slane %v7847_v9, 7  ;;  %v635_v4 = vsel %vm284_vm4, %v633_v48, %v634_v58  ;;  %v666_v32 = vsel %vm280_vm3, %v664_v30, %v665_v12  ;;  %v726_v34 = vrot.slane %v704_v16, 6  ;;  %v741_v48 = vld [vmem:[#allocation3 + $0xb] sm:$0x1]  ;;  %v7906_v30 = vld [vmem:[#allocation3 + $0x7a] sm:$0x1] }
  0x56   :  { %v626_v38 = vsel %vm284_vm4, %v624_v53, %v625_v20  ;;  %v757_v45 = vrot.slane %v7859_v25, 7  ;;  %v7886_v46 = vsel %vm288_vm6, %v541_v33, %v542_v24  ;;  %v7889_v47 = vsel %vm288_vm6, %v593_v29, %v594_v37  ;;  %v7909_v52 = vld [vmem:[#allocation3 + $0x6b] sm:$0x1]  ;;  %v785_v0 = vld [vmem:[#allocation3 + $0x1c] sm:$0x1]  ;;  %s13221_s9 = smov 97  }
  0x57   :  { %v585_v55 = vsel %vm223_vm5, %v584_v63, %v583_v18  ;;  %v637_v8 = vsel %vm223_vm5, %v636_v10, %v635_v4  ;;  %v679_v33 = vrot.slane %v7869_v31, 5  ;;  %v668_v29 = vsel %vm221_vm2, %v667_v26, %v666_v32  ;;  %v743_v61 = vld [vmem:[#allocation3 + $0x2b] sm:$0x1]  ;;  %v7923_v24 = vld [vmem:[#allocation3 + $0x5d] sm:$0x1]  ;;  %s13219_s10 = smov 111  }
  0x58   :  { %338 = vrot.lane.b32.xlu1 %v7707_v62, %s7550_s1  ;;  %v551_v62 = vsel %vm223_vm5, %v550_v23, %v549_v40  ;;  %v745_v40 = vld [vmem:[#allocation3 + $0x4b] sm:$0x1]  ;;  %v715_v49 = vsel %vm219_vm1, %v714_v28, %v698_v35  ;;  %v670_v53 = vrot.slane %v7879_v39, 5  ;;  %v717_v56 = vrot.slane %v7895_v7, 6  ;;  %v7927_v9 = vld [vmem:[#allocation3 + $0x3a] sm:$0x1] }
  0x59   :  { %v7876_v36 = vsel %vm288_vm6, %v550_v23, %v551_v62  ;;  %v677_v23 = vsel %vm221_vm2, %v676_v22, %v675_v19  ;;  %v758_v62 = vsel %vm219_vm1, %v757_v45, %v741_v48  ;;  %v669_v5 = vsel %vm284_vm4, %v667_v26, %v668_v29  ;;  %v788_v12 = vld [vmem:[#allocation3 + $0x4c] sm:$0x1]  ;;  %v7960_v51 = vld [vmem:[#allocation3 + $0x3b] sm:$0x1]  ;;  %v831_v4 = vld [vmem:[#allocation3 + $0x4d] sm:$0x1] }
  0x5a   :  { %v678_v1 = vsel %vm284_vm4, %v676_v22, %v677_v23  ;;  %v729_v6 = vrot.slane %v7906_v30, 5  ;;  %v716_v37 = vsel %vm280_vm3, %v714_v28, %v715_v49  ;;  %v769_v58 = vrot.slane %v7909_v52, 6  ;;  %v7950_v19 = vld [vmem:[#allocation3 + $0x6c] sm:$0x1]  ;;  %v7985_v23 = vld [vmem:[#allocation3 + $0x6d] sm:$0x1] }
  0x5b   :  { %v760_v20 = vrot.slane %v743_v61, 6  ;;  %v800_v22 = vrot.slane %v785_v0, 7  ;;  %v759_v25 = vsel %vm280_vm3, %v757_v45, %v758_v62  ;;  %v784_v26 = vld [vmem:[#allocation3 + $0xc] sm:$0x1]  ;;  %v852_v28 = vrot.slane %v7923_v24, 7  ;;  %s13224_s11 = smov 125  }
  0x5c   :  { %381 = vrot.lane.b32.xlu1 %v7748_v41, %s7551_s16  ;;  %v766_v41 = vrot.slane %v7853_v17, 7  ;;  %v7934_v17 = vld [vmem:[#allocation3 + $0x7b] sm:$0x1]  ;;  %v718_v44 = vsel %vm221_vm2, %v717_v56, %v716_v37  ;;  %v680_v32 = vsel %vm223_vm5, %v679_v33, %v678_v1  ;;  %v671_v50 = vsel %vm223_vm5, %v670_v53, %v669_v5  ;;  %v7973_v35 = vld [vmem:[#allocation3 + $0x2c] sm:$0x1]  ;;  %s13231_s12 = smov 11  }
  0x5d   :  { %340 = vrot.lane.b32.xlu0 %v7753_v42, %s7550_s1  ;;  %v725_v42 = vsel %vm280_vm3, %v723_v59, %v724_v57  ;;  %v7942_v57 = vsel %vm288_vm6, %v584_v63, %v585_v55  ;;  %v720_v63 = vrot.slane %v7927_v9, 5  ;;  %v812_v45 = vrot.slane %v7950_v19, 6  ;;  %v1062_v29 = vld [vmem:[#allocation3 + $0x10] sm:$0x1]  ;;  %v7996_v52 = vld [vmem:[#allocation3 + $0x3c] sm:$0x1] }
  0x5e   :  { %v727_v54 = vsel %vm221_vm2, %v726_v34, %v725_v42  ;;  %v767_v59 = vsel %vm219_vm1, %v766_v41, %v745_v40  ;;  %v772_v42 = vrot.slane %v7934_v17, 5  ;;  %v761_v40 = vsel %vm221_vm2, %v760_v20, %v759_v25  ;;  %v8008_v1 = vld [vmem:[#allocation3 + $0x7d] sm:$0x1]  ;;  %v827_v62 = vld [vmem:[#allocation3 + $0xd] sm:$0x1]  ;;  %s13233_s14 = smov 25  }
  0x5f   :  { %v728_v16 = vsel %vm284_vm4, %v726_v34, %v727_v54  ;;  %v768_v18 = vsel %vm280_vm3, %v766_v41, %v767_v59  ;;  %v7975_v41 = vld [vmem:[#allocation3 + $0x1d] sm:$0x1]  ;;  %v801_v55 = vsel %vm219_vm1, %v800_v22, %v784_v26  ;;  %v719_v7 = vsel %vm284_vm4, %v717_v56, %v718_v44  ;;  %v8020_v5 = vld [vmem:[#allocation3 + $0x2d] sm:$0x1]  ;;  %s13235_s15 = smov 39   ;;  %s13200_s0 = smov 53  }
  0x60   :  { %383 = vrot.lane.b32.xlu1 %v7756_v43, %s7551_s16  ;;  %v628_v43 = vsel %vm223_vm5, %v627_v13, %v626_v38  ;;  %v770_v34 = vsel %vm221_vm2, %v769_v58, %v768_v18  ;;  %v7977_v38 = vld [vmem:[#allocation3 + $0x50] sm:$0x1]  ;;  %v763_v48 = vrot.slane %v7960_v51, 5  ;;  %v843_v54 = vrot.slane %v7975_v41, 7  ;;  %v1061_v18 = vld [vmem:[#allocation3] sm:$0x1] }
  0x61   :  { %426 = vrot.lane.b32.xlu0 %v7783_v14, %s7552_s17  ;;  %v809_v14 = vrot.slane %v7897_v11, 7  ;;  %v7991_v11 = vld [vmem:[#allocation3 + $0x7c] sm:$0x1]  ;;  %v771_v49 = vsel %vm284_vm4, %v769_v58, %v770_v34  ;;  %v8004_v59 = vsel %vm288_vm6, %v679_v33, %v680_v32  ;;  %v762_v61 = vsel %vm284_vm4, %v760_v20, %v761_v40  ;;  %v8022_v58 = vld [vmem:[#allocation3 + $0x51] sm:$0x1]  ;;  %s13202_s13 = smov 68  }
  0x62   :  { %v802_v0 = vsel %vm280_vm3, %v800_v22, %v801_v55  ;;  %v855_v56 = vrot.slane %v7985_v23, 6  ;;  %v8016_v31 = vsel %vm288_vm6, %v670_v53, %v671_v50  ;;  %v1077_v37 = vrot.slane %v1062_v29, 7  ;;  %v8044_v22 = vld [vmem:[#allocation3 + $0x11] sm:$0x1]  ;;  %v8093_v29 = vld [vmem:[#allocation3 + $0x12] sm:$0x1] }
  0x63   :  { %v721_v39 = vsel %vm223_vm5, %v720_v63, %v719_v7  ;;  %v773_v53 = vsel %vm223_vm5, %v772_v42, %v771_v49  ;;  %v806_v19 = vrot.slane %v7996_v52, 5  ;;  %v1128_v44 = vrot.slane %v8022_v58, 7  ;;  %v8079_v7 = vld [vmem:[#allocation3 + $0x61] sm:$0x1] }
  0x64   :  { %424 = vrot.lane.b32.xlu1 %v7786_v15, %s7552_s17  ;;  %v7947_v15 = vsel %vm288_vm6, %v636_v10, %v637_v8  ;;  %v810_v10 = vsel %vm219_vm1, %v809_v14, %v788_v12  ;;  %v853_v8 = vsel %vm219_vm1, %v852_v28, %v831_v4  ;;  %v815_v12 = vrot.slane %v7991_v11, 5 }
  0x65   :  { %469 = vrot.lane.b32.xlu0 %v7790_v21, %s7553_s18  ;;  %v7956_v21 = vsel %vm288_vm6, %v627_v13, %v628_v43  ;;  %v730_v13 = vsel %vm223_vm5, %v729_v6, %v728_v16  ;;  %v803_v43 = vrot.slane %v7973_v35, 6  ;;  %v854_v24 = vsel %vm280_vm3, %v852_v28, %v853_v8  ;;  %v1067_v16 = vld [vmem:[#allocation3 + $0x60] sm:$0x1]  ;;  %v8060_v35 = vld [vmem:[#allocation3 + $0x3d] sm:$0x1] }
  0x66   :  { %v856_v26 = vsel %vm221_vm2, %v855_v56, %v854_v24  ;;  %v8049_v28 = vld [vmem:[#allocation3 + $0x20] sm:$0x1]  ;;  %v846_v4 = vrot.slane %v8020_v5, 6  ;;  %v1089_v32 = vrot.slane %v1067_v16, 6  ;;  %v1078_v50 = vsel %vm219_vm1, %v1077_v37, %v1061_v18  ;;  %v8119_v24 = vld [vmem:[#allocation3 + $0x13] sm:$0x1] }
  0x67   :  { %v804_v30 = vsel %vm221_vm2, %v803_v43, %v802_v0  ;;  %v1119_v40 = vrot.slane %v8044_v22, 7  ;;  %v857_v55 = vsel %vm284_vm4, %v855_v56, %v856_v26  ;;  %v1080_v23 = vrot.slane %v8049_v28, 6  ;;  %v1191_v22 = vld [vmem:[#allocation3 + $0x43] sm:$0x1] }
  0x68   :  { %467 = vrot.lane.b32.xlu1 %v7796_v27, %s7553_s18  ;;  %v811_v27 = vsel %vm280_vm3, %v809_v14, %v810_v10  ;;  %v1065_v14 = vld [vmem:[#allocation3 + $0x40] sm:$0x1]  ;;  %v858_v10 = vrot.slane %v8008_v1, 5  ;;  %v805_v34 = vsel %vm284_vm4, %v803_v43, %v804_v30  ;;  %v1079_v17 = vsel %vm280_vm3, %v1077_v37, %v1078_v50  ;;  %v8101_v43 = vld [vmem:[#allocation3 + $0x21] sm:$0x1] }
  0x69   :  { %512 = vrot.lane.b32.xlu0 %v7826_v60, %s7554_s19  ;;  %v1086_v60 = vrot.slane %v7977_v38, 7  ;;  %v813_v33 = vsel %vm221_vm2, %v812_v45, %v811_v27  ;;  %v8063_v38 = vld [vmem:[#allocation3 + $0x70] sm:$0x1]  ;;  %v1103_v27 = vld [vmem:[#allocation3 + $0x1] sm:$0x1]  ;;  %v807_v51 = vsel %vm223_vm5, %v806_v19, %v805_v34  ;;  %v849_v49 = vrot.slane %v8060_v35, 5 }
  0x6a   :  { %v814_v25 = vsel %vm284_vm4, %v812_v45, %v813_v33  ;;  %v8070_v45 = vsel %vm288_vm6, %v720_v63, %v721_v39  ;;  %v1131_v0 = vrot.slane %v8079_v7, 6  ;;  %v1120_v1 = vsel %vm219_vm1, %v1119_v40, %v1103_v27  ;;  %v1149_v39 = vld [vmem:[#allocation3 + $0x42] sm:$0x1] }
  0x6b   :  { %v1087_v20 = vsel %vm219_vm1, %v1086_v60, %v1065_v14  ;;  %v816_v9 = vsel %vm223_vm5, %v815_v12, %v814_v25  ;;  %v1081_v56 = vsel %vm221_vm2, %v1080_v23, %v1079_v17  ;;  %v1122_v58 = vrot.slane %v8101_v43, 6  ;;  %v8146_v25 = vld [vmem:[#allocation3 + $0x62] sm:$0x1]  ;;  %v8179_v17 = vld [vmem:[#allocation3 + $0x72] sm:$0x1] }
  0x6c   :  { %510 = vrot.lane.b32.xlu1 %v7836_v3, %s7554_s19  ;;  %v8029_v3 = vsel %vm288_vm6, %v729_v6, %v730_v13  ;;  %v844_v6 = vsel %vm219_vm1, %v843_v54, %v827_v62  ;;  %v1107_v13 = vld [vmem:[#allocation3 + $0x41] sm:$0x1]  ;;  %v8114_v62 = vld [vmem:[#allocation3 + $0x71] sm:$0x1]  ;;  %v8130_v18 = vsel %vm288_vm6, %v815_v12, %v816_v9  ;;  %v1082_v11 = vsel %vm284_vm4, %v1080_v23, %v1081_v56  ;;  %v8175_v9 = vld [vmem:[#allocation3 + $0x23] sm:$0x1] }
  0x6d   :  { %555 = vrot.lane.b32.xlu0 %v7876_v36, %s7555_s20  ;;  %v764_v36 = vsel %vm223_vm5, %v763_v48, %v762_v61  ;;  %v845_v41 = vsel %vm280_vm3, %v843_v54, %v844_v6  ;;  %v1129_v63 = vsel %vm219_vm1, %v1128_v44, %v1107_v13  ;;  %v8103_v54 = vld [vmem:[#allocation3 + $0x53] sm:$0x1]  ;;  %v8109_v61 = vld [vmem:[#allocation3 + $0x30] sm:$0x1]  ;;  %v8136_v6 = vld [vmem:[#allocation3 + $0x31] sm:$0x1] }
  0x6e   :  { %v8084_v8 = vsel %vm288_vm6, %v763_v48, %v764_v36  ;;  %v847_v48 = vsel %vm221_vm2, %v846_v4, %v845_v41  ;;  %v1130_v14 = vsel %vm280_vm3, %v1128_v44, %v1129_v63  ;;  %v1212_v16 = vrot.slane %v8103_v54, 7  ;;  %v1233_v54 = vld [vmem:[#allocation3 + $0x44] sm:$0x1] }
  0x6f   :  { %v848_v5 = vsel %vm284_vm4, %v846_v4, %v847_v48  ;;  %v8133_v36 = vsel %vm288_vm6, %v806_v19, %v807_v51  ;;  %v1083_v30 = vrot.slane %v8109_v61, 5  ;;  %v1132_v12 = vsel %vm221_vm2, %v1131_v0, %v1130_v14  ;;  %v8148_v19 = vld [vmem:[#allocation3 + $0x22] sm:$0x1]  ;;  %v8159_v4 = vld [vmem:[#allocation3 + $0x63] sm:$0x1] }
  0x70   :  { %553 = vrot.lane.b32.xlu1 %v7886_v46, %s7555_s20  ;;  %v1088_v46 = vsel %vm280_vm3, %v1086_v60, %v1087_v20  ;;  %v859_v60 = vsel %vm223_vm5, %v858_v10, %v857_v55  ;;  %v1121_v20 = vsel %vm280_vm3, %v1119_v40, %v1120_v1  ;;  %v1203_v26 = vrot.slane %v8119_v24, 7  ;;  %v8167_v40 = vld [vmem:[#allocation3 + $0x14] sm:$0x1]  ;;  %v8185_v51 = vld [vmem:[#allocation3 + $0x55] sm:$0x1] }
  0x71   :  { %598 = vrot.lane.b32.xlu0 %v7889_v47, %s7556_s21  ;;  %v8075_v47 = vsel %vm288_vm6, %v772_v42, %v773_v53  ;;  %v8091_v42 = vld [vmem:[#allocation3 + $0x52] sm:$0x1]  ;;  %v1090_v52 = vsel %vm221_vm2, %v1089_v32, %v1088_v46  ;;  %v1145_v53 = vld [vmem:[#allocation3 + $0x2] sm:$0x1]  ;;  %v850_v28 = vsel %vm223_vm5, %v849_v49, %v848_v5  ;;  %v1134_v50 = vrot.slane %v8114_v62, 5 }
  0x72   :  { %v1170_v33 = vrot.slane %v8091_v42, 7  ;;  %v1091_v37 = vsel %vm284_vm4, %v1089_v32, %v1090_v52  ;;  %v1187_v32 = vld [vmem:[#allocation3 + $0x3] sm:$0x1]  ;;  %v1123_v13 = vsel %vm221_vm2, %v1122_v58, %v1121_v20  ;;  %v1125_v34 = vrot.slane %v8136_v6, 5  ;;  %v8165_v46 = vld [vmem:[#allocation3 + $0x54] sm:$0x1] }
  0x73   :  { %v1213_v41 = vsel %vm219_vm1, %v1212_v16, %v1191_v22  ;;  %v1084_v55 = vsel %vm223_vm5, %v1083_v30, %v1082_v11  ;;  %v1133_v23 = vsel %vm284_vm4, %v1131_v0, %v1132_v12  ;;  %v1173_v7 = vrot.slane %v8146_v25, 6  ;;  %v8188_v52 = vld [vmem:[#allocation3 + $0x32] sm:$0x1]  ;;  %v1229_v14 = vld [vmem:[#allocation3 + $0x4] sm:$0x1] }
  0x74   :  { %596 = vrot.lane.b32.xlu1 %v7942_v57, %s7556_s21  ;;  %v1092_v57 = vrot.slane %v8063_v38, 5  ;;  %v1171_v44 = vsel %vm219_vm1, %v1170_v33, %v1149_v39  ;;  %v1164_v27 = vrot.slane %v8148_v19, 6  ;;  %v1215_v42 = vrot.slane %v8159_v4, 6  ;;  %v8229_v39 = vld [vmem:[#allocation3 + $0x24] sm:$0x1] }
  0x75   :  { %641 = vrot.lane.b32.xlu0 %v7947_v15, %s7557_s22  ;;  %v1161_v15 = vrot.slane %v8093_v29, 7  ;;  %v1172_v63 = vsel %vm280_vm3, %v1170_v33, %v1171_v44  ;;  %v1204_v29 = vsel %vm219_vm1, %v1203_v26, %v1187_v32  ;;  %v1124_v48 = vsel %vm284_vm4, %v1122_v58, %v1123_v13  ;;  %v8207_v33 = vld [vmem:[#allocation3 + $0x15] sm:$0x1]  ;;  %v8278_v6 = vld [vmem:[#allocation3 + $0x74] sm:$0x1] }
  0x76   :  { %v1214_v43 = vsel %vm280_vm3, %v1212_v16, %v1213_v41  ;;  %v8196_v61 = vsel %vm288_vm6, %v849_v49, %v850_v28  ;;  %v8204_v1 = vsel %vm288_vm6, %v1083_v30, %v1084_v55  ;;  %v1206_v56 = vrot.slane %v8175_v9, 6  ;;  %v8232_v30 = vld [vmem:[#allocation3 + $0x33] sm:$0x1]  ;;  %v1271_v28 = vld [vmem:[#allocation3 + $0x5] sm:$0x1] }
  0x77   :  { %v1174_v35 = vsel %vm221_vm2, %v1173_v7, %v1172_v63  ;;  %v1205_v38 = vsel %vm280_vm3, %v1203_v26, %v1204_v29  ;;  %v1296_v24 = vrot.slane %v8185_v51, 7  ;;  %v1126_v5 = vsel %vm223_vm5, %v1125_v34, %v1124_v48  ;;  %v8241_v26 = vld [vmem:[#allocation3 + $0x65] sm:$0x1]  ;;  %v8287_v29 = vld [vmem:[#allocation3 + $0x75] sm:$0x1] }
  0x78   :  { %639 = vrot.lane.b32.xlu1 %v7956_v21, %s7557_s22  ;;  %v8142_v21 = vsel %vm288_vm6, %v858_v10, %v859_v60  ;;  %v1162_v10 = vsel %vm219_vm1, %v1161_v15, %v1145_v53  ;;  %v1245_v60 = vrot.slane %v8167_v40, 7  ;;  %v1216_v58 = vsel %vm221_vm2, %v1215_v42, %v1214_v43  ;;  %v1275_v53 = vld [vmem:[#allocation3 + $0x45] sm:$0x1]  ;;  %v8261_v40 = vld [vmem:[#allocation3 + $0x56] sm:$0x1] }
  0x79   :  { %684 = vrot.lane.b32.xlu0 %v8004_v59, %s7558_s23  ;;  %v1093_v59 = vsel %vm223_vm5, %v1092_v57, %v1091_v37  ;;  %v1176_v37 = vrot.slane %v8179_v17, 5  ;;  %v1167_v16 = vrot.slane %v8188_v52, 5  ;;  %v1287_v22 = vrot.slane %v8207_v33, 7 }
  0x7a   :  { %v8201_v0 = vsel %vm288_vm6, %v1092_v57, %v1093_v59  ;;  %v8216_v57 = vld [vmem:[#allocation3 + $0x64] sm:$0x1]  ;;  %v1246_v20 = vsel %vm219_vm1, %v1245_v60, %v1229_v14  ;;  %v1175_v11 = vsel %vm284_vm4, %v1173_v7, %v1174_v35  ;;  %v1207_v19 = vsel %vm221_vm2, %v1206_v56, %v1205_v38  ;;  %v8273_v7 = vld [vmem:[#allocation3 + $0x57] sm:$0x1] }
  0x7b   :  { %v1217_v59 = vsel %vm284_vm4, %v1215_v42, %v1216_v58  ;;  %v1257_v44 = vrot.slane %v8216_v57, 6  ;;  %v1297_v4 = vsel %vm219_vm1, %v1296_v24, %v1275_v53  ;;  %v1209_v13 = vrot.slane %v8232_v30, 5  ;;  %v8327_v30 = vld [vmem:[#allocation3 + $0x67] sm:$0x1] }
  0x7c   :  { %682 = vrot.lane.b32.xlu1 %v8016_v31, %s7558_s23  ;;  %v1163_v31 = vsel %vm280_vm3, %v1161_v15, %v1162_v10  ;;  %v8213_v15 = vld [vmem:[#allocation3 + $0x73] sm:$0x1]  ;;  %v1248_v10 = vrot.slane %v8229_v39, 6  ;;  %v1247_v41 = vsel %vm280_vm3, %v1245_v60, %v1246_v20  ;;  %v8266_v55 = vsel %vm288_vm6, %v1125_v34, %v1126_v5  ;;  %v8280_v34 = vld [vmem:[#allocation3 + $0x34] sm:$0x1] }
  0x7d   :  { %734 = vrot.lane.b32.xlu0 %v8029_v3, %s7559_s24  ;;  %v1254_v3 = vrot.slane %v8165_v46, 7  ;;  %v1165_v49 = vsel %vm221_vm2, %v1164_v27, %v1163_v31  ;;  %v1218_v25 = vrot.slane %v8213_v15, 5  ;;  %v8259_v46 = vld [vmem:[#allocation3 + $0x25] sm:$0x1]  ;;  %v1208_v62 = vsel %vm284_vm4, %v1206_v56, %v1207_v19  ;;  %v8315_v5 = vld [vmem:[#allocation3 + $0x66] sm:$0x1] }
  0x7e   :  { %v1166_v12 = vsel %vm284_vm4, %v1164_v27, %v1165_v49  ;;  %v1177_v27 = vsel %vm223_vm5, %v1176_v37, %v1175_v11  ;;  %v1298_v63 = vsel %vm280_vm3, %v1296_v24, %v1297_v4  ;;  %v1249_v42 = vsel %vm221_vm2, %v1248_v10, %v1247_v41  ;;  %v8303_v49 = vld [vmem:[#allocation3 + $0x17] sm:$0x1]  ;;  %v8347_v4 = vld [vmem:[#allocation3 + $0x36] sm:$0x1]  ;;  %v8351_v41 = vld [vmem:[#allocation3 + $0x59] sm:$0x1] }
  0x7f   :  { %v1168_v9 = vsel %vm223_vm5, %v1167_v16, %v1166_v12  ;;  %v1219_v17 = vsel %vm223_vm5, %v1218_v25, %v1217_v59  ;;  %v1290_v51 = vrot.slane %v8259_v46, 6  ;;  %v1338_v48 = vrot.slane %v8261_v40, 7  ;;  %v8337_v12 = vld [vmem:[#allocation3 + $0x58] sm:$0x1] }
  0x80   :  { %732 = vrot.lane.b32.xlu1 %v8070_v45, %s7559_s24  ;;  %v1135_v45 = vsel %vm223_vm5, %v1134_v50, %v1133_v23  ;;  %v8271_v23 = vld [vmem:[#allocation3 + $0x16] sm:$0x1]  ;;  %v1210_v52 = vsel %vm223_vm5, %v1209_v13, %v1208_v62  ;;  %v1380_v60 = vrot.slane %v8273_v7, 7  ;;  %v8298_v56 = vsel %vm288_vm6, %v1176_v37, %v1177_v27  ;;  %v8343_v59 = vld [vmem:[#allocation3 + $0x18] sm:$0x1] }
  0x81   :  { %777 = vrot.lane.b32.xlu0 %v8075_v47, %s7560_s25  ;;  %v1255_v47 = vsel %vm219_vm1, %v1254_v3, %v1233_v54  ;;  %v8254_v32 = vsel %vm288_vm6, %v1134_v50, %v1135_v45  ;;  %v1288_v50 = vsel %vm219_vm1, %v1287_v22, %v1271_v28  ;;  %v1317_v54 = vld [vmem:[#allocation3 + $0x46] sm:$0x1]  ;;  %v1260_v14 = vrot.slane %v8278_v6, 5  ;;  %v8313_v45 = vld [vmem:[#allocation3 + $0x35] sm:$0x1] }
  0x82   :  { %v1289_v43 = vsel %vm280_vm3, %v1287_v22, %v1288_v50  ;;  %v1251_v33 = vrot.slane %v8280_v34, 5  ;;  %v8306_v15 = vsel %vm288_vm6, %v1167_v16, %v1168_v9  ;;  %v8309_v38 = vsel %vm288_vm6, %v1218_v25, %v1219_v17  ;;  %v8325_v16 = vld [vmem:[#allocation3 + $0x26] sm:$0x1]  ;;  %v1355_v28 = vld [vmem:[#allocation3 + $0x7] sm:$0x1] }
  0x83   :  { %v1250_v24 = vsel %vm284_vm4, %v1248_v10, %v1249_v42  ;;  %v8320_v37 = vsel %vm288_vm6, %v1209_v13, %v1210_v52  ;;  %v1302_v58 = vrot.slane %v8287_v29, 5  ;;  %v1291_v39 = vsel %vm221_vm2, %v1290_v51, %v1289_v43  ;;  %v8357_v62 = vld [vmem:[#allocation3 + $0x77] sm:$0x1]  ;;  %v8360_v50 = vld [vmem:[#allocation3 + $0x27] sm:$0x1] }
  0x84   :  { %775 = vrot.lane.b32.xlu1 %v8084_v8, %s7560_s25  ;;  %v1256_v8 = vsel %vm280_vm3, %v1254_v3, %v1255_v47  ;;  %v1329_v3 = vrot.slane %v8271_v23, 7  ;;  %v1339_v53 = vsel %vm219_vm1, %v1338_v48, %v1317_v54  ;;  %v1371_v11 = vrot.slane %v8303_v49, 7  ;;  %v1401_v9 = vld [vmem:[#allocation3 + $0x48] sm:$0x1]  ;;  %v1440_v6 = vld [vmem:[#allocation3 + $0x19] sm:$0x1] }
  0x85   :  { %820 = vrot.lane.b32.xlu0 %v8130_v18, %s7561_s26  ;;  %v1299_v18 = vrot.slane %v8241_v26, 6  ;;  %v1258_v31 = vsel %vm221_vm2, %v1257_v44, %v1256_v8  ;;  %v1252_v19 = vsel %vm223_vm5, %v1251_v33, %v1250_v24  ;;  %v1293_v26 = vrot.slane %v8313_v45, 5  ;;  %v8376_v42 = vld [vmem:[#allocation3 + $0x68] sm:$0x1] }
  0x86   :  { %v1259_v57 = vsel %vm284_vm4, %v1257_v44, %v1258_v31  ;;  %v1292_v44 = vsel %vm284_vm4, %v1290_v51, %v1291_v39  ;;  %v1340_v10 = vsel %vm280_vm3, %v1338_v48, %v1339_v53  ;;  %v1332_v13 = vrot.slane %v8325_v16, 6  ;;  %v8385_v54 = vld [vmem:[#allocation3 + $0x28] sm:$0x1] }
  0x87   :  { %v1300_v35 = vsel %vm221_vm2, %v1299_v18, %v1298_v63  ;;  %v1261_v25 = vsel %vm223_vm5, %v1260_v14, %v1259_v57  ;;  %v1383_v8 = vrot.slane %v8327_v30, 6  ;;  %v1422_v23 = vrot.slane %v8337_v12, 7  ;;  %v1492_v30 = vld [vmem:[#allocation3 + $0x6a] sm:$0x1] }
  0x88   :  { %818 = vrot.lane.b32.xlu1 %v8133_v36, %s7561_s26  ;;  %v1313_v36 = vld [vmem:[#allocation3 + $0x6] sm:$0x1]  ;;  %v1301_v47 = vsel %vm284_vm4, %v1299_v18, %v1300_v35  ;;  %v8366_v7 = vsel %vm288_vm6, %v1260_v14, %v1261_v25  ;;  %v1372_v27 = vsel %vm219_vm1, %v1371_v11, %v1355_v28  ;;  %v1413_v17 = vrot.slane %v8343_v59, 7  ;;  %v8392_v35 = vld [vmem:[#allocation3 + $0x69] sm:$0x1] }
  0x89   :  { %863 = vrot.lane.b32.xlu0 %v8142_v21, %s7562_s27  ;;  %v1359_v21 = vld [vmem:[#allocation3 + $0x47] sm:$0x1]  ;;  %v1330_v20 = vsel %vm219_vm1, %v1329_v3, %v1313_v36  ;;  %v1303_v46 = vsel %vm223_vm5, %v1302_v58, %v1301_v47  ;;  %v1294_v34 = vsel %vm223_vm5, %v1293_v26, %v1292_v44  ;;  %v1464_v29 = vrot.slane %v8351_v41, 7  ;;  %v1443_v36 = vld [vmem:[#allocation3 + $0x49] sm:$0x1] }
  0x8a   :  { %v1381_v22 = vsel %vm219_vm1, %v1380_v60, %v1359_v21  ;;  %v1331_v40 = vsel %vm280_vm3, %v1329_v3, %v1330_v20  ;;  %v8380_v51 = vsel %vm288_vm6, %v1302_v58, %v1303_v46  ;;  %v1374_v43 = vrot.slane %v8360_v50, 6  ;;  %v1491_v3 = vld [vmem:[#allocation3 + $0x5a] sm:$0x1]  ;;  %v1439_v21 = vld [vmem:[#allocation3 + $0x9] sm:$0x1] }
  0x8b   :  { %v1382_v18 = vsel %vm280_vm3, %v1380_v60, %v1381_v22  ;;  %v1333_v48 = vsel %vm221_vm2, %v1332_v13, %v1331_v40  ;;  %v1335_v60 = vrot.slane %v8347_v4, 5  ;;  %v1373_v14 = vsel %vm280_vm3, %v1371_v11, %v1372_v27  ;;  %v1490_v58 = vld [vmem:[#allocation3 + $0x4a] sm:$0x1]  ;;  %v1487_v47 = vld [vmem:[#allocation3 + $0x1a] sm:$0x1] }
  0x8c   :  { %861 = vrot.lane.b32.xlu1 %v8196_v61, %s7562_s27  ;;  %v8332_v61 = vld [vmem:[#allocation3 + $0x76] sm:$0x1]  ;;  %v1384_v52 = vsel %vm221_vm2, %v1383_v8, %v1382_v18  ;;  %v1455_v49 = vrot.slane %v1440_v6, 7  ;;  %v8397_v57 = vsel %vm288_vm6, %v1293_v26, %v1294_v34  ;;  %v1334_v39 = vsel %vm284_vm4, %v1332_v13, %v1333_v48  ;;  %v8407_v20 = vld [vmem:[#allocation3 + $0x37] sm:$0x1] }
  0x8d   :  { %1097 = vrot.lane.b32.xlu0 %v8201_v0, %s7563_s28  ;;  %v1341_v0 = vrot.slane %v8315_v5, 6  ;;  %v1344_v31 = vrot.slane %v8332_v61, 5  ;;  %v8402_v5 = vld [vmem:[#allocation3 + $0x29] sm:$0x1]  ;;  %v1385_v53 = vsel %vm284_vm4, %v1383_v8, %v1384_v52  ;;  %v1465_v16 = vsel %vm219_vm1, %v1464_v29, %v1443_v36  ;;  %v1486_v59 = vld [vmem:[#allocation3 + $0xa] sm:$0x1] }
  0x8e   :  { %v1375_v22 = vsel %vm221_vm2, %v1374_v43, %v1373_v14  ;;  %v1425_v12 = vrot.slane %v8376_v42, 6  ;;  %v1456_v25 = vsel %vm219_vm1, %v1455_v49, %v1439_v21  ;;  %v1416_v26 = vrot.slane %v8385_v54, 6  ;;  %v8421_v44 = vld [vmem:[#allocation3 + $0x78] sm:$0x1]  ;;  %v1488_v50 = vld [vmem:[#allocation3 + $0x2a] sm:$0x1] }
  0x8f   :  { %v1342_v63 = vsel %vm221_vm2, %v1341_v0, %v1340_v10  ;;  %v1466_v10 = vsel %vm280_vm3, %v1464_v29, %v1465_v16  ;;  %v1458_v13 = vrot.slane %v8402_v5, 6  ;;  %v1502_v8 = vrot.slane %v1487_v47, 7  ;;  %v1446_v6 = vld [vmem:[#allocation3 + $0x79] sm:$0x1]  ;;  %v1493_v52 = vld [vmem:[#allocation3 + $0x7a] sm:$0x1] }
  0x90   :  { %1095 = vrot.lane.b32.xlu1 %v8204_v1, %s7563_s28  ;;  %v8369_v1 = vsel %vm288_vm6, %v1251_v33, %v1252_v19  ;;  %v1423_v33 = vsel %vm219_vm1, %v1422_v23, %v1401_v9  ;;  %v1343_v24 = vsel %vm284_vm4, %v1341_v0, %v1342_v63  ;;  %v1467_v0 = vrot.slane %v8392_v35, 6  ;;  %v1442_v48 = vld [vmem:[#allocation3 + $0x39] sm:$0x1]  ;;  %v1532_v21 = vld [vmem:[#allocation3 + $0x4b] sm:$0x1] }
  0x91   :  { %1139 = vrot.lane.b32.xlu0 %v8254_v32, %s7564_s29  ;;  %v1397_v32 = vld [vmem:[#allocation3 + $0x8] sm:$0x1]  ;;  %v1424_v11 = vsel %vm280_vm3, %v1422_v23, %v1423_v33  ;;  %v1345_v41 = vsel %vm223_vm5, %v1344_v31, %v1343_v24  ;;  %v1377_v46 = vrot.slane %v8407_v20, 5  ;;  %v1457_v40 = vsel %vm280_vm3, %v1455_v49, %v1456_v25  ;;  %v1529_v49 = vld [vmem:[#allocation3 + $0x1b] sm:$0x1] }
  0x92   :  { %v1414_v45 = vsel %vm219_vm1, %v1413_v17, %v1397_v32  ;;  %v1336_v23 = vsel %vm223_vm5, %v1335_v60, %v1334_v39  ;;  %v1426_v9 = vsel %vm221_vm2, %v1425_v12, %v1424_v11  ;;  %v1503_v34 = vsel %vm219_vm1, %v1502_v8, %v1486_v59  ;;  %v8478_v25 = vld [vmem:[#allocation3 + $0x5c] sm:$0x1] }
  0x93   :  { %v1415_v19 = vsel %vm280_vm3, %v1413_v17, %v1414_v45  ;;  %v1400_v17 = vld [vmem:[#allocation3 + $0x38] sm:$0x1]  ;;  %v1376_v63 = vsel %vm284_vm4, %v1374_v43, %v1375_v22  ;;  %v1428_v42 = vrot.slane %v8421_v44, 5  ;;  %v1468_v29 = vsel %vm221_vm2, %v1467_v0, %v1466_v10  ;;  %v8492_v44 = vld [vmem:[#allocation3 + $0x2b] sm:$0x1] }
  0x94   :  { %1137 = vrot.lane.b32.xlu1 %v8266_v55, %s7564_s29  ;;  %v1386_v55 = vrot.slane %v8357_v62, 5  ;;  %v1417_v32 = vsel %vm221_vm2, %v1416_v26, %v1415_v19  ;;  %v1459_v54 = vsel %vm221_vm2, %v1458_v13, %v1457_v40  ;;  %v1427_v43 = vsel %vm284_vm4, %v1425_v12, %v1426_v9 }
  0x95   :  { %1181 = vrot.lane.b32.xlu0 %v8298_v56, %s7565_s30  ;;  %v1511_v56 = vrot.slane %v1491_v3, 7  ;;  %v1505_v3 = vrot.slane %v1488_v50, 6  ;;  %v1419_v14 = vrot.slane %v1400_v17, 5  ;;  %v1470_v33 = vrot.slane %v1446_v6, 5  ;;  %v1574_v50 = vld [vmem:[#allocation3 + $0x4c] sm:$0x1] }
  0x96   :  { %v1387_v27 = vsel %vm223_vm5, %v1386_v55, %v1385_v53  ;;  %v1504_v35 = vsel %vm280_vm3, %v1502_v8, %v1503_v34  ;;  %v1418_v24 = vsel %vm284_vm4, %v1416_v26, %v1417_v32  ;;  %v1469_v45 = vsel %vm284_vm4, %v1467_v0, %v1468_v29  ;;  %v8503_v8 = vld [vmem:[#allocation3 + $0x1c] sm:$0x1]  ;;  %v8522_v17 = vld [vmem:[#allocation3 + $0x3b] sm:$0x1]  ;;  %v1570_v34 = vld [vmem:[#allocation3 + $0xc] sm:$0x1] }
  0x97   :  { %v1512_v28 = vsel %vm219_vm1, %v1511_v56, %v1490_v58  ;;  %v1461_v5 = vrot.slane %v1442_v48, 5  ;;  %v1346_v58 = vsel %vm288_vm6, %v1344_v31, %v1345_v41  ;;  %v1378_v39 = vsel %vm223_vm5, %v1377_v46, %v1376_v63  ;;  %v8525_v63 = vld [vmem:[#allocation3 + $0x5d] sm:$0x1]  ;;  %v8537_v48 = vld [vmem:[#allocation3 + $0x7c] sm:$0x1] }
  0x98   :  { %1179 = vrot.lane.b32.xlu1 %v8306_v15, %s7565_s30  ;;  %v1514_v15 = vrot.slane %v1492_v30, 6  ;;  %v1513_v18 = vsel %vm280_vm3, %v1511_v56, %v1512_v28  ;;  %v1460_v53 = vsel %vm284_vm4, %v1458_v13, %v1459_v54  ;;  %v8461_v30 = vld [vmem:[#allocation3 + $0x3a] sm:$0x1]  ;;  %v8463_v56 = vld [vmem:[#allocation3 + $0x6b] sm:$0x1]  ;;  %v1506_v61 = vsel %vm221_vm2, %v1505_v3, %v1504_v35 }
  0x99   :  { %1223 = vrot.lane.b32.xlu0 %v8309_v38, %s7566_s5  ;;  %v1533_v38 = vld [vmem:[#allocation3 + $0x5b] sm:$0x1]  ;;  %v1544_v47 = vrot.slane %v1529_v49, 7  ;;  %v1337_v20 = vsel %vm288_vm6, %v1335_v60, %v1336_v23  ;;  %v1388_v22 = vsel %vm288_vm6, %v1386_v55, %v1387_v27  ;;  %v1420_v11 = vsel %vm223_vm5, %v1419_v14, %v1418_v24  ;;  %v263_v54 = vld [vmem:[#allocation3 + $0x10] sm:$0x1] }
  0x9a   :  { %v1515_v36 = vsel %vm221_vm2, %v1514_v15, %v1513_v18  ;;  %v1471_v12 = vsel %vm223_vm5, %v1470_v33, %v1469_v45  ;;  %v1462_v19 = vsel %vm223_vm5, %v1461_v5, %v1460_v53  ;;  %v1508_v0 = vrot.slane %v8461_v30, 5  ;;  %v8489_v28 = vld [vmem:[#allocation3 + $0x7b] sm:$0x1]  ;;  %v262_v45 = vld [vmem:[#allocation3] sm:$0x1] }
  0x9b   :  { %v1516_v16 = vsel %vm284_vm4, %v1514_v15, %v1515_v36  ;;  %v1556_v4 = vrot.slane %v8463_v56, 6  ;;  %v1379_v62 = vsel %vm288_vm6, %v1377_v46, %v1378_v39  ;;  %v1507_v55 = vsel %vm284_vm4, %v1505_v3, %v1506_v61  ;;  %v1612_v53 = vld [vmem:[#allocation3 + $0xd] sm:$0x1] }
  0x9c   :  { %1221 = vrot.lane.b32.xlu1 %v8320_v37, %s7566_s5  ;;  %v1553_v37 = vrot.slane %v1533_v38, 7  ;;  %v8496_v10 = vsel %vm288_vm6, %v1419_v14, %v1420_v11  ;;  %v1595_v15 = vrot.slane %v8478_v25, 7  ;;  %v8506_v41 = vsel %vm288_vm6, %v1461_v5, %v1462_v19  ;;  %v8517_v38 = vld [vmem:[#allocation3 + $0x6c] sm:$0x1]  ;;  %v1616_v14 = vld [vmem:[#allocation3 + $0x4d] sm:$0x1] }
  0x9d   :  { %1265 = vrot.lane.b32.xlu0 %v8366_v7, %s7567_s6  ;;  %v1517_v7 = vrot.slane %v1493_v52, 5  ;;  %v8512_v40 = vand.u32 127, %v143_v2  ;;  %v8515_v18 = vshrl.u32 %v143_v2, 7  ;;  %v1509_v23 = vsel %vm223_vm5, %v1508_v0, %v1507_v55  ;;  %v265_v5 = vld [vmem:[#allocation3 + $0x30] sm:$0x1] }
  0x9e   :  { %v1554_v31 = vsel %vm219_vm1, %v1553_v37, %v1532_v21  ;;  %v1559_v9 = vrot.slane %v8489_v28, 5  ;;  %v1547_v6 = vrot.slane %v8492_v44, 6  ;;  %v1586_v52 = vrot.slane %v8503_v8, 7  ;;  %v268_v25 = vld [vmem:[#allocation3 + $0x60] sm:$0x1] }
  0x9f   :  { %v1518_v26 = vsel %vm223_vm5, %v1517_v7, %v1516_v16  ;;  %v1555_v59 = vsel %vm280_vm3, %v1553_v37, %v1554_v31  ;;  %v8531_v2 = vsub.s32 0, %v8515_v18  ;;  %v8534_v32 = vsub.s32 4, %v8515_v18  ;;  %v8568_v31 = vld [vmem:[#allocation3 + $0x6d] sm:$0x1] }
  0xa0   :  { %1263 = vrot.lane.b32.xlu1 %v8369_v1, %s7567_s6  ;;  %v1429_v1 = vsel %vm223_vm5, %v1428_v42, %v1427_v43  ;;  %v8509_v46 = vsel %vm288_vm6, %v1517_v7, %v1518_v26  ;;  %v1557_v27 = vsel %vm221_vm2, %v1556_v4, %v1555_v59  ;;  %v8542_v36 = vsub.s32 1, %v8515_v18 }
  0xa1   :  { %1307 = vrot.lane.b32.xlu0 %v8380_v51, %s13237_s7  ;;  %v1528_v51 = vld [vmem:[#allocation3 + $0xb] sm:$0x1]  ;;  %v1430_v60 = vsel %vm288_vm6, %v1428_v42, %v1429_v1  ;;  %v8527_v42 = vld [vmem:[#allocation3 + $0x1d] sm:$0x1]  ;;  %v8545_v3 = vsub.s32 5, %v8515_v18  ;;  %v8548_v37 = vsub.s32 2, %v8515_v18  ;;  %v1596_v43 = vsel %vm219_vm1, %v1595_v15, %v1574_v50 }
  0xa2   :  { %v1545_v13 = vsel %vm219_vm1, %v1544_v47, %v1528_v51  ;;  %v8552_v35 = vsel %vm288_vm6, %v1508_v0, %v1509_v23  ;;  %v1558_v21 = vsel %vm284_vm4, %v1556_v4, %v1557_v27  ;;  %v1637_v49 = vrot.slane %v8525_v63, 7  ;;  %v8565_v1 = vld [vmem:[#allocation3 + $0x2c] sm:$0x1]  ;;  %v267_v51 = vld [vmem:[#allocation3 + $0x50] sm:$0x1] }
  0xa3   :  { %v1546_v29 = vsel %vm280_vm3, %v1544_v47, %v1545_v13  ;;  %v1628_v24 = vrot.slane %v8527_v42, 7  ;;  %v8558_v7 = vsub.s32 6, %v8515_v18  ;;  %v1598_v39 = vrot.slane %v8517_v38, 6  ;;  %v8578_v0 = vld [vmem:[#allocation3 + $0x2d] sm:$0x1] }
  0xa4   :  { %1305 = vrot.lane.b32.xlu1 %v8397_v57, %s13237_s7  ;;  %v8499_v57 = vsel %vm288_vm6, %v1470_v33, %v1471_v12  ;;  %v264_v33 = vld [vmem:[#allocation3 + $0x20] sm:$0x1]  ;;  %v278_v16 = vrot.slane %v263_v54, 7  ;;  %v1550_v30 = vrot.slane %v8522_v17, 5  ;;  %v1597_v56 = vsel %vm280_vm3, %v1595_v15, %v1596_v43  ;;  %v269_v15 = vld [vmem:[#allocation3 + $0x70] sm:$0x1] }
  0xa5   :  { %1349 = vrot.lane.b32.xlu0 %v1346_v58, %s13226_s8  ;;  %v1548_v58 = vsel %vm221_vm2, %v1547_v6, %v1546_v29  ;;  %v1587_v61 = vsel %vm219_vm1, %v1586_v52, %v1570_v34  ;;  %v282_v47 = vrot.slane %v264_v33, 6  ;;  %v286_v12 = vrot.slane %v265_v5, 5  ;;  %v266_v13 = vld [vmem:[#allocation3 + $0x40] sm:$0x1]  ;;  %v8592_v27 = vld [vmem:[#allocation3 + $0x3c] sm:$0x1] }
  0xa6   :  { %v279_v11 = vsel %vm219_vm1, %v278_v16, %v262_v45  ;;  %v1549_v19 = vsel %vm284_vm4, %v1547_v6, %v1548_v58  ;;  %v1638_v26 = vsel %vm219_vm1, %v1637_v49, %v1616_v14  ;;  %v1629_v4 = vsel %vm219_vm1, %v1628_v24, %v1612_v53  ;;  %v1851_v54 = vld [vmem:[#allocation3 + $0x50] sm:$0x1]  ;;  %v8605_v33 = vld [vmem:[#allocation3 + $0x7d] sm:$0x1]  ;;  %v1893_v53 = vld [vmem:[#allocation3 + $0x51] sm:$0x1] }
  0xa7   :  { %v1588_v55 = vsel %vm280_vm3, %v1586_v52, %v1587_v61  ;;  %v1589_v59 = vrot.slane %v8565_v1, 6  ;;  %v1640_v8 = vrot.slane %v8568_v31, 6  ;;  %v290_v38 = vrot.slane %v267_v51, 7 }
  0xa8   :  { %1347 = vrot.lane.b32.xlu1 %v1337_v20, %s13226_s8  ;;  %v1560_v20 = vsel %vm223_vm5, %v1559_v9, %v1558_v21  ;;  %v293_v23 = vrot.slane %v268_v25, 6  ;;  %v1639_v6 = vsel %vm280_vm3, %v1637_v49, %v1638_v26  ;;  %v1630_v34 = vsel %vm280_vm3, %v1628_v24, %v1629_v4  ;;  %v8607_v21 = vld [vmem:[#allocation3 + $0x3d] sm:$0x1]  ;;  %v8637_v25 = vld [vmem:[#allocation3 + $0x61] sm:$0x1] }
  0xa9   :  { %1391 = vrot.lane.b32.xlu0 %v1388_v22, %s13221_s9  ;;  %v1601_v22 = vrot.slane %v8537_v48, 5  ;;  %v1631_v63 = vrot.slane %v8578_v0, 6  ;;  %vm13239_vm7 = vcmask 109568   ;;  %v291_v29 = vsel %vm219_vm1, %v290_v38, %v266_v13  ;;  %v1934_v26 = vld [vmem:[#allocation3 + $0x42] sm:$0x1] }
  0xaa   :  { %v296_v52 = vrot.slane %v269_v15, 5  ;;  %v8601_v43 = vsub.s32 3, %v8515_v18  ;;  %v1590_v14 = vsel %vm221_vm2, %v1589_v59, %v1588_v55  ;;  %v292_v49 = vsel %vm280_vm3, %v290_v38, %v291_v29  ;;  %v8677_v29 = vld [vmem:[#allocation3 + $0x70] sm:$0x1] }
  0xab   :  { %v1561_v24 = vsel %vm288_vm6, %v1559_v9, %v1560_v20  ;;  %v1551_v45 = vsel %vm223_vm5, %v1550_v30, %v1549_v19  ;;  %v1592_v5 = vrot.slane %v8592_v27, 5  ;;  %v294_v58 = vsel %vm221_vm2, %v293_v23, %v292_v49  ;;  %v8632_v20 = vld [vmem:[#allocation3 + $0x60] sm:$0x1]  ;;  %v2019_v49 = vld [vmem:[#allocation3 + $0x54] sm:$0x1] }
  0xac   :  { %1389 = vrot.lane.b32.xlu1 %v1379_v62, %s13221_s9  ;;  %v281_v62 = vsel %vm280_vm3, %v278_v16, %v279_v11  ;;  %v1632_v28 = vsel %vm221_vm2, %v1631_v63, %v1630_v34  ;;  %v295_v9 = vsel %vm284_vm4, %v293_v23, %v294_v58  ;;  %v1871_v16 = vrot.slane %v1851_v54, 7 }
  0xad   :  { %1433 = vrot.lane.b32.xlu0 %v1430_v60, %s13219_s10  ;;  %v1599_v60 = vsel %vm221_vm2, %v1598_v39, %v1597_v56  ;;  %v283_v44 = vsel %vm221_vm2, %v282_v47, %v281_v62  ;;  %v1935_v56 = vld [vmem:[#allocation3 + $0x52] sm:$0x1]  ;;  %v1591_v61 = vsel %vm284_vm4, %v1589_v59, %v1590_v14  ;;  %v1643_v31 = vrot.slane %v8605_v33, 5  ;;  %v1936_v59 = vld [vmem:[#allocation3 + $0x62] sm:$0x1] }
  0xae   :  { %v285_v50 = vsel %vm284_vm4, %v282_v47, %v283_v44  ;;  %v297_v47 = vsel %vm223_vm5, %v296_v52, %v295_v9  ;;  %v1634_v11 = vrot.slane %v8607_v21, 5  ;;  %v1913_v19 = vrot.slane %v1893_v53, 7  ;;  %v8688_v33 = vld [vmem:[#allocation3 + $0x72] sm:$0x1]  ;;  %v1976_v21 = vld [vmem:[#allocation3 + $0x43] sm:$0x1] }
  0xaf   :  { %v149_v62 = vadd.s32 4294967288, %v8512_v40  ;;  %v1633_v55 = vsel %vm284_vm4, %v1631_v63, %v1632_v28  ;;  %v1955_v44 = vrot.slane %v1935_v56, 7  ;;  %v1874_v15 = vrot.slane %v8632_v20, 6  ;;  %v8695_v53 = vld [vmem:[#allocation3 + $0x64] sm:$0x1] }
  0xb0   :  { %1431 = vrot.lane.b32.xlu1 %v8496_v10, %s13219_s10  ;;  %v287_v10 = vsel %vm223_vm5, %v286_v12, %v285_v50  ;;  %v1593_v50 = vsel %vm223_vm5, %v1592_v5, %v1591_v61  ;;  %v1916_v23 = vrot.slane %v8637_v25, 6  ;;  %v8667_v34 = vsub.s32 %v8512_v40, %v8515_v18  ;;  %v1847_v56 = vld [vmem:[#allocation3 + $0x10] sm:$0x1] }
  0xb1   :  { %1475 = vrot.lane.b32.xlu0 %v8499_v57, %s13224_s11  ;;  %v289_v42 = vsel %vm288_vm6, %v286_v12, %v287_v10  ;;  %v1600_v57 = vsel %vm284_vm4, %v1598_v39, %v1599_v60  ;;  %v1850_v39 = vld [vmem:[#allocation3 + $0x40] sm:$0x1]  ;;  %v298_v12 = vsel %vm288_vm6, %v296_v52, %v297_v47  ;;  %v1956_v27 = vsel %vm219_vm1, %v1955_v44, %v1934_v26  ;;  %v8679_v52 = vld [vmem:[#allocation3 + $0x71] sm:$0x1] }
  0xb2   :  { %302 = vst.msk [vmem:[#allocation2] sm:$0xf] %vm13239_vm7, %v289_v42  ;;  %v1602_v1 = vsel %vm223_vm5, %v1601_v22, %v1600_v57  ;;  %v1872_v51 = vsel %vm219_vm1, %v1871_v16, %v1850_v39  ;;  %303 = vst.msk [vmem:[#allocation2 + $0x8] sm:$0xf] %vm13239_vm7, %v298_v12  ;;  %v8670_v63 = vsub.s32 7, %v8515_v18  ;;  %vm154_vm8 = vcmask 130112  }
  0xb3   :  { %v1603_v13 = vsel %vm288_vm6, %v1601_v22, %v1602_v1  ;;  %v1873_v38 = vsel %vm280_vm3, %v1871_v16, %v1872_v51  ;;  %v1977_v22 = vld [vmem:[#allocation3 + $0x53] sm:$0x1]  ;;  %v1957_v54 = vsel %vm280_vm3, %v1955_v44, %v1956_v27  ;;  %v8683_v57 = vsub.s32 %v149_v62, %v8515_v18  ;;  %v8693_v39 = vld [vmem:[#allocation3 + $0x63] sm:$0x1]  ;;  %v2018_v16 = vld [vmem:[#allocation3 + $0x44] sm:$0x1] }
  0xb4   :  { %1473 = vrot.lane.b32.xlu1 %v8506_v41, %s13224_s11  ;;  %v1641_v41 = vsel %vm221_vm2, %v1640_v8, %v1639_v6  ;;  %v1958_v6 = vrot.slane %v1936_v59, 6  ;;  %v1594_v40 = vsel %vm288_vm6, %v1592_v5, %v1593_v50  ;;  %v1875_v14 = vsel %vm221_vm2, %v1874_v15, %v1873_v38  ;;  %v8715_v62 = vld [vmem:[#allocation3 + $0x20] sm:$0x1]  ;;  %v8727_v27 = vld [vmem:[#allocation3 + $0x73] sm:$0x1] }
  0xb5   :  { %1522 = vrot.lane.b32.xlu0 %v8509_v46, %s13231_s12  ;;  %v1892_v46 = vld [vmem:[#allocation3 + $0x41] sm:$0x1]  ;;  %v1642_v60 = vsel %vm284_vm4, %v1640_v8, %v1641_v41  ;;  %v1997_v18 = vrot.slane %v1977_v22, 7  ;;  %v1877_v41 = vrot.slane %v8677_v29, 5  ;;  %v1919_v28 = vrot.slane %v8679_v52, 5 }
  0xb6   :  { %v1914_v8 = vsel %vm219_vm1, %v1913_v19, %v1892_v46  ;;  %v1644_v17 = vsel %vm223_vm5, %v1643_v31, %v1642_v60  ;;  %v1959_v9 = vsel %vm221_vm2, %v1958_v6, %v1957_v54  ;;  %v1876_v47 = vsel %vm284_vm4, %v1874_v15, %v1875_v14 }
  0xb7   :  { %v1915_v48 = vsel %vm280_vm3, %v1913_v19, %v1914_v8  ;;  %v1998_v20 = vsel %vm219_vm1, %v1997_v18, %v1976_v21  ;;  %v2039_v46 = vrot.slane %v2019_v49, 7  ;;  %v1961_v12 = vrot.slane %v8688_v33, 5  ;;  %v1846_v19 = vld [vmem:[#allocation3] sm:$0x1] }
  0xb8   :  { %1520 = vrot.lane.b32.xlu1 %v8552_v35, %s13231_s12  ;;  %v8641_v0 = vpop.xlane.xlu1 %86  ;;  %v8643_v4 = vpop.xlane.xlu0 %80  ;;  %v1552_v35 = vsel %vm288_vm6, %v1550_v30, %v1551_v45  ;;  %v1635_v30 = vsel %vm223_vm5, %v1634_v11, %v1633_v55  ;;  %v1917_v58 = vsel %vm221_vm2, %v1916_v23, %v1915_v48  ;;  %v2000_v51 = vrot.slane %v8693_v39, 6 }
  0xb9   :  { %1564 = vrot.lane.b32.xlu0 %v1561_v24, %s13233_s14  ;;  %v1645_v24 = vsel %vm288_vm6, %v1643_v31, %v1644_v17  ;;  %v1636_v45 = vsel %vm288_vm6, %v1634_v11, %v1635_v30  ;;  %v159_v5 = vrot.slane %v8641_v0, %v8667_v34  ;;  %v148_v1 = vrot.slane %v8643_v4, %v8667_v34 }
  0xba   :  { %v1918_v11 = vsel %vm284_vm4, %v1916_v23, %v1917_v58  ;;  %v2042_v25 = vrot.slane %v8695_v53, 6  ;;  %v1960_v26 = vsel %vm284_vm4, %v1958_v6, %v1959_v9  ;;  %v1999_v0 = vsel %vm280_vm3, %v1997_v18, %v1998_v20  ;;  %v8732_v6 = vld [vmem:[#allocation3 + $0x74] sm:$0x1]  ;;  %v1849_v9 = vld [vmem:[#allocation3 + $0x30] sm:$0x1] }
  0xbb   :  { %v2040_v4 = vsel %vm219_vm1, %v2039_v46, %v2018_v16  ;;  %v1862_v60 = vrot.slane %v1847_v56, 7  ;;  %v1878_v44 = vsel %vm223_vm5, %v1877_v41, %v1876_v47  ;;  %v1920_v23 = vsel %vm223_vm5, %v1919_v28, %v1918_v11  ;;  %v2103_v16 = vld [vmem:[#allocation3 + $0x56] sm:$0x1] }
  0xbc   :  { %1562 = vrot.lane.b32.xlu1 %v1552_v35, %s13233_s14  ;;  %v8673_v10 = vpop.xlane.xlu1 %89  ;;  %v8675_v42 = vpop.xlane.xlu0 %83  ;;  %v2041_v35 = vsel %vm280_vm3, %v2039_v46, %v2040_v4  ;;  %v1962_v30 = vsel %vm223_vm5, %v1961_v12, %v1960_v26  ;;  %v2001_v48 = vsel %vm221_vm2, %v2000_v51, %v1999_v0  ;;  %vm230_vm9 = vcmask 125952   ;;  %v8765_v46 = vld [vmem:[#allocation3 + $0x75] sm:$0x1] }
  0xbd   :  { %1606 = vrot.lane.b32.xlu0 %v1603_v13, %s13235_s15  ;;  %v163_v55 = vrot.slane %v8673_v10, %v8683_v57  ;;  %v153_v59 = vrot.slane %v8675_v42, %v8683_v57  ;;  %v2061_v13 = vld [vmem:[#allocation3 + $0x55] sm:$0x1]  ;;  %v1863_v17 = vsel %vm219_vm1, %v1862_v60, %v1846_v19  ;;  %v2043_v22 = vsel %vm221_vm2, %v2042_v25, %v2041_v35  ;;  %v2060_v42 = vld [vmem:[#allocation3 + $0x45] sm:$0x1]  ;;  %v8768_v19 = vld [vmem:[#allocation3 + $0x21] sm:$0x1] }
  0xbe   :  { %v1865_v10 = vrot.slane %v8715_v62, 6  ;;  %v1864_v54 = vsel %vm280_vm3, %v1862_v60, %v1863_v17  ;;  %v8742_v21 = vsel %vm288_vm6, %v1877_v41, %v1878_v44  ;;  %v8745_v49 = vsel %vm288_vm6, %v1919_v28, %v1920_v23  ;;  %v1931_v62 = vld [vmem:[#allocation3 + $0x12] sm:$0x1]  ;;  %v1932_v17 = vld [vmem:[#allocation3 + $0x22] sm:$0x1] }
  0xbf   :  { %v164_v14 = vsel %vm154_vm8, %v163_v55, %v159_v5  ;;  %v155_v33 = vsel %vm154_vm8, %v153_v59, %v148_v1  ;;  %v2003_v53 = vrot.slane %v8727_v27, 5  ;;  %v2045_v5 = vrot.slane %v8732_v6, 5  ;;  %v1930_v27 = vld [vmem:[#allocation3 + $0x2] sm:$0x1] }
  0xc0   :  { %1604 = vrot.lane.b32.xlu1 %v1594_v40, %s13235_s15  ;;  %v96_v61 = vpop.xlane.xlu1 %95  ;;  %v93_v31 = vpop.xlane.xlu0 %92  ;;  %v2081_v40 = vrot.slane %v2061_v13, 7  ;;  %v8758_v28 = vsel %vm288_vm6, %v1961_v12, %v1962_v30  ;;  %v2002_v56 = vsel %vm284_vm4, %v2000_v51, %v2001_v48  ;;  %v2044_v1 = vsel %vm284_vm4, %v2042_v25, %v2043_v22  ;;  %v2102_v25 = vld [vmem:[#allocation3 + $0x46] sm:$0x1] }
  0xc1   :  { %1648 = vrot.lane.b32.xlu0 %v1645_v24, %s13200_s0  ;;  %v172_v15 = vrot.slane %v96_v61, %v8683_v57  ;;  %v168_v8 = vrot.slane %v93_v31, %v8667_v34  ;;  %v8747_v24 = vld [vmem:[#allocation3 + $0x65] sm:$0x1]  ;;  %v1866_v61 = vsel %vm221_vm2, %v1865_v10, %v1864_v54  ;;  %v1888_v31 = vld [vmem:[#allocation3 + $0x1] sm:$0x1]  ;;  %v220_v20 = vsel %vm219_vm1, %v164_v14, %v155_v33  ;;  %v2145_v54 = vld [vmem:[#allocation3 + $0x57] sm:$0x1] }
  0xc2   :  { %v2082_v41 = vsel %vm219_vm1, %v2081_v40, %v2060_v42  ;;  %v2084_v11 = vrot.slane %v8747_v24, 6  ;;  %v1868_v0 = vrot.slane %v1849_v9, 5  ;;  %v2123_v4 = vrot.slane %v2103_v16, 7  ;;  %v8789_v24 = vld [vmem:[#allocation3 + $0x31] sm:$0x1] }
  0xc3   :  { %v173_v18 = vsel %vm154_vm8, %v172_v15, %v168_v8  ;;  %v2083_v51 = vsel %vm280_vm3, %v2081_v40, %v2082_v41  ;;  %v2004_v59 = vsel %vm223_vm5, %v2003_v53, %v2002_v56  ;;  %v2046_v44 = vsel %vm223_vm5, %v2045_v5, %v2044_v1  ;;  %v2104_v15 = vld [vmem:[#allocation3 + $0x66] sm:$0x1]  ;;  %v2144_v1 = vld [vmem:[#allocation3 + $0x47] sm:$0x1] }
  0xc4   :  { %1646 = vrot.lane.b32.xlu1 %v1636_v45, %s13200_s0  ;;  %v102_v50 = vpop.xlane.xlu1 %101  ;;  %v99_v38 = vpop.xlane.xlu0 %98  ;;  %v1889_v45 = vld [vmem:[#allocation3 + $0x11] sm:$0x1]  ;;  %v222_v12 = vsel %vm221_vm2, %v173_v18, %v220_v20  ;;  %v1867_v35 = vsel %vm284_vm4, %v1865_v10, %v1866_v61  ;;  %v2087_v23 = vrot.slane %v8765_v46, 5  ;;  %vm13213_vm10 = vcmask 224368   ;;  %v8810_v20 = vld [vmem:[#allocation3 + $0x67] sm:$0x1] }
  0xc5   :  { %v181_v29 = vrot.slane %v102_v50, %v8683_v57  ;;  %v177_v52 = vrot.slane %v99_v38, %v8667_v34  ;;  %v1904_v26 = vrot.slane %v1889_v45, 7  ;;  %v2085_v30 = vsel %vm221_vm2, %v2084_v11, %v2083_v51  ;;  %v8791_v45 = vld [vmem:[#allocation3 + $0x76] sm:$0x1]  ;;  %v1973_v51 = vld [vmem:[#allocation3 + $0x13] sm:$0x1]  ;;  %s13204_s0 = smov 82  }
  0xc6   :  { %v1907_v48 = vrot.slane %v8768_v19, 6  ;;  %v2124_v6 = vsel %vm219_vm1, %v2123_v4, %v2102_v25  ;;  %v1946_v22 = vrot.slane %v1931_v62, 7  ;;  %v1869_v42 = vsel %vm223_vm5, %v1868_v0, %v1867_v35 }
  0xc7   :  { %v182_v47 = vsel %vm154_vm8, %v181_v29, %v177_v52  ;;  %v1905_v13 = vsel %vm219_vm1, %v1904_v26, %v1888_v31  ;;  %v2126_v52 = vrot.slane %v2104_v15, 6  ;;  %v1949_v18 = vrot.slane %v1932_v17, 6  ;;  %v8831_v17 = vld [vmem:[#allocation3 + $0x23] sm:$0x1] }
  0xc8   :  { %v8749_v58 = vpop.xlane.xlu1 %107  ;;  %v8751_v39 = vpop.xlane.xlu0 %104  ;;  %v224_v38 = vsel %vm223_vm5, %v182_v47, %v222_v12  ;;  %v1906_v29 = vsel %vm280_vm3, %v1904_v26, %v1905_v13  ;;  %v8799_v41 = vsel %vm288_vm6, %v2003_v53, %v2004_v59  ;;  %v8802_v16 = vsel %vm288_vm6, %v2045_v5, %v2046_v44  ;;  %v2187_v59 = vld [vmem:[#allocation3 + $0x58] sm:$0x1] }
  0xc9   :  { %v190_v8 = vrot.slane %v8749_v58, %v8683_v57  ;;  %v186_v50 = vrot.slane %v8751_v39, %v8667_v34  ;;  %v2125_v58 = vsel %vm280_vm3, %v2123_v4, %v2124_v6  ;;  %v1947_v39 = vsel %vm219_vm1, %v1946_v22, %v1930_v27  ;;  %v2186_v6 = vld [vmem:[#allocation3 + $0x48] sm:$0x1] }
  0xca   :  { %v8796_v9 = vsel %vm230_vm9, %v224_v38, 0.0  ;;  %v2086_v56 = vsel %vm284_vm4, %v2084_v11, %v2085_v30  ;;  %v8806_v61 = vsel %vm288_vm6, %v1868_v0, %v1869_v42  ;;  %v1908_v31 = vsel %vm221_vm2, %v1907_v48, %v1906_v29  ;;  %v8816_v11 = vld [vmem:[#allocation3 + $0x32] sm:$0x1]  ;;  %v8836_v42 = vld [vmem:[#allocation3 + $0x68] sm:$0x1] }
  0xcb   :  { %v1948_v47 = vsel %vm280_vm3, %v1946_v22, %v1947_v39  ;;  %v2165_v19 = vrot.slane %v2145_v54, 7  ;;  %v191_v26 = vsel %vm154_vm8, %v190_v8, %v186_v50  ;;  %v1910_v53 = vrot.slane %v8789_v24, 5  ;;  %v1972_v8 = vld [vmem:[#allocation3 + $0x3] sm:$0x1]  ;;  %v8838_v54 = vld [vmem:[#allocation3 + $0x14] sm:$0x1] }
  0xcc   :  { %v114_v60 = vpop.xlane.xlu1 %113  ;;  %v111_v55 = vpop.xlane.xlu0 %110  ;;  %v2127_v5 = vsel %vm221_vm2, %v2126_v52, %v2125_v58  ;;  %v2129_v12 = vrot.slane %v8791_v45, 5  ;;  %vm13195_vm11 = vcmask 339168   ;;  %v2088_v62 = vsel %vm223_vm5, %v2087_v23, %v2086_v56  ;;  %v8849_v45 = vld [vmem:[#allocation3 + $0x77] sm:$0x1] }
  0xcd   :  { %v199_v10 = vrot.slane %v114_v60, %v8683_v57  ;;  %v195_v40 = vrot.slane %v111_v55, %v8667_v34  ;;  %v1950_v60 = vsel %vm221_vm2, %v1949_v18, %v1948_v47  ;;  %v2166_v55 = vsel %vm219_vm1, %v2165_v19, %v2144_v1  ;;  %v2229_v1 = vld [vmem:[#allocation3 + $0x59] sm:$0x1] }
  0xce   :  { %v1909_v13 = vsel %vm284_vm4, %v1907_v48, %v1908_v31  ;;  %v2168_v15 = vrot.slane %v8810_v20, 6  ;;  %v2128_v50 = vsel %vm284_vm4, %v2126_v52, %v2127_v5  ;;  %v1952_v38 = vrot.slane %v8816_v11, 5  ;;  %v8862_v20 = vld [vmem:[#allocation3 + $0x78] sm:$0x1] }
  0xcf   :  { %v200_v0 = vsel %vm154_vm8, %v199_v10, %v195_v40  ;;  %v2167_v27 = vsel %vm280_vm3, %v2165_v19, %v2166_v55  ;;  %v1988_v30 = vrot.slane %v1973_v51, 7  ;;  %vm13193_vm12 = vcmask 453968  }
  0xd0   :  { %v120_v14 = vpop.xlane.xlu1 %119  ;;  %v117_v33 = vpop.xlane.xlu0 %116  ;;  %v1951_v48 = vsel %vm284_vm4, %v1949_v18, %v1950_v60  ;;  %v2207_v29 = vrot.slane %v2187_v59, 7  ;;  %vm13194_vm13 = vcmask 568768   ;;  %v2130_v18 = vsel %vm223_vm5, %v2129_v12, %v2128_v50  ;;  %v2057_v50 = vld [vmem:[#allocation3 + $0x15] sm:$0x1] }
  0xd1   :  { %v208_v44 = vrot.slane %v120_v14, %v8683_v57  ;;  %v204_v35 = vrot.slane %v117_v33, %v8667_v34  ;;  %v225_v14 = vsel %vm219_vm1, %v200_v0, %v191_v26  ;;  %v8844_v33 = vsel %vm288_vm6, %v2087_v23, %v2088_v62  ;;  %v8857_v23 = vld [vmem:[#allocation3 + $0x33] sm:$0x1]  ;;  %v2014_v26 = vld [vmem:[#allocation3 + $0x4] sm:$0x1]  ;;  %v2228_v62 = vld [vmem:[#allocation3 + $0x49] sm:$0x1] }
  0xd2   :  { %v1989_v58 = vsel %vm219_vm1, %v1988_v30, %v1972_v8  ;;  %v2169_v46 = vsel %vm221_vm2, %v2168_v15, %v2167_v27  ;;  %v2208_v56 = vsel %vm219_vm1, %v2207_v29, %v2186_v6  ;;  %vm13196_vm14 = vcmask 683568  }
  0xd3   :  { %v209_v39 = vsel %vm154_vm8, %v208_v44, %v204_v35  ;;  %v1953_v31 = vsel %vm223_vm5, %v1952_v38, %v1951_v48  ;;  %v1991_v47 = vrot.slane %v8831_v17, 6  ;;  %v2210_v19 = vrot.slane %v8836_v42, 6  ;;  %v2275_v42 = vld [vmem:[#allocation3 + $0x4a] sm:$0x1] }
  0xd4   :  { %v126_v25 = vpop.xlane.xlu1 %125  ;;  %v123_v4 = vpop.xlane.xlu0 %122  ;;  %v2030_v5 = vrot.slane %v8838_v54, 7  ;;  %v2171_v51 = vrot.slane %v8849_v45, 5  ;;  %v1990_v0 = vsel %vm280_vm3, %v1988_v30, %v1989_v58  ;;  %v8878_v44 = vsel %vm288_vm6, %v2129_v12, %v2130_v18  ;;  %v8890_v30 = vld [vmem:[#allocation3 + $0x25] sm:$0x1]  ;;  %v2276_v12 = vld [vmem:[#allocation3 + $0x5a] sm:$0x1] }
  0xd5   :  { %v217_v22 = vrot.slane %v126_v25, %v8683_v57  ;;  %v213_v10 = vrot.slane %v123_v4, %v8667_v34  ;;  %v1911_v57 = vsel %vm223_vm5, %v1910_v53, %v1909_v13  ;;  %v2209_v25 = vsel %vm280_vm3, %v2207_v29, %v2208_v56  ;;  %v8870_v4 = vld [vmem:[#allocation3 + $0x24] sm:$0x1]  ;;  %v8881_v13 = vld [vmem:[#allocation3 + $0x69] sm:$0x1] }
  0xd6   :  { %v8875_v59 = vsel %vm288_vm6, %v1910_v53, %v1911_v57  ;;  %v2170_v35 = vsel %vm284_vm4, %v2168_v15, %v2169_v46  ;;  %v2249_v8 = vrot.slane %v2229_v1, 7  ;;  %v226_v27 = vsel %vm221_vm2, %v209_v39, %v225_v14  ;;  %v8903_v14 = vld [vmem:[#allocation3 + $0x6a] sm:$0x1]  ;;  %v2099_v1 = vld [vmem:[#allocation3 + $0x16] sm:$0x1] }
  0xd7   :  { %v218_v11 = vsel %vm154_vm8, %v217_v22, %v213_v10  ;;  %v8886_v17 = vsel %vm288_vm6, %v1952_v38, %v1953_v31  ;;  %v1994_v24 = vrot.slane %v8857_v23, 5  ;;  %v2031_v53 = vsel %vm219_vm1, %v2030_v5, %v2014_v26  ;;  %v8895_v10 = vld [vmem:[#allocation3 + $0x34] sm:$0x1]  ;;  %v2056_v38 = vld [vmem:[#allocation3 + $0x5] sm:$0x1] }
  0xd8   :  { %v339_v52 = vpop.permute.xlu1 %338  ;;  %v341_v40 = vpop.permute.xlu0 %340  ;;  %v227_v15 = vsel %vm223_vm5, %v218_v11, %v226_v27  ;;  %vm13197_vm15 = vcmask 798368   ;;  %v1992_v6 = vsel %vm221_vm2, %v1991_v47, %v1990_v0  ;;  %v2211_v22 = vsel %vm221_vm2, %v2210_v19, %v2209_v25  ;;  %v8912_v11 = vld [vmem:[#allocation3 + $0x79] sm:$0x1]  ;;  %v2098_v25 = vld [vmem:[#allocation3 + $0x6] sm:$0x1] }
  0xd9   :  { %345 = vst.msk [vmem:[#allocation2] sm:$0xf] %vm13213_vm10, %v339_v52  ;;  %346 = vst.msk [vmem:[#allocation2 + $0x8] sm:$0xf] %vm13213_vm10, %v341_v40  ;;  %v2250_v48 = vsel %vm219_vm1, %v2249_v8, %v2228_v62  ;;  %v2172_v29 = vsel %vm223_vm5, %v2171_v51, %v2170_v35  ;;  %v2213_v54 = vrot.slane %v8862_v20, 5  ;;  %v2033_v52 = vrot.slane %v8870_v4, 6 }
  0xda   :  { %v2072_v40 = vrot.slane %v2057_v50, 7  ;;  %v2032_v39 = vsel %vm280_vm3, %v2030_v5, %v2031_v53  ;;  %v2252_v18 = vrot.slane %v8881_v13, 6  ;;  %v2075_v46 = vrot.slane %v8890_v30, 6 }
  0xdb   :  { %v2296_v56 = vrot.slane %v2276_v12, 7  ;;  %v1993_v31 = vsel %vm284_vm4, %v1991_v47, %v1992_v6  ;;  %v2212_v26 = vsel %vm284_vm4, %v2210_v19, %v2211_v22  ;;  %v2251_v0 = vsel %vm280_vm3, %v2249_v8, %v2250_v48  ;;  %v2318_v19 = vld [vmem:[#allocation3 + $0x5b] sm:$0x1]  ;;  %v8926_v8 = vld [vmem:[#allocation3 + $0x35] sm:$0x1] }
  0xdc   :  { %v382_v60 = vpop.permute.xlu1 %381  ;;  %v427_v55 = vpop.permute.xlu0 %426  ;;  %v234_v5 = vsel %vm230_vm9, %v227_v15, 0.0  ;;  %vm13198_vm0 = vcmask 913168   ;;  %v2299_v47 = vrot.slane %v8903_v14, 6  ;;  %v2034_v35 = vsel %vm221_vm2, %v2033_v52, %v2032_v39  ;;  %v8937_v22 = vld [vmem:[#allocation3 + $0x7a] sm:$0x1] }
  0xdd   :  { %388 = vst.msk [vmem:[#allocation2] sm:$0xf] %vm13195_vm11, %v382_v60  ;;  %v2297_v62 = vsel %vm219_vm1, %v2296_v56, %v2275_v42  ;;  %v8921_v60 = vld [vmem:[#allocation3 + $0x26] sm:$0x1]  ;;  %v2036_v13 = vrot.slane %v8895_v10, 5  ;;  %v2114_v50 = vrot.slane %v2099_v1, 7  ;;  %v1995_v30 = vsel %vm223_vm5, %v1994_v24, %v1993_v31 }
  0xde   :  { %v2214_v12 = vsel %vm223_vm5, %v2213_v54, %v2212_v26  ;;  %v2253_v15 = vsel %vm221_vm2, %v2252_v18, %v2251_v0  ;;  %v2317_v48 = vld [vmem:[#allocation3 + $0x4b] sm:$0x1]  ;;  %v2338_v14 = vrot.slane %v2318_v19, 7  ;;  %vm645_vm8 = vcmask 1027968   ;;  %v2360_v31 = vld [vmem:[#allocation3 + $0x5c] sm:$0x1] }
  0xdf   :  { %v2115_v42 = vsel %vm219_vm1, %v2114_v50, %v2098_v25  ;;  %v2078_v39 = vrot.slane %v8926_v8, 5  ;;  %v8951_v26 = vsel %vm288_vm6, %v2171_v51, %v2172_v29  ;;  %v2254_v0 = vsel %vm284_vm4, %v2252_v18, %v2253_v15  ;;  %v8962_v25 = vld [vmem:[#allocation3 + $0x6b] sm:$0x1]  ;;  %v8971_v29 = vld [vmem:[#allocation3 + $0x27] sm:$0x1] }
  0xe0   :  { %v384_v57 = vpop.permute.xlu1 %383  ;;  %232 = vadd.xlane.f32.xlu0 %v8796_v9  ;;  %v470_v58 = vpop.permute.xlu0 %469  ;;  %v2073_v9 = vsel %vm219_vm1, %v2072_v40, %v2056_v38  ;;  %v2255_v38 = vrot.slane %v8912_v11, 5  ;;  %v2116_v1 = vsel %vm280_vm3, %v2114_v50, %v2115_v42  ;;  %v8956_v11 = vsel %vm288_vm6, %v1994_v24, %v1995_v30  ;;  %v2183_v19 = vld [vmem:[#allocation3 + $0x18] sm:$0x1]  ;;  %v2182_v15 = vld [vmem:[#allocation3 + $0x8] sm:$0x1] }
  0xe1   :  { %389 = vst.msk [vmem:[#allocation2 + $0x8] sm:$0xf] %vm13195_vm11, %v384_v57  ;;  %v2074_v4 = vsel %vm280_vm3, %v2072_v40, %v2073_v9  ;;  %v2117_v40 = vrot.slane %v8921_v60, 6  ;;  %v2141_v57 = vld [vmem:[#allocation3 + $0x17] sm:$0x1]  ;;  %v8967_v51 = vsel %vm288_vm6, %v2213_v54, %v2214_v12  ;;  %v2302_v23 = vrot.slane %v8937_v22, 5 }
  0xe2   :  { %432 = vst.msk [vmem:[#allocation2 + $0x8] sm:$0xf] %vm13193_vm12, %v427_v55  ;;  %v2298_v55 = vsel %vm280_vm3, %v2296_v56, %v2297_v62  ;;  %v2076_v6 = vsel %vm221_vm2, %v2075_v46, %v2074_v4  ;;  %v8960_v9 = vld [vmem:[#allocation3 + $0x36] sm:$0x1]  ;;  %v2140_v4 = vld [vmem:[#allocation3 + $0x7] sm:$0x1]  ;;  %v2339_v24 = vsel %vm219_vm1, %v2338_v14, %v2317_v48 }
  0xe3   :  { %475 = vst.msk [vmem:[#allocation2 + $0x8] sm:$0xf] %vm13194_vm13, %v470_v58  ;;  %v2035_v58 = vsel %vm284_vm4, %v2033_v52, %v2034_v35  ;;  %v2300_v56 = vsel %vm221_vm2, %v2299_v47, %v2298_v55  ;;  %v2077_v52 = vsel %vm284_vm4, %v2075_v46, %v2076_v6  ;;  %v2156_v18 = vrot.slane %v2141_v57, 7  ;;  %v2359_v46 = vld [vmem:[#allocation3 + $0x4c] sm:$0x1] }
  0xe4   :  { %v425_v27 = vpop.permute.xlu1 %424  ;;  %v513_v53 = vpop.permute.xlu0 %512  ;;  %v2301_v20 = vsel %vm284_vm4, %v2299_v47, %v2300_v56  ;;  %v2118_v54 = vsel %vm221_vm2, %v2117_v40, %v2116_v1  ;;  %v2380_v60 = vrot.slane %v2360_v31, 7  ;;  %vm693_vm9 = vcmask 1044464   ;;  %v2402_v6 = vld [vmem:[#allocation3 + $0x5d] sm:$0x1]  ;;  %v8995_v1 = vld [vmem:[#allocation3 + $0x28] sm:$0x1] }
  0xe5   :  { %431 = vst.msk [vmem:[#allocation2] sm:$0xf] %vm13193_vm12, %v425_v27  ;;  %vm694_vm12 = vcmask 97284   ;;  %v2256_v35 = vsel %vm223_vm5, %v2255_v38, %v2254_v0  ;;  %v2079_v8 = vsel %vm223_vm5, %v2078_v39, %v2077_v52  ;;  %v2341_v55 = vrot.slane %v8962_v25, 6  ;;  %v8984_v27 = vld [vmem:[#allocation3 + $0x6c] sm:$0x1] }
  0xe6   :  { %518 = vst.msk [vmem:[#allocation2 + $0x8] sm:$0xf] %vm13196_vm14, %v513_v53  ;;  %v2157_v50 = vsel %vm219_vm1, %v2156_v18, %v2140_v4  ;;  %v2120_v53 = vrot.slane %v8960_v9, 5  ;;  %v2340_v47 = vsel %vm280_vm3, %v2338_v14, %v2339_v24  ;;  %v2159_v30 = vrot.slane %v8971_v29, 6  ;;  %v9010_v52 = vld [vmem:[#allocation3 + $0x37] sm:$0x1] }
  0xe7   :  { %v2381_v12 = vsel %vm219_vm1, %v2380_v60, %v2359_v46  ;;  %v2303_v42 = vsel %vm223_vm5, %v2302_v23, %v2301_v20  ;;  %v2119_v57 = vsel %vm284_vm4, %v2117_v40, %v2118_v54  ;;  %v2158_v56 = vsel %vm280_vm3, %v2156_v18, %v2157_v50  ;;  %v2401_v25 = vld [vmem:[#allocation3 + $0x4d] sm:$0x1]  ;;  %v9023_v18 = vld [vmem:[#allocation3 + $0x7c] sm:$0x1]  ;;  %v2674_v50 = vld [vmem:[#allocation3 + $0x52] sm:$0x1] }
  0xe8   :  { %v468_v62 = vpop.permute.xlu1 %467  ;;  %235 = vadd.xlane.f32.xlu1 %v234_v5  ;;  %v556_v45 = vpop.permute.xlu0 %555  ;;  %v2037_v5 = vsel %vm223_vm5, %v2036_v13, %v2035_v58  ;;  %v8992_v58 = vld [vmem:[#allocation3 + $0x7b] sm:$0x1]  ;;  %v2198_v14 = vrot.slane %v2183_v19, 7  ;;  %v9005_v0 = vsel %vm288_vm6, %v2255_v38, %v2256_v35  ;;  %v9008_v40 = vsel %vm288_vm6, %v2078_v39, %v2079_v8  ;;  %v2225_v38 = vld [vmem:[#allocation3 + $0x19] sm:$0x1] }
  0xe9   :  { %474 = vst.msk [vmem:[#allocation2] sm:$0xf] %vm13194_vm13, %v468_v62  ;;  %vm13206_vm13 = vcmask 1031168   ;;  %v9002_v31 = vsel %vm288_vm6, %v2036_v13, %v2037_v5  ;;  %v2383_v9 = vrot.slane %v8984_v27, 6  ;;  %vm738_vm11 = vcmask 207968  }
  0xea   :  { %561 = vst.msk [vmem:[#allocation2 + $0x8] sm:$0xf] %vm13197_vm15, %v556_v45  ;;  %v2342_v4 = vsel %vm221_vm2, %v2341_v55, %v2340_v47  ;;  %v2382_v62 = vsel %vm280_vm3, %v2380_v60, %v2381_v12  ;;  %v2199_v10 = vsel %vm219_vm1, %v2198_v14, %v2182_v15  ;;  %v9016_v13 = vld [vmem:[#allocation3 + $0x6d] sm:$0x1]  ;;  %v2422_v45 = vrot.slane %v2402_v6, 7 }
  0xeb   :  { %v9019_v24 = vsel %vm288_vm6, %v2302_v23, %v2303_v42  ;;  %v2121_v39 = vsel %vm223_vm5, %v2120_v53, %v2119_v57  ;;  %v2160_v29 = vsel %vm221_vm2, %v2159_v30, %v2158_v56  ;;  %v2201_v46 = vrot.slane %v8995_v1, 6  ;;  %v9026_v5 = vld [vmem:[#allocation3 + $0x29] sm:$0x1]  ;;  %v9036_v12 = vld [vmem:[#allocation3 + $0x38] sm:$0x1] }
  0xec   :  { %v511_v22 = vpop.permute.xlu1 %510  ;;  %v599_v48 = vpop.permute.xlu0 %598  ;;  %v2344_v60 = vrot.slane %v8992_v58, 5  ;;  %v2162_v19 = vrot.slane %v9010_v52, 5  ;;  %v2200_v35 = vsel %vm280_vm3, %v2198_v14, %v2199_v10  ;;  %v2423_v23 = vsel %vm219_vm1, %v2422_v45, %v2401_v25  ;;  %v2224_v8 = vld [vmem:[#allocation3 + $0x9] sm:$0x1]  ;;  %v2673_v56 = vld [vmem:[#allocation3 + $0x42] sm:$0x1] }
  0xed   :  { %517 = vst.msk [vmem:[#allocation2] sm:$0xf] %vm13196_vm14, %v511_v22  ;;  %v2343_v27 = vsel %vm284_vm4, %v2341_v55, %v2342_v4  ;;  %v2384_v47 = vsel %vm221_vm2, %v2383_v9, %v2382_v62  ;;  %v2425_v15 = vrot.slane %v9016_v13, 6  ;;  %v2240_v6 = vrot.slane %v2225_v38, 7  ;;  %v9048_v25 = vld [vmem:[#allocation3 + $0x62] sm:$0x1] }
  0xee   :  { %604 = vst.msk [vmem:[#allocation2 + $0x8] sm:$0xf] %vm13198_vm0, %v599_v48  ;;  %vm781_vm14 = vcmask 322768   ;;  %v9040_v22 = vsel %vm288_vm6, %v2120_v53, %v2121_v39  ;;  %v2161_v48 = vsel %vm284_vm4, %v2159_v30, %v2160_v29  ;;  %v2424_v42 = vsel %vm280_vm3, %v2422_v45, %v2423_v23  ;;  %v2272_v62 = vld [vmem:[#allocation3 + $0x1a] sm:$0x1] }
  0xef   :  { %v2243_v57 = vrot.slane %v9026_v5, 6  ;;  %v2386_v55 = vrot.slane %v9023_v18, 5  ;;  %v2202_v1 = vsel %vm221_vm2, %v2201_v46, %v2200_v35  ;;  %v2241_v14 = vsel %vm219_vm1, %v2240_v6, %v2224_v8  ;;  %v9055_v38 = vld [vmem:[#allocation3 + $0x7d] sm:$0x1]  ;;  %v9057_v39 = vld [vmem:[#allocation3 + $0x39] sm:$0x1] }
  0xf0   :  { %v554_v20 = vpop.permute.xlu1 %553  ;;  %v642_v54 = vpop.permute.xlu0 %641  ;;  %v2694_v4 = vrot.slane %v2674_v50, 7  ;;  %v2345_v30 = vsel %vm223_vm5, %v2344_v60, %v2343_v27  ;;  %v2385_v13 = vsel %vm284_vm4, %v2383_v9, %v2384_v47  ;;  %v2242_v29 = vsel %vm280_vm3, %v2240_v6, %v2241_v14  ;;  %v2271_v35 = vld [vmem:[#allocation3 + $0xa] sm:$0x1]  ;;  %v2716_v23 = vld [vmem:[#allocation3 + $0x53] sm:$0x1] }
  0xf1   :  { %560 = vst.msk [vmem:[#allocation2] sm:$0xf] %vm13197_vm15, %v554_v20  ;;  %vm9063_vm15 = vmor %vm694_vm12, %vm693_vm9  ;;  %v2163_v9 = vsel %vm223_vm5, %v2162_v19, %v2161_v48  ;;  %v2426_v20 = vsel %vm221_vm2, %v2425_v15, %v2424_v42  ;;  %v2203_v8 = vsel %vm284_vm4, %v2201_v46, %v2202_v1  ;;  %v2244_v50 = vsel %vm221_vm2, %v2243_v57, %v2242_v29  ;;  %v9077_v47 = vld [vmem:[#allocation3 + $0x2a] sm:$0x1]  ;;  %v9110_v29 = vld [vmem:[#allocation3 + $0x72] sm:$0x1] }
  0xf2   :  { %647 = vst.msk [vmem:[#allocation2 + $0x8] sm:$0xf] %vm645_vm8, %v642_v54  ;;  %v2695_v54 = vsel %vm219_vm1, %v2694_v4, %v2673_v56  ;;  %v2697_v27 = vrot.slane %v9048_v25, 6  ;;  %v2287_v6 = vrot.slane %v2272_v62, 7  ;;  %v2387_v42 = vsel %vm223_vm5, %v2386_v55, %v2385_v13 }
  0xf3   :  { %v2428_v56 = vrot.slane %v9055_v38, 5  ;;  %v2696_v14 = vsel %vm280_vm3, %v2694_v4, %v2695_v54  ;;  %v2427_v1 = vsel %vm284_vm4, %v2425_v15, %v2426_v20  ;;  %v2246_v25 = vrot.slane %v9057_v39, 5  ;;  %v2757_v54 = vld [vmem:[#allocation3 + $0x44] sm:$0x1] }
  0xf4   :  { %v597_v10 = vpop.permute.xlu1 %596  ;;  %v685_v53 = vpop.permute.xlu0 %684  ;;  %v2288_v62 = vsel %vm219_vm1, %v2287_v6, %v2271_v35  ;;  %v2736_v13 = vrot.slane %v2716_v23, 7  ;;  %v9099_v4 = vsel %vm288_vm6, %v2344_v60, %v2345_v30  ;;  %v9104_v15 = vsel %vm288_vm6, %v2162_v19, %v2163_v9  ;;  %v2313_v60 = vld [vmem:[#allocation3 + $0xb] sm:$0x1]  ;;  %v9122_v9 = vld [vmem:[#allocation3 + $0x3a] sm:$0x1] }
  0xf5   :  { %603 = vst.msk [vmem:[#allocation2] sm:$0xf] %vm13198_vm0, %v597_v10  ;;  %v687_v18 = vrot.slane %v685_v53, 4  ;;  %vm824_vm0 = vcmask 437568   ;;  %v2715_v10 = vld [vmem:[#allocation3 + $0x43] sm:$0x1]  ;;  %v9119_v30 = vsel %vm288_vm6, %v2386_v55, %v2387_v42  ;;  %v2289_v20 = vsel %vm280_vm3, %v2287_v6, %v2288_v62 }
  0xf6   :  { %1882 = vrot.lane.b32.xlu0 %v8742_v21, %s7558_s23  ;;  %v9083_v21 = vld [vmem:[#allocation3 + $0x1b] sm:$0x1]  ;;  %v13276_v38 = vrot.slane %v9036_v12, 5  ;;  %vm867_vm12 = vcmask 552368   ;;  %v2290_v58 = vrot.slane %v9077_v47, 6  ;;  %v2737_v52 = vsel %vm219_vm1, %v2736_v13, %v2715_v10 }
  0xf7   :  { %v690_v48 = vsel %vm13206_vm13, %v687_v18, %v685_v53  ;;  %v9090_v53 = vld [vmem:[#allocation3 + $0x63] sm:$0x1]  ;;  %v2758_v18 = vld [vmem:[#allocation3 + $0x54] sm:$0x1]  ;;  %v2329_v19 = vrot.slane %v9083_v21, 7  ;;  %v2738_v55 = vsel %vm280_vm3, %v2736_v13, %v2737_v52  ;;  %v2293_v12 = vrot.slane %v9122_v9, 5 }
  0xf8   :  { %v640_v45 = vpop.permute.xlu1 %639  ;;  %697 = vst.msk [vmem:[#allocation2 + $0x8] sm:$0xff] %vm9063_vm15, %v690_v48  ;;  %v735_v46 = vpop.permute.xlu0 %734  ;;  %v2205_v39 = vsel %vm223_vm5, %v13276_v38, %v2203_v8  ;;  %v9128_v47 = vld [vmem:[#allocation3 + $0x73] sm:$0x1]  ;;  %v9131_v48 = vld [vmem:[#allocation3 + $0x2b] sm:$0x1]  ;;  %v2778_v42 = vrot.slane %v2758_v18, 7  ;;  %v13277_v6 = vmov %v13276_v38 }
  0xf9   :  { %646 = vst.msk [vmem:[#allocation2] sm:$0xf] %vm645_vm8, %v640_v45  ;;  %1880 = vrot.lane.b32.xlu1 %v8806_v61, %s7558_s23  ;;  %v2245_v45 = vsel %vm284_vm4, %v2243_v57, %v2244_v50  ;;  %v2698_v61 = vsel %vm221_vm2, %v2697_v27, %v2696_v14  ;;  %v2429_v57 = vsel %vm223_vm5, %v2428_v56, %v2427_v1  ;;  %v2700_v50 = vrot.slane %v9110_v29, 5  ;;  %v9143_v1 = vld [vmem:[#allocation3 + $0x64] sm:$0x1] }
  0xfa   :  { %740 = vst.msk [vmem:[#allocation2 + $0xc] sm:$0xf] %vm738_vm11, %v735_v46  ;;  %1924 = vrot.lane.b32.xlu0 %v8745_v49, %s7559_s24  ;;  %v2739_v49 = vrot.slane %v9090_v53, 6  ;;  %v2247_v8 = vsel %vm223_vm5, %v2246_v25, %v2245_v45  ;;  %v9139_v10 = vsel %vm288_vm6, %v13277_v6, %v2205_v39  ;;  %v2699_v21 = vsel %vm284_vm4, %v2697_v27, %v2698_v61  ;;  %v2356_v62 = vld [vmem:[#allocation3 + $0x1c] sm:$0x1] }
  0xfb   :  { %v2330_v46 = vsel %vm219_vm1, %v2329_v19, %v2313_v60  ;;  %v9148_v53 = vsel %vm288_vm6, %v2428_v56, %v2429_v57  ;;  %v9152_v13 = vld [vmem:[#allocation3 + $0x3b] sm:$0x1]  ;;  %v2779_v38 = vsel %vm219_vm1, %v2778_v42, %v2757_v54  ;;  %v2355_v27 = vld [vmem:[#allocation3 + $0xc] sm:$0x1]  ;;  %v9157_v45 = vsel %vm288_vm6, %v2246_v25, %v2247_v8  ;;  %v2800_v61 = vld [vmem:[#allocation3 + $0x55] sm:$0x1] }
  0xfc   :  { %v683_v35 = vpop.permute.xlu1 %682  ;;  %v778_v23 = vpop.permute.xlu0 %777  ;;  %v2740_v18 = vsel %vm221_vm2, %v2739_v49, %v2738_v55  ;;  %v9161_v56 = vld [vmem:[#allocation3 + $0x2c] sm:$0x1]  ;;  %v2701_v57 = vsel %vm223_vm5, %v2700_v50, %v2699_v21  ;;  %v2781_v25 = vrot.slane %v9143_v1, 6  ;;  %v2371_v54 = vrot.slane %v2356_v62, 7  ;;  %v9180_v6 = vld [vmem:[#allocation3 + $0x2d] sm:$0x1] }
  0xfd   :  { %v686_v14 = vrot.slane %v683_v35, 4  ;;  %783 = vst.msk [vmem:[#allocation2 + $0xc] sm:$0xf] %vm781_vm14, %v778_v23  ;;  %1922 = vrot.lane.b32.xlu1 %v8875_v59, %s7559_s24  ;;  %v2291_v59 = vsel %vm221_vm2, %v2290_v58, %v2289_v20  ;;  %v2331_v20 = vsel %vm280_vm3, %v2329_v19, %v2330_v46  ;;  %v2398_v23 = vld [vmem:[#allocation3 + $0x1d] sm:$0x1]  ;;  %v2742_v55 = vrot.slane %v9128_v47, 5 }
  0xfe   :  { %1966 = vrot.lane.b32.xlu0 %v8758_v28, %s7560_s25  ;;  %v2332_v28 = vrot.slane %v9131_v48, 6  ;;  %v2292_v8 = vsel %vm284_vm4, %v2290_v58, %v2291_v59  ;;  %v2335_v48 = vrot.slane %v9152_v13, 5  ;;  %v2780_v19 = vsel %vm280_vm3, %v2778_v42, %v2779_v38  ;;  %v2397_v58 = vld [vmem:[#allocation3 + $0xd] sm:$0x1]  ;;  %v2842_v62 = vld [vmem:[#allocation3 + $0x56] sm:$0x1] }
  0xff   :  { %v689_v39 = vsel %vm13206_vm13, %v686_v14, %v683_v35  ;;  %v9170_v35 = vld [vmem:[#allocation3 + $0x65] sm:$0x1]  ;;  %v2741_v21 = vsel %vm284_vm4, %v2739_v49, %v2740_v18  ;;  %v2372_v46 = vsel %vm219_vm1, %v2371_v54, %v2355_v27  ;;  %v2820_v1 = vrot.slane %v2800_v61, 7  ;;  %v9188_v59 = vld [vmem:[#allocation3 + $0x74] sm:$0x1] }
 0x100   :  { %696 = vst.msk [vmem:[#allocation2] sm:$0xff] %vm9063_vm15, %v689_v39  ;;  %v733_v52 = vpop.permute.xlu1 %732  ;;  %v821_v60 = vpop.permute.xlu0 %820  ;;  %v2799_v14 = vld [vmem:[#allocation3 + $0x45] sm:$0x1]  ;;  %v2333_v47 = vsel %vm221_vm2, %v2332_v28, %v2331_v20  ;;  %v2373_v42 = vsel %vm280_vm3, %v2371_v54, %v2372_v46  ;;  %v2823_v38 = vrot.slane %v9170_v35, 6  ;;  %v2413_v39 = vrot.slane %v2398_v23, 7 }
 0x101   :  { %739 = vst.msk [vmem:[#allocation2 + $0x4] sm:$0xf] %vm738_vm11, %v733_v52  ;;  %1964 = vrot.lane.b32.xlu1 %v8886_v17, %s7560_s25  ;;  %v2374_v17 = vrot.slane %v9161_v56, 6  ;;  %v2294_v49 = vsel %vm223_vm5, %v2293_v12, %v2292_v8  ;;  %v2782_v27 = vsel %vm221_vm2, %v2781_v25, %v2780_v19  ;;  %v2821_v18 = vsel %vm219_vm1, %v2820_v1, %v2799_v14  ;;  %v2841_v35 = vld [vmem:[#allocation3 + $0x46] sm:$0x1] }
 0x102   :  { %826 = vst.msk [vmem:[#allocation2 + $0xc] sm:$0xf] %vm824_vm0, %v821_v60  ;;  %2008 = vrot.lane.b32.xlu0 %v8799_v41, %s7561_s26  ;;  %v2416_v56 = vrot.slane %v9180_v6, 6  ;;  %v2743_v61 = vsel %vm223_vm5, %v2742_v55, %v2741_v21  ;;  %v9203_v60 = vld [vmem:[#allocation3 + $0x3c] sm:$0x1]  ;;  %v2822_v20 = vsel %vm280_vm3, %v2820_v1, %v2821_v18  ;;  %v2414_v54 = vsel %vm219_vm1, %v2413_v39, %v2397_v58 }
 0x103   :  { %v2862_v23 = vrot.slane %v2842_v62, 7  ;;  %v2334_v8 = vsel %vm284_vm4, %v2332_v28, %v2333_v47  ;;  %v2784_v19 = vrot.slane %v9188_v59, 5  ;;  %v2375_v14 = vsel %vm221_vm2, %v2374_v17, %v2373_v42  ;;  %v2670_v21 = vld [vmem:[#allocation3 + $0x12] sm:$0x1]  ;;  %v9227_v58 = vld [vmem:[#allocation3 + $0x3d] sm:$0x1] }
 0x104   :  { %v776_v52 = vpop.permute.xlu1 %775  ;;  %v864_v41 = vpop.permute.xlu0 %863  ;;  %v2415_v6 = vsel %vm280_vm3, %v2413_v39, %v2414_v54  ;;  %v9218_v46 = vsel %vm288_vm6, %v2700_v50, %v2701_v57  ;;  %v2783_v28 = vsel %vm284_vm4, %v2781_v25, %v2782_v27  ;;  %v2824_v1 = vsel %vm221_vm2, %v2823_v38, %v2822_v20  ;;  %v9229_v62 = vld [vmem:[#allocation3 + $0x66] sm:$0x1]  ;;  %v2669_v47 = vld [vmem:[#allocation3 + $0x2] sm:$0x1]  ;;  %v2884_v25 = vld [vmem:[#allocation3 + $0x57] sm:$0x1] }
 0x105   :  { %782 = vst.msk [vmem:[#allocation2 + $0x4] sm:$0xf] %vm781_vm14, %v776_v52  ;;  %2006 = vrot.lane.b32.xlu1 %v8956_v11, %s7561_s26  ;;  %v9212_v11 = vld [vmem:[#allocation3 + $0x75] sm:$0x1]  ;;  %v9232_v29 = vsel %vm288_vm6, %v2742_v55, %v2743_v61  ;;  %v2377_v50 = vrot.slane %v9203_v60, 5  ;;  %v2417_v9 = vsel %vm221_vm2, %v2416_v56, %v2415_v6  ;;  %v2336_v52 = vsel %vm223_vm5, %v2335_v48, %v2334_v8 }
 0x106   :  { %869 = vst.msk [vmem:[#allocation2 + $0xc] sm:$0xf] %vm867_vm12, %v864_v41  ;;  %2050 = vrot.lane.b32.xlu0 %v8802_v16, %s7562_s27  ;;  %v9223_v16 = vsel %vm288_vm6, %v2293_v12, %v2294_v49  ;;  %v2863_v12 = vsel %vm219_vm1, %v2862_v23, %v2841_v35  ;;  %v9237_v57 = vld [vmem:[#allocation3 + $0x22] sm:$0x1]  ;;  %v2376_v55 = vsel %vm284_vm4, %v2374_v17, %v2375_v14  ;;  %v2826_v41 = vrot.slane %v9212_v11, 5 }
 0x107   :  { %v2685_v49 = vrot.slane %v2670_v21, 7  ;;  %v9247_v27 = vld [vmem:[#allocation3 + $0x67] sm:$0x1]  ;;  %v9249_v18 = vld [vmem:[#allocation3 + $0x13] sm:$0x1]  ;;  %v2825_v61 = vsel %vm284_vm4, %v2823_v38, %v2824_v1  ;;  %v2419_v60 = vrot.slane %v9227_v58, 5  ;;  %v2418_v54 = vsel %vm284_vm4, %v2416_v56, %v2417_v9 }
 0x108   :  { %v819_v42 = vpop.permute.xlu1 %818  ;;  %v1098_v39 = vpop.permute.xlu0 %1097  ;;  %v2865_v17 = vrot.slane %v9229_v62, 6  ;;  %v2883_v20 = vld [vmem:[#allocation3 + $0x47] sm:$0x1]  ;;  %v9260_v35 = vld [vmem:[#allocation3 + $0x76] sm:$0x1]  ;;  %v2864_v8 = vsel %vm280_vm3, %v2862_v23, %v2863_v12  ;;  %v2378_v38 = vsel %vm223_vm5, %v2377_v50, %v2376_v55  ;;  %v2688_v1 = vrot.slane %v9237_v57, 6 }
 0x109   :  { %825 = vst.msk [vmem:[#allocation2 + $0x4] sm:$0xf] %vm824_vm0, %v819_v42  ;;  %2048 = vrot.lane.b32.xlu1 %v9002_v31, %s7562_s27  ;;  %v2785_v31 = vsel %vm223_vm5, %v2784_v19, %v2783_v28  ;;  %v2686_v14 = vsel %vm219_vm1, %v2685_v49, %v2669_v47  ;;  %v3010_v11 = vld [vmem:[#allocation3 + $0x5a] sm:$0x1]  ;;  %v2907_v58 = vrot.slane %v9247_v27, 6  ;;  %v2727_v56 = vrot.slane %v9249_v18, 7 }
 0x10a   :  { %2092 = vrot.lane.b32.xlu0 %v8844_v33, %s13202_s13  ;;  %v2904_v33 = vrot.slane %v2884_v25, 7  ;;  %v2711_v62 = vld [vmem:[#allocation3 + $0x3] sm:$0x1]  ;;  %v9277_v23 = vsel %vm288_vm6, %v2335_v48, %v2336_v52  ;;  %v2827_v47 = vsel %vm223_vm5, %v2826_v41, %v2825_v61  ;;  %v9280_v42 = vld [vmem:[#allocation3 + $0x32] sm:$0x1]  ;;  %v2687_v9 = vsel %vm280_vm3, %v2685_v49, %v2686_v14 }
 0x10b   :  { %v3009_v57 = vld [vmem:[#allocation3 + $0x4a] sm:$0x1]  ;;  %v2866_v13 = vsel %vm221_vm2, %v2865_v17, %v2864_v8  ;;  %v9289_v48 = vld [vmem:[#allocation3 + $0x77] sm:$0x1]  ;;  %v9292_v25 = vld [vmem:[#allocation3 + $0x23] sm:$0x1]  ;;  %v9297_v55 = vsel %vm288_vm6, %v2784_v19, %v2785_v31  ;;  %v9300_v49 = vsel %vm288_vm6, %v2377_v50, %v2378_v38  ;;  %v2728_v27 = vsel %vm219_vm1, %v2727_v56, %v2711_v62 }
 0x10c   :  { %v862_v21 = vpop.permute.xlu1 %861  ;;  %v1140_v28 = vpop.permute.xlu0 %1139  ;;  %v2905_v12 = vsel %vm219_vm1, %v2904_v33, %v2883_v20  ;;  %v3030_v52 = vrot.slane %v3010_v11, 7  ;;  %v9304_v18 = vld [vmem:[#allocation3 + $0x6a] sm:$0x1]  ;;  %v2754_v61 = vld [vmem:[#allocation3 + $0x14] sm:$0x1]  ;;  %v9307_v8 = vsel %vm288_vm6, %v2826_v41, %v2827_v47  ;;  %v2689_v59 = vsel %vm221_vm2, %v2688_v1, %v2687_v9 }
 0x10d   :  { %v9264_v6 = vld [vmem:[#allocation2 + $0x8] sm:$0xff]  ;;  %868 = vst.msk [vmem:[#allocation2 + $0x4] sm:$0xf] %vm867_vm12, %v862_v21  ;;  %2090 = vrot.lane.b32.xlu1 %v9008_v40, %s13202_s13  ;;  %v2420_v40 = vsel %vm223_vm5, %v2419_v60, %v2418_v54  ;;  %v9311_v31 = vld [vmem:[#allocation3 + $0x33] sm:$0x1]  ;;  %vm13279_vm9 = vcmask 339168   ;;  %v2867_v41 = vsel %vm284_vm4, %v2865_v17, %v2866_v13  ;;  %v2690_v17 = vsel %vm284_vm4, %v2688_v1, %v2689_v59 }
 0x10e   :  { %13278 = vst [vmem:[#allocation12_spill] sm:$0xff] %v9264_v6  ;;  %1102 = vst.msk [vmem:[#allocation2 + $0x8] sm:$0xf] %vm13239_vm7, %v1098_v39  ;;  %2134 = vrot.lane.b32.xlu0 %v8878_v44, %s13204_s0  ;;  %v2906_v39 = vsel %vm280_vm3, %v2904_v33, %v2905_v12  ;;  %v2868_v44 = vrot.slane %v9260_v35, 5  ;;  %v3031_v50 = vsel %vm219_vm1, %v3030_v52, %v3009_v57  ;;  %v2753_v14 = vld [vmem:[#allocation3 + $0x4] sm:$0x1] }
 0x10f   :  { %1144 = vst.msk [vmem:[#allocation2 + $0x8] sm:$0xf] %vm13213_vm10, %v1140_v28  ;;  %v2908_v19 = vsel %vm221_vm2, %v2907_v58, %v2906_v39  ;;  %v9314_v33 = vld [vmem:[#allocation3 + $0x24] sm:$0x1]  ;;  %v9320_v11 = vsel %vm288_vm6, %v2419_v60, %v2420_v40  ;;  %v2691_v21 = vrot.slane %v9280_v42, 5  ;;  %v2730_v28 = vrot.slane %v9292_v25, 6 }
 0x110   :  { %v1096_v20 = vpop.permute.xlu1 %1095  ;;  %v1182_v54 = vpop.permute.xlu0 %1181  ;;  %v2926_v38 = vld [vmem:[#allocation3 + $0x58] sm:$0x1]  ;;  %v9325_v62 = vld [vmem:[#allocation3 + $0x68] sm:$0x1]  ;;  %s13207_s13 = smov 96   ;;  %v3033_v60 = vrot.slane %v9304_v18, 6  ;;  %v2909_v57 = vsel %vm284_vm4, %v2907_v58, %v2908_v19  ;;  %v3032_v40 = vsel %vm280_vm3, %v3030_v52, %v3031_v50 }
 0x111   :  { %1186 = vst.msk [vmem:[#allocation2 + $0x8] sm:$0xf] %vm13279_vm9, %v1182_v54  ;;  %2132 = vrot.lane.b32.xlu1 %v9040_v22, %s13204_s0  ;;  %v2729_v22 = vsel %vm280_vm3, %v2727_v56, %v2728_v27  ;;  %v2769_v9 = vrot.slane %v2754_v61, 7  ;;  %v2796_v12 = vld [vmem:[#allocation3 + $0x15] sm:$0x1]  ;;  %v2772_v13 = vrot.slane %v9314_v33, 6  ;;  %v2869_v56 = vsel %vm223_vm5, %v2868_v44, %v2867_v41 }
 0x112   :  { %2176 = vrot.lane.b32.xlu0 %v8951_v26, %s13207_s13  ;;  %v2925_v39 = vld [vmem:[#allocation3 + $0x48] sm:$0x1]  ;;  %v2795_v25 = vld [vmem:[#allocation3 + $0x5] sm:$0x1]  ;;  %v2946_v18 = vrot.slane %v2926_v38, 7  ;;  %v2949_v1 = vrot.slane %v9325_v62, 6  ;;  %v2731_v52 = vsel %vm221_vm2, %v2730_v28, %v2729_v22  ;;  %v3034_v41 = vsel %vm221_vm2, %v3033_v60, %v3032_v40 }
 0x113   :  { %v2770_v27 = vsel %vm219_vm1, %v2769_v9, %v2753_v14  ;;  %v2968_v58 = vld [vmem:[#allocation3 + $0x59] sm:$0x1]  ;;  %vm13280_vm9 = vcmask 453968   ;;  %v9349_v59 = vld [vmem:[#allocation3 + $0x7a] sm:$0x1]  ;;  %v2811_v14 = vrot.slane %v2796_v12, 7 }
 0x114   :  { %v9336_v54 = vld [vmem:[#allocation2] sm:$0xff]  ;;  %v1138_v26 = vpop.permute.xlu1 %1137  ;;  %v1224_v47 = vpop.permute.xlu0 %1223  ;;  %v2771_v19 = vsel %vm280_vm3, %v2769_v9, %v2770_v27  ;;  %v9352_v50 = vld [vmem:[#allocation3 + $0x25] sm:$0x1]  ;;  %s13209_s0 = smov 110   ;;  %v2947_v62 = vsel %vm219_vm1, %v2946_v18, %v2925_v39  ;;  %v9368_v9 = vld [vmem:[#allocation3 + $0x78] sm:$0x1] }
 0x115   :  { %1101 = vst.msk [vmem:[#allocation2] sm:$0xf] %vm13239_vm7, %v1096_v20  ;;  %2174 = vrot.lane.b32.xlu1 %v9104_v15, %s13207_s13  ;;  %v2692_v15 = vsel %vm223_vm5, %v2691_v21, %v2690_v17  ;;  %v13281_v20 = vrot.slane %v9289_v48, 5  ;;  %v9364_v38 = vld [vmem:[#allocation3 + $0x34] sm:$0x1]  ;;  %v2773_v22 = vsel %vm221_vm2, %v2772_v13, %v2771_v19  ;;  %v2812_v12 = vsel %vm219_vm1, %v2811_v14, %v2795_v25  ;;  %s13214_s13 = smov 124  }
 0x116   :  { %1228 = vst.msk [vmem:[#allocation2 + $0x8] sm:$0xf] %vm13280_vm9, %v1224_v47  ;;  %2218 = vrot.lane.b32.xlu0 %v8967_v51, %s13209_s0  ;;  %v2967_v47 = vld [vmem:[#allocation3 + $0x49] sm:$0x1]  ;;  %v2948_v51 = vsel %vm280_vm3, %v2946_v18, %v2947_v62  ;;  %v2988_v17 = vrot.slane %v2968_v58, 7  ;;  %v3036_v40 = vrot.slane %v9349_v59, 5  ;;  %v3035_v25 = vsel %vm284_vm4, %v3033_v60, %v3034_v41 }
 0x117   :  { %1143 = vst.msk [vmem:[#allocation2] sm:$0xf] %vm13213_vm10, %v1138_v26  ;;  %v2911_v33 = vsel %vm223_vm5, %v13281_v20, %v2909_v57  ;;  %v2732_v57 = vsel %vm284_vm4, %v2730_v28, %v2731_v52  ;;  %v2950_v20 = vsel %vm221_vm2, %v2949_v1, %v2948_v51  ;;  %v2814_v39 = vrot.slane %v9352_v50, 6  ;;  %v9376_v61 = vld [vmem:[#allocation3 + $0x69] sm:$0x1] }
 0x118   :  { %v1180_v26 = vpop.permute.xlu1 %1179  ;;  %v1266_v27 = vpop.permute.xlu0 %1265  ;;  %v2838_v19 = vld [vmem:[#allocation3 + $0x16] sm:$0x1]  ;;  %vm13282_vm9 = vcmask 339168   ;;  %vm13283_vm13 = vcmask 568768   ;;  %v2775_v28 = vrot.slane %v9364_v38, 5  ;;  %v2813_v58 = vsel %vm280_vm3, %v2811_v14, %v2812_v12 }
 0x119   :  { %1185 = vst.msk [vmem:[#allocation2] sm:$0xf] %vm13282_vm9, %v1180_v26  ;;  %2216 = vrot.lane.b32.xlu1 %v9139_v10, %s13209_s0  ;;  %v9384_v18 = vld [vmem:[#allocation3 + $0x35] sm:$0x1]  ;;  %v2989_v52 = vsel %vm219_vm1, %v2988_v17, %v2967_v47  ;;  %v2837_v50 = vld [vmem:[#allocation3 + $0x6] sm:$0x1]  ;;  %v9393_v62 = vsel %vm288_vm6, %v2868_v44, %v2869_v56  ;;  %v9398_v10 = vsel %vm288_vm6, %v2691_v21, %v2692_v15 }
 0x11a   :  { %1270 = vst.msk [vmem:[#allocation2 + $0x8] sm:$0xf] %vm13283_vm13, %v1266_v27  ;;  %2260 = vrot.lane.b32.xlu0 %v9005_v0, %s13214_s13  ;;  %v2774_v60 = vsel %vm284_vm4, %v2772_v13, %v2773_v22  ;;  %v2952_v14 = vrot.slane %v9368_v9, 5  ;;  %v9402_v41 = vld [vmem:[#allocation3 + $0x26] sm:$0x1]  ;;  %v13284_v47 = vrot.slane %v9289_v48, 5  ;;  %v2951_v35 = vsel %vm284_vm4, %v2949_v1, %v2950_v20 }
 0x11b   :  { %v3056_v38 = vld [vmem:[#allocation3 + $0x5b] sm:$0x1]  ;;  %v2991_v44 = vrot.slane %v9376_v61, 6  ;;  %v2853_v42 = vrot.slane %v2838_v19, 7  ;;  %v9411_v56 = vld [vmem:[#allocation3 + $0x6b] sm:$0x1]  ;;  %v3037_v48 = vsel %vm223_vm5, %v3036_v40, %v3035_v25  ;;  %v2990_v1 = vsel %vm280_vm3, %v2988_v17, %v2989_v52 }
 0x11c   :  { %v9407_v0 = vsel %vm288_vm6, %v13284_v47, %v2911_v33  ;;  %v2880_v21 = vld [vmem:[#allocation3 + $0x17] sm:$0x1]  ;;  %v1222_v15 = vpop.permute.xlu1 %1221  ;;  %v1308_v13 = vpop.permute.xlu0 %1307  ;;  %v13285_v22 = vrot.slane %v9311_v31, 5  ;;  %v2815_v33 = vsel %vm221_vm2, %v2814_v39, %v2813_v58  ;;  %v3055_v12 = vld [vmem:[#allocation3 + $0x4b] sm:$0x1]  ;;  %vm13286_vm13 = vcmask 453968  }
 0x11d   :  { %v2879_v61 = vld [vmem:[#allocation3 + $0x7] sm:$0x1]  ;;  %1227 = vst.msk [vmem:[#allocation2] sm:$0xf] %vm13286_vm13, %v1222_v15  ;;  %vm13287_vm9 = vcmask 683568   ;;  %2258 = vrot.lane.b32.xlu1 %v9157_v45, %s13214_s13  ;;  %v2776_v26 = vsel %vm223_vm5, %v2775_v28, %v2774_v60  ;;  %v2817_v27 = vrot.slane %v9384_v18, 5  ;;  %v2953_v17 = vsel %vm223_vm5, %v2952_v14, %v2951_v35 }
 0x11e   :  { %v2734_v51 = vsel %vm223_vm5, %v13285_v22, %v2732_v57  ;;  %1312 = vst.msk [vmem:[#allocation2 + $0x8] sm:$0xf] %vm13287_vm9, %v1308_v13  ;;  %v2854_v57 = vsel %vm219_vm1, %v2853_v42, %v2837_v50  ;;  %v3076_v20 = vrot.slane %v3056_v38, 7  ;;  %v9428_v19 = vld [vmem:[#allocation3 + $0x27] sm:$0x1]  ;;  %s13211_s0 = smov 10   ;;  %v2816_v18 = vsel %vm284_vm4, %v2814_v39, %v2815_v33 }
 0x11f   :  { %v3098_v25 = vld [vmem:[#allocation3 + $0x5c] sm:$0x1]  ;;  %2307 = vrot.lane.b32.xlu0 %v9019_v24, %s13211_s0  ;;  %v2856_v45 = vrot.slane %v9402_v41, 6  ;;  %v3079_v58 = vrot.slane %v9411_v56, 6  ;;  %v2895_v52 = vrot.slane %v2880_v21, 7  ;;  %v2992_v50 = vsel %vm221_vm2, %v2991_v44, %v2990_v1  ;;  %s7584_s13 = smov 38  }
 0x120   :  { %v2855_v60 = vsel %vm280_vm3, %v2853_v42, %v2854_v57  ;;  %v3077_v38 = vsel %vm219_vm1, %v3076_v20, %v3055_v12  ;;  %v3097_v47 = vld [vmem:[#allocation3 + $0x4c] sm:$0x1]  ;;  %v1264_v15 = vpop.permute.xlu1 %1263  ;;  %v1350_v24 = vpop.permute.xlu0 %1349  ;;  %v9441_v13 = vld [vmem:[#allocation3 + $0x79] sm:$0x1]  ;;  %v9443_v22 = vld [vmem:[#allocation3 + $0x36] sm:$0x1]  ;;  %v9460_v33 = vsel %vm288_vm6, %v3036_v40, %v3037_v48  ;;  %v9463_v1 = vsel %vm288_vm6, %v2775_v28, %v2776_v26 }
 0x121   :  { %v3078_v41 = vsel %vm280_vm3, %v3076_v20, %v3077_v38  ;;  %v2896_v35 = vsel %vm219_vm1, %v2895_v52, %v2879_v61  ;;  %v2898_v56 = vrot.slane %v9428_v19, 6  ;;  %v3118_v39 = vrot.slane %v3098_v25, 7  ;;  %2305 = vrot.lane.b32.xlu1 %v9223_v16, %s13211_s0  ;;  %v9465_v12 = vld [vmem:[#allocation3 + $0x7b] sm:$0x1]  ;;  %v9468_v57 = vld [vmem:[#allocation3 + $0x6c] sm:$0x1] }
 0x122   :  { %vm13288_vm13 = vcmask 568768   ;;  %vm13289_vm9 = vcmask 798368   ;;  %v13290_v42 = vrot.slane %v9311_v31, 5  ;;  %v2897_v61 = vsel %vm280_vm3, %v2895_v52, %v2896_v35  ;;  %v3006_v16 = vld [vmem:[#allocation3 + $0x1a] sm:$0x1]  ;;  %s13216_s0 = smov 24  }
 0x123   :  { %1269 = vst.msk [vmem:[#allocation2] sm:$0xf] %vm13288_vm13, %v1264_v15  ;;  %2349 = vrot.lane.b32.xlu0 %v9099_v4, %s13216_s0  ;;  %v2818_v31 = vsel %vm223_vm5, %v2817_v27, %v2816_v18  ;;  %v2857_v59 = vsel %vm221_vm2, %v2856_v45, %v2855_v60  ;;  %v3080_v40 = vsel %vm221_vm2, %v3079_v58, %v3078_v41  ;;  %v3005_v48 = vld [vmem:[#allocation3 + $0xa] sm:$0x1]  ;;  %v2994_v4 = vrot.slane %v9441_v13, 5 }
 0x124   :  { %1354 = vst.msk [vmem:[#allocation2 + $0x8] sm:$0xf] %vm13289_vm9, %v1350_v24  ;;  %v9455_v21 = vsel %vm288_vm6, %v13290_v42, %v2734_v51  ;;  %v9475_v51 = vld [vmem:[#allocation3 + $0x37] sm:$0x1]  ;;  %v3119_v28 = vsel %vm219_vm1, %v3118_v39, %v3097_v47  ;;  %v9481_v26 = vsel %vm288_vm6, %v2952_v14, %v2953_v17  ;;  %v2993_v20 = vsel %vm284_vm4, %v2991_v44, %v2992_v50  ;;  %v9486_v25 = vld [vmem:[#allocation3 + $0x2a] sm:$0x1]  ;;  %v1306_v18 = vpop.permute.xlu1 %1305  ;;  %v1392_v60 = vpop.permute.xlu0 %1391 }
 0x125   :  { %v2859_v19 = vrot.slane %v9443_v22, 5  ;;  %v3140_v52 = vld [vmem:[#allocation3 + $0x5d] sm:$0x1]  ;;  %vm13218_vm13 = vcmask 1022976   ;;  %v3082_v38 = vrot.slane %v9465_v12, 5  ;;  %v2899_v47 = vsel %vm221_vm2, %v2898_v56, %v2897_v61  ;;  %2347 = vrot.lane.b32.xlu1 %v9277_v23, %s13216_s0  ;;  %s7585_s0 = smov 52  }
 0x126   :  { %v9490_v9 = vld [vmem:[#allocation3 + $0x7c] sm:$0x1]  ;;  %v3121_v14 = vrot.slane %v9468_v57, 6  ;;  %v3021_v17 = vrot.slane %v3006_v16, 7  ;;  %v2922_v44 = vld [vmem:[#allocation3 + $0x18] sm:$0x1]  ;;  %v9498_v50 = vsel %vm288_vm6, %v2817_v27, %v2818_v31  ;;  %v2858_v15 = vsel %vm284_vm4, %v2856_v45, %v2857_v59 }
 0x127   :  { %vm13291_vm9 = vcmask 683568   ;;  %vm13292_vm10 = vcmask 913168   ;;  %v3081_v24 = vsel %vm284_vm4, %v3079_v58, %v3080_v40  ;;  %v3120_v41 = vsel %vm280_vm3, %v3118_v39, %v3119_v28  ;;  %v3139_v35 = vld [vmem:[#allocation3 + $0x4d] sm:$0x1]  ;;  %v2921_v61 = vld [vmem:[#allocation3 + $0x8] sm:$0x1]  ;;  %2391 = vrot.lane.b32.xlu0 %v9119_v30, %s7584_s13 }
 0x128   :  { %1311 = vst.msk [vmem:[#allocation2] sm:$0xf] %vm13291_vm9, %v1306_v18  ;;  %v9503_v42 = vld [vmem:[#allocation3 + $0x6d] sm:$0x1]  ;;  %v2901_v57 = vrot.slane %v9475_v51, 5  ;;  %v3022_v23 = vsel %vm219_vm1, %v3021_v17, %v3005_v48  ;;  %v3024_v27 = vrot.slane %v9486_v25, 6  ;;  %v2995_v58 = vsel %vm223_vm5, %v2994_v4, %v2993_v20  ;;  %v1348_v30 = vpop.permute.xlu1 %1347  ;;  %v1434_v28 = vpop.permute.xlu0 %1433 }
 0x129   :  { %1396 = vst.msk [vmem:[#allocation2 + $0x8] sm:$0xf] %vm13292_vm10, %v1392_v60  ;;  %v3160_v16 = vrot.slane %v3140_v52, 7  ;;  %v3182_v45 = vld [vmem:[#allocation3 + $0x5e] sm:$0x1]  ;;  %v2900_v39 = vsel %vm284_vm4, %v2898_v56, %v2899_v47  ;;  %v3023_v31 = vsel %vm280_vm3, %v3021_v17, %v3022_v23  ;;  %v2937_v40 = vrot.slane %v2922_v44, 7  ;;  %2389 = vrot.lane.b32.xlu1 %v9300_v49, %s7584_s13 }
 0x12a   :  { %v9515_v59 = vld [vmem:[#allocation3 + $0x28] sm:$0x1]  ;;  %v2860_v51 = vsel %vm223_vm5, %v2859_v19, %v2858_v15  ;;  %v3083_v48 = vsel %vm223_vm5, %v3082_v38, %v3081_v24  ;;  %v3122_v25 = vsel %vm221_vm2, %v3121_v14, %v3120_v41  ;;  %v3181_v56 = vld [vmem:[#allocation3 + $0x4e] sm:$0x1]  ;;  %vm13293_vm10 = vcmask 798368  }
 0x12b   :  { %v3161_v20 = vsel %vm219_vm1, %v3160_v16, %v3139_v35  ;;  %v9525_v52 = vld [vmem:[#allocation3 + $0x6e] sm:$0x1]  ;;  %1353 = vst.msk [vmem:[#allocation2] sm:$0xf] %vm13293_vm10, %v1348_v30  ;;  %v3124_v18 = vrot.slane %v9490_v9, 5  ;;  %v3163_v47 = vrot.slane %v9503_v42, 6  ;;  %v2938_v17 = vsel %vm219_vm1, %v2937_v40, %v2921_v61  ;;  %2433 = vrot.lane.b32.xlu0 %v9148_v53, %s7585_s0 }
 0x12c   :  { %1438 = vst.msk [vmem:[#allocation2 + $0x8] sm:$0xf] %vm645_vm8, %v1434_v28  ;;  %v9532_v60 = vld [vmem:[#allocation3 + $0x3a] sm:$0x1]  ;;  %v3202_v44 = vrot.slane %v3182_v45, 7  ;;  %v2902_v15 = vsel %vm223_vm5, %v2901_v57, %v2900_v39  ;;  %v3025_v24 = vsel %vm221_vm2, %v3024_v27, %v3023_v31  ;;  %v3162_v49 = vsel %vm280_vm3, %v3160_v16, %v3161_v20  ;;  %v1390_v39 = vpop.permute.xlu1 %1389  ;;  %v1476_v28 = vpop.permute.xlu0 %1475 }
 0x12d   :  { %v9540_v41 = vld [vmem:[#allocation3 + $0x7d] sm:$0x1]  ;;  %v2940_v35 = vrot.slane %v9515_v59, 6  ;;  %v3123_v23 = vsel %vm284_vm4, %v3121_v14, %v3122_v25  ;;  %v9545_v42 = vld [vmem:[#allocation3 + $0x38] sm:$0x1]  ;;  %v2939_v61 = vsel %vm280_vm3, %v2937_v40, %v2938_v17  ;;  %v3205_v53 = vrot.slane %v9525_v52, 6  ;;  %2431 = vrot.lane.b32.xlu1 %v9320_v11, %s7585_s0 }
 0x12e   :  { %v3203_v45 = vsel %vm219_vm1, %v3202_v44, %v3181_v56  ;;  %v2964_v30 = vld [vmem:[#allocation3 + $0x19] sm:$0x1]  ;;  %v9553_v31 = vsel %vm288_vm6, %v2994_v4, %v2995_v58  ;;  %v9558_v14 = vsel %vm288_vm6, %v2859_v19, %v2860_v51  ;;  %v3027_v16 = vrot.slane %v9532_v60, 5  ;;  %v9561_v59 = vld [vmem:[#allocation3 + $0x7e] sm:$0x1] }
 0x12f   :  { %v3204_v40 = vsel %vm280_vm3, %v3202_v44, %v3203_v45  ;;  %v3416_v25 = vld [vmem:[#allocation3 + $0x51] sm:$0x1]  ;;  %vm13294_vm9 = vcmask 913168   ;;  %v1478_v20 = vrot.slane %v1476_v28, 4  ;;  %v9570_v13 = vsel %vm288_vm6, %v3082_v38, %v3083_v48  ;;  %v2963_v19 = vld [vmem:[#allocation3 + $0x9] sm:$0x1]  ;;  %2705 = vrot.lane.b32.xlu0 %v9218_v46, %s7550_s1 }
 0x130   :  { %1395 = vst.msk [vmem:[#allocation2] sm:$0xf] %vm13294_vm9, %v1390_v39  ;;  %v3026_v22 = vsel %vm284_vm4, %v3024_v27, %v3025_v24  ;;  %v3164_v4 = vsel %vm221_vm2, %v3163_v47, %v3162_v49  ;;  %v9574_v58 = vld [vmem:[#allocation3 + $0x29] sm:$0x1]  ;;  %v9579_v51 = vsel %vm288_vm6, %v2901_v57, %v2902_v15  ;;  %v3125_v11 = vsel %vm223_vm5, %v3124_v18, %v3123_v23  ;;  %v3415_v48 = vld [vmem:[#allocation3 + $0x41] sm:$0x1]  ;;  %v1432_v15 = vpop.permute.xlu1 %1431  ;;  %v1523_v24 = vpop.permute.xlu0 %1522 }
 0x131   :  { %v2941_v12 = vsel %vm221_vm2, %v2940_v35, %v2939_v61  ;;  %v2979_v38 = vrot.slane %v2964_v30, 7  ;;  %v3052_v27 = vld [vmem:[#allocation3 + $0x1b] sm:$0x1]  ;;  %v1481_v56 = vsel %vm13218_vm13, %v1478_v20, %v1476_v28  ;;  %v3166_v52 = vrot.slane %v9540_v41, 5  ;;  %v9588_v44 = vld [vmem:[#allocation3 + $0x61] sm:$0x1]  ;;  %2703 = vrot.lane.b32.xlu1 %v9398_v10, %s7550_s1 }
 0x132   :  { %v3206_v17 = vsel %vm221_vm2, %v3205_v53, %v3204_v40  ;;  %v3436_v46 = vrot.slane %v3416_v25, 7  ;;  %v3458_v57 = vld [vmem:[#allocation3 + $0x52] sm:$0x1]  ;;  %1485 = vst.msk [vmem:[#allocation2 + $0x8] sm:$0xff] %vm9063_vm15, %v1481_v56  ;;  %v3028_v49 = vsel %vm223_vm5, %v3027_v16, %v3026_v22  ;;  %v3165_v23 = vsel %vm284_vm4, %v3163_v47, %v3164_v4  ;;  %v3051_v30 = vld [vmem:[#allocation3 + $0xb] sm:$0x1] }
 0x133   :  { %v2943_v61 = vrot.slane %v9545_v42, 5  ;;  %v2980_v45 = vsel %vm219_vm1, %v2979_v38, %v2963_v19  ;;  %v9598_v39 = vld [vmem:[#allocation3 + $0x2b] sm:$0x1]  ;;  %1437 = vst.msk [vmem:[#allocation2] sm:$0xf] %vm645_vm8, %v1432_v15  ;;  %v2942_v28 = vsel %vm284_vm4, %v2940_v35, %v2941_v12  ;;  %v3067_v25 = vrot.slane %v3052_v27, 7  ;;  %2747 = vrot.lane.b32.xlu0 %v9232_v29, %s7551_s16 }
 0x134   :  { %1527 = vst.msk [vmem:[#allocation2 + $0xc] sm:$0xf] %vm738_vm11, %v1523_v24  ;;  %v3437_v47 = vsel %vm219_vm1, %v3436_v46, %v3415_v48  ;;  %v3457_v20 = vld [vmem:[#allocation3 + $0x42] sm:$0x1]  ;;  %v3207_v4 = vsel %vm284_vm4, %v3205_v53, %v3206_v17  ;;  %v2982_v19 = vrot.slane %v9574_v58, 6  ;;  %v3439_v56 = vrot.slane %v9588_v44, 6  ;;  %v1474_v24 = vpop.permute.xlu1 %1473  ;;  %v1565_v40 = vpop.permute.xlu0 %1564 }
 0x135   :  { %v9607_v22 = vld [vmem:[#allocation3 + $0x62] sm:$0x1]  ;;  %v3478_v10 = vrot.slane %v3458_v57, 7  ;;  %v9614_v15 = vld [vmem:[#allocation3 + $0x39] sm:$0x1]  ;;  %v2981_v35 = vsel %vm280_vm3, %v2979_v38, %v2980_v45  ;;  %v3438_v12 = vsel %vm280_vm3, %v3436_v46, %v3437_v47  ;;  %v3068_v48 = vsel %vm219_vm1, %v3067_v25, %v3051_v30  ;;  %2745 = vrot.lane.b32.xlu1 %v9455_v21, %s7551_s16 }
 0x136   :  { %v3070_v27 = vrot.slane %v9598_v39, 6  ;;  %v9623_v29 = vsel %vm288_vm6, %v3124_v18, %v3125_v11  ;;  %v9625_v53 = vld [vmem:[#allocation3 + $0x71] sm:$0x1]  ;;  %v3069_v58 = vsel %vm280_vm3, %v3067_v25, %v3068_v48  ;;  %v3481_v38 = vrot.slane %v9607_v22, 6  ;;  %v3094_v44 = vld [vmem:[#allocation3 + $0x1c] sm:$0x1] }
 0x137   :  { %v3479_v17 = vsel %vm219_vm1, %v3478_v10, %v3457_v20  ;;  %v1477_v46 = vrot.slane %v1474_v24, 4  ;;  %1569 = vst.msk [vmem:[#allocation2 + $0xc] sm:$0xf] %vm781_vm14, %v1565_v40  ;;  %v9636_v9 = vsel %vm288_vm6, %v3027_v16, %v3028_v49  ;;  %v3167_v18 = vsel %vm223_vm5, %v3166_v52, %v3165_v23  ;;  %v9646_v57 = vld [vmem:[#allocation3 + $0x3b] sm:$0x1]  ;;  %2789 = vrot.lane.b32.xlu0 %v9297_v55, %s7552_s17 }
 0x138   :  { %v9644_v11 = vsel %vm223_vm5, %v2943_v61, %v2942_v28  ;;  %v9648_v45 = vld [vmem:[#allocation3 + $0x2c] sm:$0x1]  ;;  %v13295_v21 = vrot.slane %v9561_v59, 5  ;;  %v2983_v16 = vsel %vm221_vm2, %v2982_v19, %v2981_v35  ;;  %v3440_v49 = vsel %vm221_vm2, %v3439_v56, %v3438_v12  ;;  %v9657_v23 = vld [vmem:[#allocation3 + $0x72] sm:$0x1]  ;;  %v1607_v35 = vpop.permute.xlu0 %1606 }
 0x139   :  { %v3480_v30 = vsel %vm280_vm3, %v3478_v10, %v3479_v17  ;;  %v3093_v39 = vld [vmem:[#allocation3 + $0xc] sm:$0x1]  ;;  %v3500_v28 = vld [vmem:[#allocation3 + $0x53] sm:$0x1]  ;;  %v1480_v40 = vsel %vm13218_vm13, %v1477_v46, %v1474_v24  ;;  %v2985_v47 = vrot.slane %v9614_v15, 5  ;;  %v3071_v55 = vsel %vm221_vm2, %v3070_v27, %v3069_v58  ;;  %2787 = vrot.lane.b32.xlu1 %v9463_v1, %s7552_s17 }
 0x13a   :  { %v3209_v60 = vsel %vm223_vm5, %v13295_v21, %v3207_v4  ;;  %v3109_v25 = vrot.slane %v3094_v44, 7  ;;  %v3499_v20 = vld [vmem:[#allocation3 + $0x43] sm:$0x1]  ;;  %v9663_v22 = vld [vmem:[#allocation3 + $0x1d] sm:$0x1]  ;;  %1484 = vst.msk [vmem:[#allocation2] sm:$0xff] %vm9063_vm15, %v1480_v40  ;;  %v1521_v4 = vpop.permute.xlu1 %1520  ;;  %v3482_v48 = vsel %vm221_vm2, %v3481_v38, %v3480_v30  ;;  %v2984_v58 = vsel %vm284_vm4, %v2982_v19, %v2983_v16 }
 0x13b   :  { %v3442_v12 = vrot.slane %v9625_v53, 5  ;;  %v3073_v10 = vrot.slane %v9646_v57, 5  ;;  %v3112_v24 = vrot.slane %v9648_v45, 6  ;;  %v9671_v15 = vld [vmem:[#allocation3 + $0x63] sm:$0x1]  ;;  %v3441_v17 = vsel %vm284_vm4, %v3439_v56, %v3440_v49  ;;  %2831 = vrot.lane.b32.xlu0 %v9307_v8, %s7553_s18 }
 0x13c   :  { %1526 = vst.msk [vmem:[#allocation2 + $0x4] sm:$0xf] %vm738_vm11, %v1521_v4  ;;  %v3110_v53 = vsel %vm219_vm1, %v3109_v25, %v3093_v39  ;;  %v3520_v44 = vrot.slane %v3500_v28, 7  ;;  %v9680_v46 = vld [vmem:[#allocation3 + $0x54] sm:$0x1]  ;;  %v3072_v57 = vsel %vm284_vm4, %v3070_v27, %v3071_v55  ;;  %v3484_v45 = vrot.slane %v9657_v23, 5  ;;  %v1649_v28 = vpop.permute.xlu0 %1648 }
 0x13d   :  { %1611 = vst.msk [vmem:[#allocation2 + $0xc] sm:$0xf] %vm824_vm0, %v1607_v35  ;;  %v9686_v21 = vld [vmem:[#allocation3 + $0x3c] sm:$0x1]  ;;  %v3111_v1 = vsel %vm280_vm3, %v3109_v25, %v3110_v53  ;;  %v3135_v30 = vld [vmem:[#allocation3 + $0xd] sm:$0x1]  ;;  %v3483_v56 = vsel %vm284_vm4, %v3481_v38, %v3482_v48  ;;  %v2986_v27 = vsel %vm223_vm5, %v2985_v47, %v2984_v58  ;;  %v3443_v23 = vsel %vm223_vm5, %v3442_v12, %v3441_v17 }
 0x13e   :  { %v3151_v19 = vrot.slane %v9663_v22, 7  ;;  %v3113_v16 = vsel %vm221_vm2, %v3112_v24, %v3111_v1  ;;  %v3521_v49 = vsel %vm219_vm1, %v3520_v44, %v3499_v20  ;;  %v3523_v39 = vrot.slane %v9671_v15, 6  ;;  %v1563_v8 = vpop.permute.xlu1 %1562  ;;  %v9696_v40 = vld [vmem:[#allocation3 + $0x73] sm:$0x1]  ;;  %v9699_v25 = vld [vmem:[#allocation3 + $0x2d] sm:$0x1]  ;;  %2829 = vrot.lane.b32.xlu1 %v9498_v50, %s7553_s18 }
 0x13f   :  { %v3522_v55 = vsel %vm280_vm3, %v3520_v44, %v3521_v49  ;;  %v3562_v38 = vrot.slane %v9680_v46, 7  ;;  %1568 = vst.msk [vmem:[#allocation2 + $0x4] sm:$0xf] %vm781_vm14, %v1563_v8  ;;  %v9709_v20 = vsel %vm288_vm6, %v3166_v52, %v3167_v18  ;;  %v3074_v22 = vsel %vm223_vm5, %v3073_v10, %v3072_v57  ;;  %v3541_v48 = vld [vmem:[#allocation3 + $0x44] sm:$0x1]  ;;  %2873 = vrot.lane.b32.xlu0 %v9393_v62, %s7554_s19 }
 0x140   :  { %1653 = vst.msk [vmem:[#allocation2 + $0xc] sm:$0xf] %vm867_vm12, %v1649_v28  ;;  %v3115_v4 = vrot.slane %v9686_v21, 5  ;;  %v3152_v35 = vsel %vm219_vm1, %v3151_v19, %v3135_v30  ;;  %v3178_v15 = vld [vmem:[#allocation3 + $0x1e] sm:$0x1]  ;;  %v9720_v50 = vsel %vm288_vm6, %v2943_v61, %v9644_v11  ;;  %v13296_v41 = vrot.slane %v9561_v59, 5 }
 0x141   :  { %v3485_v18 = vsel %vm223_vm5, %v3484_v45, %v3483_v56  ;;  %v3114_v58 = vsel %vm284_vm4, %v3112_v24, %v3113_v16  ;;  %v9729_v17 = vld [vmem:[#allocation3 + $0x3d] sm:$0x1]  ;;  %v9731_v53 = vld [vmem:[#allocation3 + $0x64] sm:$0x1]  ;;  %v3177_v62 = vld [vmem:[#allocation3 + $0xe] sm:$0x1]  ;;  %v9734_v44 = vsel %vm288_vm6, %v2985_v47, %v2986_v27  ;;  %v9737_v42 = vsel %vm288_vm6, %v3442_v12, %v3443_v23 }
 0x142   :  { %v9725_v52 = vsel %vm288_vm6, %v13296_v41, %v3209_v60  ;;  %v3524_v59 = vsel %vm221_vm2, %v3523_v39, %v3522_v55  ;;  %v3154_v61 = vrot.slane %v9699_v25, 6  ;;  %v9741_v11 = vld [vmem:[#allocation3 + $0x2e] sm:$0x1]  ;;  %v3584_v60 = vld [vmem:[#allocation3 + $0x55] sm:$0x1]  ;;  %v1605_v46 = vpop.permute.xlu1 %1604  ;;  %v9744_v24 = vsel %vm288_vm6, %v3073_v10, %v3074_v22  ;;  %2871 = vrot.lane.b32.xlu1 %v9558_v14, %s7554_s19 }
 0x143   :  { %v3153_v57 = vsel %vm280_vm3, %v3151_v19, %v3152_v35  ;;  %v3563_v1 = vsel %vm219_vm1, %v3562_v38, %v3541_v48  ;;  %v3193_v47 = vrot.slane %v3178_v15, 7  ;;  %v3583_v30 = vld [vmem:[#allocation3 + $0x45] sm:$0x1]  ;;  %v3412_v56 = vld [vmem:[#allocation3 + $0x11] sm:$0x1]  ;;  %v9752_v12 = vsel %vm288_vm6, %v3484_v45, %v3485_v18  ;;  %2915 = vrot.lane.b32.xlu0 %v9407_v0, %s7555_s20 }
 0x144   :  { %1610 = vst.msk [vmem:[#allocation2 + $0x4] sm:$0xf] %vm824_vm0, %v1605_v46  ;;  %v3116_v10 = vsel %vm223_vm5, %v3115_v4, %v3114_v58  ;;  %v3526_v16 = vrot.slane %v9696_v40, 5  ;;  %v3157_v19 = vrot.slane %v9729_v17, 5  ;;  %v3585_v49 = vld [vmem:[#allocation3 + $0x65] sm:$0x1]  ;;  %v3525_v28 = vsel %vm284_vm4, %v3523_v39, %v3524_v59 }
 0x145   :  { %v3413_v8 = vld [vmem:[#allocation3 + $0x21] sm:$0x1]  ;;  %v3565_v14 = vrot.slane %v9731_v53, 6  ;;  %v3194_v45 = vsel %vm219_vm1, %v3193_v47, %v3177_v62  ;;  %v3604_v27 = vrot.slane %v3584_v60, 7  ;;  %v3626_v55 = vld [vmem:[#allocation3 + $0x56] sm:$0x1]  ;;  %v3155_v25 = vsel %vm221_vm2, %v3154_v61, %v3153_v57 }
 0x146   :  { %v3411_v23 = vld [vmem:[#allocation3 + $0x1] sm:$0x1]  ;;  %v3564_v40 = vsel %vm280_vm3, %v3562_v38, %v3563_v1  ;;  %v3196_v22 = vrot.slane %v9741_v11, 6  ;;  %v3427_v35 = vrot.slane %v3412_v56, 7  ;;  %v3627_v48 = vld [vmem:[#allocation3 + $0x66] sm:$0x1]  ;;  %v1647_v15 = vpop.permute.xlu1 %1646  ;;  %v3195_v0 = vsel %vm280_vm3, %v3193_v47, %v3194_v45  ;;  %2913 = vrot.lane.b32.xlu1 %v9579_v51, %s7555_s20 }
 0x147   :  { %v9767_v41 = vld [vmem:[#allocation3 + $0x74] sm:$0x1]  ;;  %v3605_v39 = vsel %vm219_vm1, %v3604_v27, %v3583_v30  ;;  %v3607_v18 = vrot.slane %v3585_v49, 6  ;;  %v3430_v58 = vrot.slane %v3413_v8, 6  ;;  %v3625_v53 = vld [vmem:[#allocation3 + $0x46] sm:$0x1]  ;;  %v3527_v38 = vsel %vm223_vm5, %v3526_v16, %v3525_v28  ;;  %3041 = vrot.lane.b32.xlu0 %v9460_v33, %s7558_s23 }
 0x148   :  { %1652 = vst.msk [vmem:[#allocation2 + $0x4] sm:$0xf] %vm867_vm12, %v1647_v15  ;;  %v3606_v62 = vsel %vm280_vm3, %v3604_v27, %v3605_v39  ;;  %v3428_v59 = vsel %vm219_vm1, %v3427_v35, %v3411_v23  ;;  %v3646_v11 = vrot.slane %v3626_v55, 7  ;;  %v3156_v60 = vsel %vm284_vm4, %v3154_v61, %v3155_v25  ;;  %v3180_v57 = vld [vmem:[#allocation3 + $0x3e] sm:$0x1] }
 0x149   :  { %v3566_v46 = vsel %vm221_vm2, %v3565_v14, %v3564_v40  ;;  %v3429_v1 = vsel %vm280_vm3, %v3427_v35, %v3428_v59  ;;  %v3649_v47 = vrot.slane %v3627_v48, 6  ;;  %v3454_v30 = vld [vmem:[#allocation3 + $0x12] sm:$0x1]  ;;  %v9785_v51 = vsel %vm288_vm6, %v3115_v4, %v3116_v10  ;;  %v9789_v8 = vld [vmem:[#allocation3 + $0x75] sm:$0x1] }
 0x14a   :  { %v3568_v56 = vrot.slane %v9767_v41, 5  ;;  %v3197_v49 = vsel %vm221_vm2, %v3196_v22, %v3195_v0  ;;  %v9791_v33 = vld [vmem:[#allocation3 + $0x31] sm:$0x1]  ;;  %v3647_v61 = vsel %vm219_vm1, %v3646_v11, %v3625_v53  ;;  %v9795_v28 = vsel %vm288_vm6, %v3526_v16, %v3527_v38  ;;  %v9799_v27 = vld [vmem:[#allocation3 + $0x76] sm:$0x1]  ;;  %3039 = vrot.lane.b32.xlu1 %v9636_v9, %s7558_s23 }
 0x14b   :  { %v3608_v45 = vsel %vm221_vm2, %v3607_v18, %v3606_v62  ;;  %v3431_v21 = vsel %vm221_vm2, %v3430_v58, %v3429_v1  ;;  %v3648_v4 = vsel %vm280_vm3, %v3646_v11, %v3647_v61  ;;  %v3453_v10 = vld [vmem:[#allocation3 + $0x2] sm:$0x1]  ;;  %v3668_v23 = vld [vmem:[#allocation3 + $0x57] sm:$0x1]  ;;  %v3158_v55 = vsel %vm223_vm5, %v3157_v19, %v3156_v60  ;;  %v3496_v48 = vld [vmem:[#allocation3 + $0x13] sm:$0x1]  ;;  %2957 = vrot.lane.b32.xlu0 %v9481_v26, %s7556_s21 }
 0x14c   :  { %v3567_v16 = vsel %vm284_vm4, %v3565_v14, %v3566_v46  ;;  %v3199_v25 = vrot.slane %v3180_v57, 5  ;;  %v9808_v40 = vld [vmem:[#allocation3 + $0x22] sm:$0x1]  ;;  %v3469_v35 = vrot.slane %v3454_v30, 7  ;;  %v3198_v15 = vsel %vm284_vm4, %v3196_v22, %v3197_v49  ;;  %v3667_v39 = vld [vmem:[#allocation3 + $0x47] sm:$0x1] }
 0x14d   :  { %v3610_v41 = vrot.slane %v9789_v8, 5  ;;  %v3433_v9 = vrot.slane %v9791_v33, 5  ;;  %v3650_v0 = vsel %vm221_vm2, %v3649_v47, %v3648_v4  ;;  %v3609_v53 = vsel %vm284_vm4, %v3607_v18, %v3608_v45  ;;  %v3669_v62 = vld [vmem:[#allocation3 + $0x67] sm:$0x1]  ;;  %v3794_v11 = vld [vmem:[#allocation3 + $0x5a] sm:$0x1] }
 0x14e   :  { %v3432_v14 = vsel %vm284_vm4, %v3430_v58, %v3431_v21  ;;  %v3470_v38 = vsel %vm219_vm1, %v3469_v35, %v3453_v10  ;;  %v3688_v59 = vrot.slane %v3668_v23, 7  ;;  %v3569_v26 = vsel %vm223_vm5, %v3568_v56, %v3567_v16  ;;  %v3495_v46 = vld [vmem:[#allocation3 + $0x3] sm:$0x1]  ;;  %2955 = vrot.lane.b32.xlu1 %v9720_v50, %s7556_s21  ;;  %v3793_v49 = vld [vmem:[#allocation3 + $0x4a] sm:$0x1] }
 0x14f   :  { %v3652_v22 = vrot.slane %v9799_v27, 5  ;;  %v3472_v60 = vrot.slane %v9808_v40, 6  ;;  %v3511_v57 = vrot.slane %v3496_v48, 7  ;;  %v3200_v18 = vsel %vm223_vm5, %v3199_v25, %v3198_v15  ;;  %2999 = vrot.lane.b32.xlu0 %v9553_v31, %s7557_s22  ;;  %v9832_v61 = vld [vmem:[#allocation3 + $0x32] sm:$0x1] }
 0x150   :  { %v3651_v58 = vsel %vm284_vm4, %v3649_v47, %v3650_v0  ;;  %v3471_v1 = vsel %vm280_vm3, %v3469_v35, %v3470_v38  ;;  %v3689_v30 = vsel %vm219_vm1, %v3688_v59, %v3667_v39  ;;  %v3611_v8 = vsel %vm223_vm5, %v3610_v41, %v3609_v53  ;;  %v9834_v50 = vld [vmem:[#allocation3 + $0x23] sm:$0x1]  ;;  %v9846_v10 = vld [vmem:[#allocation3 + $0x6a] sm:$0x1]  ;;  %v3538_v23 = vld [vmem:[#allocation3 + $0x14] sm:$0x1] }
 0x151   :  { %v3434_v33 = vsel %vm223_vm5, %v3433_v9, %v3432_v14  ;;  %v3691_v45 = vrot.slane %v3669_v62, 6  ;;  %v3814_v21 = vrot.slane %v3794_v11, 7  ;;  %v9839_v47 = vsel %vm288_vm6, %v3157_v19, %v3158_v55  ;;  %v9853_v35 = vld [vmem:[#allocation3 + $0x77] sm:$0x1]  ;;  %v3539_v55 = vld [vmem:[#allocation3 + $0x24] sm:$0x1] }
 0x152   :  { %v9842_v27 = vsel %vm288_vm6, %v3568_v56, %v3569_v26  ;;  %v3690_v31 = vsel %vm280_vm3, %v3688_v59, %v3689_v30  ;;  %v3512_v4 = vsel %vm219_vm1, %v3511_v57, %v3495_v46  ;;  %v9849_v16 = vsel %vm288_vm6, %v3199_v25, %v3200_v18  ;;  %v3537_v56 = vld [vmem:[#allocation3 + $0x4] sm:$0x1]  ;;  %2997 = vrot.lane.b32.xlu1 %v9734_v44, %s7557_s22  ;;  %v3710_v39 = vld [vmem:[#allocation3 + $0x58] sm:$0x1]  ;;  %v3711_v53 = vld [vmem:[#allocation3 + $0x68] sm:$0x1] }
 0x153   :  { %v3653_v40 = vsel %vm223_vm5, %v3652_v22, %v3651_v58  ;;  %v3473_v17 = vsel %vm221_vm2, %v3472_v60, %v3471_v1  ;;  %v3815_v19 = vsel %vm219_vm1, %v3814_v21, %v3793_v49  ;;  %v9859_v48 = vsel %vm288_vm6, %v3610_v41, %v3611_v8  ;;  %3087 = vrot.lane.b32.xlu0 %v9570_v13, %s7559_s24  ;;  %v9869_v38 = vld [vmem:[#allocation3 + $0x33] sm:$0x1]  ;;  %v3709_v18 = vld [vmem:[#allocation3 + $0x48] sm:$0x1]  ;;  %v3579_v13 = vld [vmem:[#allocation3 + $0x5] sm:$0x1] }
 0x154   :  { %v9862_v15 = vsel %vm288_vm6, %v3433_v9, %v3434_v33  ;;  %v3475_v25 = vrot.slane %v9832_v61, 5  ;;  %v3514_v0 = vrot.slane %v9834_v50, 6  ;;  %v3692_v14 = vsel %vm221_vm2, %v3691_v45, %v3690_v31  ;;  %v3580_v9 = vld [vmem:[#allocation3 + $0x15] sm:$0x1]  ;;  %v3752_v49 = vld [vmem:[#allocation3 + $0x59] sm:$0x1] }
 0x155   :  { %v3513_v44 = vsel %vm280_vm3, %v3511_v57, %v3512_v4  ;;  %v3817_v41 = vrot.slane %v9846_v10, 6  ;;  %v3553_v62 = vrot.slane %v3538_v23, 7  ;;  %v9874_v59 = vsel %vm288_vm6, %v3652_v22, %v3653_v40  ;;  %v9886_v33 = vld [vmem:[#allocation3 + $0x34] sm:$0x1]  ;;  %v9897_v10 = vld [vmem:[#allocation3 + $0x25] sm:$0x1] }
 0x156   :  { %v3474_v11 = vsel %vm284_vm4, %v3472_v60, %v3473_v17  ;;  %v3816_v26 = vsel %vm280_vm3, %v3814_v21, %v3815_v19  ;;  %v3556_v46 = vrot.slane %v3539_v55, 6  ;;  %v3694_v58 = vrot.slane %v9853_v35, 5  ;;  %3085 = vrot.lane.b32.xlu1 %v9744_v24, %s7559_s24  ;;  %v9884_v60 = vld [vmem:[#allocation3 + $0x7a] sm:$0x1]  ;;  %v3751_v23 = vld [vmem:[#allocation3 + $0x49] sm:$0x1] }
 0x157   :  { %v3554_v1 = vsel %vm219_vm1, %v3553_v62, %v3537_v56  ;;  %v3730_v30 = vrot.slane %v3710_v39, 7  ;;  %v3733_v57 = vrot.slane %v3711_v53, 6  ;;  %v3693_v22 = vsel %vm284_vm4, %v3691_v45, %v3692_v14  ;;  %3129 = vrot.lane.b32.xlu0 %v9623_v29, %s7560_s25  ;;  %v9900_v17 = vld [vmem:[#allocation3 + $0x78] sm:$0x1]  ;;  %v3753_v19 = vld [vmem:[#allocation3 + $0x69] sm:$0x1] }
 0x158   :  { %v3515_v8 = vsel %vm221_vm2, %v3514_v0, %v3513_v44  ;;  %v3555_v50 = vsel %vm280_vm3, %v3553_v62, %v3554_v1  ;;  %v3595_v21 = vrot.slane %v3580_v9, 7  ;;  %v3476_v31 = vsel %vm223_vm5, %v3475_v25, %v3474_v11  ;;  %v9908_v44 = vld [vmem:[#allocation3 + $0x35] sm:$0x1]  ;;  %v3622_v62 = vld [vmem:[#allocation3 + $0x16] sm:$0x1] }
 0x159   :  { %v3517_v24 = vrot.slane %v9869_v38, 5  ;;  %v3818_v45 = vsel %vm221_vm2, %v3817_v41, %v3816_v26  ;;  %v3731_v4 = vsel %vm219_vm1, %v3730_v30, %v3709_v18  ;;  %v3557_v40 = vsel %vm221_vm2, %v3556_v46, %v3555_v50  ;;  %v9915_v18 = vld [vmem:[#allocation3 + $0x79] sm:$0x1]  ;;  %v3663_v50 = vld [vmem:[#allocation3 + $0x7] sm:$0x1] }
 0x15a   :  { %v3732_v35 = vsel %vm280_vm3, %v3730_v30, %v3731_v4  ;;  %v3596_v29 = vsel %vm219_vm1, %v3595_v21, %v3579_v13  ;;  %v3772_v56 = vrot.slane %v3752_v49, 7  ;;  %v3695_v55 = vsel %vm223_vm5, %v3694_v58, %v3693_v22  ;;  %3127 = vrot.lane.b32.xlu1 %v9785_v51, %s7560_s25  ;;  %v3621_v13 = vld [vmem:[#allocation3 + $0x6] sm:$0x1]  ;;  %v3664_v22 = vld [vmem:[#allocation3 + $0x17] sm:$0x1] }
 0x15b   :  { %v3516_v39 = vsel %vm284_vm4, %v3514_v0, %v3515_v8  ;;  %v3820_v53 = vrot.slane %v9884_v60, 5  ;;  %v3734_v14 = vsel %vm221_vm2, %v3733_v57, %v3732_v35  ;;  %v3819_v9 = vsel %vm284_vm4, %v3817_v41, %v3818_v45  ;;  %3171 = vrot.lane.b32.xlu0 %v9709_v20, %s7561_s26  ;;  %v9923_v41 = vld [vmem:[#allocation3 + $0x26] sm:$0x1] }
 0x15c   :  { %v3559_v11 = vrot.slane %v9886_v33, 5  ;;  %v3598_v26 = vrot.slane %v9897_v10, 6  ;;  %v3773_v0 = vsel %vm219_vm1, %v3772_v56, %v3751_v23  ;;  %v3558_v1 = vsel %vm284_vm4, %v3556_v46, %v3557_v40  ;;  %v3790_v46 = vld [vmem:[#allocation3 + $0x1a] sm:$0x1]  ;;  %v3791_v40 = vld [vmem:[#allocation3 + $0x2a] sm:$0x1] }
 0x15d   :  { %v3736_v30 = vrot.slane %v9900_v17, 5  ;;  %v3597_v51 = vsel %vm280_vm3, %v3595_v21, %v3596_v29  ;;  %v3775_v49 = vrot.slane %v3753_v19, 6  ;;  %v9928_v8 = vsel %vm288_vm6, %v3475_v25, %v3476_v31  ;;  %v3665_v25 = vld [vmem:[#allocation3 + $0x27] sm:$0x1]  ;;  %v3789_v31 = vld [vmem:[#allocation3 + $0xa] sm:$0x1] }
 0x15e   :  { %v3735_v60 = vsel %vm284_vm4, %v3733_v57, %v3734_v14  ;;  %v3774_v33 = vsel %vm280_vm3, %v3772_v56, %v3773_v0  ;;  %v3637_v20 = vrot.slane %v3622_v62, 7  ;;  %v9933_v45 = vsel %vm288_vm6, %v3694_v58, %v3695_v55  ;;  %3169 = vrot.lane.b32.xlu1 %v9839_v47, %s7561_s26  ;;  %v3706_v17 = vld [vmem:[#allocation3 + $0x18] sm:$0x1]  ;;  %v3707_v47 = vld [vmem:[#allocation3 + $0x28] sm:$0x1] }
 0x15f   :  { %v3518_v21 = vsel %vm223_vm5, %v3517_v24, %v3516_v39  ;;  %v3821_v4 = vsel %vm223_vm5, %v3820_v53, %v3819_v9  ;;  %v3601_v61 = vrot.slane %v9908_v44, 5  ;;  %v3560_v57 = vsel %vm223_vm5, %v3559_v11, %v3558_v1  ;;  %3213 = vrot.lane.b32.xlu0 %v9725_v52, %s7562_s27  ;;  %v3705_v9 = vld [vmem:[#allocation3 + $0x8] sm:$0x1] }
 0x160   :  { %v3599_v10 = vsel %vm221_vm2, %v3598_v26, %v3597_v51  ;;  %v3638_v58 = vsel %vm219_vm1, %v3637_v20, %v3621_v13  ;;  %v3679_v23 = vrot.slane %v3664_v22, 7  ;;  %v3737_v35 = vsel %vm223_vm5, %v3736_v30, %v3735_v60  ;;  %v9959_v60 = vld [vmem:[#allocation3 + $0x36] sm:$0x1] }
 0x161   :  { %v3776_v29 = vsel %vm221_vm2, %v3775_v49, %v3774_v33  ;;  %v3778_v19 = vrot.slane %v9915_v18, 5  ;;  %v3805_v56 = vrot.slane %v3790_v46, 7  ;;  %v3639_v55 = vsel %vm280_vm3, %v3637_v20, %v3638_v58 }
 0x162   :  { %v3640_v39 = vrot.slane %v9923_v41, 6  ;;  %v3680_v14 = vsel %vm219_vm1, %v3679_v23, %v3663_v50  ;;  %v3682_v62 = vrot.slane %v3665_v25, 6  ;;  %v3808_v13 = vrot.slane %v3791_v40, 6  ;;  %3211 = vrot.lane.b32.xlu1 %v9849_v16, %s7562_s27  ;;  %v9961_v41 = vld [vmem:[#allocation3 + $0x37] sm:$0x1] }
 0x163   :  { %v3681_v0 = vsel %vm280_vm3, %v3679_v23, %v3680_v14  ;;  %v3806_v52 = vsel %vm219_vm1, %v3805_v56, %v3789_v31  ;;  %v3721_v1 = vrot.slane %v3706_v17, 7  ;;  %v3600_v51 = vsel %vm284_vm4, %v3598_v26, %v3599_v10  ;;  %3447 = vrot.lane.b32.xlu0 %v9737_v42, %s7563_s28  ;;  %v3748_v25 = vld [vmem:[#allocation3 + $0x19] sm:$0x1]  ;;  %v3749_v31 = vld [vmem:[#allocation3 + $0x29] sm:$0x1] }
 0x164   :  { %v3777_v22 = vsel %vm284_vm4, %v3775_v49, %v3776_v29  ;;  %v3807_v33 = vsel %vm280_vm3, %v3805_v56, %v3806_v52  ;;  %v3724_v20 = vrot.slane %v3707_v47, 6  ;;  %v9969_v50 = vsel %vm288_vm6, %v3517_v24, %v3518_v21  ;;  %v9977_v49 = vld [vmem:[#allocation3 + $0x3a] sm:$0x1]  ;;  %v9985_v24 = vld [vmem:[#allocation3 + $0x38] sm:$0x1] }
 0x165   :  { %v9972_v16 = vsel %vm288_vm6, %v3820_v53, %v3821_v4  ;;  %v9975_v26 = vsel %vm288_vm6, %v3559_v11, %v3560_v57  ;;  %v3722_v46 = vsel %vm219_vm1, %v3721_v1, %v3705_v9  ;;  %v9981_v10 = vsel %vm288_vm6, %v3736_v30, %v3737_v35  ;;  %v3747_v21 = vld [vmem:[#allocation3 + $0x9] sm:$0x1]  ;;  %v3836_v11 = vld [vmem:[#allocation3 + $0x1b] sm:$0x1]  ;;  %v3835_v23 = vld [vmem:[#allocation3 + $0xb] sm:$0x1] }
 0x166   :  { %v3641_v42 = vsel %vm221_vm2, %v3640_v39, %v3639_v55  ;;  %v3683_v38 = vsel %vm221_vm2, %v3682_v62, %v3681_v0  ;;  %v3723_v53 = vsel %vm280_vm3, %v3721_v1, %v3722_v46  ;;  %v3602_v4 = vsel %vm223_vm5, %v3601_v61, %v3600_v51  ;;  %v3878_v40 = vld [vmem:[#allocation3 + $0x1c] sm:$0x1]  ;;  %3445 = vrot.lane.b32.xlu1 %v9862_v15, %s7563_s28  ;;  %v3837_v47 = vld [vmem:[#allocation3 + $0x2b] sm:$0x1]  ;;  %v3877_v52 = vld [vmem:[#allocation3 + $0xc] sm:$0x1] }
 0x167   :  { %v3779_v57 = vsel %vm223_vm5, %v3778_v19, %v3777_v22  ;;  %v3643_v30 = vrot.slane %v9959_v60, 5  ;;  %v3809_v58 = vsel %vm221_vm2, %v3808_v13, %v3807_v33  ;;  %v3685_v17 = vrot.slane %v9961_v41, 5  ;;  %3489 = vrot.lane.b32.xlu0 %v9752_v12, %s7564_s29  ;;  %v3920_v1 = vld [vmem:[#allocation3 + $0x1d] sm:$0x1]  ;;  %v10008_v60 = vld [vmem:[#allocation3 + $0x2c] sm:$0x1] }
 0x168   :  { %v3725_v35 = vsel %vm221_vm2, %v3724_v20, %v3723_v53  ;;  %v3763_v29 = vrot.slane %v3748_v25, 7  ;;  %v3766_v56 = vrot.slane %v3749_v31, 6  ;;  %v3642_v55 = vsel %vm284_vm4, %v3640_v39, %v3641_v42  ;;  %v10011_v33 = vld [vmem:[#allocation3 + $0x39] sm:$0x1]  ;;  %v3919_v46 = vld [vmem:[#allocation3 + $0xd] sm:$0x1] }
 0x169   :  { %v3684_v14 = vsel %vm284_vm4, %v3682_v62, %v3683_v38  ;;  %v3811_v9 = vrot.slane %v9977_v49, 5  ;;  %v3851_v0 = vrot.slane %v3836_v11, 7  ;;  %v3810_v15 = vsel %vm284_vm4, %v3808_v13, %v3809_v58  ;;  %v10020_v42 = vld [vmem:[#allocation3 + $0x2d] sm:$0x1]  ;;  %v10030_v58 = vld [vmem:[#allocation3 + $0x3b] sm:$0x1] }
 0x16a   :  { %v3727_v51 = vrot.slane %v9985_v24, 5  ;;  %v3764_v22 = vsel %vm219_vm1, %v3763_v29, %v3747_v21  ;;  %v3893_v41 = vrot.slane %v3878_v40, 7  ;;  %v3726_v12 = vsel %vm284_vm4, %v3724_v20, %v3725_v35  ;;  %3487 = vrot.lane.b32.xlu1 %v9928_v8, %s7564_s29 }
 0x16b   :  { %v3765_v39 = vsel %vm280_vm3, %v3763_v29, %v3764_v22  ;;  %v3852_v62 = vsel %vm219_vm1, %v3851_v0, %v3835_v23  ;;  %v3854_v49 = vrot.slane %v3837_v47, 6  ;;  %v3935_v20 = vrot.slane %v3920_v1, 7  ;;  %3531 = vrot.lane.b32.xlu0 %v9795_v28, %s7565_s30  ;;  %v10032_v23 = vld [vmem:[#allocation3 + $0x3c] sm:$0x1]  ;;  %v2636_v22 = vld [vmem:[#allocation3 + $0x51] sm:$0x1] }
 0x16c   :  { %v3767_v13 = vsel %vm221_vm2, %v3766_v56, %v3765_v39  ;;  %v3853_v25 = vsel %vm280_vm3, %v3851_v0, %v3852_v62  ;;  %v3894_v31 = vsel %vm219_vm1, %v3893_v41, %v3877_v52  ;;  %v3644_v38 = vsel %vm223_vm5, %v3643_v30, %v3642_v55  ;;  %v3962_v0 = vld [vmem:[#allocation3 + $0x1e] sm:$0x1]  ;;  %v2635_v39 = vld [vmem:[#allocation3 + $0x41] sm:$0x1] }
 0x16d   :  { %v3686_v24 = vsel %vm223_vm5, %v3685_v17, %v3684_v14  ;;  %v3812_v53 = vsel %vm223_vm5, %v3811_v9, %v3810_v15  ;;  %v3896_v8 = vrot.slane %v10008_v60, 6  ;;  %v3728_v21 = vsel %vm223_vm5, %v3727_v51, %v3726_v12  ;;  %v3961_v14 = vld [vmem:[#allocation3 + $0xe] sm:$0x1]  ;;  %v10042_v52 = vpop.xlane.xlu0 %232  ;;  %v10062_v60 = vld [vmem:[#allocation3 + $0x61] sm:$0x1] }
 0x16e   :  { %v3769_v11 = vrot.slane %v10011_v33, 5  ;;  %v3895_v40 = vsel %vm280_vm3, %v3893_v41, %v3894_v31  ;;  %v3936_v28 = vsel %vm219_vm1, %v3935_v20, %v3919_v46  ;;  %v3603_v35 = vsel %vm288_vm6, %v3601_v61, %v3602_v4  ;;  %3529 = vrot.lane.b32.xlu1 %v9969_v50, %s7565_s30  ;;  %v10057_v4 = vld [vmem:[#allocation3 + $0x3d] sm:$0x1]  ;;  %v10060_v15 = vld [vmem:[#allocation3 + $0x2e] sm:$0x1] }
 0x16f   :  { %v3768_v29 = vsel %vm284_vm4, %v3766_v56, %v3767_v13  ;;  %v3855_v47 = vsel %vm221_vm2, %v3854_v49, %v3853_v25  ;;  %v3938_v55 = vrot.slane %v10020_v42, 6  ;;  %v10049_v1 = vsel %vm288_vm6, %v3778_v19, %v3779_v57  ;;  %3573 = vrot.lane.b32.xlu0 %v9842_v27, %s7566_s5  ;;  %v4195_v25 = vld [vmem:[#allocation3 + $0x1] sm:$0x1]  ;;  %v10082_v31 = vld [vmem:[#allocation2 + $0x8] sm:$0xff] }
 0x170   :  { %v10052_v44 = vsel %vm288_vm6, %v3643_v30, %v3644_v38  ;;  %v10055_v61 = vsel %vm288_vm6, %v3685_v17, %v3686_v24  ;;  %v3937_v56 = vsel %vm280_vm3, %v3935_v20, %v3936_v28  ;;  %v10067_v18 = vsel %vm288_vm6, %v3811_v9, %v3812_v53  ;;  %v4196_v30 = vld [vmem:[#allocation3 + $0x11] sm:$0x1]  ;;  %v10074_v17 = vld [vmem:[#allocation3 + $0x21] sm:$0x1]  ;;  %v4238_v9 = vld [vmem:[#allocation3 + $0x12] sm:$0x1] }
 0x171   :  { %v10070_v19 = vsel %vm288_vm6, %v3727_v51, %v3728_v21  ;;  %v3857_v50 = vrot.slane %v10030_v58, 5  ;;  %v3897_v57 = vsel %vm221_vm2, %v3896_v8, %v3895_v40  ;;  %v3770_v41 = vsel %vm223_vm5, %v3769_v11, %v3768_v29  ;;  %13297 = vst [vmem:[#allocation13_spill] sm:$0xff] %v10082_v31  ;;  %v1883_v42 = vpop.permute.xlu0 %1882  ;;  %v4237_v53 = vld [vmem:[#allocation3 + $0x2] sm:$0x1]  ;;  %v4536_v31 = vld [vmem:[#allocation3 + $0x59] sm:$0x1] }
 0x172   :  { %v3856_v12 = vsel %vm284_vm4, %v3854_v49, %v3855_v47  ;;  %v3899_v33 = vrot.slane %v10032_v23, 5  ;;  %v3977_v27 = vrot.slane %v3962_v0, 7  ;;  %v3939_v62 = vsel %vm221_vm2, %v3938_v55, %v3937_v56  ;;  %3571 = vrot.lane.b32.xlu1 %v9975_v26, %s7566_s5  ;;  %1887 = vst.msk [vmem:[#allocation2 + $0x8] sm:$0xf] %vm13239_vm7, %v1883_v42  ;;  %v10095_v26 = vld [vmem:[#allocation3 + $0x22] sm:$0x1] }
 0x173   :  { %v3980_v51 = vrot.slane %v10060_v15, 6  ;;  %v2656_v46 = vrot.slane %v2636_v22, 7  ;;  %v2659_v13 = vrot.slane %v10062_v60, 6  ;;  %v3898_v49 = vsel %vm284_vm4, %v3896_v8, %v3897_v57  ;;  %3615 = vrot.lane.b32.xlu0 %v9859_v48, %s7567_s6  ;;  %v10101_v47 = vld [vmem:[#allocation3 + $0x3e] sm:$0x1] }
 0x174   :  { %v3978_v20 = vsel %vm219_vm1, %v3977_v27, %v3961_v14  ;;  %v4211_v38 = vrot.slane %v4196_v30, 7  ;;  %v4214_v24 = vrot.slane %v10074_v17, 6  ;;  %v3941_v21 = vrot.slane %v10057_v4, 5  ;;  %v10103_v14 = vld [vmem:[#allocation3 + $0x71] sm:$0x1] }
 0x175   :  { %v3979_v23 = vsel %vm280_vm3, %v3977_v27, %v3978_v20  ;;  %v2657_v40 = vsel %vm219_vm1, %v2656_v46, %v2635_v39  ;;  %v4253_v8 = vrot.slane %v4238_v9, 7  ;;  %v10098_v28 = vsel %vm288_vm6, %v3769_v11, %v3770_v41  ;;  %v10109_v15 = vld [vmem:[#allocation3 + $0x31] sm:$0x1]  ;;  %v1925_v57 = vpop.permute.xlu0 %1924  ;;  %v10134_v20 = vld [vmem:[#allocation3 + $0x21] sm:$0x1] }
 0x176   :  { %v3940_v29 = vsel %vm284_vm4, %v3938_v55, %v3939_v62  ;;  %v2658_v48 = vsel %vm280_vm3, %v2656_v46, %v2657_v40  ;;  %v4212_v0 = vsel %vm219_vm1, %v4211_v38, %v4195_v25  ;;  %v3981_v4 = vsel %vm221_vm2, %v3980_v51, %v3979_v23  ;;  %v2632_v60 = vld [vmem:[#allocation3 + $0x11] sm:$0x1]  ;;  %v10113_v55 = vpop.xlane.xlu1 %235  ;;  %3613 = vrot.lane.b32.xlu1 %v3603_v35, %s7567_s6  ;;  %v10128_v62 = vld [vmem:[#allocation3 + $0x32] sm:$0x1]  ;;  %v2631_v46 = vld [vmem:[#allocation3 + $0x1] sm:$0x1] }
 0x177   :  { %v2660_v56 = vsel %vm221_vm2, %v2659_v13, %v2658_v48  ;;  %v4213_v22 = vsel %vm280_vm3, %v4211_v38, %v4212_v0  ;;  %v4254_v11 = vsel %vm219_vm1, %v4253_v8, %v4237_v53  ;;  %v3858_v30 = vsel %vm223_vm5, %v3857_v50, %v3856_v12  ;;  %3657 = vrot.lane.b32.xlu0 %v9874_v59, %s13237_s7  ;;  %v4280_v38 = vld [vmem:[#allocation3 + $0x13] sm:$0x1]  ;;  %v4364_v48 = vld [vmem:[#allocation3 + $0x15] sm:$0x1] }
 0x178   :  { %v3900_v17 = vsel %vm223_vm5, %v3899_v33, %v3898_v49  ;;  %v4215_v41 = vsel %vm221_vm2, %v4214_v24, %v4213_v22  ;;  %v4256_v27 = vrot.slane %v10095_v26, 6  ;;  %vm13298_vm10 = vcmask 224368   ;;  %v10147_v26 = vld [vmem:[#allocation3 + $0x23] sm:$0x1]  ;;  %v10169_v22 = vld [vmem:[#allocation3 + $0x25] sm:$0x1] }
 0x179   :  { %1929 = vst.msk [vmem:[#allocation2 + $0x8] sm:$0xf] %vm13298_vm10, %v1925_v57  ;;  %v3942_v39 = vsel %vm223_vm5, %v3941_v21, %v3940_v29  ;;  %v3983_v9 = vrot.slane %v10101_v47, 5  ;;  %v2662_v35 = vrot.slane %v10103_v14, 5  ;;  %v4255_v12 = vsel %vm280_vm3, %v4253_v8, %v4254_v11  ;;  %v4322_v8 = vld [vmem:[#allocation3 + $0x14] sm:$0x1]  ;;  %v1967_v14 = vpop.permute.xlu0 %1966 }
 0x17a   :  { %v3982_v25 = vsel %vm284_vm4, %v3980_v51, %v3981_v4  ;;  %v2661_v42 = vsel %vm284_vm4, %v2659_v13, %v2660_v56  ;;  %v4217_v49 = vrot.slane %v10109_v15, 5  ;;  %v2647_v59 = vrot.slane %v2632_v60, 7  ;;  %v4279_v13 = vld [vmem:[#allocation3 + $0x3] sm:$0x1]  ;;  %v10149_v29 = vld [vmem:[#allocation2] sm:$0xff]  ;;  %v1881_v47 = vpop.permute.xlu1 %1880  ;;  %3655 = vrot.lane.b32.xlu1 %v10052_v44, %s13237_s7  ;;  %s13337_s7 = smov 24  }
 0x17b   :  { %v242_v53 = vrot.slane %v10042_v52, %v8667_v34  ;;  %v10141_v23 = vsel %vm288_vm6, %v3857_v50, %v3858_v30  ;;  %v10144_v40 = vsel %vm288_vm6, %v3899_v33, %v3900_v17  ;;  %v4216_v51 = vsel %vm284_vm4, %v4214_v24, %v4215_v41  ;;  %v4321_v24 = vld [vmem:[#allocation3 + $0x4] sm:$0x1]  ;;  %1886 = vst.msk [vmem:[#allocation2] sm:$0xf] %vm13239_vm7, %v1881_v47  ;;  %v4363_v57 = vld [vmem:[#allocation3 + $0x5] sm:$0x1] }
 0x17c   :  { %v10154_v58 = vsel %vm288_vm6, %v3941_v21, %v3942_v39  ;;  %vm249_vm9 = vcmask 25600   ;;  %v4257_v52 = vsel %vm221_vm2, %v4256_v27, %v4255_v12  ;;  %v4259_v50 = vrot.slane %v10128_v62, 5  ;;  %3699 = vrot.lane.b32.xlu0 %v9933_v45, %s13226_s8  ;;  %v10167_v56 = vld [vmem:[#allocation3 + $0x24] sm:$0x1] }
 0x17d   :  { %v2648_v33 = vsel %vm219_vm1, %v2647_v59, %v2631_v46  ;;  %v246_v0 = vrot.slane %v10113_v55, %v8667_v34  ;;  %vm13299_vm10 = vcmask 339168   ;;  %v3984_v44 = vsel %vm223_vm5, %v3983_v9, %v3982_v25  ;;  %v2009_v12 = vpop.permute.xlu0 %2008  ;;  %v10181_v46 = vld [vmem:[#allocation3 + $0x31] sm:$0x1] }
 0x17e   :  { %1971 = vst.msk [vmem:[#allocation2 + $0x8] sm:$0xf] %vm13299_vm10, %v1967_v14  ;;  %v2663_v21 = vsel %vm223_vm5, %v2662_v35, %v2661_v42  ;;  %v4295_v4 = vrot.slane %v4280_v38, 7  ;;  %v4218_v34 = vsel %vm223_vm5, %v4217_v49, %v4216_v51  ;;  %v2650_v11 = vrot.slane %v10134_v20, 6  ;;  %v1923_v39 = vpop.permute.xlu1 %1922  ;;  %3697 = vrot.lane.b32.xlu1 %v10055_v61, %s13226_s8  ;;  %v4406_v38 = vld [vmem:[#allocation3 + $0x16] sm:$0x1] }
 0x17f   :  { %v4298_v60 = vrot.slane %v10147_v26, 6  ;;  %v4337_v55 = vrot.slane %v4322_v8, 7  ;;  %v4258_v45 = vsel %vm284_vm4, %v4256_v27, %v4257_v52  ;;  %v2649_v30 = vsel %vm280_vm3, %v2647_v59, %v2648_v33  ;;  %v10197_v51 = vld [vmem:[#allocation3 + $0x33] sm:$0x1]  ;;  %v10201_v8 = vld [vmem:[#allocation3 + $0x26] sm:$0x1] }
 0x180   :  { %v4296_v17 = vsel %vm219_vm1, %v4295_v4, %v4279_v13  ;;  %v4379_v41 = vrot.slane %v4364_v48, 7  ;;  %v4340_v20 = vrot.slane %v10167_v56, 6  ;;  %v4382_v27 = vrot.slane %v10169_v22, 6  ;;  %3825 = vrot.lane.b32.xlu0 %v9972_v16, %s13224_s11  ;;  %v10206_v52 = vld [vmem:[#allocation3 + $0x34] sm:$0x1]  ;;  %s13322_s8 = smov 124  }
 0x181   :  { %v4297_v25 = vsel %vm280_vm3, %v4295_v4, %v4296_v17  ;;  %v4338_v42 = vsel %vm219_vm1, %v4337_v55, %v4321_v24  ;;  %vm13300_vm10 = vcmask 224368   ;;  %vm13301_vm13 = vcmask 453968   ;;  %v4405_v33 = vld [vmem:[#allocation3 + $0x6] sm:$0x1]  ;;  %v2051_v56 = vpop.permute.xlu0 %2050  ;;  %v4447_v17 = vld [vmem:[#allocation3 + $0x7] sm:$0x1] }
 0x182   :  { %1928 = vst.msk [vmem:[#allocation2] sm:$0xf] %vm13300_vm10, %v1923_v39  ;;  %v10192_v61 = vsel %vm288_vm6, %v3983_v9, %v3984_v44  ;;  %v10195_v59 = vsel %vm288_vm6, %v2662_v35, %v2663_v21  ;;  %v4339_v13 = vsel %vm280_vm3, %v4337_v55, %v4338_v42  ;;  %v4380_v26 = vsel %vm219_vm1, %v4379_v41, %v4363_v57  ;;  %v10208_v9 = vld [vmem:[#allocation3 + $0x35] sm:$0x1]  ;;  %v4448_v44 = vld [vmem:[#allocation3 + $0x17] sm:$0x1]  ;;  %v1965_v4 = vpop.permute.xlu1 %1964 }
 0x183   :  { %2013 = vst.msk [vmem:[#allocation2 + $0x8] sm:$0xf] %vm13301_vm13, %v2009_v12  ;;  %v247_v47 = vsel %vm219_vm1, %v246_v0, %v242_v53  ;;  %v2651_v14 = vsel %vm221_vm2, %v2650_v11, %v2649_v30  ;;  %v4299_v16 = vsel %vm221_vm2, %v4298_v60, %v4297_v25  ;;  %v4381_v35 = vsel %vm280_vm3, %v4379_v41, %v4380_v26  ;;  %v10220_v21 = vld [vmem:[#allocation3 + $0x27] sm:$0x1]  ;;  %v3840_v55 = vld [vmem:[#allocation3 + $0x5b] sm:$0x1] }
 0x184   :  { %v10214_v24 = vsel %vm288_vm6, %v4217_v49, %v4218_v34  ;;  %v4260_v53 = vsel %vm223_vm5, %v4259_v50, %v4258_v45  ;;  %v2653_v48 = vrot.slane %v10181_v46, 5  ;;  %v4421_v0 = vrot.slane %v4406_v38, 7  ;;  %3823 = vrot.lane.b32.xlu1 %v10067_v18, %s13224_s11  ;;  %3741 = vrot.lane.b32.xlu0 %v9981_v10, %s13221_s9  ;;  %v4574_v41 = vld [vmem:[#allocation3 + $0x1a] sm:$0x1]  ;;  %v3839_v42 = vld [vmem:[#allocation3 + $0x4b] sm:$0x1] }
 0x185   :  { %v4301_v15 = vrot.slane %v10197_v51, 5  ;;  %v4341_v49 = vsel %vm221_vm2, %v4340_v20, %v4339_v13  ;;  %v4383_v22 = vsel %vm221_vm2, %v4382_v27, %v4381_v35  ;;  %v4424_v34 = vrot.slane %v10201_v8, 6  ;;  %v10244_v38 = vld [vmem:[#allocation3 + $0x36] sm:$0x1]  ;;  %v2093_v26 = vpop.permute.xlu0 %2092  ;;  %s13316_s11 = smov 82  }
 0x186   :  { %vm13302_vm13 = vcmask 339168   ;;  %vm13303_vm10 = vcmask 568768   ;;  %v2652_v57 = vsel %vm284_vm4, %v2650_v11, %v2651_v14  ;;  %v4300_v18 = vsel %vm284_vm4, %v4298_v60, %v4299_v16  ;;  %v2007_v13 = vpop.permute.xlu1 %2006 }
 0x187   :  { %1970 = vst.msk [vmem:[#allocation2] sm:$0xf] %vm13302_vm13, %v1965_v4  ;;  %v4343_v45 = vrot.slane %v10206_v52, 5  ;;  %v4422_v30 = vsel %vm219_vm1, %v4421_v0, %v4405_v33  ;;  %v4385_v39 = vrot.slane %v10208_v9, 5  ;;  %v4463_v46 = vrot.slane %v4448_v44, 7 }
 0x188   :  { %2055 = vst.msk [vmem:[#allocation2 + $0x8] sm:$0xf] %vm13303_vm10, %v2051_v56  ;;  %v4423_v12 = vsel %vm280_vm3, %v4421_v0, %v4422_v30  ;;  %v4466_v25 = vrot.slane %v10220_v21, 6  ;;  %v10240_v10 = vsel %vm249_vm9, %v247_v47, 0.0  ;;  %v4342_v11 = vsel %vm284_vm4, %v4340_v20, %v4341_v49  ;;  %3739 = vrot.lane.b32.xlu1 %v10070_v19, %s13221_s9  ;;  %v10251_v47 = vld [vmem:[#allocation3 + $0x6b] sm:$0x1]  ;;  %3783 = vrot.lane.b32.xlu0 %v10049_v1, %s13219_s10 }
 0x189   :  { %v4384_v60 = vsel %vm284_vm4, %v4382_v27, %v4383_v22  ;;  %v3860_v51 = vrot.slane %v3840_v55, 7  ;;  %v2654_v8 = vsel %vm223_vm5, %v2653_v48, %v2652_v57  ;;  %v4425_v14 = vsel %vm221_vm2, %v4424_v34, %v4423_v12  ;;  %v4573_v52 = vld [vmem:[#allocation3 + $0xa] sm:$0x1]  ;;  %v10263_v9 = vld [vmem:[#allocation3 + $0x37] sm:$0x1]  ;;  %v2135_v30 = vpop.permute.xlu0 %2134  ;;  %s13314_s9 = smov 68  }
 0x18a   :  { %v4464_v16 = vsel %vm219_vm1, %v4463_v46, %v4447_v17  ;;  %v4589_v20 = vrot.slane %v4574_v41, 7  ;;  %vm13304_vm9 = vcmask 453968   ;;  %vm13305_vm13 = vcmask 683568   ;;  %v3882_v0 = vld [vmem:[#allocation3 + $0x5c] sm:$0x1] }
 0x18b   :  { %2012 = vst.msk [vmem:[#allocation2] sm:$0xf] %vm13304_vm9, %v2007_v13  ;;  %v10260_v19 = vsel %vm288_vm6, %v4259_v50, %v4260_v53  ;;  %v4302_v27 = vsel %vm223_vm5, %v4301_v15, %v4300_v18  ;;  %v4465_v35 = vsel %vm280_vm3, %v4463_v46, %v4464_v16  ;;  %v3861_v33 = vsel %vm219_vm1, %v3860_v51, %v3839_v42  ;;  %v10271_v4 = vld [vmem:[#allocation3 + $0x7b] sm:$0x1]  ;;  %v10273_v50 = vld [vmem:[#allocation3 + $0x2a] sm:$0x1]  ;;  %v2049_v18 = vpop.permute.xlu1 %2048 }
 0x18c   :  { %2097 = vst.msk [vmem:[#allocation2 + $0x8] sm:$0xf] %vm13305_vm13, %v2093_v26  ;;  %v4344_v44 = vsel %vm223_vm5, %v4343_v45, %v4342_v11  ;;  %v4386_v21 = vsel %vm223_vm5, %v4385_v39, %v4384_v60  ;;  %v4427_v1 = vrot.slane %v10244_v38, 5  ;;  %v4467_v62 = vsel %vm221_vm2, %v4466_v25, %v4465_v35  ;;  %v3881_v55 = vld [vmem:[#allocation3 + $0x4c] sm:$0x1]  ;;  %3781 = vrot.lane.b32.xlu1 %v10098_v28, %s13219_s10  ;;  %s13310_s10 = smov 53  }
 0x18d   :  { %v10276_v53 = vsel %vm288_vm6, %v2653_v48, %v2654_v8  ;;  %v4426_v56 = vsel %vm284_vm4, %v4424_v34, %v4425_v14  ;;  %v3863_v49 = vrot.slane %v10251_v47, 6  ;;  %v4590_v22 = vsel %vm219_vm1, %v4589_v20, %v4573_v52  ;;  %v10281_v57 = vld [vmem:[#allocation3 + $0x6c] sm:$0x1]  ;;  %v4490_v12 = vld [vmem:[#allocation3 + $0x18] sm:$0x1]  ;;  %v2177_v35 = vpop.permute.xlu0 %2176 }
 0x18e   :  { %v10286_v17 = vsel %vm288_vm6, %v4301_v15, %v4302_v27  ;;  %v4469_v48 = vrot.slane %v10263_v9, 5  ;;  %v3862_v41 = vsel %vm280_vm3, %v3860_v51, %v3861_v33  ;;  %v3902_v34 = vrot.slane %v3882_v0, 7  ;;  %v10290_v46 = vld [vmem:[#allocation3 + $0x28] sm:$0x1]  ;;  %2054 = vst.msk [vmem:[#allocation2] sm:$0xf] %vm13303_vm10, %v2049_v18 }
 0x18f   :  { %vm13306_vm9 = vcmask 798368   ;;  %v10295_v42 = vsel %vm288_vm6, %v4343_v45, %v4344_v44  ;;  %v10298_v28 = vsel %vm288_vm6, %v4385_v39, %v4386_v21  ;;  %v4468_v15 = vsel %vm284_vm4, %v4466_v25, %v4467_v62  ;;  %v3924_v60 = vld [vmem:[#allocation3 + $0x5d] sm:$0x1]  ;;  %v10302_v38 = vld [vmem:[#allocation3 + $0x6d] sm:$0x1]  ;;  %v2091_v9 = vpop.permute.xlu1 %2090 }
 0x190   :  { %2139 = vst.msk [vmem:[#allocation2 + $0x8] sm:$0xf] %vm13306_vm9, %v2135_v30  ;;  %v4592_v11 = vrot.slane %v10273_v50, 6  ;;  %v4428_v51 = vsel %vm223_vm5, %v4427_v1, %v4426_v56  ;;  %v4591_v13 = vsel %vm280_vm3, %v4589_v20, %v4590_v22  ;;  %v3903_v26 = vsel %vm219_vm1, %v3902_v34, %v3881_v55  ;;  %v4489_v45 = vld [vmem:[#allocation3 + $0x8] sm:$0x1]  ;;  %3869 = vrot.lane.b32.xlu1 %v10141_v23, %s13231_s12 }
 0x191   :  { %v3905_v8 = vrot.slane %v10281_v57, 6  ;;  %v4532_v14 = vld [vmem:[#allocation3 + $0x19] sm:$0x1]  ;;  %v3864_v39 = vsel %vm221_vm2, %v3863_v49, %v3862_v41  ;;  %v3866_v16 = vrot.slane %v10271_v4, 5  ;;  %v10310_v25 = vld [vmem:[#allocation3 + $0x3a] sm:$0x1]  ;;  %v3904_v47 = vsel %vm280_vm3, %v3902_v34, %v3903_v26 }
 0x192   :  { %v4505_v52 = vrot.slane %v4490_v12, 7  ;;  %v3923_v27 = vld [vmem:[#allocation3 + $0x4d] sm:$0x1]  ;;  %vm2264_vm13 = vcmask 1014784   ;;  %v4470_v20 = vsel %vm223_vm5, %v4469_v48, %v4468_v15  ;;  %v4508_v33 = vrot.slane %v10290_v46, 6 }
 0x193   :  { %v3944_v0 = vrot.slane %v3924_v60, 7  ;;  %v3947_v44 = vrot.slane %v10302_v38, 6  ;;  %v4531_v21 = vld [vmem:[#allocation3 + $0x9] sm:$0x1]  ;;  %vm13307_vm10 = vcmask 683568   ;;  %vm13308_vm9 = vcmask 913168  }
 0x194   :  { %2096 = vst.msk [vmem:[#allocation2] sm:$0xf] %vm13307_vm10, %v2091_v9  ;;  %v10321_v62 = vsel %vm288_vm6, %v4427_v1, %v4428_v51  ;;  %v4593_v50 = vsel %vm221_vm2, %v4592_v11, %v4591_v13  ;;  %v10324_v56 = vld [vmem:[#allocation3 + $0x7c] sm:$0x1]  ;;  %v4506_v23 = vsel %vm219_vm1, %v4505_v52, %v4489_v45  ;;  %v4547_v22 = vrot.slane %v4532_v14, 7  ;;  %v2133_v51 = vpop.permute.xlu1 %2132  ;;  %v2219_v13 = vpop.permute.xlu0 %2218  ;;  %3911 = vrot.lane.b32.xlu1 %v10144_v40, %s13233_s14 }
 0x195   :  { %2181 = vst.msk [vmem:[#allocation2 + $0x8] sm:$0xf] %vm13308_vm9, %v2177_v35  ;;  %v3865_v55 = vsel %vm284_vm4, %v3863_v49, %v3864_v39  ;;  %v3906_v57 = vsel %vm221_vm2, %v3905_v8, %v3904_v47  ;;  %v10329_v18 = vld [vmem:[#allocation3 + $0x38] sm:$0x1]  ;;  %v4507_v30 = vsel %vm280_vm3, %v4505_v52, %v4506_v23  ;;  %v3945_v41 = vsel %vm219_vm1, %v3944_v0, %v3923_v27  ;;  %v10333_v34 = vld [vmem:[#allocation3 + $0x29] sm:$0x1] }
 0x196   :  { %v3966_v1 = vld [vmem:[#allocation3 + $0x5e] sm:$0x1]  ;;  %v10336_v12 = vsel %vm288_vm6, %v4469_v48, %v4470_v20  ;;  %v4595_v46 = vrot.slane %v10310_v25, 5  ;;  %v10339_v15 = vld [vmem:[#allocation3 + $0x7d] sm:$0x1]  ;;  %v3946_v49 = vsel %vm280_vm3, %v3944_v0, %v3945_v41  ;;  %v4548_v60 = vsel %vm219_vm1, %v4547_v22, %v4531_v21 }
 0x197   :  { %v3967_v38 = vld [vmem:[#allocation3 + $0x6e] sm:$0x1]  ;;  %v4594_v26 = vsel %vm284_vm4, %v4592_v11, %v4593_v50  ;;  %v3908_v45 = vrot.slane %v10324_v56, 5  ;;  %v4509_v48 = vsel %vm221_vm2, %v4508_v33, %v4507_v30  ;;  %v3948_v14 = vsel %vm221_vm2, %v3947_v44, %v3946_v49  ;;  %2223 = vst.msk [vmem:[#allocation2 + $0x8] sm:$0xf] %vm645_vm8, %v2219_v13 }
 0x198   :  { %v3965_v39 = vld [vmem:[#allocation3 + $0x4e] sm:$0x1]  ;;  %vm13309_vm10 = vcmask 798368   ;;  %v3867_v47 = vsel %vm223_vm5, %v3866_v16, %v3865_v55  ;;  %v3907_v52 = vsel %vm284_vm4, %v3905_v8, %v3906_v57  ;;  %v10355_v40 = vld [vmem:[#allocation3 + $0x39] sm:$0x1]  ;;  %v4550_v11 = vrot.slane %v10333_v34, 6  ;;  %v2261_v34 = vpop.permute.xlu0 %2260  ;;  %3953 = vrot.lane.b32.xlu1 %v10154_v58, %s13235_s15 }
 0x199   :  { %2138 = vst.msk [vmem:[#allocation2] sm:$0xf] %vm13309_vm10, %v2133_v51  ;;  %v3986_v27 = vrot.slane %v3966_v1, 7  ;;  %v4620_v9 = vld [vmem:[#allocation3 + $0x1b] sm:$0x1]  ;;  %v4511_v35 = vrot.slane %v10329_v18, 5  ;;  %v4549_v0 = vsel %vm280_vm3, %v4547_v22, %v4548_v60  ;;  %v4596_v23 = vsel %vm223_vm5, %v4595_v46, %v4594_v26  ;;  %v2175_v18 = vpop.permute.xlu1 %2174 }
 0x19a   :  { %v3950_v20 = vrot.slane %v10339_v15, 5  ;;  %v3989_v21 = vrot.slane %v3967_v38, 6  ;;  %v4200_v50 = vld [vmem:[#allocation3 + $0x51] sm:$0x1]  ;;  %v4510_v8 = vsel %vm284_vm4, %v4508_v33, %v4509_v48  ;;  %v3949_v55 = vsel %vm284_vm4, %v3947_v44, %v3948_v14  ;;  %v4619_v30 = vld [vmem:[#allocation3 + $0xb] sm:$0x1] }
 0x19b   :  { %v3987_v57 = vsel %vm219_vm1, %v3986_v27, %v3965_v39  ;;  %v10367_v41 = vld [vmem:[#allocation3 + $0x2b] sm:$0x1]  ;;  %v3909_v22 = vsel %vm223_vm5, %v3908_v45, %v3907_v52  ;;  %v4553_v1 = vrot.slane %v10355_v40, 5  ;;  %v10375_v15 = vld [vmem:[#allocation3 + $0x7e] sm:$0x1]  ;;  %v4635_v44 = vrot.slane %v4620_v9, 7 }
 0x19c   :  { %v3988_v33 = vsel %vm280_vm3, %v3986_v27, %v3987_v57  ;;  %v4199_v49 = vld [vmem:[#allocation3 + $0x41] sm:$0x1]  ;;  %2180 = vst.msk [vmem:[#allocation2] sm:$0xf] %vm13308_vm9, %v2175_v18  ;;  %v2263_v60 = vrot.slane %v2261_v34, 4  ;;  %v4551_v38 = vsel %vm221_vm2, %v4550_v11, %v4549_v0  ;;  %v4220_v13 = vrot.slane %v4200_v50, 7  ;;  %3995 = vrot.lane.b32.xlu1 %v10192_v61, %s13310_s10 }
 0x19d   :  { %v3990_v51 = vsel %vm221_vm2, %v3989_v21, %v3988_v33  ;;  %v10381_v58 = vld [vmem:[#allocation3 + $0x61] sm:$0x1]  ;;  %v4662_v26 = vld [vmem:[#allocation3 + $0x1c] sm:$0x1]  ;;  %v4512_v48 = vsel %vm223_vm5, %v4511_v35, %v4510_v8  ;;  %v3951_v14 = vsel %vm223_vm5, %v3950_v20, %v3949_v55  ;;  %v4636_v39 = vsel %vm219_vm1, %v4635_v44, %v4619_v30  ;;  %v4661_v18 = vld [vmem:[#allocation3 + $0xc] sm:$0x1]  ;;  %v2217_v50 = vpop.permute.xlu1 %2216  ;;  %v2308_v8 = vpop.permute.xlu0 %2307 }
 0x19e   :  { %v4638_v52 = vrot.slane %v10367_v41, 6  ;;  %v2266_v27 = vsel %vm2264_vm13, %v2263_v60, %v2261_v34  ;;  %v3992_v9 = vrot.slane %v10375_v15, 5  ;;  %v4637_v0 = vsel %vm280_vm3, %v4635_v44, %v4636_v39  ;;  %v4242_v33 = vld [vmem:[#allocation3 + $0x52] sm:$0x1]  ;;  %v10398_v34 = vld [vmem:[#allocation3 + $0x2c] sm:$0x1] }
 0x19f   :  { %v4221_v57 = vsel %vm219_vm1, %v4220_v13, %v4199_v49  ;;  %2270 = vst.msk [vmem:[#allocation2 + $0x8] sm:$0xff] %vm9063_vm15, %v2266_v27  ;;  %v4552_v55 = vsel %vm284_vm4, %v4550_v11, %v4551_v38  ;;  %v3991_v30 = vsel %vm284_vm4, %v3989_v21, %v3990_v51  ;;  %v4223_v41 = vrot.slane %v10381_v58, 6  ;;  %v10417_v21 = vld [vmem:[#allocation3 + $0x3b] sm:$0x1]  ;;  %v4241_v60 = vld [vmem:[#allocation3 + $0x42] sm:$0x1] }
 0x1a0   :  { %v4677_v15 = vrot.slane %v4662_v26, 7  ;;  %2222 = vst.msk [vmem:[#allocation2] sm:$0xf] %vm645_vm8, %v2217_v50  ;;  %v10405_v44 = vsel %vm288_vm6, %v3866_v16, %v3867_v47  ;;  %v10410_v61 = vsel %vm288_vm6, %v4595_v46, %v4596_v23  ;;  %v10415_v11 = vsel %vm288_vm6, %v3908_v45, %v3909_v22  ;;  %v10425_v47 = vld [vmem:[#allocation3 + $0x62] sm:$0x1]  ;;  %4229 = vrot.lane.b32.xlu1 %v10214_v24, %s7558_s23 }
 0x1a1   :  { %2312 = vst.msk [vmem:[#allocation2 + $0xc] sm:$0xf] %vm738_vm11, %v2308_v8  ;;  %v4222_v49 = vsel %vm280_vm3, %v4220_v13, %v4221_v57  ;;  %v10421_v4 = vsel %vm288_vm6, %v4511_v35, %v4512_v48  ;;  %v4639_v16 = vsel %vm221_vm2, %v4638_v52, %v4637_v0  ;;  %v4262_v46 = vrot.slane %v4242_v33, 7  ;;  %v4704_v23 = vld [vmem:[#allocation3 + $0x1d] sm:$0x1]  ;;  %v2259_v58 = vpop.permute.xlu1 %2258  ;;  %v2350_v13 = vpop.permute.xlu0 %2349 }
 0x1a2   :  { %v4678_v25 = vsel %vm219_vm1, %v4677_v15, %v4661_v18  ;;  %v10428_v56 = vsel %vm288_vm6, %v3950_v20, %v3951_v14  ;;  %v4554_v45 = vsel %vm223_vm5, %v4553_v1, %v4552_v55  ;;  %v3993_v22 = vsel %vm223_vm5, %v3992_v9, %v3991_v30  ;;  %v10434_v38 = vld [vmem:[#allocation3 + $0x71] sm:$0x1]  ;;  %v10436_v35 = vld [vmem:[#allocation3 + $0x3c] sm:$0x1]  ;;  %v4703_v39 = vld [vmem:[#allocation3 + $0xd] sm:$0x1] }
 0x1a3   :  { %v4680_v51 = vrot.slane %v10398_v34, 6  ;;  %v4641_v20 = vrot.slane %v10417_v21, 5  ;;  %v4224_v26 = vsel %vm221_vm2, %v4223_v41, %v4222_v49  ;;  %v4679_v48 = vsel %vm280_vm3, %v4677_v15, %v4678_v25  ;;  %v10445_v27 = vld [vmem:[#allocation3 + $0x2d] sm:$0x1]  ;;  %2354 = vst.msk [vmem:[#allocation2 + $0xc] sm:$0xf] %vm781_vm14, %v2350_v13 }
 0x1a4   :  { %v4263_v14 = vsel %vm219_vm1, %v4262_v46, %v4241_v60  ;;  %v2262_v0 = vrot.slane %v2259_v58, 4  ;;  %v4640_v57 = vsel %vm284_vm4, %v4638_v52, %v4639_v16  ;;  %v10449_v18 = vld [vmem:[#allocation3 + $0x72] sm:$0x1]  ;;  %v4265_v24 = vrot.slane %v10425_v47, 6  ;;  %v4284_v50 = vld [vmem:[#allocation3 + $0x53] sm:$0x1]  ;;  %4271 = vrot.lane.b32.xlu1 %v10260_v19, %s7559_s24 }
 0x1a5   :  { %v4719_v33 = vrot.slane %v4704_v23, 7  ;;  %v10455_v8 = vsel %vm288_vm6, %v4553_v1, %v4554_v45  ;;  %v10458_v55 = vsel %vm288_vm6, %v3992_v9, %v3993_v22  ;;  %v4226_v30 = vrot.slane %v10434_v38, 5  ;;  %v10462_v15 = vld [vmem:[#allocation3 + $0x63] sm:$0x1]  ;;  %v4746_v52 = vld [vmem:[#allocation3 + $0x1e] sm:$0x1]  ;;  %v2306_v9 = vpop.permute.xlu1 %2305 }
 0x1a6   :  { %v4264_v34 = vsel %vm280_vm3, %v4262_v46, %v4263_v14  ;;  %v2265_v49 = vsel %vm2264_vm13, %v2262_v0, %v2259_v58  ;;  %v4225_v60 = vsel %vm284_vm4, %v4223_v41, %v4224_v26  ;;  %v4681_v16 = vsel %vm221_vm2, %v4680_v51, %v4679_v48  ;;  %v4283_v1 = vld [vmem:[#allocation3 + $0x43] sm:$0x1]  ;;  %v4745_v25 = vld [vmem:[#allocation3 + $0xe] sm:$0x1]  ;;  %v2392_v46 = vpop.permute.xlu0 %2391  ;;  %v4326_v38 = vld [vmem:[#allocation3 + $0x54] sm:$0x1] }
 0x1a7   :  { %v4720_v40 = vsel %vm219_vm1, %v4719_v33, %v4703_v39  ;;  %v10468_v47 = vld [vmem:[#allocation3 + $0x2e] sm:$0x1]  ;;  %2269 = vst.msk [vmem:[#allocation2] sm:$0xff] %vm9063_vm15, %v2265_v49  ;;  %v4642_v41 = vsel %vm223_vm5, %v4641_v20, %v4640_v57  ;;  %v4683_v23 = vrot.slane %v10436_v35, 5  ;;  %v4722_v45 = vrot.slane %v10445_v27, 6  ;;  %251 = vadd.xlane.f32.xlu0 %v10240_v10 }
 0x1a8   :  { %v4304_v22 = vrot.slane %v4284_v50, 7  ;;  %2311 = vst.msk [vmem:[#allocation2 + $0x4] sm:$0xf] %vm738_vm11, %v2306_v9  ;;  %v4266_v58 = vsel %vm221_vm2, %v4265_v24, %v4264_v34  ;;  %v4721_v13 = vsel %vm280_vm3, %v4719_v33, %v4720_v40  ;;  %v4307_v19 = vrot.slane %v10462_v15, 6  ;;  %v10484_v48 = vld [vmem:[#allocation3 + $0x64] sm:$0x1]  ;;  %4313 = vrot.lane.b32.xlu1 %v10286_v17, %s7560_s25 }
 0x1a9   :  { %2396 = vst.msk [vmem:[#allocation2 + $0xc] sm:$0xf] %vm824_vm0, %v2392_v46  ;;  %v4761_v26 = vrot.slane %v4746_v52, 7  ;;  %v4227_v14 = vsel %vm223_vm5, %v4226_v30, %v4225_v60  ;;  %v4682_v35 = vsel %vm284_vm4, %v4680_v51, %v4681_v16  ;;  %v4268_v39 = vrot.slane %v10449_v18, 5  ;;  %v4325_v0 = vld [vmem:[#allocation3 + $0x44] sm:$0x1]  ;;  %v2348_v49 = vpop.permute.xlu1 %2347 }
 0x1aa   :  { %v4305_v27 = vsel %vm219_vm1, %v4304_v22, %v4283_v1  ;;  %v10490_v57 = vld [vmem:[#allocation3 + $0x3d] sm:$0x1]  ;;  %v4764_v34 = vrot.slane %v10468_v47, 6  ;;  %v4346_v15 = vrot.slane %v4326_v38, 7  ;;  %v5018_v52 = vld [vmem:[#allocation3 + $0x13] sm:$0x1]  ;;  %v2434_v60 = vpop.permute.xlu0 %2433  ;;  %v4267_v51 = vsel %vm284_vm4, %v4265_v24, %v4266_v58 }
 0x1ab   :  { %v4306_v50 = vsel %vm280_vm3, %v4304_v22, %v4305_v27  ;;  %v4762_v33 = vsel %vm219_vm1, %v4761_v26, %v4745_v25  ;;  %v4723_v18 = vsel %vm221_vm2, %v4722_v45, %v4721_v13  ;;  %v10500_v16 = vld [vmem:[#allocation3 + $0x73] sm:$0x1]  ;;  %v4349_v1 = vrot.slane %v10484_v48, 6  ;;  %2353 = vst.msk [vmem:[#allocation2 + $0x4] sm:$0xf] %vm781_vm14, %v2348_v49 }
 0x1ac   :  { %v4763_v40 = vsel %vm280_vm3, %v4761_v26, %v4762_v33  ;;  %2438 = vst.msk [vmem:[#allocation2 + $0xc] sm:$0xf] %vm867_vm12, %v2434_v60  ;;  %v10509_v10 = vsel %vm288_vm6, %v4641_v20, %v4642_v41  ;;  %v10512_v17 = vsel %vm288_vm6, %v4226_v30, %v4227_v14  ;;  %v4308_v24 = vsel %vm221_vm2, %v4307_v19, %v4306_v50  ;;  %v5017_v47 = vld [vmem:[#allocation3 + $0x3] sm:$0x1]  ;;  %v10520_v38 = vld [vmem:[#allocation3 + $0x3e] sm:$0x1] }
 0x1ad   :  { %v4347_v25 = vsel %vm219_vm1, %v4346_v15, %v4325_v0  ;;  %v10516_v9 = vld [vmem:[#allocation3 + $0x23] sm:$0x1]  ;;  %v4684_v46 = vsel %vm223_vm5, %v4683_v23, %v4682_v35  ;;  %v4725_v22 = vrot.slane %v10490_v57, 5  ;;  %v5033_v20 = vrot.slane %v5018_v52, 7  ;;  %v4368_v41 = vld [vmem:[#allocation3 + $0x55] sm:$0x1]  ;;  %v2390_v35 = vpop.permute.xlu1 %2389  ;;  %4355 = vrot.lane.b32.xlu1 %v10295_v42, %s7561_s26 }
 0x1ae   :  { %v4348_v21 = vsel %vm280_vm3, %v4346_v15, %v4347_v25  ;;  %v4269_v30 = vsel %vm223_vm5, %v4268_v39, %v4267_v51  ;;  %v4724_v58 = vsel %vm284_vm4, %v4722_v45, %v4723_v18  ;;  %v4310_v13 = vrot.slane %v10500_v16, 5  ;;  %v10527_v48 = vld [vmem:[#allocation3 + $0x74] sm:$0x1]  ;;  %v2706_v27 = vpop.permute.xlu0 %2705  ;;  %v4367_v33 = vld [vmem:[#allocation3 + $0x45] sm:$0x1] }
 0x1af   :  { %v4765_v26 = vsel %vm221_vm2, %v4764_v34, %v4763_v40  ;;  %v5060_v14 = vld [vmem:[#allocation3 + $0x14] sm:$0x1]  ;;  %v4309_v0 = vsel %vm284_vm4, %v4307_v19, %v4308_v24  ;;  %v4350_v57 = vsel %vm221_vm2, %v4349_v1, %v4348_v21  ;;  %v5034_v50 = vsel %vm219_vm1, %v5033_v20, %v5017_v47  ;;  %v10535_v15 = vld [vmem:[#allocation3 + $0x65] sm:$0x1]  ;;  %2395 = vst.msk [vmem:[#allocation2 + $0x4] sm:$0xf] %vm824_vm0, %v2390_v35 }
 0x1b0   :  { %v5036_v45 = vrot.slane %v10516_v9, 6  ;;  %v10539_v52 = vsel %vm288_vm6, %v4683_v23, %v4684_v46  ;;  %v4767_v49 = vrot.slane %v10520_v38, 5  ;;  %v5035_v42 = vsel %vm280_vm3, %v5033_v20, %v5034_v50  ;;  %v5059_v19 = vld [vmem:[#allocation3 + $0x4] sm:$0x1]  ;;  %v4410_v51 = vld [vmem:[#allocation3 + $0x56] sm:$0x1] }
 0x1b1   :  { %v4388_v60 = vrot.slane %v4368_v41, 7  ;;  %v4726_v18 = vsel %vm223_vm5, %v4725_v22, %v4724_v58  ;;  %v4766_v16 = vsel %vm284_vm4, %v4764_v34, %v4765_v26  ;;  %v4352_v40 = vrot.slane %v10527_v48, 5  ;;  %v10546_v24 = vld [vmem:[#allocation3 + $0x24] sm:$0x1]  ;;  %v10553_v46 = vld [vmem:[#allocation3 + $0x33] sm:$0x1]  ;;  %v2432_v41 = vpop.permute.xlu1 %2431  ;;  %4397 = vrot.lane.b32.xlu1 %v10298_v28, %s7562_s27 }
 0x1b2   :  { %v5075_v25 = vrot.slane %v5060_v14, 7  ;;  %v10549_v47 = vsel %vm288_vm6, %v4268_v39, %v4269_v30  ;;  %v4311_v23 = vsel %vm223_vm5, %v4310_v13, %v4309_v0  ;;  %v4351_v9 = vsel %vm284_vm4, %v4349_v1, %v4350_v57  ;;  %v4409_v21 = vld [vmem:[#allocation3 + $0x46] sm:$0x1]  ;;  %v2748_v58 = vpop.permute.xlu0 %2747  ;;  %v5102_v48 = vld [vmem:[#allocation3 + $0x15] sm:$0x1] }
 0x1b3   :  { %v4389_v38 = vsel %vm219_vm1, %v4388_v60, %v4367_v33  ;;  %v10556_v20 = vld [vmem:[#allocation3 + $0x66] sm:$0x1]  ;;  %v10558_v34 = vld [vmem:[#allocation2 + $0x8] sm:$0xff]  ;;  %v5037_v39 = vsel %vm221_vm2, %v5036_v45, %v5035_v42  ;;  %v4391_v30 = vrot.slane %v10535_v15, 6  ;;  %v4430_v26 = vrot.slane %v4410_v51, 7 }
 0x1b4   :  { %13311 = vst [vmem:[#allocation14_spill] sm:$0xff] %v10558_v34  ;;  %v5076_v1 = vsel %vm219_vm1, %v5075_v25, %v5059_v19  ;;  %2668 = vst.msk [vmem:[#allocation2 + $0x8] sm:$0xf] %vm13239_vm7, %v10195_v59  ;;  %v10569_v14 = vsel %vm288_vm6, %v4725_v22, %v4726_v18  ;;  %v4768_v35 = vsel %vm223_vm5, %v4767_v49, %v4766_v16  ;;  %v10572_v0 = vld [vmem:[#allocation3 + $0x75] sm:$0x1]  ;;  %v5078_v57 = vrot.slane %v10546_v24, 6 }
 0x1b5   :  { %2437 = vst.msk [vmem:[#allocation2 + $0x4] sm:$0xf] %vm867_vm12, %v2432_v41  ;;  %v4390_v28 = vsel %vm280_vm3, %v4388_v60, %v4389_v38  ;;  %v10576_v50 = vld [vmem:[#allocation3 + $0x25] sm:$0x1]  ;;  %vm13312_vm10 = vcmask 224368   ;;  %v4353_v33 = vsel %vm223_vm5, %v4352_v40, %v4351_v9  ;;  %v13223_v59 = vrot.slane %v10553_v46, 5  ;;  %v2704_v9 = vpop.permute.xlu1 %2703  ;;  %4439 = vrot.lane.b32.xlu1 %v10321_v62, %s13314_s9 }
 0x1b6   :  { %2710 = vst.msk [vmem:[#allocation2 + $0x8] sm:$0xf] %vm13312_vm10, %v2706_v27  ;;  %v10581_v15 = vld [vmem:[#allocation3 + $0x34] sm:$0x1]  ;;  %v5077_v22 = vsel %vm280_vm3, %v5075_v25, %v5076_v1  ;;  %v4431_v42 = vsel %vm219_vm1, %v4430_v26, %v4409_v21  ;;  %v5101_v19 = vld [vmem:[#allocation3 + $0x5] sm:$0x1]  ;;  %v10587_v60 = vsel %vm288_vm6, %v4310_v13, %v4311_v23  ;;  %v5038_v51 = vsel %vm284_vm4, %v5036_v45, %v5037_v39  ;;  %v2790_v38 = vpop.permute.xlu0 %2789 }
 0x1b7   :  { %vm13313_vm9 = vcmask 339168   ;;  %v10590_v18 = vld [vmem:[#allocation3 + $0x76] sm:$0x1]  ;;  %v4433_v27 = vrot.slane %v10556_v20, 6  ;;  %v5117_v16 = vrot.slane %v5102_v48, 7  ;;  %v10596_v25 = vsel %vm288_vm6, %v4767_v49, %v4768_v35 }
 0x1b8   :  { %2752 = vst.msk [vmem:[#allocation2 + $0x8] sm:$0xf] %vm13313_vm9, %v2748_v58  ;;  %v4452_v24 = vld [vmem:[#allocation3 + $0x57] sm:$0x1]  ;;  %v4392_v21 = vsel %vm221_vm2, %v4391_v30, %v4390_v28  ;;  %v4432_v13 = vsel %vm280_vm3, %v4430_v26, %v4431_v42  ;;  %v5120_v45 = vrot.slane %v10576_v50, 6  ;;  %vm13315_vm10 = vcmask 453968  }
 0x1b9   :  { %v4451_v23 = vld [vmem:[#allocation3 + $0x47] sm:$0x1]  ;;  %v5144_v41 = vld [vmem:[#allocation3 + $0x16] sm:$0x1]  ;;  %2794 = vst.msk [vmem:[#allocation2 + $0x8] sm:$0xf] %vm13315_vm10, %v2790_v38  ;;  %v10603_v20 = vsel %vm288_vm6, %v4352_v40, %v4353_v33  ;;  %v5079_v62 = vsel %vm221_vm2, %v5078_v57, %v5077_v22  ;;  %v5118_v49 = vsel %vm219_vm1, %v5117_v16, %v5101_v19  ;;  %v5040_v26 = vsel %vm223_vm5, %v13223_v59, %v5038_v51  ;;  %v2746_v48 = vpop.permute.xlu1 %2745 }
 0x1ba   :  { %v10608_v39 = vld [vmem:[#allocation3 + $0x67] sm:$0x1]  ;;  %v5143_v1 = vld [vmem:[#allocation3 + $0x6] sm:$0x1]  ;;  %v5119_v35 = vsel %vm280_vm3, %v5117_v16, %v5118_v49  ;;  %v4472_v28 = vrot.slane %v4452_v24, 7  ;;  %v4393_v33 = vsel %vm284_vm4, %v4391_v30, %v4392_v21  ;;  %v4434_v22 = vsel %vm221_vm2, %v4433_v27, %v4432_v13  ;;  %v2832_v59 = vpop.permute.xlu0 %2831  ;;  %4481 = vrot.lane.b32.xlu1 %v10336_v12, %s13316_s11 }
 0x1bb   :  { %v10615_v40 = vld [vmem:[#allocation3 + $0x26] sm:$0x1]  ;;  %v4578_v50 = vld [vmem:[#allocation3 + $0x5a] sm:$0x1]  ;;  %v10620_v19 = vld [vmem:[#allocation3 + $0x35] sm:$0x1]  ;;  %v5080_v16 = vsel %vm284_vm4, %v5078_v57, %v5079_v62  ;;  %v5121_v30 = vsel %vm221_vm2, %v5120_v45, %v5119_v35 }
 0x1bc   :  { %v5159_v38 = vrot.slane %v5144_v41, 7  ;;  %v10622_v58 = vld [vmem:[#allocation3 + $0x6a] sm:$0x1]  ;;  %v10624_v51 = vld [vmem:[#allocation2] sm:$0xff]  ;;  %v4473_v24 = vsel %vm219_vm1, %v4472_v28, %v4451_v23  ;;  %v4475_v21 = vrot.slane %v10608_v39, 6  ;;  %vm13317_vm9 = vcmask 568768  }
 0x1bd   :  { %v4577_v13 = vld [vmem:[#allocation3 + $0x4a] sm:$0x1]  ;;  %2667 = vst.msk [vmem:[#allocation2] sm:$0xf] %vm13239_vm7, %v10276_v53  ;;  %v4474_v41 = vsel %vm280_vm3, %v4472_v28, %v4473_v24  ;;  %v5162_v12 = vrot.slane %v10615_v40, 6  ;;  %v4598_v42 = vrot.slane %v4578_v50, 7  ;;  %v4435_v23 = vsel %vm284_vm4, %v4433_v27, %v4434_v22  ;;  %v2788_v24 = vpop.permute.xlu1 %2787  ;;  %3871 = vrot.lane.b32.xlu0 %v10405_v44, %s13231_s12 }
 0x1be   :  { %2836 = vst.msk [vmem:[#allocation2 + $0x8] sm:$0xf] %vm13317_vm9, %v2832_v59  ;;  %v5160_v49 = vsel %vm219_vm1, %v5159_v38, %v5143_v1  ;;  %v5186_v57 = vld [vmem:[#allocation3 + $0x17] sm:$0x1]  ;;  %vm13318_vm10 = vcmask 224368   ;;  %v5123_v62 = vrot.slane %v10620_v19, 5  ;;  %v5122_v40 = vsel %vm284_vm4, %v5120_v45, %v5121_v30  ;;  %4607 = vrot.lane.b32.xlu1 %v10410_v61, %s13322_s8 }
 0x1bf   :  { %2709 = vst.msk [vmem:[#allocation2] sm:$0xf] %vm13318_vm10, %v2704_v9  ;;  %v10641_v39 = vld [vmem:[#allocation3 + $0x77] sm:$0x1]  ;;  %v5161_v53 = vsel %vm280_vm3, %v5159_v38, %v5160_v49  ;;  %v4601_v59 = vrot.slane %v10622_v58, 6  ;;  %vm13319_vm9 = vcmask 339168   ;;  %v4599_v58 = vsel %vm219_vm1, %v4598_v42, %v4577_v13 }
 0x1c0   :  { %v5187_v35 = vld [vmem:[#allocation3 + $0x27] sm:$0x1]  ;;  %2751 = vst.msk [vmem:[#allocation2] sm:$0xf] %vm13319_vm9, %v2746_v48  ;;  %v13320_v1 = vrot.slane %v10553_v46, 5  ;;  %v13321_v9 = vrot.slane %v10572_v0, 5  ;;  %v2874_v48 = vpop.permute.xlu0 %2873  ;;  %v4600_v45 = vsel %vm280_vm3, %v4598_v42, %v4599_v58 }
 0x1c1   :  { %v10655_v50 = vld [vmem:[#allocation3 + $0x36] sm:$0x1]  ;;  %v10657_v22 = vld [vmem:[#allocation3 + $0x7a] sm:$0x1]  ;;  %v5185_v38 = vld [vmem:[#allocation3 + $0x7] sm:$0x1]  ;;  %v2830_v6 = vpop.permute.xlu1 %2829  ;;  %3913 = vrot.lane.b32.xlu0 %v10415_v11, %s13233_s14 }
 0x1c2   :  { %v10649_v28 = vsel %vm288_vm6, %v13320_v1, %v5040_v26  ;;  %v4395_v27 = vsel %vm223_vm5, %v13321_v9, %v4393_v33  ;;  %v13323_v46 = vrot.slane %v10581_v15, 5  ;;  %v4476_v33 = vsel %vm221_vm2, %v4475_v21, %v4474_v41  ;;  %v4494_v49 = vld [vmem:[#allocation3 + $0x58] sm:$0x1]  ;;  %v10667_v1 = vld [vmem:[#allocation3 + $0x68] sm:$0x1]  ;;  %s13327_s12 = smov 96  }
 0x1c3   :  { %v5201_v30 = vrot.slane %v5186_v57, 7  ;;  %vm13324_vm10 = vcmask 453968   ;;  %vm13325_vm9 = vcmask 683568   ;;  %v13326_v13 = vrot.slane %v10590_v18, 5  ;;  %v5228_v42 = vld [vmem:[#allocation3 + $0x18] sm:$0x1]  ;;  %4523 = vrot.lane.b32.xlu1 %v10421_v4, %s13327_s12 }
 0x1c4   :  { %v5082_v26 = vsel %vm223_vm5, %v13323_v46, %v5080_v16  ;;  %2793 = vst.msk [vmem:[#allocation2] sm:$0xf] %vm13324_vm10, %v2788_v24  ;;  %v4478_v9 = vrot.slane %v10641_v39, 5  ;;  %v5163_v16 = vsel %vm221_vm2, %v5162_v12, %v5161_v53  ;;  %v10676_v46 = vld [vmem:[#allocation3 + $0x37] sm:$0x1]  ;;  %v5204_v41 = vrot.slane %v5187_v35, 6 }
 0x1c5   :  { %2878 = vst.msk [vmem:[#allocation2 + $0x8] sm:$0xf] %vm13325_vm9, %v2874_v48  ;;  %v4437_v61 = vsel %vm223_vm5, %v13326_v13, %v4435_v23  ;;  %v5124_v57 = vsel %vm223_vm5, %v5123_v62, %v5122_v40  ;;  %v5165_v58 = vrot.slane %v10655_v50, 5  ;;  %v4602_v24 = vsel %vm221_vm2, %v4601_v59, %v4600_v45  ;;  %v4493_v39 = vld [vmem:[#allocation3 + $0x48] sm:$0x1]  ;;  %v2916_v40 = vpop.permute.xlu0 %2915  ;;  %s13331_s14 = smov 110   ;;  %3955 = vrot.lane.b32.xlu0 %v10428_v56, %s13235_s15 }
 0x1c6   :  { %v5202_v23 = vsel %vm219_vm1, %v5201_v30, %v5185_v38  ;;  %v5227_v48 = vld [vmem:[#allocation3 + $0x8] sm:$0x1]  ;;  %v4477_v53 = vsel %vm284_vm4, %v4475_v21, %v4476_v33  ;;  %v4514_v13 = vrot.slane %v4494_v49, 7  ;;  %v4517_v34 = vrot.slane %v10667_v1, 6  ;;  %v10704_v4 = vld [vmem:[#allocation3 + $0x78] sm:$0x1] }
 0x1c7   :  { %v5203_v35 = vsel %vm280_vm3, %v5201_v30, %v5202_v23  ;;  %v10689_v44 = vld [vmem:[#allocation3 + $0x28] sm:$0x1]  ;;  %v5164_v50 = vsel %vm284_vm4, %v5162_v12, %v5163_v16  ;;  %v4604_v38 = vrot.slane %v10657_v22, 5  ;;  %v5243_v21 = vrot.slane %v5228_v42, 7  ;;  %v4535_v16 = vld [vmem:[#allocation3 + $0x49] sm:$0x1]  ;;  %4565 = vrot.lane.b32.xlu1 %v10455_v8, %s13331_s14 }
 0x1c8   :  { %v5205_v45 = vsel %vm221_vm2, %v5204_v41, %v5203_v35  ;;  %vm13328_vm10 = vcmask 568768   ;;  %vm13329_vm9 = vcmask 798368   ;;  %v4603_v33 = vsel %vm284_vm4, %v4601_v59, %v4602_v24  ;;  %v5354_v23 = vld [vmem:[#allocation3 + $0x1b] sm:$0x1]  ;;  %v10762_v56 = vld [vmem:[#allocation3 + $0x79] sm:$0x1] }
 0x1c9   :  { %2835 = vst.msk [vmem:[#allocation2] sm:$0xf] %vm13328_vm10, %v2830_v6  ;;  %v5206_v30 = vsel %vm284_vm4, %v5204_v41, %v5205_v45  ;;  %v5207_v49 = vrot.slane %v10676_v46, 5  ;;  %v4515_v1 = vsel %vm219_vm1, %v4514_v13, %v4493_v39  ;;  %v5244_v22 = vsel %vm219_vm1, %v5243_v21, %v5227_v48  ;;  %v2872_v39 = vpop.permute.xlu1 %2871  ;;  %v10717_v35 = vpop.permute.xlu0 %3041  ;;  %s13335_s15 = smov 10   ;;  %3997 = vrot.lane.b32.xlu0 %v10458_v55, %s13310_s10 }
 0x1ca   :  { %2920 = vst.msk [vmem:[#allocation2 + $0x8] sm:$0xf] %vm13329_vm9, %v2916_v40  ;;  %v4516_v12 = vsel %vm280_vm3, %v4514_v13, %v4515_v1  ;;  %v5246_v6 = vrot.slane %v10689_v44, 6  ;;  %v4556_v42 = vrot.slane %v4536_v31, 7  ;;  %v13330_v59 = vrot.slane %v10572_v0, 5 }
 0x1cb   :  { %v4479_v46 = vsel %vm223_vm5, %v4478_v9, %v4477_v53  ;;  %v4518_v24 = vsel %vm221_vm2, %v4517_v34, %v4516_v12  ;;  %v5245_v11 = vsel %vm280_vm3, %v5243_v21, %v5244_v22  ;;  %v13332_v31 = vrot.slane %v10581_v15, 5  ;;  %v10733_v44 = vld [vmem:[#allocation3 + $0x38] sm:$0x1]  ;;  %v10735_v40 = vld [vmem:[#allocation3 + $0x69] sm:$0x1]  ;;  %4653 = vrot.lane.b32.xlu1 %v10509_v10, %s13335_s15 }
 0x1cc   :  { %v10712_v41 = vsel %vm288_vm6, %v13330_v59, %v4395_v27  ;;  %v13333_v27 = vrot.slane %v10590_v18, 5  ;;  %v5166_v53 = vsel %vm223_vm5, %v5165_v58, %v5164_v50  ;;  %v4605_v13 = vsel %vm223_vm5, %v4604_v38, %v4603_v33  ;;  %v4624_v50 = vld [vmem:[#allocation3 + $0x5b] sm:$0x1]  ;;  %v4623_v33 = vld [vmem:[#allocation3 + $0x4b] sm:$0x1] }
 0x1cd   :  { %v10724_v0 = vsel %vm288_vm6, %v13332_v31, %v5082_v26  ;;  %vm13334_vm10 = vcmask 683568   ;;  %v10741_v8 = vsel %vm288_vm6, %v5123_v62, %v5124_v57  ;;  %v5208_v15 = vsel %vm223_vm5, %v5207_v49, %v5206_v30  ;;  %v10753_v62 = vld [vmem:[#allocation3 + $0x2b] sm:$0x1]  ;;  %v2914_v22 = vpop.permute.xlu1 %2913  ;;  %v5269_v31 = vld [vmem:[#allocation3 + $0x9] sm:$0x1]  ;;  %4231 = vrot.lane.b32.xlu0 %v10512_v17, %s7558_s23 }
 0x1ce   :  { %v10729_v48 = vsel %vm288_vm6, %v13333_v27, %v4437_v61  ;;  %2877 = vst.msk [vmem:[#allocation2] sm:$0xf] %vm13334_vm10, %v2872_v39  ;;  %v4520_v18 = vrot.slane %v10704_v4, 5  ;;  %v4557_v26 = vsel %vm219_vm1, %v4556_v42, %v4535_v16  ;;  %v5353_v61 = vld [vmem:[#allocation3 + $0xb] sm:$0x1]  ;;  %v10749_v45 = vsel %vm288_vm6, %v4478_v9, %v4479_v46  ;;  %v2958_v16 = vpop.permute.xlu0 %2957 }
 0x1cf   :  { %v4519_v21 = vsel %vm284_vm4, %v4517_v34, %v4518_v24  ;;  %v5247_v19 = vsel %vm221_vm2, %v5246_v6, %v5245_v11  ;;  %v5369_v57 = vrot.slane %v5354_v23, 7  ;;  %v10756_v30 = vsel %vm288_vm6, %v5165_v58, %v5166_v53  ;;  %v10765_v12 = vld [vmem:[#allocation3 + $0x6b] sm:$0x1]  ;;  %v5270_v34 = vld [vmem:[#allocation3 + $0x19] sm:$0x1]  ;;  %4695 = vrot.lane.b32.xlu1 %v10539_v52, %s13337_s7 }
 0x1d0   :  { %v10759_v1 = vsel %vm288_vm6, %v4604_v38, %v4605_v13  ;;  %v5249_v4 = vrot.slane %v10733_v44, 5  ;;  %v4559_v9 = vrot.slane %v10735_v40, 6  ;;  %v10770_v58 = vsel %vm288_vm6, %v5207_v49, %v5208_v15  ;;  %v10774_v24 = vld [vmem:[#allocation3 + $0x29] sm:$0x1]  ;;  %v4666_v11 = vld [vmem:[#allocation3 + $0x5c] sm:$0x1] }
 0x1d1   :  { %v4558_v38 = vsel %vm280_vm3, %v4556_v42, %v4557_v26  ;;  %v5370_v59 = vsel %vm219_vm1, %v5369_v57, %v5353_v61  ;;  %v4644_v46 = vrot.slane %v4624_v50, 7  ;;  %v3044_v23 = vrot.slane %v10717_v35, 4  ;;  %2919 = vst.msk [vmem:[#allocation2] sm:$0xf] %vm13329_vm9, %v2914_v22  ;;  %v10782_v42 = vld [vmem:[#allocation3 + $0x6c] sm:$0x1]  ;;  %4273 = vrot.lane.b32.xlu0 %v10549_v47, %s7559_s24 }
 0x1d2   :  { %vm13336_vm10 = vcmask 913168   ;;  %v4521_v39 = vsel %vm223_vm5, %v4520_v18, %v4519_v21  ;;  %v5248_v10 = vsel %vm284_vm4, %v5246_v6, %v5247_v19  ;;  %v5372_v49 = vrot.slane %v10753_v62, 6  ;;  %v4665_v61 = vld [vmem:[#allocation3 + $0x4c] sm:$0x1]  ;;  %v3040_v21 = vpop.permute.xlu1 %3039  ;;  %v3000_v19 = vpop.permute.xlu0 %2999 }
 0x1d3   :  { %2962 = vst.msk [vmem:[#allocation2 + $0x8] sm:$0xf] %vm13336_vm10, %v2958_v16  ;;  %v5371_v27 = vsel %vm280_vm3, %v5369_v57, %v5370_v59  ;;  %v4645_v53 = vsel %vm219_vm1, %v4644_v46, %v4623_v33  ;;  %v4647_v13 = vrot.slane %v10765_v12, 6  ;;  %v5285_v40 = vrot.slane %v5270_v34, 7  ;;  %v10798_v57 = vld [vmem:[#allocation3 + $0x3b] sm:$0x1]  ;;  %4737 = vrot.lane.b32.xlu1 %v10569_v14, %s7584_s13 }
 0x1d4   :  { %v4560_v15 = vsel %vm221_vm2, %v4559_v9, %v4558_v38  ;;  %v4646_v26 = vsel %vm280_vm3, %v4644_v46, %v4645_v53  ;;  %v5288_v6 = vrot.slane %v10774_v24, 6  ;;  %v4686_v50 = vrot.slane %v4666_v11, 7  ;;  %v10800_v33 = vld [vmem:[#allocation3 + $0x7b] sm:$0x1]  ;;  %3004 = vst.msk [vmem:[#allocation2 + $0x8] sm:$0xf] %vm645_vm8, %v3000_v19 }
 0x1d5   :  { %v10795_v55 = vsel %vm288_vm6, %v4520_v18, %v4521_v39  ;;  %v4562_v62 = vrot.slane %v10762_v56, 5  ;;  %v5286_v12 = vsel %vm219_vm1, %v5285_v40, %v5269_v31  ;;  %v4689_v34 = vrot.slane %v10782_v42, 6  ;;  %v10811_v16 = vld [vmem:[#allocation3 + $0x39] sm:$0x1]  ;;  %v10814_v59 = vld [vmem:[#allocation3 + $0x7c] sm:$0x1]  ;;  %4315 = vrot.lane.b32.xlu0 %v10587_v60, %s7560_s25 }
 0x1d6   :  { %vm13338_vm9 = vcmask 1031168   ;;  %v5250_v52 = vsel %vm223_vm5, %v5249_v4, %v5248_v10  ;;  %v5373_v18 = vsel %vm221_vm2, %v5372_v49, %v5371_v27  ;;  %v5287_v38 = vsel %vm280_vm3, %v5285_v40, %v5286_v12  ;;  %v5312_v46 = vld [vmem:[#allocation3 + $0x1a] sm:$0x1]  ;;  %v10823_v39 = vld [vmem:[#allocation3 + $0x2a] sm:$0x1]  ;;  %v2956_v17 = vpop.permute.xlu1 %2955 }
 0x1d7   :  { %v3046_v22 = vsel %vm13338_vm9, %v3044_v23, %v10717_v35  ;;  %v3043_v24 = vrot.slane %v3040_v21, 4  ;;  %v4561_v35 = vsel %vm284_vm4, %v4559_v9, %v4560_v15  ;;  %v4648_v11 = vsel %vm221_vm2, %v4647_v13, %v4646_v26  ;;  %v4708_v10 = vld [vmem:[#allocation3 + $0x5d] sm:$0x1]  ;;  %v5311_v40 = vld [vmem:[#allocation3 + $0xa] sm:$0x1]  ;;  %v3088_v9 = vpop.permute.xlu0 %3087  ;;  %4779 = vrot.lane.b32.xlu1 %v10596_v25, %s7585_s0 }
 0x1d8   :  { %3050 = vst.msk [vmem:[#allocation2 + $0x8] sm:$0xff] %vm9063_vm15, %v3046_v22  ;;  %v4687_v23 = vsel %vm219_vm1, %v4686_v50, %v4665_v61  ;;  %v5375_v31 = vrot.slane %v10798_v57, 5  ;;  %v5289_v27 = vsel %vm221_vm2, %v5288_v6, %v5287_v38  ;;  %v10829_v19 = vld [vmem:[#allocation3 + $0x6d] sm:$0x1]  ;;  %v5374_v15 = vsel %vm284_vm4, %v5372_v49, %v5373_v18  ;;  %v5400_v42 = vld [vmem:[#allocation3 + $0x1c] sm:$0x1] }
 0x1d9   :  { %v4688_v53 = vsel %vm280_vm3, %v4686_v50, %v4687_v23  ;;  %v5291_v26 = vrot.slane %v10811_v16, 5  ;;  %v5327_v12 = vrot.slane %v5312_v46, 7  ;;  %v4707_v22 = vld [vmem:[#allocation3 + $0x4d] sm:$0x1]  ;;  %2961 = vst.msk [vmem:[#allocation2] sm:$0xf] %vm13336_vm10, %v2956_v17  ;;  %v4649_v50 = vsel %vm284_vm4, %v4647_v13, %v4648_v11  ;;  %4357 = vrot.lane.b32.xlu0 %v10603_v20, %s7561_s26 }
 0x1da   :  { %v4690_v61 = vsel %vm221_vm2, %v4689_v34, %v4688_v53  ;;  %3092 = vst.msk [vmem:[#allocation2 + $0xc] sm:$0xf] %vm738_vm11, %v3088_v9  ;;  %v4692_v38 = vrot.slane %v10814_v59, 5  ;;  %v5330_v23 = vrot.slane %v10823_v39, 6  ;;  %v4728_v14 = vrot.slane %v4708_v10, 7 }
 0x1db   :  { %v3045_v49 = vsel %vm13338_vm9, %v3043_v24, %v3040_v21  ;;  %v5290_v18 = vsel %vm284_vm4, %v5288_v6, %v5289_v27  ;;  %v5328_v46 = vsel %vm219_vm1, %v5327_v12, %v5311_v40  ;;  %v4731_v53 = vrot.slane %v10829_v19, 6  ;;  %v5399_v17 = vld [vmem:[#allocation3 + $0xc] sm:$0x1]  ;;  %v10847_v9 = vld [vmem:[#allocation3 + $0x5e] sm:$0x1]  ;;  %v2998_v24 = vpop.permute.xlu1 %2997  ;;  %v3130_v47 = vpop.permute.xlu0 %3129  ;;  %5051 = vrot.lane.b32.xlu1 %v10649_v28, %s7550_s1 }
 0x1dc   :  { %v4691_v13 = vsel %vm284_vm4, %v4689_v34, %v4690_v61  ;;  %v5329_v59 = vsel %vm280_vm3, %v5327_v12, %v5328_v46  ;;  %v4729_v11 = vsel %vm219_vm1, %v4728_v14, %v4707_v22  ;;  %v10852_v39 = vld [vmem:[#allocation3 + $0x2c] sm:$0x1]  ;;  %v5415_v21 = vrot.slane %v5400_v42, 7  ;;  %v10867_v27 = vld [vmem:[#allocation3 + $0x3a] sm:$0x1] }
 0x1dd   :  { %v10859_v6 = vsel %vm288_vm6, %v5249_v4, %v5250_v52  ;;  %v4563_v34 = vsel %vm223_vm5, %v4562_v62, %v4561_v35  ;;  %v5376_v10 = vsel %vm223_vm5, %v5375_v31, %v5374_v15  ;;  %v10869_v42 = vld [vmem:[#allocation3 + $0x7d] sm:$0x1]  ;;  %v4730_v40 = vsel %vm280_vm3, %v4728_v14, %v4729_v11  ;;  %3003 = vst.msk [vmem:[#allocation2] sm:$0xf] %vm645_vm8, %v2998_v24  ;;  %v4749_v52 = vld [vmem:[#allocation3 + $0x4e] sm:$0x1] }
 0x1de   :  { %3134 = vst.msk [vmem:[#allocation2 + $0xc] sm:$0xf] %vm781_vm14, %v3130_v47  ;;  %v5331_v25 = vsel %vm221_vm2, %v5330_v23, %v5329_v59  ;;  %v4732_v44 = vsel %vm221_vm2, %v4731_v53, %v4730_v40  ;;  %v5416_v4 = vsel %vm219_vm1, %v5415_v21, %v5399_v17  ;;  %v4770_v35 = vrot.slane %v10847_v9, 7  ;;  %v10889_v22 = vld [vmem:[#allocation3 + $0x3c] sm:$0x1]  ;;  %4399 = vrot.lane.b32.xlu0 %v10712_v41, %s7562_s27 }
 0x1df   :  { %3049 = vst.msk [vmem:[#allocation2] sm:$0xff] %vm9063_vm15, %v3045_v49  ;;  %v13339_v19 = vrot.slane %v10800_v33, 5  ;;  %v5292_v61 = vsel %vm223_vm5, %v5291_v26, %v5290_v18  ;;  %v4693_v12 = vsel %vm223_vm5, %v4692_v38, %v4691_v13  ;;  %v5418_v14 = vrot.slane %v10852_v39, 6  ;;  %v5442_v46 = vld [vmem:[#allocation3 + $0x1d] sm:$0x1]  ;;  %v3086_v13 = vpop.permute.xlu1 %3085  ;;  %v3172_v59 = vpop.permute.xlu0 %3171  ;;  %5093 = vrot.lane.b32.xlu1 %v10724_v0, %s7551_s16 }
 0x1e0   :  { %v10895_v49 = vsel %vm288_vm6, %v4562_v62, %v4563_v34  ;;  %v5333_v60 = vrot.slane %v10867_v27, 5  ;;  %v5417_v17 = vsel %vm280_vm3, %v5415_v21, %v5416_v4  ;;  %v10900_v9 = vld [vmem:[#allocation3 + $0x6e] sm:$0x1]  ;;  %v5022_v18 = vld [vmem:[#allocation3 + $0x53] sm:$0x1]  ;;  %v10907_v56 = vsel %vm288_vm6, %v5375_v31, %v5376_v10 }
 0x1e1   :  { %v4651_v15 = vsel %vm223_vm5, %v13339_v19, %v4649_v50  ;;  %v4734_v50 = vrot.slane %v10869_v42, 5  ;;  %v5332_v62 = vsel %vm284_vm4, %v5330_v23, %v5331_v25  ;;  %v4733_v11 = vsel %vm284_vm4, %v4731_v53, %v4732_v44  ;;  %v5441_v21 = vld [vmem:[#allocation3 + $0xd] sm:$0x1]  ;;  %v5021_v47 = vld [vmem:[#allocation3 + $0x43] sm:$0x1] }
 0x1e2   :  { %v4771_v39 = vsel %vm219_vm1, %v4770_v35, %v4749_v52  ;;  %v10912_v24 = vld [vmem:[#allocation3 + $0x2d] sm:$0x1]  ;;  %3091 = vst.msk [vmem:[#allocation2 + $0x4] sm:$0xf] %vm738_vm11, %v3086_v13  ;;  %v13340_v28 = vmov %v13339_v19  ;;  %v10924_v31 = vsel %vm288_vm6, %v5291_v26, %v5292_v61  ;;  %v10927_v23 = vsel %vm288_vm6, %v4692_v38, %v4693_v12  ;;  %v10929_v34 = vld [vmem:[#allocation3 + $0x63] sm:$0x1]  ;;  %4441 = vrot.lane.b32.xlu0 %v10729_v48, %s13314_s9 }
 0x1e3   :  { %3176 = vst.msk [vmem:[#allocation2 + $0xc] sm:$0xf] %vm824_vm0, %v3172_v59  ;;  %v10919_v57 = vsel %vm288_vm6, %v13340_v28, %v4651_v15  ;;  %v5457_v53 = vrot.slane %v5442_v46, 7  ;;  %v5484_v10 = vld [vmem:[#allocation3 + $0x1e] sm:$0x1]  ;;  %v5419_v33 = vsel %vm221_vm2, %v5418_v14, %v5417_v17  ;;  %v5421_v27 = vrot.slane %v10889_v22, 5  ;;  %v3128_v19 = vpop.permute.xlu1 %3127  ;;  %v3214_v15 = vpop.permute.xlu0 %3213  ;;  %5135 = vrot.lane.b32.xlu1 %v10741_v8, %s7552_s17 }
 0x1e4   :  { %v4773_v42 = vrot.slane %v10900_v9, 6  ;;  %v5042_v16 = vrot.slane %v5022_v18, 7  ;;  %v10936_v40 = vld [vmem:[#allocation3 + $0x2e] sm:$0x1]  ;;  %v5334_v26 = vsel %vm223_vm5, %v5333_v60, %v5332_v62  ;;  %v4735_v38 = vsel %vm223_vm5, %v4734_v50, %v4733_v11  ;;  %v10940_v25 = vld [vmem:[#allocation3 + $0x7e] sm:$0x1] }
 0x1e5   :  { %v4772_v44 = vsel %vm280_vm3, %v4770_v35, %v4771_v39  ;;  %v5458_v4 = vsel %vm219_vm1, %v5457_v53, %v5441_v21  ;;  %v5483_v20 = vld [vmem:[#allocation3 + $0xe] sm:$0x1]  ;;  %v5064_v52 = vld [vmem:[#allocation3 + $0x54] sm:$0x1]  ;;  %v5460_v61 = vrot.slane %v10912_v24, 6  ;;  %v5045_v46 = vrot.slane %v10929_v34, 6 }
 0x1e6   :  { %v5043_v12 = vsel %vm219_vm1, %v5042_v16, %v5021_v47  ;;  %v5499_v17 = vrot.slane %v5484_v10, 7  ;;  %v10949_v9 = vld [vmem:[#allocation3 + $0x64] sm:$0x1]  ;;  %3133 = vst.msk [vmem:[#allocation2 + $0x4] sm:$0xf] %vm781_vm14, %v3128_v19  ;;  %v5420_v35 = vsel %vm284_vm4, %v5418_v14, %v5419_v33  ;;  %v5459_v13 = vsel %vm280_vm3, %v5457_v53, %v5458_v4  ;;  %4483 = vrot.lane.b32.xlu0 %v10749_v45, %s13316_s11 }
 0x1e7   :  { %3218 = vst.msk [vmem:[#allocation2 + $0xc] sm:$0xf] %vm867_vm12, %v3214_v15  ;;  %v10954_v18 = vld [vmem:[#allocation3 + $0x3d] sm:$0x1]  ;;  %v5044_v0 = vsel %vm280_vm3, %v5042_v16, %v5043_v12  ;;  %v5502_v59 = vrot.slane %v10936_v40, 6  ;;  %v10962_v11 = vsel %vm288_vm6, %v5333_v60, %v5334_v26  ;;  %v4774_v39 = vsel %vm221_vm2, %v4773_v42, %v4772_v44  ;;  %v3170_v33 = vpop.permute.xlu1 %3169  ;;  %v3448_v16 = vpop.permute.xlu0 %3447  ;;  %5177 = vrot.lane.b32.xlu1 %v10756_v30, %s7553_s18 }
 0x1e8   :  { %v5063_v62 = vld [vmem:[#allocation3 + $0x44] sm:$0x1]  ;;  %v10965_v21 = vld [vmem:[#allocation3 + $0x73] sm:$0x1]  ;;  %v10967_v14 = vld [vmem:[#allocation3 + $0x3e] sm:$0x1]  ;;  %v5500_v24 = vsel %vm219_vm1, %v5499_v17, %v5483_v20  ;;  %v10971_v28 = vsel %vm288_vm6, %v4734_v50, %v4735_v38  ;;  %v5422_v40 = vsel %vm223_vm5, %v5421_v27, %v5420_v35  ;;  %v5461_v50 = vsel %vm221_vm2, %v5460_v61, %v5459_v13 }
 0x1e9   :  { %v5084_v47 = vrot.slane %v5064_v52, 7  ;;  %v4776_v53 = vrot.slane %v10940_v25, 5  ;;  %v5501_v34 = vsel %vm280_vm3, %v5499_v17, %v5500_v24  ;;  %v10975_v41 = vld [vmem:[#allocation3 + $0x74] sm:$0x1]  ;;  %v5087_v60 = vrot.slane %v10949_v9, 6 }
 0x1ea   :  { %v5526_v10 = vld [vmem:[#allocation3 + $0x1f] sm:$0x1]  ;;  %v5046_v26 = vsel %vm221_vm2, %v5045_v46, %v5044_v0  ;;  %v5525_v44 = vld [vmem:[#allocation3 + $0xf] sm:$0x1]  ;;  %v5106_v20 = vld [vmem:[#allocation3 + $0x55] sm:$0x1]  ;;  %v4775_v52 = vsel %vm284_vm4, %v4773_v42, %v4774_v39  ;;  %v5503_v19 = vsel %vm221_vm2, %v5502_v59, %v5501_v34  ;;  %v5462_v42 = vsel %vm284_vm4, %v5460_v61, %v5461_v50  ;;  %4609 = vrot.lane.b32.xlu0 %v10759_v1, %s13322_s8 }
 0x1eb   :  { %v5085_v38 = vsel %vm219_vm1, %v5084_v47, %v5063_v62  ;;  %v10986_v4 = vld [vmem:[#allocation3 + $0x2f] sm:$0x1]  ;;  %3175 = vst.msk [vmem:[#allocation2 + $0x4] sm:$0xf] %vm824_vm0, %v3170_v33  ;;  %v5463_v8 = vrot.slane %v10954_v18, 5  ;;  %v5048_v9 = vrot.slane %v10965_v21, 5  ;;  %v5047_v39 = vsel %vm284_vm4, %v5045_v46, %v5046_v26  ;;  %v3490_v48 = vpop.permute.xlu0 %3489  ;;  %5219 = vrot.lane.b32.xlu1 %v10770_v58, %s7554_s19 }
 0x1ec   :  { %v5086_v15 = vsel %vm280_vm3, %v5084_v47, %v5085_v38  ;;  %v5105_v12 = vld [vmem:[#allocation3 + $0x45] sm:$0x1]  ;;  %v5541_v0 = vrot.slane %v5526_v10, 7  ;;  %v5760_v62 = vld [vmem:[#allocation3 + $0x12] sm:$0x1]  ;;  %v5544_v24 = vrot.slane %v10986_v4, 6  ;;  %v3212_v38 = vpop.permute.xlu1 %3211  ;;  %v5504_v35 = vsel %vm284_vm4, %v5502_v59, %v5503_v19 }
 0x1ed   :  { %v5107_v17 = vld [vmem:[#allocation3 + $0x65] sm:$0x1]  ;;  %v5088_v13 = vsel %vm221_vm2, %v5087_v60, %v5086_v15  ;;  %v5126_v47 = vrot.slane %v5106_v20, 7  ;;  %v5759_v34 = vld [vmem:[#allocation3 + $0x2] sm:$0x1]  ;;  %v5090_v10 = vrot.slane %v10975_v41, 5  ;;  %v11023_v41 = vsel %vm288_vm6, %v5421_v27, %v5422_v40 }
 0x1ee   :  { %v11001_v33 = vld [vmem:[#allocation2 + $0x8] sm:$0xff]  ;;  %v5542_v15 = vsel %vm219_vm1, %v5541_v0, %v5525_v44  ;;  %v5129_v61 = vrot.slane %v5107_v17, 6  ;;  %v11008_v50 = vld [vmem:[#allocation3 + $0x56] sm:$0x1]  ;;  %3217 = vst.msk [vmem:[#allocation2 + $0x4] sm:$0xf] %vm867_vm12, %v3212_v38  ;;  %v5089_v46 = vsel %vm284_vm4, %v5087_v60, %v5088_v13  ;;  %v4777_v60 = vsel %vm223_vm5, %v4776_v53, %v4775_v52  ;;  %4525 = vrot.lane.b32.xlu0 %v10795_v55, %s13327_s12 }
 0x1ef   :  { %3452 = vst.msk [vmem:[#allocation2 + $0x8] sm:$0xf] %vm13239_vm7, %v3448_v16  ;;  %v5543_v26 = vsel %vm280_vm3, %v5541_v0, %v5542_v15  ;;  %v5127_v4 = vsel %vm219_vm1, %v5126_v47, %v5105_v12  ;;  %v11015_v30 = vld [vmem:[#allocation3 + $0x22] sm:$0x1]  ;;  %v5775_v59 = vrot.slane %v5760_v62, 7  ;;  %vm13341_vm10 = vcmask 224368   ;;  %v3532_v17 = vpop.permute.xlu0 %3531  ;;  %5261 = vrot.lane.b32.xlu1 %v10859_v6, %s7555_s20 }
 0x1f0   :  { %3494 = vst.msk [vmem:[#allocation2 + $0x8] sm:$0xf] %vm13341_vm10, %v3490_v48  ;;  %v5464_v16 = vsel %vm223_vm5, %v5463_v8, %v5462_v42  ;;  %v11031_v44 = vld [vmem:[#allocation3 + $0x3f] sm:$0x1]  ;;  %v11033_v20 = vld [vmem:[#allocation3 + $0x75] sm:$0x1]  ;;  %v5128_v19 = vsel %vm280_vm3, %v5126_v47, %v5127_v4  ;;  %v5545_v45 = vsel %vm221_vm2, %v5544_v24, %v5543_v26  ;;  %v3446_v52 = vpop.permute.xlu1 %3445  ;;  %v5049_v13 = vsel %vm223_vm5, %v5048_v9, %v5047_v39 }
 0x1f1   :  { %v5130_v22 = vsel %vm221_vm2, %v5129_v61, %v5128_v19  ;;  %v5776_v27 = vsel %vm219_vm1, %v5775_v59, %v5759_v34  ;;  %v5147_v40 = vld [vmem:[#allocation3 + $0x46] sm:$0x1]  ;;  %v5168_v12 = vrot.slane %v11008_v50, 7  ;;  %v13342_v0 = vrot.slane %v10967_v14, 5  ;;  %v11049_v47 = vld [vmem:[#allocation3 + $0x32] sm:$0x1] }
 0x1f2   :  { %v5091_v42 = vsel %vm223_vm5, %v5090_v10, %v5089_v46  ;;  %v5778_v34 = vrot.slane %v11015_v30, 6  ;;  %v5802_v38 = vld [vmem:[#allocation3 + $0x13] sm:$0x1]  ;;  %vm13343_vm9 = vcmask 339168   ;;  %v11056_v58 = vsel %vm288_vm6, %v4776_v53, %v4777_v60  ;;  %v11061_v15 = vld [vmem:[#allocation3 + $0x66] sm:$0x1]  ;;  %4567 = vrot.lane.b32.xlu0 %v10895_v49, %s13331_s14 }
 0x1f3   :  { %v5506_v62 = vsel %vm223_vm5, %v13342_v0, %v5504_v35  ;;  %3536 = vst.msk [vmem:[#allocation2 + $0x8] sm:$0xf] %vm13343_vm9, %v3532_v17  ;;  %v5547_v39 = vrot.slane %v11031_v44, 5  ;;  %v5132_v48 = vrot.slane %v11033_v20, 5  ;;  %v5777_v35 = vsel %vm280_vm3, %v5775_v59, %v5776_v27  ;;  %v5190_v50 = vld [vmem:[#allocation3 + $0x57] sm:$0x1]  ;;  %v3574_v19 = vpop.permute.xlu0 %3573  ;;  %5387 = vrot.lane.b32.xlu1 %v10907_v56, %s7558_s23 }
 0x1f4   :  { %v11068_v46 = vsel %vm288_vm6, %v5463_v8, %v5464_v16  ;;  %v5546_v25 = vsel %vm284_vm4, %v5544_v24, %v5545_v45  ;;  %v5131_v53 = vsel %vm284_vm4, %v5129_v61, %v5130_v22  ;;  %v5169_v26 = vsel %vm219_vm1, %v5168_v12, %v5147_v40  ;;  %v5801_v4 = vld [vmem:[#allocation3 + $0x3] sm:$0x1]  ;;  %v5189_v59 = vld [vmem:[#allocation3 + $0x47] sm:$0x1]  ;;  %v5844_v16 = vld [vmem:[#allocation3 + $0x14] sm:$0x1]  ;;  %v3488_v20 = vpop.permute.xlu1 %3487 }
 0x1f5   :  { %v11073_v30 = vld [vmem:[#allocation3 + $0x23] sm:$0x1]  ;;  %v11078_v60 = vsel %vm288_vm6, %v5048_v9, %v5049_v13  ;;  %v13344_v1 = vmov %v13342_v0  ;;  %v11086_v8 = vsel %vm288_vm6, %v5090_v10, %v5091_v42  ;;  %v5817_v24 = vrot.slane %v5802_v38, 7  ;;  %v11088_v61 = vld [vmem:[#allocation3 + $0x67] sm:$0x1]  ;;  %v11090_v44 = vld [vmem:[#allocation2] sm:$0xff] }
 0x1f6   :  { %v11083_v18 = vsel %vm288_vm6, %v13344_v1, %v5506_v62  ;;  %v5779_v21 = vsel %vm221_vm2, %v5778_v34, %v5777_v35  ;;  %v5781_v14 = vrot.slane %v11049_v47, 5  ;;  %v5171_v9 = vrot.slane %v11061_v15, 6  ;;  %v11097_v10 = vld [vmem:[#allocation3 + $0x24] sm:$0x1]  ;;  %3451 = vst.msk [vmem:[#allocation2] sm:$0xf] %vm13239_vm7, %v3446_v52  ;;  %4655 = vrot.lane.b32.xlu0 %v10919_v57, %s13335_s15 }
 0x1f7   :  { %v5210_v45 = vrot.slane %v5190_v50, 7  ;;  %vm13345_vm10 = vcmask 453968   ;;  %v5548_v22 = vsel %vm223_vm5, %v5547_v39, %v5546_v25  ;;  %v5133_v27 = vsel %vm223_vm5, %v5132_v48, %v5131_v53  ;;  %v11103_v40 = vld [vmem:[#allocation3 + $0x76] sm:$0x1]  ;;  %v5843_v13 = vld [vmem:[#allocation3 + $0x4] sm:$0x1]  ;;  %5303 = vrot.lane.b32.xlu1 %v10924_v31, %s7556_s21 }
 0x1f8   :  { %3578 = vst.msk [vmem:[#allocation2 + $0x8] sm:$0xf] %vm13345_vm10, %v3574_v19  ;;  %v5170_v6 = vsel %vm280_vm3, %v5168_v12, %v5169_v26  ;;  %v5818_v17 = vsel %vm219_vm1, %v5817_v24, %v5801_v4  ;;  %v5232_v0 = vld [vmem:[#allocation3 + $0x58] sm:$0x1]  ;;  %vm13346_vm9 = vcmask 224368   ;;  %v5820_v52 = vrot.slane %v11073_v30, 6  ;;  %v3530_v55 = vpop.permute.xlu1 %3529  ;;  %v3616_v4 = vpop.permute.xlu0 %3615 }
 0x1f9   :  { %3493 = vst.msk [vmem:[#allocation2] sm:$0xf] %vm13346_vm9, %v3488_v20  ;;  %v5211_v62 = vsel %vm219_vm1, %v5210_v45, %v5189_v59  ;;  %v5213_v42 = vrot.slane %v11088_v61, 6  ;;  %v5859_v38 = vrot.slane %v5844_v16, 7  ;;  %v5233_v35 = vld [vmem:[#allocation3 + $0x68] sm:$0x1]  ;;  %v5780_v15 = vsel %vm284_vm4, %v5778_v34, %v5779_v21 }
 0x1fa   :  { %v11114_v12 = vld [vmem:[#allocation3 + $0x33] sm:$0x1]  ;;  %v5819_v50 = vsel %vm280_vm3, %v5817_v24, %v5818_v17  ;;  %v5212_v25 = vsel %vm280_vm3, %v5210_v45, %v5211_v62  ;;  %v5862_v53 = vrot.slane %v11097_v10, 6  ;;  %v5231_v26 = vld [vmem:[#allocation3 + $0x48] sm:$0x1]  ;;  %v11122_v30 = vsel %vm288_vm6, %v5547_v39, %v5548_v22  ;;  %4697 = vrot.lane.b32.xlu0 %v10927_v23, %s13337_s7 }
 0x1fb   :  { %v5172_v59 = vsel %vm221_vm2, %v5171_v9, %v5170_v6  ;;  %v11125_v34 = vld [vmem:[#allocation3 + $0x77] sm:$0x1]  ;;  %v11127_v1 = vld [vmem:[#allocation3 + $0x34] sm:$0x1]  ;;  %v5860_v24 = vsel %vm219_vm1, %v5859_v38, %v5843_v13  ;;  %v5252_v61 = vrot.slane %v5232_v0, 7  ;;  %vm13347_vm10 = vcmask 339168   ;;  %5345 = vrot.lane.b32.xlu1 %v10962_v11, %s7557_s22 }
 0x1fc   :  { %3535 = vst.msk [vmem:[#allocation2] sm:$0xf] %vm13347_vm10, %v3530_v55  ;;  %vm13348_vm9 = vcmask 568768   ;;  %v11133_v16 = vsel %vm288_vm6, %v5132_v48, %v5133_v27  ;;  %v5174_v56 = vrot.slane %v11103_v40, 5  ;;  %v5861_v39 = vsel %vm280_vm3, %v5859_v38, %v5860_v24  ;;  %v5886_v19 = vld [vmem:[#allocation3 + $0x15] sm:$0x1] }
 0x1fd   :  { %3620 = vst.msk [vmem:[#allocation2 + $0x8] sm:$0xf] %vm13348_vm9, %v3616_v4  ;;  %v5255_v20 = vrot.slane %v5233_v35, 6  ;;  %v11137_v21 = vld [vmem:[#allocation3 + $0x25] sm:$0x1]  ;;  %v5782_v45 = vsel %vm223_vm5, %v5781_v14, %v5780_v15  ;;  %v5821_v10 = vsel %vm221_vm2, %v5820_v52, %v5819_v50  ;;  %v5214_v48 = vsel %vm221_vm2, %v5213_v42, %v5212_v25  ;;  %v3572_v15 = vpop.permute.xlu1 %3571  ;;  %v3658_v50 = vpop.permute.xlu0 %3657 }
 0x1fe   :  { %v11146_v22 = vld [vmem:[#allocation3 + $0x78] sm:$0x1]  ;;  %v5253_v27 = vsel %vm219_vm1, %v5252_v61, %v5231_v26  ;;  %v5885_v6 = vld [vmem:[#allocation3 + $0x5] sm:$0x1]  ;;  %v5358_v17 = vld [vmem:[#allocation3 + $0x5b] sm:$0x1]  ;;  %v5173_v13 = vsel %vm284_vm4, %v5171_v9, %v5172_v59  ;;  %v5863_v49 = vsel %vm221_vm2, %v5862_v53, %v5861_v39  ;;  %v5822_v59 = vsel %vm284_vm4, %v5820_v52, %v5821_v10  ;;  %4739 = vrot.lane.b32.xlu0 %v10971_v28, %s7584_s13 }
 0x1ff   :  { %v5823_v0 = vrot.slane %v11114_v12, 5  ;;  %v5254_v62 = vsel %vm280_vm3, %v5252_v61, %v5253_v27  ;;  %v5357_v38 = vld [vmem:[#allocation3 + $0x4b] sm:$0x1]  ;;  %v5216_v25 = vrot.slane %v11125_v34, 5  ;;  %v5901_v55 = vrot.slane %v5886_v19, 7  ;;  %5433 = vrot.lane.b32.xlu1 %v11023_v41, %s7559_s24 }
 0x200   :  { %v5359_v35 = vld [vmem:[#allocation3 + $0x6b] sm:$0x1]  ;;  %v5256_v26 = vsel %vm221_vm2, %v5255_v20, %v5254_v62  ;;  %v5904_v9 = vrot.slane %v11137_v21, 6  ;;  %v5928_v4 = vld [vmem:[#allocation3 + $0x16] sm:$0x1]  ;;  %vm13349_vm10 = vcmask 453968   ;;  %v5215_v24 = vsel %vm284_vm4, %v5213_v42, %v5214_v48 }
 0x201   :  { %3577 = vst.msk [vmem:[#allocation2] sm:$0xf] %vm13349_vm10, %v3572_v15  ;;  %vm13350_vm9 = vcmask 683568   ;;  %v5865_v61 = vrot.slane %v11127_v1, 5  ;;  %v5378_v39 = vrot.slane %v5358_v17, 7  ;;  %v5864_v31 = vsel %vm284_vm4, %v5862_v53, %v5863_v49  ;;  %v3614_v48 = vpop.permute.xlu1 %3613  ;;  %v3700_v57 = vpop.permute.xlu0 %3699 }
 0x202   :  { %3662 = vst.msk [vmem:[#allocation2 + $0x8] sm:$0xf] %vm13350_vm9, %v3658_v50  ;;  %v5258_v19 = vrot.slane %v11146_v22, 5  ;;  %v5902_v21 = vsel %vm219_vm1, %v5901_v55, %v5885_v6  ;;  %v5381_v27 = vrot.slane %v5359_v35, 6  ;;  %v5927_v62 = vld [vmem:[#allocation3 + $0x6] sm:$0x1]  ;;  %v5257_v50 = vsel %vm284_vm4, %v5255_v20, %v5256_v26  ;;  %4781 = vrot.lane.b32.xlu0 %v11056_v58, %s7585_s0 }
 0x203   :  { %v5274_v15 = vld [vmem:[#allocation3 + $0x59] sm:$0x1]  ;;  %v11169_v52 = vld [vmem:[#allocation3 + $0x35] sm:$0x1]  ;;  %v5903_v42 = vsel %vm280_vm3, %v5901_v55, %v5902_v21  ;;  %v5379_v1 = vsel %vm219_vm1, %v5378_v39, %v5357_v38  ;;  %v5943_v10 = vrot.slane %v5928_v4, 7  ;;  %v11178_v53 = vsel %vm288_vm6, %v5781_v14, %v5782_v45  ;;  %5475 = vrot.lane.b32.xlu1 %v11068_v46, %s7560_s25 }
 0x204   :  { %v5175_v20 = vsel %vm223_vm5, %v5174_v56, %v5173_v13  ;;  %v5905_v22 = vsel %vm221_vm2, %v5904_v9, %v5903_v42  ;;  %v11184_v6 = vld [vmem:[#allocation3 + $0x7b] sm:$0x1]  ;;  %v5380_v17 = vsel %vm280_vm3, %v5378_v39, %v5379_v1  ;;  %v11187_v49 = vld [vmem:[#allocation3 + $0x26] sm:$0x1]  ;;  %v5273_v38 = vld [vmem:[#allocation3 + $0x49] sm:$0x1]  ;;  %v5824_v11 = vsel %vm223_vm5, %v5823_v0, %v5822_v59 }
 0x205   :  { %vm13351_vm10 = vcmask 568768   ;;  %vm13352_vm9 = vcmask 798368   ;;  %v5382_v47 = vsel %vm221_vm2, %v5381_v27, %v5380_v17  ;;  %v5944_v14 = vsel %vm219_vm1, %v5943_v10, %v5927_v62  ;;  %v11196_v45 = vld [vmem:[#allocation3 + $0x69] sm:$0x1]  ;;  %v5970_v59 = vld [vmem:[#allocation3 + $0x17] sm:$0x1]  ;;  %v3656_v1 = vpop.permute.xlu1 %3655 }
 0x206   :  { %3619 = vst.msk [vmem:[#allocation2] sm:$0xf] %vm13351_vm10, %v3614_v48  ;;  %v5294_v13 = vrot.slane %v5274_v15, 7  ;;  %v5217_v35 = vsel %vm223_vm5, %v5216_v25, %v5215_v24  ;;  %v5866_v26 = vsel %vm223_vm5, %v5865_v61, %v5864_v31  ;;  %v5259_v55 = vsel %vm223_vm5, %v5258_v19, %v5257_v50  ;;  %v11208_v62 = vld [vmem:[#allocation3 + $0x36] sm:$0x1]  ;;  %v11212_v24 = vpop.permute.xlu0 %3825  ;;  %5053 = vrot.lane.b32.xlu0 %v11078_v60, %s7550_s1  ;;  %s13356_s1 = smov 69  }
 0x207   :  { %3704 = vst.msk [vmem:[#allocation2 + $0x8] sm:$0xf] %vm13352_vm9, %v3700_v57  ;;  %v5907_v4 = vrot.slane %v11169_v52, 5  ;;  %v5906_v39 = vsel %vm284_vm4, %v5904_v9, %v5905_v22  ;;  %v5384_v21 = vrot.slane %v11184_v6, 5  ;;  %v5946_v15 = vrot.slane %v11187_v49, 6  ;;  %5517 = vrot.lane.b32.xlu1 %v11083_v18, %s7561_s26 }
 0x208   :  { %v5295_v23 = vsel %vm219_vm1, %v5294_v13, %v5273_v38  ;;  %v5969_v42 = vld [vmem:[#allocation3 + $0x7] sm:$0x1]  ;;  %v11219_v31 = vsel %vm288_vm6, %v5174_v56, %v5175_v20  ;;  %v5383_v9 = vsel %vm284_vm4, %v5381_v27, %v5382_v47  ;;  %v5945_v50 = vsel %vm280_vm3, %v5943_v10, %v5944_v14  ;;  %v5316_v57 = vld [vmem:[#allocation3 + $0x5a] sm:$0x1]  ;;  %v5315_v10 = vld [vmem:[#allocation3 + $0x4a] sm:$0x1] }
 0x209   :  { %v5297_v52 = vrot.slane %v11196_v45, 6  ;;  %v11224_v48 = vld [vmem:[#allocation3 + $0x27] sm:$0x1]  ;;  %vm13353_vm10 = vcmask 683568   ;;  %v11230_v41 = vsel %vm288_vm6, %v5823_v0, %v5824_v11  ;;  %v11235_v40 = vsel %vm288_vm6, %v5216_v25, %v5217_v35  ;;  %v11238_v20 = vld [vmem:[#allocation3 + $0x6a] sm:$0x1]  ;;  %v3698_v14 = vpop.permute.xlu1 %3697 }
 0x20a   :  { %3661 = vst.msk [vmem:[#allocation2] sm:$0xf] %vm13353_vm10, %v3656_v1  ;;  %v5296_v56 = vsel %vm280_vm3, %v5294_v13, %v5295_v23  ;;  %v5985_v27 = vrot.slane %v5970_v59, 7  ;;  %v11243_v22 = vsel %vm288_vm6, %v5865_v61, %v5866_v26  ;;  %v11246_v12 = vsel %vm288_vm6, %v5258_v19, %v5259_v55  ;;  %v6012_v25 = vld [vmem:[#allocation3 + $0x18] sm:$0x1]  ;;  %v3742_v45 = vpop.permute.xlu0 %3741  ;;  %5095 = vrot.lane.b32.xlu0 %v11086_v8, %s7551_s16  ;;  %s13357_s16 = smov 83  }
 0x20b   :  { %v5908_v34 = vsel %vm223_vm5, %v5907_v4, %v5906_v39  ;;  %v5949_v0 = vrot.slane %v11208_v62, 5  ;;  %v11250_v17 = vld [vmem:[#allocation3 + $0x28] sm:$0x1]  ;;  %v5385_v49 = vsel %vm223_vm5, %v5384_v21, %v5383_v9  ;;  %v5947_v38 = vsel %vm221_vm2, %v5946_v15, %v5945_v50  ;;  %v11256_v28 = vld [vmem:[#allocation3 + $0x79] sm:$0x1]  ;;  %5559 = vrot.lane.b32.xlu1 %v11122_v30, %s7562_s27 }
 0x20c   :  { %v5986_v61 = vsel %vm219_vm1, %v5985_v27, %v5969_v42  ;;  %v5336_v11 = vrot.slane %v5316_v57, 7  ;;  %v5404_v19 = vld [vmem:[#allocation3 + $0x5c] sm:$0x1]  ;;  %v3828_v47 = vrot.slane %v11212_v24, 4  ;;  %v5298_v13 = vsel %vm221_vm2, %v5297_v52, %v5296_v56  ;;  %v6011_v55 = vld [vmem:[#allocation3 + $0x8] sm:$0x1] }
 0x20d   :  { %v5987_v35 = vsel %vm280_vm3, %v5985_v27, %v5986_v61  ;;  %v5988_v26 = vrot.slane %v11224_v48, 6  ;;  %v5405_v59 = vld [vmem:[#allocation3 + $0x6c] sm:$0x1]  ;;  %3703 = vst.msk [vmem:[#allocation2] sm:$0xf] %vm13352_vm9, %v3698_v14  ;;  %vm13354_vm10 = vcmask 913168   ;;  %v11273_v9 = vsel %vm288_vm6, %v5907_v4, %v5908_v34 }
 0x20e   :  { %3746 = vst.msk [vmem:[#allocation2 + $0x8] sm:$0xf] %vm13354_vm10, %v3742_v45  ;;  %v5337_v39 = vsel %vm219_vm1, %v5336_v11, %v5315_v10  ;;  %v5339_v23 = vrot.slane %v11238_v20, 6  ;;  %v6027_v42 = vrot.slane %v6012_v25, 7  ;;  %v6030_v1 = vrot.slane %v11250_v17, 6  ;;  %v3824_v17 = vpop.permute.xlu1 %3823  ;;  %v3784_v61 = vpop.permute.xlu0 %3783  ;;  %5137 = vrot.lane.b32.xlu0 %v11133_v16, %s7552_s17  ;;  %s13359_s17 = smov 125  }
 0x20f   :  { %v5403_v46 = vld [vmem:[#allocation3 + $0x4c] sm:$0x1]  ;;  %v5300_v50 = vrot.slane %v11256_v28, 5  ;;  %v5338_v48 = vsel %vm280_vm3, %v5336_v11, %v5337_v39  ;;  %v5424_v57 = vrot.slane %v5404_v19, 7  ;;  %v5948_v56 = vsel %vm284_vm4, %v5946_v15, %v5947_v38  ;;  %v11279_v10 = vld [vmem:[#allocation3 + $0x37] sm:$0x1]  ;;  %5793 = vrot.lane.b32.xlu1 %v11178_v53, %s7563_s28 }
 0x210   :  { %v5299_v27 = vsel %vm284_vm4, %v5297_v52, %v5298_v13  ;;  %v6028_v20 = vsel %vm219_vm1, %v6027_v42, %v6011_v55  ;;  %v5427_v25 = vrot.slane %v5405_v59, 6  ;;  %v11287_v58 = vsel %vm288_vm6, %v5384_v21, %v5385_v49  ;;  %v11290_v15 = vld [vmem:[#allocation3 + $0x7a] sm:$0x1]  ;;  %v11292_v52 = vld [vmem:[#allocation3 + $0x38] sm:$0x1] }
 0x211   :  { %v5989_v4 = vsel %vm221_vm2, %v5988_v26, %v5987_v35  ;;  %v6029_v34 = vsel %vm280_vm3, %v6027_v42, %v6028_v20  ;;  %v5425_v38 = vsel %vm219_vm1, %v5424_v57, %v5403_v46  ;;  %v6138_v11 = vld [vmem:[#allocation3 + $0x1b] sm:$0x1]  ;;  %vm13355_vm9 = vcmask 1022976   ;;  %3788 = vst.msk [vmem:[#allocation2 + $0x8] sm:$0xf] %vm645_vm8, %v3784_v61 }
 0x212   :  { %v3830_v19 = vsel %vm13355_vm9, %v3828_v47, %v11212_v24  ;;  %v5340_v18 = vsel %vm221_vm2, %v5339_v23, %v5338_v48  ;;  %v6031_v6 = vsel %vm221_vm2, %v6030_v1, %v6029_v34  ;;  %v11301_v21 = vld [vmem:[#allocation3 + $0x7c] sm:$0x1]  ;;  %v5426_v49 = vsel %vm280_vm3, %v5424_v57, %v5425_v38  ;;  %v6137_v14 = vld [vmem:[#allocation3 + $0xb] sm:$0x1]  ;;  %v5446_v55 = vld [vmem:[#allocation3 + $0x5d] sm:$0x1]  ;;  %v3740_v57 = vpop.permute.xlu1 %3739  ;;  %5179 = vrot.lane.b32.xlu0 %v11219_v31, %s7553_s18 }
 0x213   :  { %v11304_v45 = vld [vmem:[#allocation3 + $0x2b] sm:$0x1]  ;;  %3834 = vst.msk [vmem:[#allocation2 + $0x8] sm:$0xff] %vm9063_vm15, %v3830_v19  ;;  %v5950_v24 = vsel %vm223_vm5, %v5949_v0, %v5948_v56  ;;  %v5301_v47 = vsel %vm223_vm5, %v5300_v50, %v5299_v27  ;;  %v5991_v13 = vrot.slane %v11279_v10, 5  ;;  %v5428_v35 = vsel %vm221_vm2, %v5427_v25, %v5426_v49  ;;  %v11318_v59 = vld [vmem:[#allocation3 + $0x6d] sm:$0x1]  ;;  %5835 = vrot.lane.b32.xlu1 %v11230_v41, %s7564_s29 }
 0x214   :  { %v3827_v39 = vrot.slane %v3824_v17, 4  ;;  %v5990_v42 = vsel %vm284_vm4, %v5988_v26, %v5989_v4  ;;  %v5342_v60 = vrot.slane %v11290_v15, 5  ;;  %v6153_v46 = vrot.slane %v6138_v11, 7  ;;  %v6054_v48 = vld [vmem:[#allocation3 + $0x19] sm:$0x1]  ;;  %s13361_s18 = smov 97  }
 0x215   :  { %v5341_v56 = vsel %vm284_vm4, %v5339_v23, %v5340_v18  ;;  %v6032_v27 = vsel %vm284_vm4, %v6030_v1, %v6031_v6  ;;  %v6033_v10 = vrot.slane %v11292_v52, 5  ;;  %v5430_v20 = vrot.slane %v11301_v21, 5  ;;  %v5445_v61 = vld [vmem:[#allocation3 + $0x4d] sm:$0x1]  ;;  %v11328_v34 = vld [vmem:[#allocation3 + $0x5e] sm:$0x1] }
 0x216   :  { %3745 = vst.msk [vmem:[#allocation2] sm:$0xf] %vm13354_vm10, %v3740_v57  ;;  %v5429_v26 = vsel %vm284_vm4, %v5427_v25, %v5428_v35  ;;  %v6154_v4 = vsel %vm219_vm1, %v6153_v46, %v6137_v14  ;;  %v6156_v15 = vrot.slane %v11304_v45, 6  ;;  %v5466_v30 = vrot.slane %v5446_v55, 7  ;;  %v6053_v38 = vld [vmem:[#allocation3 + $0x9] sm:$0x1]  ;;  %v3782_v14 = vpop.permute.xlu1 %3781  ;;  %5221 = vrot.lane.b32.xlu0 %v11235_v40, %s7554_s19 }
 0x217   :  { %v5992_v23 = vsel %vm223_vm5, %v5991_v13, %v5990_v42  ;;  %v6155_v1 = vsel %vm280_vm3, %v6153_v46, %v6154_v4  ;;  %v5469_v52 = vrot.slane %v11318_v59, 6  ;;  %v11339_v11 = vld [vmem:[#allocation3 + $0x29] sm:$0x1]  ;;  %v6069_v19 = vrot.slane %v6054_v48, 7  ;;  %v5487_v21 = vld [vmem:[#allocation3 + $0x4e] sm:$0x1]  ;;  %5877 = vrot.lane.b32.xlu1 %v11243_v22, %s7565_s30 }
 0x218   :  { %v3829_v25 = vsel %vm13355_vm9, %v3827_v39, %v3824_v17  ;;  %v5343_v18 = vsel %vm223_vm5, %v5342_v60, %v5341_v56  ;;  %v5467_v6 = vsel %vm219_vm1, %v5466_v30, %v5445_v61  ;;  %v5508_v49 = vrot.slane %v11328_v34, 7  ;;  %v11349_v35 = vld [vmem:[#allocation3 + $0x3b] sm:$0x1]  ;;  %v11351_v55 = vld [vmem:[#allocation3 + $0x7d] sm:$0x1]  ;;  %s13363_s19 = smov 111  }
 0x219   :  { %v6034_v8 = vsel %vm223_vm5, %v6033_v10, %v6032_v27  ;;  %v5431_v45 = vsel %vm223_vm5, %v5430_v20, %v5429_v26  ;;  %v5468_v17 = vsel %vm280_vm3, %v5466_v30, %v5467_v6  ;;  %v11354_v59 = vld [vmem:[#allocation3 + $0x39] sm:$0x1]  ;;  %v6070_v39 = vsel %vm219_vm1, %v6069_v19, %v6053_v38  ;;  %3787 = vst.msk [vmem:[#allocation2] sm:$0xf] %vm645_vm8, %v3782_v14  ;;  %v11370_v57 = vld [vmem:[#allocation3 + $0x6e] sm:$0x1] }
 0x21a   :  { %v11361_v53 = vsel %vm288_vm6, %v5949_v0, %v5950_v24  ;;  %v11366_v42 = vsel %vm288_vm6, %v5300_v50, %v5301_v47  ;;  %v6157_v46 = vsel %vm221_vm2, %v6156_v15, %v6155_v1  ;;  %v6072_v48 = vrot.slane %v11339_v11, 6  ;;  %v6096_v56 = vld [vmem:[#allocation3 + $0x1a] sm:$0x1]  ;;  %3833 = vst.msk [vmem:[#allocation2] sm:$0xff] %vm9063_vm15, %v3829_v25  ;;  %v6095_v24 = vld [vmem:[#allocation3 + $0xa] sm:$0x1]  ;;  %v3870_v30 = vpop.permute.xlu1 %3869  ;;  %5263 = vrot.lane.b32.xlu0 %v11246_v12, %s7555_s20 }
 0x21b   :  { %v11377_v62 = vsel %vm288_vm6, %v5991_v13, %v5992_v23  ;;  %v5470_v0 = vsel %vm221_vm2, %v5469_v52, %v5468_v17  ;;  %v6071_v28 = vsel %vm280_vm3, %v6069_v19, %v6070_v39  ;;  %v5509_v50 = vsel %vm219_vm1, %v5508_v49, %v5487_v21  ;;  %v11382_v47 = vld [vmem:[#allocation3 + $0x2a] sm:$0x1]  ;;  %v5530_v27 = vld [vmem:[#allocation3 + $0x5f] sm:$0x1]  ;;  %v11394_v26 = vld [vmem:[#allocation3 + $0x6f] sm:$0x1]  ;;  %5919 = vrot.lane.b32.xlu1 %v11273_v9, %s7566_s5 }
 0x21c   :  { %v11385_v61 = vsel %vm288_vm6, %v5342_v60, %v5343_v18  ;;  %v11388_v34 = vsel %vm288_vm6, %v6033_v10, %v6034_v8  ;;  %v11391_v16 = vsel %vm288_vm6, %v5430_v20, %v5431_v45  ;;  %v6159_v13 = vrot.slane %v11349_v35, 5  ;;  %v6184_v4 = vld [vmem:[#allocation3 + $0x1c] sm:$0x1]  ;;  %v11400_v23 = vld [vmem:[#allocation3 + $0x7e] sm:$0x1]  ;;  %s13365_s20 = smov 11  }
 0x21d   :  { %v6158_v38 = vsel %vm284_vm4, %v6156_v15, %v6157_v46  ;;  %v5472_v60 = vrot.slane %v11351_v55, 5  ;;  %v5511_v10 = vrot.slane %v11370_v57, 6  ;;  %v6111_v1 = vrot.slane %v6096_v56, 7  ;;  %v11403_v20 = vld [vmem:[#allocation3 + $0x2c] sm:$0x1] }
 0x21e   :  { %3875 = vst.msk [vmem:[#allocation2 + $0x4] sm:$0xf] %vm738_vm11, %v3870_v30  ;;  %v5471_v11 = vsel %vm284_vm4, %v5469_v52, %v5470_v0  ;;  %v6073_v19 = vsel %vm221_vm2, %v6072_v48, %v6071_v28  ;;  %v6075_v25 = vrot.slane %v11354_v59, 5  ;;  %v5510_v41 = vsel %vm280_vm3, %v5508_v49, %v5509_v50  ;;  %v5529_v15 = vld [vmem:[#allocation3 + $0x4f] sm:$0x1]  ;;  %v3912_v39 = vpop.permute.xlu1 %3911  ;;  %5389 = vrot.lane.b32.xlu0 %v11287_v58, %s7558_s23 }
 0x21f   :  { %v5764_v18 = vld [vmem:[#allocation3 + $0x52] sm:$0x1]  ;;  %v6112_v6 = vsel %vm219_vm1, %v6111_v1, %v6095_v24  ;;  %v6114_v21 = vrot.slane %v11382_v47, 6  ;;  %v5550_v14 = vrot.slane %v5530_v27, 7  ;;  %v5553_v8 = vrot.slane %v11394_v26, 6  ;;  %5961 = vrot.lane.b32.xlu1 %v11361_v53, %s7567_s6 }
 0x220   :  { %v6183_v45 = vld [vmem:[#allocation3 + $0xc] sm:$0x1]  ;;  %v6160_v52 = vsel %vm223_vm5, %v6159_v13, %v6158_v38  ;;  %v6113_v35 = vsel %vm280_vm3, %v6111_v1, %v6112_v6  ;;  %v6199_v55 = vrot.slane %v6184_v4, 7  ;;  %v6202_v49 = vrot.slane %v11403_v20, 6  ;;  %v5763_v17 = vld [vmem:[#allocation3 + $0x42] sm:$0x1] }
 0x221   :  { %v5473_v31 = vsel %vm223_vm5, %v5472_v60, %v5471_v11  ;;  %v5512_v46 = vsel %vm221_vm2, %v5511_v10, %v5510_v41  ;;  %v5551_v57 = vsel %vm219_vm1, %v5550_v14, %v5529_v15  ;;  %v11423_v56 = vld [vmem:[#allocation3 + $0x62] sm:$0x1]  ;;  %v5784_v0 = vrot.slane %v5764_v18, 7  ;;  %3917 = vst.msk [vmem:[#allocation2 + $0x4] sm:$0xf] %vm781_vm14, %v3912_v39 }
 0x222   :  { %v6074_v28 = vsel %vm284_vm4, %v6072_v48, %v6073_v19  ;;  %v5514_v50 = vrot.slane %v11400_v23, 5  ;;  %v11428_v24 = vld [vmem:[#allocation3 + $0x3a] sm:$0x1]  ;;  %v11430_v47 = vld [vmem:[#allocation3 + $0x7f] sm:$0x1]  ;;  %v5552_v22 = vsel %vm280_vm3, %v5550_v14, %v5551_v57  ;;  %v6200_v27 = vsel %vm219_vm1, %v6199_v55, %v6183_v45  ;;  %v3954_v18 = vpop.permute.xlu1 %3953  ;;  %5305 = vrot.lane.b32.xlu0 %v11366_v42, %s7556_s21  ;;  %s13367_s21 = smov 25  }
 0x223   :  { %v6115_v26 = vsel %vm221_vm2, %v6114_v21, %v6113_v35  ;;  %v5554_v4 = vsel %vm221_vm2, %v5553_v8, %v5552_v22  ;;  %v11438_v30 = vld [vmem:[#allocation3 + $0x3c] sm:$0x1]  ;;  %v6201_v48 = vsel %vm280_vm3, %v6199_v55, %v6200_v27  ;;  %v5785_v38 = vsel %vm219_vm1, %v5784_v0, %v5763_v17  ;;  %v6226_v1 = vld [vmem:[#allocation3 + $0x1d] sm:$0x1]  ;;  %v6225_v41 = vld [vmem:[#allocation3 + $0xd] sm:$0x1]  ;;  %6003 = vrot.lane.b32.xlu1 %v11377_v62, %s13356_s1 }
 0x224   :  { %v11443_v20 = vsel %vm288_vm6, %v6159_v13, %v6160_v52  ;;  %v5513_v11 = vsel %vm284_vm4, %v5511_v10, %v5512_v46  ;;  %v6203_v19 = vsel %vm221_vm2, %v6202_v49, %v6201_v48  ;;  %v5787_v40 = vrot.slane %v11423_v56, 6  ;;  %v6227_v15 = vld [vmem:[#allocation3 + $0x2d] sm:$0x1]  ;;  %v5806_v10 = vld [vmem:[#allocation3 + $0x53] sm:$0x1] }
 0x225   :  { %v11451_v6 = vsel %vm288_vm6, %v5472_v60, %v5473_v31  ;;  %v6117_v14 = vrot.slane %v11428_v24, 5  ;;  %v5556_v13 = vrot.slane %v11430_v47, 5  ;;  %v5786_v45 = vsel %vm280_vm3, %v5784_v0, %v5785_v38  ;;  %v5807_v52 = vld [vmem:[#allocation3 + $0x63] sm:$0x1]  ;;  %3959 = vst.msk [vmem:[#allocation2 + $0x4] sm:$0xf] %vm824_vm0, %v3954_v18 }
 0x226   :  { %v6076_v35 = vsel %vm223_vm5, %v6075_v25, %v6074_v28  ;;  %v6116_v55 = vsel %vm284_vm4, %v6114_v21, %v6115_v26  ;;  %v5555_v9 = vsel %vm284_vm4, %v5553_v8, %v5554_v4  ;;  %v11462_v60 = vld [vmem:[#allocation3 + $0x72] sm:$0x1]  ;;  %v6241_v17 = vrot.slane %v6226_v1, 7  ;;  %v6268_v39 = vld [vmem:[#allocation3 + $0x1e] sm:$0x1]  ;;  %v3996_v4 = vpop.permute.xlu1 %3995  ;;  %5347 = vrot.lane.b32.xlu0 %v11385_v61, %s7557_s22  ;;  %s13369_s22 = smov 39  }
 0x227   :  { %v5515_v31 = vsel %vm223_vm5, %v5514_v50, %v5513_v11  ;;  %v6204_v46 = vsel %vm284_vm4, %v6202_v49, %v6203_v19  ;;  %v6205_v57 = vrot.slane %v11438_v30, 5  ;;  %v6244_v56 = vrot.slane %v6227_v15, 6  ;;  %v5805_v0 = vld [vmem:[#allocation3 + $0x43] sm:$0x1]  ;;  %v5848_v21 = vld [vmem:[#allocation3 + $0x54] sm:$0x1]  ;;  %6045 = vrot.lane.b32.xlu1 %v11388_v34, %s13357_s16 }
 0x228   :  { %v5788_v8 = vsel %vm221_vm2, %v5787_v40, %v5786_v45  ;;  %v11472_v28 = vld [vmem:[#allocation3 + $0x3d] sm:$0x1]  ;;  %v6242_v22 = vsel %vm219_vm1, %v6241_v17, %v6225_v41  ;;  %v5826_v27 = vrot.slane %v5806_v10, 7  ;;  %v5829_v26 = vrot.slane %v5807_v52, 6  ;;  %v6267_v12 = vld [vmem:[#allocation3 + $0xe] sm:$0x1] }
 0x229   :  { %v6118_v49 = vsel %vm223_vm5, %v6117_v14, %v6116_v55  ;;  %v5557_v30 = vsel %vm223_vm5, %v5556_v13, %v5555_v9  ;;  %v6243_v48 = vsel %vm280_vm3, %v6241_v17, %v6242_v22  ;;  %v11484_v38 = vld [vmem:[#allocation3 + $0x2e] sm:$0x1]  ;;  %v6283_v1 = vrot.slane %v6268_v39, 7  ;;  %v5847_v11 = vld [vmem:[#allocation3 + $0x44] sm:$0x1] }
 0x22a   :  { %4001 = vst.msk [vmem:[#allocation2 + $0x4] sm:$0xf] %vm867_vm12, %v3996_v4  ;;  %v5790_v19 = vrot.slane %v11462_v60, 5  ;;  %v6245_v53 = vsel %vm221_vm2, %v6244_v56, %v6243_v48  ;;  %v11489_v41 = vld [vmem:[#allocation3 + $0x73] sm:$0x1]  ;;  %v5827_v15 = vsel %vm219_vm1, %v5826_v27, %v5805_v0  ;;  %v5868_v45 = vrot.slane %v5848_v21, 7  ;;  %v4230_v4 = vpop.permute.xlu1 %4229  ;;  %5435 = vrot.lane.b32.xlu0 %v11391_v16, %s7559_s24 }
 0x22b   :  { %v11492_v18 = vld [vmem:[#allocation3 + $0x64] sm:$0x1]  ;;  %v6206_v10 = vsel %vm223_vm5, %v6205_v57, %v6204_v46  ;;  %v5789_v52 = vsel %vm284_vm4, %v5787_v40, %v5788_v8  ;;  %v5828_v55 = vsel %vm280_vm3, %v5826_v27, %v5827_v15  ;;  %v6284_v9 = vsel %vm219_vm1, %v6283_v1, %v6267_v12  ;;  %v6310_v21 = vld [vmem:[#allocation3 + $0x1f] sm:$0x1]  ;;  %v11508_v46 = vld [vmem:[#allocation3 + $0x3e] sm:$0x1]  ;;  %6171 = vrot.lane.b32.xlu1 %v11443_v20, %s13359_s17 }
 0x22c   :  { %v6247_v17 = vrot.slane %v11472_v28, 5  ;;  %v5830_v39 = vsel %vm221_vm2, %v5829_v26, %v5828_v55  ;;  %v6286_v0 = vrot.slane %v11484_v38, 6  ;;  %v5869_v22 = vsel %vm219_vm1, %v5868_v45, %v5847_v11  ;;  %v6309_v12 = vld [vmem:[#allocation3 + $0xf] sm:$0x1]  ;;  %v11523_v38 = vld [vmem:[#allocation3 + $0x74] sm:$0x1] }
 0x22d   :  { %v6246_v58 = vsel %vm284_vm4, %v6244_v56, %v6245_v53  ;;  %v5832_v40 = vrot.slane %v11489_v41, 5  ;;  %v6285_v8 = vsel %vm280_vm3, %v6283_v1, %v6284_v9  ;;  %v5871_v27 = vrot.slane %v11492_v18, 6  ;;  %v11526_v1 = vld [vmem:[#allocation3 + $0x2f] sm:$0x1]  ;;  %v5890_v53 = vld [vmem:[#allocation3 + $0x55] sm:$0x1] }
 0x22e   :  { %v11515_v48 = vsel %vm288_vm6, %v6075_v25, %v6076_v35  ;;  %v11520_v62 = vsel %vm288_vm6, %v5514_v50, %v5515_v31  ;;  %v5831_v56 = vsel %vm284_vm4, %v5829_v26, %v5830_v39  ;;  %v5870_v11 = vsel %vm280_vm3, %v5868_v45, %v5869_v22  ;;  %v11528_v15 = vld [vmem:[#allocation3 + $0x65] sm:$0x1]  ;;  %v6544_v35 = vld [vmem:[#allocation3 + $0x12] sm:$0x1]  ;;  %v11545_v31 = vld [vmem:[#allocation3 + $0x22] sm:$0x1]  ;;  %5477 = vrot.lane.b32.xlu0 %v11451_v6, %s7560_s25 }
 0x22f   :  { %v11535_v59 = vsel %vm288_vm6, %v6117_v14, %v6118_v49  ;;  %v11540_v23 = vsel %vm288_vm6, %v5556_v13, %v5557_v30  ;;  %v11543_v25 = vsel %vm288_vm6, %v6205_v57, %v6206_v10  ;;  %v6325_v50 = vrot.slane %v6310_v21, 7  ;;  %v5889_v13 = vld [vmem:[#allocation3 + $0x45] sm:$0x1]  ;;  %v5932_v26 = vld [vmem:[#allocation3 + $0x56] sm:$0x1]  ;;  %v4272_v49 = vpop.permute.xlu1 %4271  ;;  %6087 = vrot.lane.b32.xlu1 %v11515_v48, %s13361_s18 }
 0x230   :  { %v5791_v42 = vsel %vm223_vm5, %v5790_v19, %v5789_v52  ;;  %v6248_v24 = vsel %vm223_vm5, %v6247_v17, %v6246_v58  ;;  %v6287_v47 = vsel %vm221_vm2, %v6286_v0, %v6285_v8  ;;  %v6289_v14 = vrot.slane %v11508_v46, 5  ;;  %v6543_v52 = vld [vmem:[#allocation3 + $0x2] sm:$0x1]  ;;  %v5931_v34 = vld [vmem:[#allocation3 + $0x46] sm:$0x1] }
 0x231   :  { %v11555_v57 = vld [vmem:[#allocation2] sm:$0xff]  ;;  %v5833_v30 = vsel %vm223_vm5, %v5832_v40, %v5831_v56  ;;  %v5872_v18 = vsel %vm221_vm2, %v5871_v27, %v5870_v11  ;;  %v6326_v45 = vsel %vm219_vm1, %v6325_v50, %v6309_v12  ;;  %v5910_v10 = vrot.slane %v5890_v53, 7 }
 0x232   :  { %4235 = vst.msk [vmem:[#allocation2] sm:$0xf] %vm13239_vm7, %v4230_v4  ;;  %v6328_v55 = vrot.slane %v11526_v1, 6  ;;  %v5913_v9 = vrot.slane %v11528_v15, 6  ;;  %v6559_v39 = vrot.slane %v6544_v35, 7  ;;  %v6562_v22 = vrot.slane %v11545_v31, 6  ;;  %5519 = vrot.lane.b32.xlu0 %v11520_v62, %s7561_s26 }
 0x233   :  { %vm13358_vm10 = vcmask 224368   ;;  %v5874_v21 = vrot.slane %v11523_v38, 5  ;;  %v6327_v58 = vsel %vm280_vm3, %v6325_v50, %v6326_v45  ;;  %v5911_v8 = vsel %vm219_vm1, %v5910_v10, %v5889_v13  ;;  %v11574_v4 = vld [vmem:[#allocation3 + $0x66] sm:$0x1]  ;;  %v11578_v1 = vld [vmem:[#allocation3 + $0x3f] sm:$0x1]  ;;  %v4314_v35 = vpop.permute.xlu1 %4313  ;;  %6129 = vrot.lane.b32.xlu1 %v11535_v59, %s13363_s19 }
 0x234   :  { %4277 = vst.msk [vmem:[#allocation2] sm:$0xf] %vm13358_vm10, %v4272_v49  ;;  %v5952_v12 = vrot.slane %v5932_v26, 7  ;;  %v6288_v56 = vsel %vm284_vm4, %v6286_v0, %v6287_v47  ;;  %v5873_v11 = vsel %vm284_vm4, %v5871_v27, %v5872_v18  ;;  %v11580_v53 = vld [vmem:[#allocation3 + $0x75] sm:$0x1]  ;;  %v5912_v15 = vsel %vm280_vm3, %v5910_v10, %v5911_v8 }
 0x235   :  { %v6560_v61 = vsel %vm219_vm1, %v6559_v39, %v6543_v52  ;;  %v11589_v50 = vsel %vm288_vm6, %v5790_v19, %v5791_v42  ;;  %v11594_v0 = vsel %vm288_vm6, %v6247_v17, %v6248_v24  ;;  %v11596_v27 = vld [vmem:[#allocation3 + $0x32] sm:$0x1]  ;;  %v6585_v13 = vld [vmem:[#allocation3 + $0x3] sm:$0x1]  ;;  %v6586_v26 = vld [vmem:[#allocation3 + $0x13] sm:$0x1]  ;;  %v6329_v20 = vsel %vm221_vm2, %v6328_v55, %v6327_v58 }
 0x236   :  { %v6561_v31 = vsel %vm280_vm3, %v6559_v39, %v6560_v61  ;;  %v5953_v47 = vsel %vm219_vm1, %v5952_v12, %v5931_v34  ;;  %vm13360_vm9 = vcmask 339168   ;;  %v5914_v60 = vsel %vm221_vm2, %v5913_v9, %v5912_v15  ;;  %v11604_v28 = vld [vmem:[#allocation3 + $0x76] sm:$0x1]  ;;  %v6587_v42 = vld [vmem:[#allocation3 + $0x23] sm:$0x1]  ;;  %5561 = vrot.lane.b32.xlu0 %v11540_v23, %s7562_s27 }
 0x237   :  { %4319 = vst.msk [vmem:[#allocation2] sm:$0xf] %vm13360_vm9, %v4314_v35  ;;  %v6563_v19 = vsel %vm221_vm2, %v6562_v22, %v6561_v31  ;;  %v5955_v17 = vrot.slane %v11574_v4, 6  ;;  %v11607_v24 = vld [vmem:[#allocation3 + $0x33] sm:$0x1]  ;;  %v11614_v49 = vsel %vm288_vm6, %v5832_v40, %v5833_v30  ;;  %v6290_v18 = vsel %vm223_vm5, %v6289_v14, %v6288_v56  ;;  %v4356_v8 = vpop.permute.xlu1 %4355  ;;  %6217 = vrot.lane.b32.xlu1 %v11543_v25, %s13365_s20 }
 0x238   :  { %v5875_v45 = vsel %vm223_vm5, %v5874_v21, %v5873_v11  ;;  %v5954_v10 = vsel %vm280_vm3, %v5952_v12, %v5953_v47  ;;  %v5973_v52 = vld [vmem:[#allocation3 + $0x47] sm:$0x1]  ;;  %v5974_v39 = vld [vmem:[#allocation3 + $0x57] sm:$0x1]  ;;  %v6331_v16 = vrot.slane %v11578_v1, 5  ;;  %v5916_v41 = vrot.slane %v11580_v53, 5 }
 0x239   :  { %v5975_v34 = vld [vmem:[#allocation3 + $0x67] sm:$0x1]  ;;  %v6565_v40 = vrot.slane %v11596_v27, 5  ;;  %v6601_v30 = vrot.slane %v6586_v26, 7  ;;  %v4980_v58 = vld [vmem:[#allocation3 + $0x12] sm:$0x1]  ;;  %v6330_v4 = vsel %vm284_vm4, %v6328_v55, %v6329_v20  ;;  %v5915_v56 = vsel %vm284_vm4, %v5913_v9, %v5914_v60 }
 0x23a   :  { %v6564_v12 = vsel %vm284_vm4, %v6562_v22, %v6563_v19  ;;  %v6604_v11 = vrot.slane %v6587_v42, 6  ;;  %v11631_v15 = vld [vmem:[#allocation3 + $0x22] sm:$0x1]  ;;  %v6628_v1 = vld [vmem:[#allocation3 + $0x14] sm:$0x1]  ;;  %vm13362_vm10 = vcmask 453968   ;;  %v5956_v61 = vsel %vm221_vm2, %v5955_v17, %v5954_v10  ;;  %5795 = vrot.lane.b32.xlu0 %v11589_v50, %s7563_s28 }
 0x23b   :  { %4361 = vst.msk [vmem:[#allocation2] sm:$0xf] %vm13362_vm10, %v4356_v8  ;;  %v6602_v35 = vsel %vm219_vm1, %v6601_v30, %v6585_v13  ;;  %v5994_v31 = vrot.slane %v5974_v39, 7  ;;  %v5997_v47 = vrot.slane %v5975_v34, 6  ;;  %v4979_v26 = vld [vmem:[#allocation3 + $0x2] sm:$0x1]  ;;  %v4398_v10 = vpop.permute.xlu1 %4397  ;;  %v5957_v6 = vsel %vm284_vm4, %v5955_v17, %v5956_v61  ;;  %6259 = vrot.lane.b32.xlu1 %v11594_v0, %s13367_s21 }
 0x23c   :  { %v5958_v48 = vrot.slane %v11604_v28, 5  ;;  %v6603_v55 = vsel %vm280_vm3, %v6601_v30, %v6602_v35  ;;  %v6607_v9 = vrot.slane %v11607_v24, 5  ;;  %v4995_v22 = vrot.slane %v4980_v58, 7  ;;  %v6627_v13 = vld [vmem:[#allocation3 + $0x4] sm:$0x1] }
 0x23d   :  { %v6605_v20 = vsel %vm221_vm2, %v6604_v11, %v6603_v55  ;;  %v5995_v60 = vsel %vm219_vm1, %v5994_v31, %v5973_v52  ;;  %v4998_v19 = vrot.slane %v11631_v15, 6  ;;  %v6643_v42 = vrot.slane %v6628_v1, 7  ;;  %v11648_v39 = vld [vmem:[#allocation3 + $0x77] sm:$0x1]  ;;  %v11661_v58 = vld [vmem:[#allocation3 + $0x24] sm:$0x1] }
 0x23e   :  { %v6606_v28 = vsel %vm284_vm4, %v6604_v11, %v6605_v20  ;;  %v5996_v24 = vsel %vm280_vm3, %v5994_v31, %v5995_v60  ;;  %v4996_v34 = vsel %vm219_vm1, %v4995_v22, %v4979_v26  ;;  %vm13364_vm9 = vcmask 568768   ;;  %v6016_v8 = vld [vmem:[#allocation3 + $0x58] sm:$0x1]  ;;  %v11683_v1 = vld [vmem:[#allocation3 + $0x68] sm:$0x1]  ;;  %v11697_v20 = vpop.xlane.xlu0 %251  ;;  %5837 = vrot.lane.b32.xlu0 %v11614_v49, %s7564_s29 }
 0x23f   :  { %4403 = vst.msk [vmem:[#allocation2] sm:$0xf] %vm13364_vm9, %v4398_v10  ;;  %v11656_v52 = vsel %vm288_vm6, %v6289_v14, %v6290_v18  ;;  %v6332_v30 = vsel %vm223_vm5, %v6331_v16, %v6330_v4  ;;  %v5998_v59 = vsel %vm221_vm2, %v5997_v47, %v5996_v24  ;;  %v4997_v17 = vsel %vm280_vm3, %v4995_v22, %v4996_v34  ;;  %v11676_v18 = vld [vmem:[#allocation3 + $0x32] sm:$0x1]  ;;  %v11691_v35 = vld [vmem:[#allocation3 + $0x34] sm:$0x1] }
 0x240   :  { %v11668_v11 = vsel %vm288_vm6, %v5874_v21, %v5875_v45  ;;  %v5917_v46 = vsel %vm223_vm5, %v5916_v41, %v5915_v56  ;;  %v6566_v14 = vsel %vm223_vm5, %v6565_v40, %v6564_v12  ;;  %v6644_v4 = vsel %vm219_vm1, %v6643_v42, %v6627_v13  ;;  %v6015_v45 = vld [vmem:[#allocation3 + $0x48] sm:$0x1]  ;;  %v4440_v56 = vpop.permute.xlu1 %4439  ;;  %v6670_v55 = vld [vmem:[#allocation3 + $0x15] sm:$0x1]  ;;  %v11694_v22 = vld [vmem:[#allocation3 + $0x25] sm:$0x1]  ;;  %6301 = vrot.lane.b32.xlu1 %v11656_v52, %s13369_s22 }
 0x241   :  { %v5959_v15 = vsel %vm223_vm5, %v5958_v48, %v5957_v6  ;;  %v6608_v62 = vsel %vm223_vm5, %v6607_v9, %v6606_v28  ;;  %v6000_v38 = vrot.slane %v11648_v39, 5  ;;  %v4999_v21 = vsel %vm221_vm2, %v4998_v19, %v4997_v17  ;;  %v6142_v13 = vld [vmem:[#allocation3 + $0x5b] sm:$0x1]  ;;  %v11711_v10 = vld [vmem:[#allocation3 + $0x6b] sm:$0x1] }
 0x242   :  { %v11688_v12 = vsel %vm288_vm6, %v6331_v16, %v6332_v30  ;;  %v5999_v61 = vsel %vm284_vm4, %v5997_v47, %v5998_v59  ;;  %v6646_v31 = vrot.slane %v11661_v58, 6  ;;  %v6036_v26 = vrot.slane %v6016_v8, 7  ;;  %v6669_v6 = vld [vmem:[#allocation3 + $0x5] sm:$0x1]  ;;  %v6712_v28 = vld [vmem:[#allocation3 + $0x16] sm:$0x1]  ;;  %5879 = vrot.lane.b32.xlu0 %v11668_v11, %s7565_s30 }
 0x243   :  { %vm13366_vm10 = vcmask 683568   ;;  %v11702_v25 = vsel %vm288_vm6, %v5916_v41, %v5917_v46  ;;  %v11707_v16 = vsel %vm288_vm6, %v6565_v40, %v6566_v14  ;;  %v5001_v47 = vrot.slane %v11676_v18, 5  ;;  %v11728_v30 = vld [vmem:[#allocation3 + $0x26] sm:$0x1]  ;;  %v3872_v46 = vpop.permute.xlu0 %3871  ;;  %v6796_v11 = vld [vmem:[#allocation3 + $0x18] sm:$0x1] }
 0x244   :  { %4445 = vst.msk [vmem:[#allocation2] sm:$0xf] %vm13366_vm10, %v4440_v56  ;;  %v6645_v60 = vsel %vm280_vm3, %v6643_v42, %v6644_v4  ;;  %v11716_v53 = vsel %vm288_vm6, %v5958_v48, %v5959_v15  ;;  %v11719_v41 = vsel %vm288_vm6, %v6607_v9, %v6608_v62  ;;  %v5000_v27 = vsel %vm284_vm4, %v4998_v19, %v4999_v21  ;;  %v6141_v48 = vld [vmem:[#allocation3 + $0x4b] sm:$0x1]  ;;  %v4482_v9 = vpop.permute.xlu1 %4481  ;;  %v6711_v8 = vld [vmem:[#allocation3 + $0x6] sm:$0x1] }
 0x245   :  { %v6039_v40 = vrot.slane %v11683_v1, 6  ;;  %v6001_v42 = vsel %vm223_vm5, %v6000_v38, %v5999_v61  ;;  %v6037_v24 = vsel %vm219_vm1, %v6036_v26, %v6015_v45  ;;  %v6685_v34 = vrot.slane %v6670_v55, 7  ;;  %v11740_v15 = vld [vmem:[#allocation3 + $0x78] sm:$0x1]  ;;  %3876 = vst.msk [vmem:[#allocation2 + $0xc] sm:$0xf] %vm738_vm11, %v3872_v46  ;;  %6343 = vrot.lane.b32.xlu1 %v11688_v12, %s13310_s10 }
 0x246   :  { %v6688_v23 = vrot.slane %v11694_v22, 6  ;;  %v6647_v19 = vsel %vm221_vm2, %v6646_v31, %v6645_v60  ;;  %v6038_v59 = vsel %vm280_vm3, %v6036_v26, %v6037_v24  ;;  %v6162_v17 = vrot.slane %v6142_v13, 7  ;;  %v11747_v45 = vld [vmem:[#allocation3 + $0x35] sm:$0x1]  ;;  %v11750_v56 = vld [vmem:[#allocation3 + $0x7b] sm:$0x1]  ;;  %5921 = vrot.lane.b32.xlu0 %v11702_v25, %s7566_s5 }
 0x247   :  { %v6165_v58 = vrot.slane %v11711_v10, 6  ;;  %vm13368_vm9 = vcmask 798368   ;;  %v5002_v14 = vsel %vm223_vm5, %v5001_v47, %v5000_v27  ;;  %v6649_v4 = vrot.slane %v11691_v35, 5  ;;  %v11757_v13 = vld [vmem:[#allocation3 + $0x36] sm:$0x1] }
 0x248   :  { %4487 = vst.msk [vmem:[#allocation2] sm:$0xf] %vm13368_vm9, %v4482_v9  ;;  %v6686_v0 = vsel %vm219_vm1, %v6685_v34, %v6669_v6  ;;  %v6727_v62 = vrot.slane %v6712_v28, 7  ;;  %v6040_v21 = vsel %vm221_vm2, %v6039_v40, %v6038_v59  ;;  %v6163_v61 = vsel %vm219_vm1, %v6162_v17, %v6141_v48  ;;  %v4608_v10 = vpop.permute.xlu1 %4607  ;;  %v6057_v24 = vld [vmem:[#allocation3 + $0x49] sm:$0x1] }
 0x249   :  { %v6687_v1 = vsel %vm280_vm3, %v6685_v34, %v6686_v0  ;;  %v6730_v26 = vrot.slane %v11728_v30, 6  ;;  %v6648_v55 = vsel %vm284_vm4, %v6646_v31, %v6647_v19  ;;  %v6164_v60 = vsel %vm280_vm3, %v6162_v17, %v6163_v61  ;;  %v6058_v34 = vld [vmem:[#allocation3 + $0x59] sm:$0x1]  ;;  %v6059_v48 = vld [vmem:[#allocation3 + $0x69] sm:$0x1]  ;;  %v3914_v30 = vpop.permute.xlu0 %3913  ;;  %6577 = vrot.lane.b32.xlu1 %v11707_v16, %s7558_s23 }
 0x24a   :  { %v6689_v22 = vsel %vm221_vm2, %v6688_v23, %v6687_v1  ;;  %v6728_v50 = vsel %vm219_vm1, %v6727_v62, %v6711_v8  ;;  %v11765_v27 = vsel %vm288_vm6, %v6000_v38, %v6001_v42  ;;  %v6042_v6 = vrot.slane %v11740_v15, 5  ;;  %v6754_v38 = vld [vmem:[#allocation3 + $0x17] sm:$0x1]  ;;  %v11774_v42 = vld [vmem:[#allocation3 + $0x27] sm:$0x1]  ;;  %5963 = vrot.lane.b32.xlu0 %v11716_v53, %s7567_s6 }
 0x24b   :  { %v6166_v31 = vsel %vm221_vm2, %v6165_v58, %v6164_v60  ;;  %v6729_v28 = vsel %vm280_vm3, %v6727_v62, %v6728_v50  ;;  %v6041_v9 = vsel %vm284_vm4, %v6039_v40, %v6040_v21  ;;  %v6691_v19 = vrot.slane %v11747_v45, 5  ;;  %3918 = vst.msk [vmem:[#allocation2 + $0xc] sm:$0xf] %vm781_vm14, %v3914_v30  ;;  %v11789_v46 = vld [vmem:[#allocation3 + $0x79] sm:$0x1] }
 0x24c   :  { %v6168_v52 = vrot.slane %v11750_v56, 5  ;;  %v6731_v39 = vsel %vm221_vm2, %v6730_v26, %v6729_v28  ;;  %v11782_v59 = vsel %vm288_vm6, %v5001_v47, %v5002_v14  ;;  %v6650_v40 = vsel %vm223_vm5, %v6649_v4, %v6648_v55  ;;  %v6753_v0 = vld [vmem:[#allocation3 + $0x7] sm:$0x1]  ;;  %v6100_v62 = vld [vmem:[#allocation3 + $0x5a] sm:$0x1]  ;;  %v4524_v47 = vpop.permute.xlu1 %4523 }
 0x24d   :  { %v6690_v17 = vsel %vm284_vm4, %v6688_v23, %v6689_v22  ;;  %v6167_v8 = vsel %vm284_vm4, %v6165_v58, %v6166_v31  ;;  %v4611_v21 = vrot.slane %v4608_v10, 4  ;;  %v6733_v49 = vrot.slane %v11757_v13, 5  ;;  %v11792_v1 = vld [vmem:[#allocation3 + $0x6a] sm:$0x1]  ;;  %v3956_v55 = vpop.permute.xlu0 %3955  ;;  %v6923_v56 = vld [vmem:[#allocation3 + $0x2b] sm:$0x1]  ;;  %6619 = vrot.lane.b32.xlu1 %v11719_v41, %s7559_s24 }
 0x24e   :  { %v6078_v45 = vrot.slane %v6058_v34, 7  ;;  %v6081_v18 = vrot.slane %v6059_v48, 6  ;;  %v6043_v23 = vsel %vm223_vm5, %v6042_v6, %v6041_v9  ;;  %v6732_v58 = vsel %vm284_vm4, %v6730_v26, %v6731_v39  ;;  %v6099_v50 = vld [vmem:[#allocation3 + $0x4a] sm:$0x1]  ;;  %3960 = vst.msk [vmem:[#allocation2 + $0xc] sm:$0xf] %vm824_vm0, %v3956_v55  ;;  %6005 = vrot.lane.b32.xlu0 %v11765_v27, %s13356_s1 }
 0x24f   :  { %v6769_v14 = vrot.slane %v6754_v38, 7  ;;  %v6772_v61 = vrot.slane %v11774_v42, 6  ;;  %vm13370_vm10 = vcmask 913168   ;;  %v6692_v22 = vsel %vm223_vm5, %v6691_v19, %v6690_v17  ;;  %v11817_v9 = vld [vmem:[#allocation3 + $0x37] sm:$0x1] }
 0x250   :  { %4529 = vst.msk [vmem:[#allocation2] sm:$0xf] %vm13370_vm10, %v4524_v47  ;;  %v6169_v60 = vsel %vm223_vm5, %v6168_v52, %v6167_v8  ;;  %v6079_v12 = vsel %vm219_vm1, %v6078_v45, %v6057_v24  ;;  %v6084_v13 = vrot.slane %v11789_v46, 5  ;;  %v6120_v28 = vrot.slane %v6100_v62, 7  ;;  %v11820_v38 = vld [vmem:[#allocation3 + $0x7a] sm:$0x1]  ;;  %v4566_v42 = vpop.permute.xlu1 %4565 }
 0x251   :  { %v6080_v26 = vsel %vm280_vm3, %v6078_v45, %v6079_v12  ;;  %v6770_v31 = vsel %vm219_vm1, %v6769_v14, %v6753_v0  ;;  %v6123_v34 = vrot.slane %v11792_v1, 6  ;;  %v4613_v48 = vsel %vm2264_vm13, %v4611_v21, %v4608_v10  ;;  %v6795_v0 = vld [vmem:[#allocation3 + $0x8] sm:$0x1]  ;;  %v11830_v21 = vld [vmem:[#allocation3 + $0x38] sm:$0x1]  ;;  %v3998_v45 = vpop.permute.xlu0 %3997 }
 0x252   :  { %v6734_v30 = vsel %vm223_vm5, %v6733_v49, %v6732_v58  ;;  %v6082_v24 = vsel %vm221_vm2, %v6081_v18, %v6080_v26  ;;  %v6771_v39 = vsel %vm280_vm3, %v6769_v14, %v6770_v31  ;;  %v6651_v17 = vsel %vm288_vm6, %v6649_v4, %v6650_v40  ;;  %v6797_v62 = vld [vmem:[#allocation3 + $0x28] sm:$0x1]  ;;  %4571 = vst.msk [vmem:[#allocation2] sm:$0xf] %vm645_vm8, %v4566_v42  ;;  %v6188_v1 = vld [vmem:[#allocation3 + $0x5c] sm:$0x1] }
 0x253   :  { %v6083_v10 = vsel %vm284_vm4, %v6081_v18, %v6082_v24  ;;  %v6773_v8 = vsel %vm221_vm2, %v6772_v61, %v6771_v39  ;;  %v6121_v46 = vsel %vm219_vm1, %v6120_v28, %v6099_v50  ;;  %v11836_v16 = vsel %vm288_vm6, %v6042_v6, %v6043_v23  ;;  %v6187_v18 = vld [vmem:[#allocation3 + $0x4c] sm:$0x1]  ;;  %4617 = vst.msk [vmem:[#allocation2] sm:$0xff] %vm9063_vm15, %v4613_v48  ;;  %v11857_v58 = vld [vmem:[#allocation3 + $0x7c] sm:$0x1] }
 0x254   :  { %v11839_v35 = vsel %vm288_vm6, %v6691_v19, %v6692_v22  ;;  %v6085_v4 = vsel %vm223_vm5, %v6084_v13, %v6083_v10  ;;  %v6122_v40 = vsel %vm280_vm3, %v6120_v28, %v6121_v46  ;;  %v6189_v47 = vld [vmem:[#allocation3 + $0x6c] sm:$0x1]  ;;  %4002 = vst.msk [vmem:[#allocation2 + $0xc] sm:$0xf] %vm867_vm12, %v3998_v45  ;;  %v11851_v15 = vsel %vm288_vm6, %v6168_v52, %v6169_v60  ;;  %v6922_v14 = vld [vmem:[#allocation3 + $0x1b] sm:$0x1]  ;;  %v4654_v50 = vpop.permute.xlu1 %4653 }
 0x255   :  { %v11854_v6 = vsel %vm288_vm6, %v6733_v49, %v6734_v30  ;;  %v6124_v19 = vsel %vm221_vm2, %v6123_v34, %v6122_v40  ;;  %v6811_v23 = vrot.slane %v6796_v11, 7  ;;  %v6774_v55 = vsel %vm284_vm4, %v6772_v61, %v6773_v8  ;;  %v6921_v31 = vld [vmem:[#allocation3 + $0xb] sm:$0x1]  ;;  %v6230_v61 = vld [vmem:[#allocation3 + $0x5d] sm:$0x1]  ;;  %v4232_v28 = vpop.permute.xlu0 %4231  ;;  %6661 = vrot.lane.b32.xlu1 %v6651_v17, %s7560_s25  ;;  %6047 = vrot.lane.b32.xlu0 %v11836_v16, %s13357_s16 }
 0x256   :  { %v6775_v22 = vrot.slane %v11817_v9, 5  ;;  %v6126_v25 = vrot.slane %v11820_v38, 5  ;;  %v6814_v12 = vrot.slane %v6797_v62, 6  ;;  %v11865_v52 = vsel %vm288_vm6, %v6084_v13, %v6085_v4  ;;  %4659 = vst.msk [vmem:[#allocation2 + $0x4] sm:$0xf] %vm738_vm11, %v4654_v50 }
 0x257   :  { %v6125_v49 = vsel %vm284_vm4, %v6123_v34, %v6124_v19  ;;  %v6812_v60 = vsel %vm219_vm1, %v6811_v23, %v6795_v0  ;;  %v6208_v26 = vrot.slane %v6188_v1, 7  ;;  %v6817_v30 = vrot.slane %v11830_v21, 5  ;;  %v6231_v9 = vld [vmem:[#allocation3 + $0x6d] sm:$0x1]  ;;  %v11880_v0 = vld [vmem:[#allocation3 + $0x3b] sm:$0x1] }
 0x258   :  { %v6813_v48 = vsel %vm280_vm3, %v6811_v23, %v6812_v60  ;;  %v6211_v24 = vrot.slane %v6189_v47, 6  ;;  %v6214_v41 = vrot.slane %v11857_v58, 5  ;;  %v6937_v39 = vrot.slane %v6922_v14, 7  ;;  %v6229_v42 = vld [vmem:[#allocation3 + $0x4d] sm:$0x1]  ;;  %v4696_v21 = vpop.permute.xlu1 %4695 }
 0x259   :  { %v6815_v13 = vsel %vm221_vm2, %v6814_v12, %v6813_v48  ;;  %v6209_v34 = vsel %vm219_vm1, %v6208_v26, %v6187_v18  ;;  %v6940_v11 = vrot.slane %v6923_v56, 6  ;;  %v6776_v10 = vsel %vm223_vm5, %v6775_v22, %v6774_v55  ;;  %v11888_v40 = vld [vmem:[#allocation3 + $0x7d] sm:$0x1]  ;;  %v6838_v1 = vld [vmem:[#allocation3 + $0x19] sm:$0x1]  ;;  %v4274_v19 = vpop.permute.xlu0 %4273  ;;  %6703 = vrot.lane.b32.xlu1 %v11839_v35, %s7561_s26  ;;  %6173 = vrot.lane.b32.xlu0 %v11851_v15, %s13359_s17 }
 0x25a   :  { %v6816_v8 = vsel %vm284_vm4, %v6814_v12, %v6815_v13  ;;  %v6210_v46 = vsel %vm280_vm3, %v6208_v26, %v6209_v34  ;;  %v6250_v62 = vrot.slane %v6230_v61, 7  ;;  %v6127_v53 = vsel %vm223_vm5, %v6126_v25, %v6125_v49  ;;  %4701 = vst.msk [vmem:[#allocation2 + $0x4] sm:$0xf] %vm781_vm14, %v4696_v21  ;;  %v6837_v55 = vld [vmem:[#allocation3 + $0x9] sm:$0x1] }
 0x25b   :  { %v6212_v45 = vsel %vm221_vm2, %v6211_v24, %v6210_v46  ;;  %v6938_v4 = vsel %vm219_vm1, %v6937_v39, %v6921_v31  ;;  %v6253_v18 = vrot.slane %v6231_v9, 6  ;;  %v11890_v47 = vld [vmem:[#allocation2 + $0x8] sm:$0xff]  ;;  %v6818_v23 = vsel %vm223_vm5, %v6817_v30, %v6816_v8  ;;  %v6839_v12 = vld [vmem:[#allocation3 + $0x29] sm:$0x1]  ;;  %v6273_v9 = vld [vmem:[#allocation3 + $0x6e] sm:$0x1] }
 0x25c   :  { %13371 = vst [vmem:[#allocation15_spill] sm:$0xff] %v11890_v47  ;;  %v6213_v17 = vsel %vm284_vm4, %v6211_v24, %v6212_v45  ;;  %v6939_v58 = vsel %vm280_vm3, %v6937_v39, %v6938_v4  ;;  %v6251_v14 = vsel %vm219_vm1, %v6250_v62, %v6229_v42  ;;  %4236 = vst.msk [vmem:[#allocation2 + $0x8] sm:$0xf] %vm13239_vm7, %v4232_v28  ;;  %v6943_v49 = vrot.slane %v11880_v0, 5  ;;  %v11904_v26 = vld [vmem:[#allocation3 + $0x39] sm:$0x1]  ;;  %v4738_v13 = vpop.permute.xlu1 %4737 }
 0x25d   :  { %v6215_v56 = vsel %vm223_vm5, %v6214_v41, %v6213_v17  ;;  %v6941_v50 = vsel %vm221_vm2, %v6940_v11, %v6939_v58  ;;  %v6252_v60 = vsel %vm280_vm3, %v6250_v62, %v6251_v14  ;;  %v6272_v31 = vld [vmem:[#allocation3 + $0x5e] sm:$0x1]  ;;  %vm13372_vm9 = vcmask 224368   ;;  %v6271_v24 = vld [vmem:[#allocation3 + $0x4e] sm:$0x1]  ;;  %v4316_v8 = vpop.permute.xlu0 %4315  ;;  %6745 = vrot.lane.b32.xlu1 %v11854_v6, %s7562_s27  ;;  %6089 = vrot.lane.b32.xlu0 %v11865_v52, %s13361_s18 }
 0x25e   :  { %4278 = vst.msk [vmem:[#allocation2 + $0x8] sm:$0xf] %vm13372_vm9, %v4274_v19  ;;  %v11908_v61 = vsel %vm288_vm6, %v6775_v22, %v6776_v10  ;;  %v6942_v28 = vsel %vm284_vm4, %v6940_v11, %v6941_v50  ;;  %v6254_v27 = vsel %vm221_vm2, %v6253_v18, %v6252_v60  ;;  %v6853_v48 = vrot.slane %v6838_v1, 7  ;;  %v6880_v42 = vld [vmem:[#allocation3 + $0x1a] sm:$0x1] }
 0x25f   :  { %v11917_v34 = vsel %vm288_vm6, %v6126_v25, %v6127_v53  ;;  %v11920_v39 = vsel %vm288_vm6, %v6817_v30, %v6818_v23  ;;  %v6256_v22 = vrot.slane %v11888_v40, 5  ;;  %v6856_v11 = vrot.slane %v6839_v12, 6  ;;  %v6881_v10 = vld [vmem:[#allocation3 + $0x2a] sm:$0x1]  ;;  %4743 = vst.msk [vmem:[#allocation2 + $0x4] sm:$0xf] %vm824_vm0, %v4738_v13 }
 0x260   :  { %v11925_v46 = vsel %vm288_vm6, %v6214_v41, %v6215_v56  ;;  %v6255_v35 = vsel %vm284_vm4, %v6253_v18, %v6254_v27  ;;  %v6854_v38 = vsel %vm219_vm1, %v6853_v48, %v6837_v55  ;;  %v11929_v25 = vld [vmem:[#allocation3 + $0x7e] sm:$0x1]  ;;  %v6292_v62 = vrot.slane %v6272_v31, 7  ;;  %v6314_v30 = vld [vmem:[#allocation3 + $0x5f] sm:$0x1]  ;;  %v4780_v14 = vpop.permute.xlu1 %4779 }
 0x261   :  { %vm13373_vm10 = vcmask 339168   ;;  %v6944_v21 = vsel %vm223_vm5, %v6943_v49, %v6942_v28  ;;  %v6855_v41 = vsel %vm280_vm3, %v6853_v48, %v6854_v38  ;;  %v6859_v53 = vrot.slane %v11904_v26, 5  ;;  %v6879_v4 = vld [vmem:[#allocation3 + $0xa] sm:$0x1]  ;;  %v6315_v18 = vld [vmem:[#allocation3 + $0x6f] sm:$0x1]  ;;  %v4358_v26 = vpop.permute.xlu0 %4357  ;;  %6787 = vrot.lane.b32.xlu1 %v11908_v61, %s13314_s9  ;;  %6131 = vrot.lane.b32.xlu0 %v11917_v34, %s13363_s19 }
 0x262   :  { %4320 = vst.msk [vmem:[#allocation2 + $0x8] sm:$0xf] %vm13373_vm10, %v4316_v8  ;;  %v6295_v45 = vrot.slane %v6273_v9, 6  ;;  %v6857_v1 = vsel %vm221_vm2, %v6856_v11, %v6855_v41  ;;  %v6293_v19 = vsel %vm219_vm1, %v6292_v62, %v6271_v24  ;;  %v11941_v23 = vld [vmem:[#allocation3 + $0x3a] sm:$0x1]  ;;  %v6895_v17 = vrot.slane %v6880_v42, 7 }
 0x263   :  { %v6898_v58 = vrot.slane %v6881_v10, 6  ;;  %v6313_v16 = vld [vmem:[#allocation3 + $0x4f] sm:$0x1]  ;;  %v6257_v55 = vsel %vm223_vm5, %v6256_v22, %v6255_v35  ;;  %v6858_v12 = vsel %vm284_vm4, %v6856_v11, %v6857_v1  ;;  %v6294_v56 = vsel %vm280_vm3, %v6292_v62, %v6293_v19  ;;  %v11950_v50 = vld [vmem:[#allocation3 + $0x7f] sm:$0x1] }
 0x264   :  { %v6334_v60 = vrot.slane %v6314_v30, 7  ;;  %4785 = vst.msk [vmem:[#allocation2 + $0x4] sm:$0xf] %vm867_vm12, %v4780_v14  ;;  %v6296_v31 = vsel %vm221_vm2, %v6295_v45, %v6294_v56  ;;  %v6298_v28 = vrot.slane %v11929_v25, 5  ;;  %v6896_v6 = vsel %vm219_vm1, %v6895_v17, %v6879_v4  ;;  %v6967_v48 = vld [vmem:[#allocation3 + $0xc] sm:$0x1]  ;;  %v5052_v4 = vpop.permute.xlu1 %5051 }
 0x265   :  { %v6337_v27 = vrot.slane %v6315_v18, 6  ;;  %v6968_v24 = vld [vmem:[#allocation3 + $0x1c] sm:$0x1]  ;;  %vm13374_vm9 = vcmask 453968   ;;  %v6860_v9 = vsel %vm223_vm5, %v6859_v53, %v6858_v12  ;;  %v6897_v13 = vsel %vm280_vm3, %v6895_v17, %v6896_v6  ;;  %v6969_v10 = vld [vmem:[#allocation3 + $0x2c] sm:$0x1]  ;;  %v4400_v14 = vpop.permute.xlu0 %4399  ;;  %6829 = vrot.lane.b32.xlu1 %v11920_v39, %s13316_s11  ;;  %6219 = vrot.lane.b32.xlu0 %v11925_v46, %s13365_s20 }
 0x266   :  { %4362 = vst.msk [vmem:[#allocation2 + $0x8] sm:$0xf] %vm13374_vm9, %v4358_v26  ;;  %v6901_v11 = vrot.slane %v11941_v23, 5  ;;  %v6335_v42 = vsel %vm219_vm1, %v6334_v60, %v6313_v16  ;;  %v11963_v8 = vld [vmem:[#allocation3 + $0x3c] sm:$0x1]  ;;  %v6297_v35 = vsel %vm284_vm4, %v6295_v45, %v6296_v31  ;;  %v6899_v38 = vsel %vm221_vm2, %v6898_v58, %v6897_v13 }
 0x267   :  { %v6336_v62 = vsel %vm280_vm3, %v6334_v60, %v6335_v42  ;;  %v6340_v30 = vrot.slane %v11950_v50, 5  ;;  %v6547_v15 = vld [vmem:[#allocation3 + $0x42] sm:$0x1]  ;;  %v6548_v41 = vld [vmem:[#allocation3 + $0x52] sm:$0x1]  ;;  %v6945_v18 = vsel %vm288_vm6, %v6943_v49, %v6944_v21  ;;  %v6900_v1 = vsel %vm284_vm4, %v6898_v58, %v6899_v38 }
 0x268   :  { %v6338_v45 = vsel %vm221_vm2, %v6337_v27, %v6336_v62  ;;  %v6983_v19 = vrot.slane %v6968_v24, 7  ;;  %v6549_v17 = vld [vmem:[#allocation3 + $0x62] sm:$0x1]  ;;  %v11976_v16 = vld [vmem:[#allocation3 + $0x72] sm:$0x1]  ;;  %v11981_v12 = vsel %vm288_vm6, %v6256_v22, %v6257_v55  ;;  %v11984_v61 = vsel %vm288_vm6, %v6859_v53, %v6860_v9  ;;  %v5094_v13 = vpop.permute.xlu1 %5093 }
 0x269   :  { %v6339_v0 = vsel %vm284_vm4, %v6337_v27, %v6338_v45  ;;  %v6986_v49 = vrot.slane %v6969_v10, 6  ;;  %v7010_v21 = vld [vmem:[#allocation3 + $0x1d] sm:$0x1]  ;;  %v7011_v58 = vld [vmem:[#allocation3 + $0x2d] sm:$0x1]  ;;  %vm13375_vm10 = vcmask 568768   ;;  %v6299_v40 = vsel %vm223_vm5, %v6298_v28, %v6297_v35  ;;  %6955 = vrot.lane.b32.xlu1 %v6945_v18, %s13322_s8  ;;  %6261 = vrot.lane.b32.xlu0 %v11981_v12, %s13367_s21 }
 0x26a   :  { %4404 = vst.msk [vmem:[#allocation2 + $0x8] sm:$0xf] %vm13375_vm10, %v4400_v14  ;;  %v6902_v22 = vsel %vm223_vm5, %v6901_v11, %v6900_v1  ;;  %v6984_v53 = vsel %vm219_vm1, %v6983_v19, %v6967_v48  ;;  %v6568_v55 = vrot.slane %v6548_v41, 7  ;;  %v7009_v56 = vld [vmem:[#allocation3 + $0xd] sm:$0x1]  ;;  %v6341_v26 = vsel %vm223_vm5, %v6340_v30, %v6339_v0 }
 0x26b   :  { %v6590_v60 = vld [vmem:[#allocation3 + $0x53] sm:$0x1]  ;;  %v6985_v31 = vsel %vm280_vm3, %v6983_v19, %v6984_v53  ;;  %v6989_v52 = vrot.slane %v11963_v8, 5  ;;  %v6571_v6 = vrot.slane %v6549_v17, 6  ;;  %v12002_v27 = vld [vmem:[#allocation3 + $0x3d] sm:$0x1]  ;;  %v4442_v8 = vpop.permute.xlu0 %4441  ;;  %v6903_v53 = vsel %vm288_vm6, %v6901_v11, %v6902_v22 }
 0x26c   :  { %v6591_v24 = vld [vmem:[#allocation3 + $0x63] sm:$0x1]  ;;  %v12004_v9 = vld [vmem:[#allocation2] sm:$0xff]  ;;  %v6987_v48 = vsel %vm221_vm2, %v6986_v49, %v6985_v31  ;;  %v6569_v42 = vsel %vm219_vm1, %v6568_v55, %v6547_v15  ;;  %v7025_v10 = vrot.slane %v7010_v21, 7  ;;  %v7028_v35 = vrot.slane %v7011_v58, 6  ;;  %v5136_v21 = vpop.permute.xlu1 %5135 }
 0x26d   :  { %v6589_v38 = vld [vmem:[#allocation3 + $0x43] sm:$0x1]  ;;  %5015 = vst.msk [vmem:[#allocation2] sm:$0xf] %vm13239_vm7, %v11782_v59  ;;  %v6988_v62 = vsel %vm284_vm4, %v6986_v49, %v6987_v48  ;;  %v6570_v41 = vsel %vm280_vm3, %v6568_v55, %v6569_v42  ;;  %v6574_v1 = vrot.slane %v11976_v16, 5  ;;  %v6610_v45 = vrot.slane %v6590_v60, 7  ;;  %6871 = vrot.lane.b32.xlu1 %v11984_v61, %s13327_s12 }
 0x26e   :  { %vm13376_vm9 = vcmask 224368   ;;  %vm13377_vm10 = vcmask 683568   ;;  %v6572_v39 = vsel %vm221_vm2, %v6571_v6, %v6570_v41  ;;  %v7026_v15 = vsel %vm219_vm1, %v7025_v10, %v7009_v56  ;;  %v4984_v17 = vld [vmem:[#allocation3 + $0x52] sm:$0x1]  ;;  %v12026_v0 = vld [vmem:[#allocation3 + $0x73] sm:$0x1] }
 0x26f   :  { %5057 = vst.msk [vmem:[#allocation2] sm:$0xf] %vm13376_vm9, %v5052_v4  ;;  %v7031_v59 = vrot.slane %v12002_v27, 5  ;;  %v6613_v19 = vrot.slane %v6591_v24, 6  ;;  %vm13378_vm7 = vcmask 339168   ;;  %v6990_v16 = vsel %vm223_vm5, %v6989_v52, %v6988_v62  ;;  %v4484_v27 = vpop.permute.xlu0 %4483 }
 0x270   :  { %4446 = vst.msk [vmem:[#allocation2 + $0x8] sm:$0xf] %vm13377_vm10, %v4442_v8  ;;  %v6573_v14 = vsel %vm284_vm4, %v6571_v6, %v6572_v39  ;;  %v7027_v4 = vsel %vm280_vm3, %v7025_v10, %v7026_v15  ;;  %v6611_v34 = vsel %vm219_vm1, %v6610_v45, %v6589_v38  ;;  %v4985_v49 = vld [vmem:[#allocation3 + $0x62] sm:$0x1]  ;;  %v12033_v58 = vsel %vm288_vm6, %v6298_v28, %v6299_v40  ;;  %v7051_v31 = vld [vmem:[#allocation3 + $0xe] sm:$0x1]  ;;  %v5178_v62 = vpop.permute.xlu1 %5177 }
 0x271   :  { %5099 = vst.msk [vmem:[#allocation2] sm:$0xf] %vm13378_vm7, %v5094_v13  ;;  %v7029_v55 = vsel %vm221_vm2, %v7028_v35, %v7027_v4  ;;  %v6612_v56 = vsel %vm280_vm3, %v6610_v45, %v6611_v34  ;;  %v4983_v60 = vld [vmem:[#allocation3 + $0x42] sm:$0x1]  ;;  %v7052_v6 = vld [vmem:[#allocation3 + $0x1e] sm:$0x1]  ;;  %v6575_v18 = vsel %vm223_vm5, %v6574_v1, %v6573_v14  ;;  %v12052_v11 = vsel %vm288_vm6, %v6340_v30, %v6341_v26 }
 0x272   :  { %vm13379_vm7 = vcmask 453968   ;;  %v7030_v25 = vsel %vm284_vm4, %v7028_v35, %v7029_v55  ;;  %v6614_v28 = vsel %vm221_vm2, %v6613_v19, %v6612_v56  ;;  %v5004_v40 = vrot.slane %v4984_v17, 7  ;;  %v7053_v23 = vld [vmem:[#allocation3 + $0x2e] sm:$0x1]  ;;  %v12044_v24 = vld [vmem:[#allocation3 + $0x3e] sm:$0x1]  ;;  %6913 = vrot.lane.b32.xlu1 %v6903_v53, %s13331_s14  ;;  %6303 = vrot.lane.b32.xlu0 %v12033_v58, %s13369_s22 }
 0x273   :  { %5141 = vst.msk [vmem:[#allocation2] sm:$0xf] %vm13379_vm7, %v5136_v21  ;;  %vm13380_vm9 = vcmask 798368   ;;  %v12055_v22 = vsel %vm288_vm6, %v6989_v52, %v6990_v16  ;;  %v6616_v13 = vrot.slane %v12026_v0, 5  ;;  %v5007_v48 = vrot.slane %v4985_v49, 6  ;;  %v4610_v15 = vpop.permute.xlu0 %4609 }
 0x274   :  { %4488 = vst.msk [vmem:[#allocation2 + $0x8] sm:$0xf] %vm13380_vm9, %v4484_v27  ;;  %v6632_v42 = vld [vmem:[#allocation3 + $0x54] sm:$0x1]  ;;  %v6633_v10 = vld [vmem:[#allocation3 + $0x64] sm:$0x1]  ;;  %v7032_v35 = vsel %vm223_vm5, %v7031_v59, %v7030_v25  ;;  %v6615_v38 = vsel %vm284_vm4, %v6613_v19, %v6614_v28  ;;  %v5005_v46 = vsel %vm219_vm1, %v5004_v40, %v4983_v60  ;;  %v12066_v30 = vsel %vm288_vm6, %v6574_v1, %v6575_v18  ;;  %v5220_v12 = vpop.permute.xlu1 %5219 }
 0x275   :  { %v12060_v8 = vld [vmem:[#allocation3 + $0x72] sm:$0x1]  ;;  %v7067_v50 = vrot.slane %v7052_v6, 7  ;;  %v5006_v26 = vsel %vm280_vm3, %v5004_v40, %v5005_v46  ;;  %v7070_v52 = vrot.slane %v7053_v23, 6  ;;  %v7073_v41 = vrot.slane %v12044_v24, 5 }
 0x276   :  { %v6631_v45 = vld [vmem:[#allocation3 + $0x44] sm:$0x1]  ;;  %v7094_v39 = vld [vmem:[#allocation3 + $0x1f] sm:$0x1]  ;;  %vm13381_vm10 = vcmask 568768   ;;  %v5008_v19 = vsel %vm221_vm2, %v5007_v48, %v5006_v26  ;;  %v6652_v61 = vrot.slane %v6632_v42, 7  ;;  %v12078_v1 = vsel %vm288_vm6, %v7031_v59, %v7032_v35  ;;  %7001 = vrot.lane.b32.xlu1 %v12055_v22, %s13335_s15  ;;  %6345 = vrot.lane.b32.xlu0 %v12052_v11, %s13310_s10 }
 0x277   :  { %5183 = vst.msk [vmem:[#allocation2] sm:$0xf] %vm13381_vm10, %v5178_v62  ;;  %v7068_v17 = vsel %vm219_vm1, %v7067_v50, %v7051_v31  ;;  %v12073_v16 = vld [vmem:[#allocation3 + $0x74] sm:$0x1]  ;;  %v6655_v14 = vrot.slane %v6633_v10, 6  ;;  %v6617_v4 = vsel %vm223_vm5, %v6616_v13, %v6615_v38  ;;  %v5010_v0 = vrot.slane %v12060_v8, 5  ;;  %v4526_v23 = vpop.permute.xlu0 %4525 }
 0x278   :  { %v7069_v34 = vsel %vm280_vm3, %v7067_v50, %v7068_v17  ;;  %v7093_v49 = vld [vmem:[#allocation3 + $0xf] sm:$0x1]  ;;  %v4612_v55 = vrot.slane %v4610_v15, 4  ;;  %v6653_v60 = vsel %vm219_vm1, %v6652_v61, %v6631_v45  ;;  %v12085_v31 = vld [vmem:[#allocation3 + $0x3f] sm:$0x1]  ;;  %v7109_v6 = vrot.slane %v7094_v39, 7 }
 0x279   :  { %v7095_v21 = vld [vmem:[#allocation3 + $0x2f] sm:$0x1]  ;;  %v7071_v56 = vsel %vm221_vm2, %v7070_v52, %v7069_v34  ;;  %v5009_v59 = vsel %vm284_vm4, %v5007_v48, %v5008_v19  ;;  %v6654_v18 = vsel %vm280_vm3, %v6652_v61, %v6653_v60  ;;  %v6658_v25 = vrot.slane %v12073_v16, 5  ;;  %v6674_v28 = vld [vmem:[#allocation3 + $0x55] sm:$0x1] }
 0x27a   :  { %v7072_v27 = vsel %vm284_vm4, %v7070_v52, %v7071_v56  ;;  %v6675_v40 = vld [vmem:[#allocation3 + $0x65] sm:$0x1]  ;;  %vm13382_vm7 = vcmask 683568   ;;  %v6656_v42 = vsel %vm221_vm2, %v6655_v14, %v6654_v18  ;;  %v7110_v10 = vsel %vm219_vm1, %v7109_v6, %v7093_v49  ;;  %v6716_v48 = vld [vmem:[#allocation3 + $0x56] sm:$0x1]  ;;  %7043 = vrot.lane.b32.xlu1 %v12078_v1, %s13337_s7  ;;  %6579 = vrot.lane.b32.xlu0 %v12066_v30, %s7558_s23 }
 0x27b   :  { %5225 = vst.msk [vmem:[#allocation2] sm:$0xf] %vm13382_vm7, %v5220_v12  ;;  %v7074_v24 = vsel %vm223_vm5, %v7073_v41, %v7072_v27  ;;  %v7112_v53 = vrot.slane %v7095_v21, 6  ;;  %v6673_v35 = vld [vmem:[#allocation3 + $0x45] sm:$0x1]  ;;  %vm13383_vm9 = vcmask 913168   ;;  %v12100_v38 = vsel %vm288_vm6, %v6616_v13, %v6617_v4  ;;  %v4568_v60 = vpop.permute.xlu0 %4567 }
 0x27c   :  { %4530 = vst.msk [vmem:[#allocation2 + $0x8] sm:$0xf] %vm13383_vm9, %v4526_v23  ;;  %v6657_v46 = vsel %vm284_vm4, %v6655_v14, %v6656_v42  ;;  %v7111_v50 = vsel %vm280_vm3, %v7109_v6, %v7110_v10  ;;  %v7115_v62 = vrot.slane %v12085_v31, 5  ;;  %v12105_v26 = vld [vmem:[#allocation3 + $0x75] sm:$0x1]  ;;  %v5011_v45 = vsel %vm223_vm5, %v5010_v0, %v5009_v59  ;;  %v5262_v14 = vpop.permute.xlu1 %5261 }
 0x27d   :  { %v6717_v52 = vld [vmem:[#allocation3 + $0x66] sm:$0x1]  ;;  %v7113_v39 = vsel %vm221_vm2, %v7112_v53, %v7111_v50  ;;  %v6694_v19 = vrot.slane %v6674_v28, 7  ;;  %v6697_v58 = vrot.slane %v6675_v40, 6  ;;  %v6758_v13 = vld [vmem:[#allocation3 + $0x57] sm:$0x1]  ;;  %v4614_v61 = vsel %vm2264_vm13, %v4612_v55, %v4610_v15 }
 0x27e   :  { %v6715_v17 = vld [vmem:[#allocation3 + $0x46] sm:$0x1]  ;;  %v7075_v4 = vsel %vm288_vm6, %v7073_v41, %v7074_v24  ;;  %v7114_v34 = vsel %vm284_vm4, %v7112_v53, %v7113_v39  ;;  %v12116_v49 = vld [vmem:[#allocation3 + $0x76] sm:$0x1]  ;;  %v6736_v21 = vrot.slane %v6716_v48, 7  ;;  %vm13384_vm10 = vcmask 798368   ;;  %6621 = vrot.lane.b32.xlu0 %v12100_v38, %s7559_s24 }
 0x27f   :  { %v12118_v56 = vld [vmem:[#allocation3 + $0x67] sm:$0x1]  ;;  %5267 = vst.msk [vmem:[#allocation2] sm:$0xf] %vm13384_vm10, %v5262_v14  ;;  %v6659_v15 = vsel %vm223_vm5, %v6658_v25, %v6657_v46  ;;  %v6695_v55 = vsel %vm219_vm1, %v6694_v19, %v6673_v35  ;;  %v6700_v22 = vrot.slane %v12105_v26, 5  ;;  %v6739_v31 = vrot.slane %v6717_v52, 6  ;;  %v4656_v52 = vpop.permute.xlu0 %4655  ;;  %7085 = vrot.lane.b32.xlu1 %v7075_v4, %s7584_s13 }
 0x280   :  { %v6757_v41 = vld [vmem:[#allocation3 + $0x47] sm:$0x1]  ;;  %v6800_v6 = vld [vmem:[#allocation3 + $0x58] sm:$0x1]  ;;  %4572 = vst.msk [vmem:[#allocation2 + $0x8] sm:$0xf] %vm645_vm8, %v4568_v60  ;;  %v7116_v12 = vsel %vm223_vm5, %v7115_v62, %v7114_v34  ;;  %v6696_v59 = vsel %vm280_vm3, %v6694_v19, %v6695_v55  ;;  %v6737_v27 = vsel %vm219_vm1, %v6736_v21, %v6715_v17  ;;  %v5388_v11 = vpop.permute.xlu1 %5387  ;;  %7466 = vrsqrt.f32 %v11697_v20 }
 0x281   :  { %v6778_v18 = vrot.slane %v6758_v13, 7  ;;  %4618 = vst.msk [vmem:[#allocation2 + $0x8] sm:$0xff] %vm9063_vm15, %v4614_v61  ;;  %v6698_v28 = vsel %vm221_vm2, %v6697_v58, %v6696_v59  ;;  %v6738_v40 = vsel %vm280_vm3, %v6736_v21, %v6737_v27  ;;  %v6742_v23 = vrot.slane %v12116_v49, 5  ;;  %v6799_v42 = vld [vmem:[#allocation3 + $0x48] sm:$0x1] }
 0x282   :  { %v6781_v24 = vrot.slane %v12118_v56, 6  ;;  %v6699_v10 = vsel %vm284_vm4, %v6697_v58, %v6698_v28  ;;  %v6740_v53 = vsel %vm221_vm2, %v6739_v31, %v6738_v40  ;;  %v12142_v35 = vld [vmem:[#allocation3 + $0x77] sm:$0x1]  ;;  %v6801_v46 = vld [vmem:[#allocation3 + $0x68] sm:$0x1]  ;;  %v6820_v50 = vrot.slane %v6800_v6, 7 }
 0x283   :  { %v6779_v48 = vsel %vm219_vm1, %v6778_v18, %v6757_v41  ;;  %v5391_v26 = vrot.slane %v5388_v11, 4  ;;  %v6701_v39 = vsel %vm223_vm5, %v6700_v22, %v6699_v10  ;;  %v6741_v19 = vsel %vm284_vm4, %v6739_v31, %v6740_v53  ;;  %v12148_v13 = vld [vmem:[#allocation3 + $0x78] sm:$0x1]  ;;  %v6926_v1 = vld [vmem:[#allocation3 + $0x5b] sm:$0x1] }
 0x284   :  { %v6780_v17 = vsel %vm280_vm3, %v6778_v18, %v6779_v48  ;;  %4660 = vst.msk [vmem:[#allocation2 + $0xc] sm:$0xf] %vm738_vm11, %v4656_v52  ;;  %v12156_v58 = vsel %vm288_vm6, %v5010_v0, %v5011_v45  ;;  %v6660_v61 = vsel %vm288_vm6, %v6658_v25, %v6659_v15  ;;  %v6821_v34 = vsel %vm219_vm1, %v6820_v50, %v6799_v42  ;;  %v6925_v21 = vld [vmem:[#allocation3 + $0x4b] sm:$0x1]  ;;  %v6842_v60 = vld [vmem:[#allocation3 + $0x59] sm:$0x1]  ;;  %v5304_v15 = vpop.permute.xlu1 %5303 }
 0x285   :  { %v6782_v14 = vsel %vm221_vm2, %v6781_v24, %v6780_v17  ;;  %v6927_v56 = vld [vmem:[#allocation3 + $0x6b] sm:$0x1]  ;;  %v7117_v55 = vsel %vm288_vm6, %v7115_v62, %v7116_v12  ;;  %v12165_v30 = vsel %vm288_vm6, %v6700_v22, %v6701_v39  ;;  %v6784_v8 = vrot.slane %v12142_v35, 5  ;;  %v12169_v45 = vld [vmem:[#allocation3 + $0x7b] sm:$0x1]  ;;  %v4698_v12 = vpop.permute.xlu0 %4697  ;;  %6663 = vrot.lane.b32.xlu0 %v6660_v61, %s7560_s25  ;;  %s7587_s25 = smov [#allocation8]  }
 0x286   :  { %v6822_v0 = vsel %vm280_vm3, %v6820_v50, %v6821_v34  ;;  %v6843_v16 = vld [vmem:[#allocation3 + $0x69] sm:$0x1]  ;;  %vm13385_vm7 = vcmask 1031168   ;;  %v6743_v31 = vsel %vm223_vm5, %v6742_v23, %v6741_v19  ;;  %v6823_v62 = vrot.slane %v6801_v46, 6  ;;  %v6884_v6 = vld [vmem:[#allocation3 + $0x5a] sm:$0x1]  ;;  %7127 = vrot.lane.b32.xlu1 %v7117_v55, %s7585_s0 }
 0x287   :  { %v5393_v25 = vsel %vm13385_vm7, %v5391_v26, %v5388_v11  ;;  %v6946_v41 = vrot.slane %v6926_v1, 7  ;;  %v6841_v22 = vld [vmem:[#allocation3 + $0x49] sm:$0x1]  ;;  %5309 = vst.msk [vmem:[#allocation2] sm:$0xf] %vm13383_vm9, %v5304_v15  ;;  %v6783_v59 = vsel %vm284_vm4, %v6781_v24, %v6782_v14  ;;  %v6826_v27 = vrot.slane %v12148_v13, 5 }
 0x288   :  { %v6949_v18 = vrot.slane %v6927_v56, 6  ;;  %v6862_v28 = vrot.slane %v6842_v60, 7  ;;  %v12179_v40 = vld [vmem:[#allocation3 + $0x6a] sm:$0x1]  ;;  %4702 = vst.msk [vmem:[#allocation2 + $0xc] sm:$0xf] %vm781_vm14, %v4698_v12  ;;  %v6824_v4 = vsel %vm221_vm2, %v6823_v62, %v6822_v0  ;;  %v5346_v38 = vpop.permute.xlu1 %5345  ;;  %v6785_v52 = vsel %vm223_vm5, %v6784_v8, %v6783_v59 }
 0x289   :  { %v6947_v42 = vsel %vm219_vm1, %v6946_v41, %v6925_v21  ;;  %v6952_v11 = vrot.slane %v12169_v45, 5  ;;  %v6865_v10 = vrot.slane %v6843_v16, 6  ;;  %v6883_v53 = vld [vmem:[#allocation3 + $0x4a] sm:$0x1]  ;;  %v6825_v24 = vsel %vm284_vm4, %v6823_v62, %v6824_v4  ;;  %v12189_v48 = vld [vmem:[#allocation3 + $0x79] sm:$0x1]  ;;  %v4740_v14 = vpop.permute.xlu0 %4739  ;;  %6705 = vrot.lane.b32.xlu0 %v12165_v30, %s7561_s26 }
 0x28a   :  { %v6948_v35 = vsel %vm280_vm3, %v6946_v41, %v6947_v42  ;;  %v6863_v46 = vsel %vm219_vm1, %v6862_v28, %v6841_v22  ;;  %v12192_v50 = vld [vmem:[#allocation3 + $0x7a] sm:$0x1]  ;;  %v6904_v26 = vrot.slane %v6884_v6, 7  ;;  %v6907_v17 = vrot.slane %v12179_v40, 6  ;;  %v6971_v13 = vld [vmem:[#allocation3 + $0x4c] sm:$0x1] }
 0x28b   :  { %v6950_v39 = vsel %vm221_vm2, %v6949_v18, %v6948_v35  ;;  %v6864_v19 = vsel %vm280_vm3, %v6862_v28, %v6863_v46  ;;  %v6972_v1 = vld [vmem:[#allocation3 + $0x5c] sm:$0x1]  ;;  %5351 = vst.msk [vmem:[#allocation2] sm:$0xf] %vm645_vm8, %v5346_v38  ;;  %v6827_v34 = vsel %vm223_vm5, %v6826_v27, %v6825_v24  ;;  %v6973_v55 = vld [vmem:[#allocation3 + $0x6c] sm:$0x1]  ;;  %v6744_v16 = vsel %vm288_vm6, %v6742_v23, %v6743_v31 }
 0x28c   :  { %v6951_v21 = vsel %vm284_vm4, %v6949_v18, %v6950_v39  ;;  %v6866_v56 = vsel %vm221_vm2, %v6865_v10, %v6864_v19  ;;  %v6905_v60 = vsel %vm219_vm1, %v6904_v26, %v6883_v53  ;;  %v12204_v0 = vld [vmem:[#allocation3 + $0x7c] sm:$0x1]  ;;  %v7014_v45 = vld [vmem:[#allocation3 + $0x5d] sm:$0x1]  ;;  %5397 = vst.msk [vmem:[#allocation2] sm:$0xff] %vm9063_vm15, %v5393_v25  ;;  %v6868_v62 = vrot.slane %v12189_v48, 5  ;;  %v5434_v28 = vpop.permute.xlu1 %5433 }
 0x28d   :  { %4744 = vst.msk [vmem:[#allocation2 + $0xc] sm:$0xf] %vm824_vm0, %v4740_v14  ;;  %v6953_v15 = vsel %vm223_vm5, %v6952_v11, %v6951_v21  ;;  %v6906_v41 = vsel %vm280_vm3, %v6904_v26, %v6905_v60  ;;  %v7013_v22 = vld [vmem:[#allocation3 + $0x4d] sm:$0x1]  ;;  %v12217_v12 = vsel %vm288_vm6, %v6784_v8, %v6785_v52  ;;  %v6867_v25 = vsel %vm284_vm4, %v6865_v10, %v6866_v56  ;;  %v7016_v18 = vld [vmem:[#allocation3 + $0x7d] sm:$0x1]  ;;  %v4782_v10 = vpop.permute.xlu0 %4781 }
 0x28e   :  { %v7015_v6 = vld [vmem:[#allocation3 + $0x6d] sm:$0x1]  ;;  %v6908_v59 = vsel %vm221_vm2, %v6907_v17, %v6906_v41  ;;  %v6992_v61 = vrot.slane %v6972_v1, 7  ;;  %v7056_v49 = vld [vmem:[#allocation3 + $0x5e] sm:$0x1]  ;;  %v12222_v23 = vsel %vm288_vm6, %v6826_v27, %v6827_v34  ;;  %v12225_v31 = vsel %vm288_vm6, %v6952_v11, %v6953_v15  ;;  %6747 = vrot.lane.b32.xlu0 %v6744_v16, %s7562_s27 }
 0x28f   :  { %v6910_v40 = vrot.slane %v12192_v50, 5  ;;  %v6995_v4 = vrot.slane %v6973_v55, 6  ;;  %v7055_v42 = vld [vmem:[#allocation3 + $0x4e] sm:$0x1]  ;;  %5439 = vst.msk [vmem:[#allocation2 + $0x4] sm:$0xf] %vm738_vm11, %v5434_v28  ;;  %v6869_v27 = vsel %vm223_vm5, %v6868_v62, %v6867_v25  ;;  %v6909_v11 = vsel %vm284_vm4, %v6907_v17, %v6908_v59 }
 0x290   :  { %v7057_v8 = vld [vmem:[#allocation3 + $0x6e] sm:$0x1]  ;;  %v6993_v53 = vsel %vm219_vm1, %v6992_v61, %v6971_v13  ;;  %v6998_v24 = vrot.slane %v12204_v0, 5  ;;  %v7034_v35 = vrot.slane %v7014_v45, 7  ;;  %v7037_v48 = vrot.slane %v7015_v6, 6  ;;  %v5476_v14 = vpop.permute.xlu1 %5475 }
 0x291   :  { %v7098_v46 = vld [vmem:[#allocation3 + $0x5f] sm:$0x1]  ;;  %4786 = vst.msk [vmem:[#allocation2 + $0xc] sm:$0xf] %vm867_vm12, %v4782_v10  ;;  %v6994_v50 = vsel %vm280_vm3, %v6992_v61, %v6993_v53  ;;  %v7076_v26 = vrot.slane %v7056_v49, 7  ;;  %v7040_v39 = vrot.slane %v7016_v18, 5  ;;  %v5054_v60 = vpop.permute.xlu0 %5053  ;;  %v6911_v55 = vsel %vm223_vm5, %v6910_v40, %v6909_v11 }
 0x292   :  { %v6996_v38 = vsel %vm221_vm2, %v6995_v4, %v6994_v50  ;;  %v7035_v52 = vsel %vm219_vm1, %v7034_v35, %v7013_v22  ;;  %v12239_v19 = vld [vmem:[#allocation3 + $0x7e] sm:$0x1]  ;;  %v7079_v13 = vrot.slane %v7057_v8, 6  ;;  %v7097_v1 = vld [vmem:[#allocation3 + $0x4f] sm:$0x1]  ;;  %v7118_v56 = vrot.slane %v7098_v46, 7  ;;  %6789 = vrot.lane.b32.xlu0 %v12217_v12, %s13314_s9 }
 0x293   :  { %v6997_v34 = vsel %vm284_vm4, %v6995_v4, %v6996_v38  ;;  %v7036_v30 = vsel %vm280_vm3, %v7034_v35, %v7035_v52  ;;  %v7077_v21 = vsel %vm219_vm1, %v7076_v26, %v7055_v42  ;;  %v12244_v17 = vld [vmem:[#allocation3 + $0x6f] sm:$0x1]  ;;  %5481 = vst.msk [vmem:[#allocation2 + $0x4] sm:$0xf] %vm781_vm14, %v5476_v14  ;;  %v13240_v6 = vrot.slane %v12239_v19, 5  ;;  %v12304_v12 = vld [vmem:[#allocation6] sm:$0xff] }
 0x294   :  { %v6999_v0 = vsel %vm223_vm5, %v6998_v24, %v6997_v34  ;;  %v7038_v45 = vsel %vm221_vm2, %v7037_v48, %v7036_v30  ;;  %v7078_v15 = vsel %vm280_vm3, %v7076_v26, %v7077_v21  ;;  %v12255_v25 = vld [vmem:[#allocation3 + $0x7f] sm:$0x1]  ;;  %v7119_v59 = vsel %vm219_vm1, %v7118_v56, %v7097_v1  ;;  %v5518_v16 = vpop.permute.xlu1 %5517  ;;  %v12314_v14 = vld [vmem:[#allocation6 + $0x90] sm:$0xff] }
 0x295   :  { %v7039_v41 = vsel %vm284_vm4, %v7037_v48, %v7038_v45  ;;  %v7080_v22 = vsel %vm221_vm2, %v7079_v13, %v7078_v15  ;;  %v12259_v61 = vsel %vm288_vm6, %v6868_v62, %v6869_v27  ;;  %v7121_v28 = vrot.slane %v12244_v17, 6  ;;  %5523 = vst.msk [vmem:[#allocation2 + $0x4] sm:$0xf] %vm824_vm0, %v5518_v16  ;;  %v5096_v53 = vpop.permute.xlu0 %5095  ;;  %v12325_v45 = vld [vmem:[#allocation6 + $0x120] sm:$0xff] }
 0x296   :  { %v7041_v18 = vsel %vm223_vm5, %v7040_v39, %v7039_v41  ;;  %v7081_v49 = vsel %vm284_vm4, %v7079_v13, %v7080_v22  ;;  %v12265_v4 = vsel %vm288_vm6, %v6910_v40, %v6911_v55  ;;  %v12268_v42 = vsel %vm288_vm6, %v6998_v24, %v6999_v0  ;;  %v12311_v13 = vld [vmem:[#allocation6 + $0x8] sm:$0xff]  ;;  %v12322_v55 = vld [vmem:[#allocation6 + $0x98] sm:$0xff]  ;;  %6831 = vrot.lane.b32.xlu0 %v12222_v23, %s13316_s11 }
 0x297   :  { %v7120_v8 = vsel %vm280_vm3, %v7118_v56, %v7119_v59  ;;  %v879_v10 = vrot.slane %v9336_v54, %v8531_v2  ;;  %v12277_v35 = vsel %vm288_vm6, %v7040_v39, %v7041_v18  ;;  %v13243_v48 = vrot.slane %v12255_v25, 5  ;;  %v12334_v59 = vld [vmem:[#allocation6 + $0x128] sm:$0xff] }
 0x298   :  { %v12273_v62 = vld [vmem:[#allocation2 + $0x8] sm:$0xff]  ;;  %v883_v40 = vrot.slane %v9336_v54, %v8534_v32  ;;  %v926_v24 = vrot.slane %v9336_v54, %v8542_v36  ;;  %vm13387_vm1 = vcmask 109568   ;;  %v12291_v46 = vsel %vm223_vm5, %v13240_v6, %v7081_v49  ;;  %v5560_v39 = vpop.permute.xlu1 %5559 }
 0x299   :  { %13386 = vst [vmem:[#allocation16_spill] sm:$0xff] %v12273_v62  ;;  %5016 = vst.msk [vmem:[#allocation2 + $0x8] sm:$0xf] %vm13387_vm1, %v12156_v58  ;;  %v899_v27 = vrot.slane %v879_v10, %v8531_v2  ;;  %v930_v11 = vrot.slane %v9336_v54, %v8545_v3  ;;  %v973_v50 = vrot.slane %v9336_v54, %v8548_v37  ;;  %vm13388_vm3 = vcmask 224368   ;;  %v5138_v56 = vpop.permute.xlu0 %5137 }
 0x29a   :  { %5058 = vst.msk [vmem:[#allocation2 + $0x8] sm:$0xf] %vm13388_vm3, %v5054_v60  ;;  %v12302_v58 = vsel %vm221_vm2, %v7121_v28, %v7120_v8  ;;  %v903_v26 = vrot.slane %v883_v40, %v8531_v2  ;;  %v946_v38 = vrot.slane %v926_v24, %v8542_v36  ;;  %v977_v52 = vrot.slane %v9336_v54, %v8558_v7  ;;  %vm13392_vm9 = vmmov %vm13387_vm1 }
 0x29b   :  { %vm13389_vm10 = vcmask 339168   ;;  %v912_v1 = vmul.f32 %v899_v27, %v12304_v12  ;;  %v950_v34 = vrot.slane %v930_v11, %v8542_v36  ;;  %v993_v30 = vrot.slane %v973_v50, %v8548_v37  ;;  %5565 = vst.msk [vmem:[#allocation2 + $0x4] sm:$0xf] %vm867_vm12, %v5560_v39  ;;  %v12346_v27 = vld [vmem:[#allocation6 + $0x1b8] sm:$0xff]  ;;  %6957 = vrot.lane.b32.xlu0 %v12225_v31, %s13322_s8  ;;  %vm13393_vm1 = vmmov %vm13388_vm3 }
 0x29c   :  { %5100 = vst.msk [vmem:[#allocation2 + $0x8] sm:$0xf] %vm13389_vm10, %v5096_v53  ;;  %v1020_v21 = vrot.slane %v9336_v54, %v8601_v43  ;;  %v913_v60 = vmul.f32 %v903_v26, %v12311_v13  ;;  %v959_v0 = vmul.f32 %v946_v38, %v12314_v14  ;;  %v997_v15 = vrot.slane %v977_v52, %v8548_v37  ;;  %v5794_v40 = vpop.permute.xlu1 %5793 }
 0x29d   :  { %v1024_v41 = vrot.slane %v9336_v54, %v8670_v63  ;;  %vm13390_vm2 = vcmask 453968   ;;  %v960_v22 = vmul.f32 %v950_v34, %v12322_v55  ;;  %v1006_v18 = vmul.f32 %v993_v30, %v12325_v45  ;;  %v12341_v54 = vld [vmem:[#allocation6 + $0x1b0] sm:$0xff]  ;;  %v5180_v38 = vpop.permute.xlu0 %5179 }
 0x29e   :  { %5142 = vst.msk [vmem:[#allocation2 + $0x8] sm:$0xf] %vm13390_vm2, %v5138_v56  ;;  %v1040_v49 = vrot.slane %v1020_v21, %v8601_v43  ;;  %v1664_v16 = vrot.slane %v10149_v29, %v8531_v2  ;;  %v963_v8 = vadd.f32 %v959_v0, %v912_v1  ;;  %v1007_v10 = vmul.f32 %v997_v15, %v12334_v59  ;;  %v12353_v1 = vld [vmem:[#allocation6 + $0x10] sm:$0xff]  ;;  %v12361_v56 = vld [vmem:[#allocation6 + $0x18] sm:$0xff] }
 0x29f   :  { %v1044_v53 = vrot.slane %v1024_v41, %v8601_v43  ;;  %v1668_v23 = vrot.slane %v10149_v29, %v8534_v32  ;;  %v964_v24 = vadd.f32 %v960_v22, %v913_v60  ;;  %v1711_v26 = vrot.slane %v10149_v29, %v8542_v36  ;;  %6873 = vrot.lane.b32.xlu0 %v12259_v61, %s13327_s12 }
 0x2a0   :  { %v1053_v11 = vmul.f32 %v1040_v49, %v12341_v54  ;;  %v1684_v50 = vrot.slane %v1664_v16, %v8531_v2  ;;  %v1010_v52 = vadd.f32 %v1006_v18, %v963_v8  ;;  %v1715_v30 = vrot.slane %v10149_v29, %v8545_v3  ;;  %v12368_v18 = vld [vmem:[#allocation6 + $0xa0] sm:$0xff]  ;;  %v5836_v8 = vpop.permute.xlu1 %5835 }
 0x2a1   :  { %v1054_v39 = vmul.f32 %v1044_v53, %v12346_v27  ;;  %v1688_v34 = vrot.slane %v1668_v23, %v8531_v2  ;;  %vm13391_vm7 = vcmask 568768   ;;  %v1011_v21 = vadd.f32 %v1007_v10, %v964_v24  ;;  %v12375_v53 = vld [vmem:[#allocation6 + $0xa8] sm:$0xff] }
 0x2a2   :  { %5184 = vst.msk [vmem:[#allocation2 + $0x8] sm:$0xf] %vm13391_vm7, %v5180_v38  ;;  %v1697_v60 = vmul.f32 %v1684_v50, %v12353_v1  ;;  %v1731_v0 = vrot.slane %v1711_v26, %v8542_v36  ;;  %v1758_v15 = vrot.slane %v10149_v29, %v8548_v37  ;;  %v1057_v41 = vadd.f32 %v1053_v11, %v1010_v52  ;;  %v12373_v16 = vld [vmem:[#allocation2] sm:$0xff]  ;;  %v5222_v50 = vpop.permute.xlu0 %5221 }
 0x2a3   :  { %v1698_v22 = vmul.f32 %v1688_v34, %v12361_v56  ;;  %v1735_v49 = vrot.slane %v1715_v30, %v8542_v36  ;;  %v1762_v31 = vrot.slane %v10149_v29, %v8558_v7  ;;  %v1058_v10 = vadd.f32 %v1054_v39, %v1011_v21  ;;  %5799 = vst.msk [vmem:[#allocation2] sm:$0xf] %vm13392_vm9, %v5794_v40  ;;  %v12383_v52 = vld [vmem:[#allocation6 + $0x130] sm:$0xff]  ;;  %v12396_v21 = vld [vmem:[#allocation6 + $0x138] sm:$0xff] }
 0x2a4   :  { %v1744_v23 = vmul.f32 %v1731_v0, %v12368_v18  ;;  %v1778_v24 = vrot.slane %v1758_v15, %v8548_v37  ;;  %v1805_v11 = vrot.slane %v10149_v29, %v8601_v43  ;;  %v1701_v26 = vadd.f32 %v1697_v60, %v1057_v41  ;;  %5841 = vst.msk [vmem:[#allocation2] sm:$0xf] %vm13393_vm1, %v5836_v8  ;;  %v12401_v41 = vld [vmem:[#allocation6 + $0x1c0] sm:$0xff]  ;;  %v5878_v17 = vpop.permute.xlu1 %5877 }
 0x2a5   :  { %v1745_v38 = vmul.f32 %v1735_v49, %v12375_v53  ;;  %v1782_v34 = vrot.slane %v1762_v31, %v8548_v37  ;;  %v1809_v39 = vrot.slane %v10149_v29, %v8670_v63  ;;  %vm13394_vm3 = vcmask 683568   ;;  %6915 = vrot.lane.b32.xlu0 %v12265_v4, %s13331_s14 }
 0x2a6   :  { %5226 = vst.msk [vmem:[#allocation2 + $0x8] sm:$0xf] %vm13394_vm3, %v5222_v50  ;;  %v7123_v40 = vsel %vm284_vm4, %v7121_v28, %v12302_v58  ;;  %v1702_v30 = vadd.f32 %v1698_v22, %v1058_v10  ;;  %v1791_v60 = vmul.f32 %v1778_v24, %v12383_v52  ;;  %v1825_v0 = vrot.slane %v1805_v11, %v8601_v43  ;;  %v12406_v28 = vld [vmem:[#allocation6 + $0x1c8] sm:$0xff]  ;;  %vm13395_vm4 = vmmov %vm13389_vm10  ;;  %v5264_v10 = vpop.permute.xlu0 %5263 }
 0x2a7   :  { %v1748_v29 = vadd.f32 %v1744_v23, %v1701_v26  ;;  %v1792_v15 = vmul.f32 %v1782_v34, %v12396_v21  ;;  %v1829_v49 = vrot.slane %v1809_v39, %v8601_v43  ;;  %v2449_v61 = vrot.slane %v10624_v51, %v8531_v2  ;;  %5883 = vst.msk [vmem:[#allocation2] sm:$0xf] %vm13395_vm4, %v5878_v17  ;;  %vm13403_vm1 = vmmov %vm13394_vm3 }
 0x2a8   :  { %v1749_v31 = vadd.f32 %v1745_v38, %v1702_v30  ;;  %v1838_v58 = vmul.f32 %v1825_v0, %v12401_v41  ;;  %v2453_v22 = vrot.slane %v10624_v51, %v8534_v32  ;;  %v2496_v8 = vrot.slane %v10624_v51, %v8542_v36  ;;  %v12421_v38 = vld [vmem:[#allocation6 + $0x20] sm:$0xff]  ;;  %v12427_v0 = vld [vmem:[#allocation6 + $0x28] sm:$0xff] }
 0x2a9   :  { %v1795_v23 = vadd.f32 %v1791_v60, %v1748_v29  ;;  %v1839_v24 = vmul.f32 %v1829_v49, %v12406_v28  ;;  %v2469_v11 = vrot.slane %v2449_v61, %v8531_v2  ;;  %v2500_v50 = vrot.slane %v10624_v51, %v8545_v3  ;;  %v12430_v49 = vld [vmem:[#allocation6 + $0xb0] sm:$0xff]  ;;  %7003 = vrot.lane.b32.xlu0 %v12268_v42, %s13335_s15 }
 0x2aa   :  { %vm13396_vm10 = vcmask 798368   ;;  %v1796_v26 = vadd.f32 %v1792_v15, %v1749_v31  ;;  %v2473_v34 = vrot.slane %v2453_v22, %v8531_v2  ;;  %v2516_v39 = vrot.slane %v2496_v8, %v8542_v36  ;;  %v5920_v15 = vpop.permute.xlu1 %5919  ;;  %v12436_v22 = vld [vmem:[#allocation6 + $0xb8] sm:$0xff] }
 0x2ab   :  { %5268 = vst.msk [vmem:[#allocation2 + $0x8] sm:$0xf] %vm13396_vm10, %v5264_v10  ;;  %v2543_v30 = vrot.slane %v10624_v51, %v8548_v37  ;;  %v1842_v60 = vadd.f32 %v1838_v58, %v1795_v23  ;;  %v2482_v29 = vmul.f32 %v2469_v11, %v12421_v38  ;;  %v2520_v61 = vrot.slane %v2500_v50, %v8542_v36  ;;  %v5390_v10 = vpop.permute.xlu0 %5389  ;;  %v12442_v50 = vld [vmem:[#allocation6 + $0x140] sm:$0xff] }
 0x2ac   :  { %v2547_v4 = vrot.slane %v10624_v51, %v8558_v7  ;;  %v1843_v17 = vadd.f32 %v1839_v24, %v1796_v26  ;;  %v2483_v31 = vmul.f32 %v2473_v34, %v12427_v0  ;;  %v2529_v8 = vmul.f32 %v2516_v39, %v12430_v49  ;;  %5925 = vst.msk [vmem:[#allocation2] sm:$0xf] %vm13390_vm2, %v5920_v15  ;;  %v12452_v39 = vld [vmem:[#allocation6 + $0x148] sm:$0xff] }
 0x2ad   :  { %v2563_v58 = vrot.slane %v2543_v30, %v8548_v37  ;;  %v2486_v23 = vadd.f32 %v2482_v29, %v1842_v60  ;;  %v2530_v11 = vmul.f32 %v2520_v61, %v12436_v22  ;;  %v2590_v24 = vrot.slane %v10624_v51, %v8601_v43  ;;  %7045 = vrot.lane.b32.xlu0 %v12277_v35, %s13337_s7 }
 0x2ae   :  { %v2567_v6 = vrot.slane %v2547_v4, %v8548_v37  ;;  %v7125_v26 = vsel %vm223_vm5, %v13243_v48, %v7123_v40  ;;  %v2487_v34 = vadd.f32 %v2483_v31, %v1843_v17  ;;  %v2594_v60 = vrot.slane %v10624_v51, %v8670_v63  ;;  %v5962_v62 = vpop.permute.xlu1 %5961  ;;  %v12461_v40 = vld [vmem:[#allocation6 + $0x1d0] sm:$0xff]  ;;  %vm13397_vm5 = vmmov %vm13391_vm7 }
 0x2af   :  { %v2576_v30 = vmul.f32 %v2563_v58, %v12442_v50  ;;  %v2533_v29 = vadd.f32 %v2529_v8, %v2486_v23  ;;  %v2610_v4 = vrot.slane %v2590_v24, %v8601_v43  ;;  %v3229_v42 = vrot.slane %v11090_v44, %v8531_v2  ;;  %5967 = vst.msk [vmem:[#allocation2] sm:$0xf] %vm13397_vm5, %v5962_v62  ;;  %v5306_v51 = vpop.permute.xlu0 %5305  ;;  %v12477_v62 = vld [vmem:[#allocation6 + $0x30] sm:$0xff] }
 0x2b0   :  { %v2577_v61 = vmul.f32 %v2567_v6, %v12452_v39  ;;  %v5392_v15 = vrot.slane %v5390_v10, 4  ;;  %v2534_v47 = vadd.f32 %v2530_v11, %v2487_v34  ;;  %v2614_v17 = vrot.slane %v2594_v60, %v8601_v43  ;;  %v12467_v6 = vld [vmem:[#allocation6 + $0x1d8] sm:$0xff]  ;;  %13400 = vst [vmem:[#allocation18_spill] sm:$0xff] %v12477_v62 }
 0x2b1   :  { %v3233_v31 = vrot.slane %v11090_v44, %v8534_v32  ;;  %v2580_v8 = vadd.f32 %v2576_v30, %v2533_v29  ;;  %13398 = vst [vmem:[#allocation17_spill] sm:$0xff] %v12467_v6  ;;  %v2623_v58 = vmul.f32 %v2610_v4, %v12461_v40  ;;  %v3249_v23 = vrot.slane %v3229_v42, %v8531_v2  ;;  %v12486_v42 = vld [vmem:[#allocation6 + $0x38] sm:$0xff] }
 0x2b2   :  { %v3276_v11 = vrot.slane %v11090_v44, %v8542_v36  ;;  %vm13399_vm7 = vcmask 913168   ;;  %v2581_v24 = vadd.f32 %v2577_v61, %v2534_v47  ;;  %v2624_v34 = vmul.f32 %v2614_v17, %v12467_v6  ;;  %v6004_v61 = vpop.permute.xlu1 %6003  ;;  %v12501_v6 = vld [vmem:[#allocation6 + $0xc0] sm:$0xff] }
 0x2b3   :  { %5310 = vst.msk [vmem:[#allocation2 + $0x8] sm:$0xf] %vm13399_vm7, %v5306_v51  ;;  %v3253_v30 = vrot.slane %v3233_v31, %v8531_v2  ;;  %v3280_v60 = vrot.slane %v11090_v44, %v8545_v3  ;;  %v13401_v29 = vrot.slane %v12239_v19, 5  ;;  %v3262_v51 = vmul.f32 %v3249_v23, %v12477_v62  ;;  %vm13413_vm3 = vmmov %vm13399_vm7 }
 0x2b4   :  { %v3296_v47 = vrot.slane %v3276_v11, %v8542_v36  ;;  %v3323_v35 = vrot.slane %v11090_v44, %v8548_v37  ;;  %v2627_v17 = vadd.f32 %v2623_v58, %v2580_v8  ;;  %v3327_v19 = vrot.slane %v11090_v44, %v8558_v7  ;;  %6009 = vst.msk [vmem:[#allocation2] sm:$0xf] %vm13403_vm1, %v6004_v61  ;;  %v12505_v58 = vld [vmem:[#allocation6 + $0xc8] sm:$0xff] }
 0x2b5   :  { %v7084_v4 = vsel %vm288_vm6, %v13401_v29, %v12291_v46  ;;  %v3263_v31 = vmul.f32 %v3253_v30, %v12486_v42  ;;  %v3300_v48 = vrot.slane %v3280_v60, %v8542_v36  ;;  %vm13402_vm9 = vcmask 1031168   ;;  %v5348_v29 = vpop.permute.xlu0 %5347  ;;  %13405 = vst [vmem:[#allocation19_spill] sm:$0xff] %v12505_v58 }
 0x2b6   :  { %v5394_v46 = vsel %vm13402_vm9, %v5392_v15, %v5390_v10  ;;  %v13404_v23 = vrot.slane %v12255_v25, 5  ;;  %v2628_v62 = vadd.f32 %v2624_v34, %v2581_v24  ;;  %5352 = vst.msk [vmem:[#allocation2 + $0x8] sm:$0xf] %vm645_vm8, %v5348_v29  ;;  %7087 = vrot.lane.b32.xlu0 %v7084_v4, %s7584_s13  ;;  %v3266_v8 = vadd.f32 %v3262_v51, %v2627_v17  ;;  %v6046_v60 = vpop.permute.xlu1 %6045 }
 0x2b7   :  { %v3309_v30 = vmul.f32 %v3296_v47, %v12501_v6  ;;  %v3343_v10 = vrot.slane %v3323_v35, %v8548_v37  ;;  %v3370_v15 = vrot.slane %v11090_v44, %v8601_v43  ;;  %5398 = vst.msk [vmem:[#allocation2 + $0x8] sm:$0xff] %vm9063_vm15, %v5394_v46  ;;  %v3347_v24 = vrot.slane %v3327_v19, %v8548_v37  ;;  %v12520_v47 = vld [vmem:[#allocation6 + $0x150] sm:$0xff] }
 0x2b8   :  { %v7126_v11 = vsel %vm288_vm6, %v13404_v23, %v7125_v26  ;;  %v3267_v25 = vadd.f32 %v3263_v31, %v2628_v62  ;;  %v3310_v26 = vmul.f32 %v3300_v48, %v12505_v58  ;;  %v3374_v34 = vrot.slane %v11090_v44, %v8670_v63  ;;  %vm13406_vm6 = vmmov %vm13396_vm10  ;;  %13407 = vst [vmem:[#allocation20_spill] sm:$0xff] %v12520_v47  ;;  %v12527_v44 = vld [vmem:[#allocation6 + $0x158] sm:$0xff] }
 0x2b9   :  { %v4013_v4 = vrot.slane %v11555_v57, %v8531_v2  ;;  %6051 = vst.msk [vmem:[#allocation2] sm:$0xf] %vm13406_vm6, %v6046_v60  ;;  %v5436_v51 = vpop.permute.xlu0 %5435  ;;  %v4017_v35 = vrot.slane %v11555_v57, %v8534_v32  ;;  %v3313_v48 = vadd.f32 %v3309_v30, %v3266_v8  ;;  %13408 = vst [vmem:[#allocation21_spill] sm:$0xff] %v12527_v44  ;;  %v12538_v8 = vld [vmem:[#allocation6 + $0x40] sm:$0xff]  ;;  %vm13416_vm4 = vcmask 1022976  }
 0x2ba   :  { %5440 = vst.msk [vmem:[#allocation2 + $0xc] sm:$0xf] %vm738_vm11, %v5436_v51  ;;  %7129 = vrot.lane.b32.xlu0 %v7126_v11, %s7585_s0  ;;  %v3356_v62 = vmul.f32 %v3343_v10, %v12520_v47  ;;  %v3390_v61 = vrot.slane %v3370_v15, %v8601_v43  ;;  %v3314_v17 = vadd.f32 %v3310_v26, %v3267_v25  ;;  %v6172_v46 = vpop.permute.xlu1 %6171  ;;  %v12536_v11 = vld [vmem:[#allocation6 + $0x1e0] sm:$0xff]  ;;  %13410 = vst [vmem:[#allocation23_spill] sm:$0xff] %v12538_v8  ;;  %v12544_v25 = vld [vmem:[#allocation6 + $0x1e8] sm:$0xff]  ;;  %vm13424_vm2 = vcmask 109568  }
 0x2bb   :  { %v3357_v31 = vmul.f32 %v3347_v24, %v12527_v44  ;;  %v3394_v19 = vrot.slane %v3374_v34, %v8601_v43  ;;  %v4033_v29 = vrot.slane %v4013_v4, %v8531_v2  ;;  %v4060_v23 = vrot.slane %v11555_v57, %v8542_v36  ;;  %13409 = vst [vmem:[#allocation22_spill] sm:$0xff] %v12536_v11  ;;  %v12547_v24 = vld [vmem:[#allocation6 + $0x48] sm:$0xff] }
 0x2bc   :  { %v4037_v30 = vrot.slane %v4017_v35, %v8531_v2  ;;  %v4064_v10 = vrot.slane %v11555_v57, %v8545_v3  ;;  %v3360_v15 = vadd.f32 %v3356_v62, %v3313_v48  ;;  %13411 = vst [vmem:[#allocation24_spill] sm:$0xff] %v12544_v25  ;;  %v3403_v26 = vmul.f32 %v3390_v61, %v12536_v11  ;;  %v12556_v61 = vld [vmem:[#allocation6 + $0xd0] sm:$0xff] }
 0x2bd   :  { %v5478_v60 = vpop.permute.xlu0 %5477  ;;  %13412 = vst [vmem:[#allocation25_spill] sm:$0xff] %v12547_v24  ;;  %v6175_v34 = vrot.slane %v6172_v46, 4  ;;  %v3361_v4 = vadd.f32 %v3357_v31, %v3314_v17  ;;  %v3404_v51 = vmul.f32 %v3394_v19, %v12544_v25  ;;  %v4046_v47 = vmul.f32 %v4033_v29, %v12538_v8  ;;  %13414 = vst [vmem:[#allocation26_spill] sm:$0xff] %v12556_v61  ;;  %v12562_v19 = vld [vmem:[#allocation6 + $0xd8] sm:$0xff]  ;;  %v7467_v8 = vpop.eup %7466 }
 0x2be   :  { %5482 = vst.msk [vmem:[#allocation2 + $0xc] sm:$0xf] %vm781_vm14, %v5478_v60  ;;  %v6088_v44 = vpop.permute.xlu1 %6087  ;;  %v4080_v35 = vrot.slane %v4060_v23, %v8542_v36  ;;  %v4107_v58 = vrot.slane %v11555_v57, %v8548_v37  ;;  %v4047_v62 = vmul.f32 %v4037_v30, %v12547_v24  ;;  %v4084_v60 = vrot.slane %v4064_v10, %v8542_v36 }
 0x2bf   :  { %6093 = vst.msk [vmem:[#allocation2] sm:$0xf] %vm13413_vm3, %v6088_v44  ;;  %v4111_v17 = vrot.slane %v11555_v57, %v8558_v7  ;;  %v3407_v31 = vadd.f32 %v3403_v26, %v3360_v15  ;;  %13415 = vst [vmem:[#allocation27_spill] sm:$0xff] %v12562_v19  ;;  %v6177_v29 = vsel %vm13416_vm4, %v6175_v34, %v6172_v46  ;;  %v12571_v26 = vld [vmem:[#allocation6 + $0x160] sm:$0xff]  ;;  %vm255_vm10 = vcmp.eq.f32.partialorder %v11697_v20, inf }
 0x2c0   :  { %v3408_v23 = vadd.f32 %v3404_v51, %v3361_v4  ;;  %v4093_v30 = vmul.f32 %v4080_v35, %v12556_v61  ;;  %v4127_v24 = vrot.slane %v4107_v58, %v8548_v37  ;;  %v4154_v10 = vrot.slane %v11555_v57, %v8601_v43  ;;  %13417 = vst [vmem:[#allocation28_spill] sm:$0xff] %v12571_v26  ;;  %v12579_v58 = vld [vmem:[#allocation6 + $0x168] sm:$0xff]  ;;  %vm13436_vm3 = vmmov %vm13424_vm2 }
 0x2c1   :  { %v5520_v48 = vpop.permute.xlu0 %5519  ;;  %v4050_v25 = vadd.f32 %v4046_v47, %v3407_v31  ;;  %v4094_v15 = vmul.f32 %v4084_v60, %v12562_v19  ;;  %v4131_v46 = vrot.slane %v4111_v17, %v8548_v37  ;;  %v4158_v47 = vrot.slane %v11555_v57, %v8670_v63  ;;  %13418 = vst [vmem:[#allocation29_spill] sm:$0xff] %v12579_v58  ;;  %v12610_v19 = vld [vmem:[#allocation6 + $0x58] sm:$0xff] }
 0x2c2   :  { %5524 = vst.msk [vmem:[#allocation2 + $0xc] sm:$0xf] %vm824_vm0, %v5520_v48  ;;  %v6130_v44 = vpop.permute.xlu1 %6129  ;;  %v4051_v48 = vadd.f32 %v4047_v62, %v3408_v23  ;;  %v4797_v34 = vrot.slane %v12004_v9, %v8531_v2  ;;  %v254_v4 = vmul.f32 %v7467_v8, %v11697_v20  ;;  %v4140_v62 = vmul.f32 %v4127_v24, %v12571_v26 }
 0x2c3   :  { %6135 = vst.msk [vmem:[#allocation2] sm:$0xf] %vm645_vm8, %v6130_v44  ;;  %v4097_v35 = vadd.f32 %v4093_v30, %v4050_v25  ;;  %v4174_v60 = vrot.slane %v4154_v10, %v8601_v43  ;;  %v4801_v57 = vrot.slane %v12004_v9, %v8534_v32  ;;  %v4141_v31 = vmul.f32 %v4131_v46, %v12579_v58  ;;  %v12595_v25 = vld [vmem:[#allocation6 + $0x1f8] sm:$0xff]  ;;  %v12601_v30 = vld [vmem:[#allocation6 + $0x50] sm:$0xff] }
 0x2c4   :  { %6181 = vst.msk [vmem:[#allocation2] sm:$0xff] %vm9063_vm15, %v6177_v29  ;;  %v12590_v29 = vld [vmem:[#allocation6 + $0x1f0] sm:$0xff]  ;;  %v4178_v23 = vrot.slane %v4158_v47, %v8601_v43  ;;  %v4844_v8 = vrot.slane %v12004_v9, %v8542_v36  ;;  %13420 = vst [vmem:[#allocation31_spill] sm:$0xff] %v12595_v25  ;;  %v4817_v24 = vrot.slane %v4797_v34, %v8531_v2  ;;  %vm257_vm5 = vcmp.eq.f32.partialorder %v11697_v20, 0.0 }
 0x2c5   :  { %v5562_v11 = vpop.permute.xlu0 %5561  ;;  %13419 = vst [vmem:[#allocation30_spill] sm:$0xff] %v12590_v29  ;;  %v4848_v44 = vrot.slane %v12004_v9, %v8545_v3  ;;  %13421 = vst [vmem:[#allocation32_spill] sm:$0xff] %v12601_v30  ;;  %v256_v10 = vsel %vm255_vm10, %v11697_v20, %v254_v4  ;;  %v4187_v46 = vmul.f32 %v4174_v60, %v12590_v29  ;;  %v12618_v60 = vld [vmem:[#allocation6 + $0xe0] sm:$0xff]  ;;  %vm13427_vm7 = vcmask 224368  }
 0x2c6   :  { %5566 = vst.msk [vmem:[#allocation2 + $0xc] sm:$0xf] %vm867_vm12, %v5562_v11  ;;  %v6218_v51 = vpop.permute.xlu1 %6217  ;;  %v4098_v11 = vadd.f32 %v4094_v15, %v4051_v48  ;;  %v4144_v15 = vadd.f32 %v4140_v62, %v4097_v35  ;;  %v4821_v47 = vrot.slane %v4801_v57, %v8531_v2  ;;  %v4188_v26 = vmul.f32 %v4178_v23, %v12595_v25  ;;  %v12625_v23 = vld [vmem:[#allocation6 + $0xe8] sm:$0xff]  ;;  %vm13437_vm4 = vmmov %vm13427_vm7 }
 0x2c7   :  { %6223 = vst.msk [vmem:[#allocation2 + $0x4] sm:$0xf] %vm738_vm11, %v6218_v51  ;;  %13423 = vst [vmem:[#allocation34_spill] sm:$0xff] %v12610_v19  ;;  %v4864_v61 = vrot.slane %v4844_v8, %v8542_v36  ;;  %v4891_v4 = vrot.slane %v12004_v9, %v8548_v37  ;;  %v258_v35 = vand.u32 2147483648, %v11697_v20  ;;  %v4830_v62 = vmul.f32 %v4817_v24, %v12601_v30 }
 0x2c8   :  { %v4145_v58 = vadd.f32 %v4141_v31, %v4098_v11  ;;  %13425 = vst [vmem:[#allocation35_spill] sm:$0xff] %v12618_v60  ;;  %v4868_v57 = vrot.slane %v4848_v44, %v8542_v36  ;;  %v13426_v11 = vld [vmem:[#allocation12_spill] sm:$0xff]  ;;  %v4895_v8 = vrot.slane %v12004_v9, %v8558_v7  ;;  %v4191_v24 = vadd.f32 %v4187_v46, %v4144_v15 }
 0x2c9   :  { %v5796_v17 = vpop.permute.xlu0 %5795  ;;  %v887_v31 = vrot.slane %v13426_v11, %v8531_v2  ;;  %13428 = vst [vmem:[#allocation12_spill] sm:$0xff] %v12625_v23  ;;  %v4877_v25 = vmul.f32 %v4864_v61, %v12618_v60  ;;  %v4911_v20 = vrot.slane %v4891_v4, %v8548_v37  ;;  %vm13430_vm9 = vcmask 339168  }
 0x2ca   :  { %v6260_v48 = vpop.permute.xlu1 %6259  ;;  %v4192_v30 = vadd.f32 %v4188_v26, %v4145_v58  ;;  %v4834_v29 = vadd.f32 %v4830_v62, %v4191_v24  ;;  %v934_v46 = vrot.slane %v13426_v11, %v8542_v36  ;;  %v4915_v26 = vrot.slane %v4895_v8, %v8548_v37  ;;  %v12656_v24 = vld [vmem:[#allocation6 + $0x178] sm:$0xff] }
 0x2cb   :  { %6265 = vst.msk [vmem:[#allocation2 + $0x4] sm:$0xf] %vm781_vm14, %v6260_v48  ;;  %v12629_v48 = vsel %vm257_vm5, %v258_v35, %v256_v10  ;;  %v4878_v10 = vmul.f32 %v4868_v57, %v12625_v23  ;;  %v12639_v35 = vld [vmem:[#allocation6 + $0x170] sm:$0xff]  ;;  %v907_v15 = vrot.slane %v887_v31, %v8531_v2  ;;  %v938_v58 = vrot.slane %v13426_v11, %v8545_v3 }
 0x2cc   :  { %13429 = vst [vmem:[#allocation36_spill] sm:$0xff] %v12629_v48  ;;  %13431 = vst [vmem:[#allocation37_spill] sm:$0xff] %v12639_v35  ;;  %v4938_v57 = vrot.slane %v12004_v9, %v8601_v43  ;;  %v954_v31 = vrot.slane %v934_v46, %v8542_v36  ;;  %vm13433_vm1 = vcmask 453968   ;;  %v4881_v46 = vadd.f32 %v4877_v25, %v4834_v29 }
 0x2cd   :  { %v12606_v51 = vld [vmem:[#allocation2 + $0x8] sm:$0xff]  ;;  %v5838_v34 = vpop.permute.xlu0 %5837  ;;  %13432 = vst [vmem:[#allocation38_spill] sm:$0xff] %v12656_v24  ;;  %v5577_v23 = vrot.slane %v12373_v16, %v8531_v2  ;;  %v4925_v29 = vmul.f32 %v4915_v26, %v12656_v24  ;;  %vm13435_vm6 = vcmask 568768   ;;  %vm13438_vm10 = vcmask 683568  }
 0x2ce   :  { %13422 = vst [vmem:[#allocation33_spill] sm:$0xff] %v12606_v51  ;;  %5800 = vst.msk [vmem:[#allocation2 + $0x8] sm:$0xf] %vm13424_vm2, %v5796_v17  ;;  %v6302_v17 = vpop.permute.xlu1 %6301  ;;  %v4831_v51 = vmul.f32 %v4821_v47, %v12610_v19  ;;  %v981_v47 = vrot.slane %v13426_v11, %v8548_v37  ;;  %v961_v60 = vmul.f32 %v954_v31, %v12314_v14  ;;  %v12679_v31 = vld [vmem:[#allocation6 + $0x200] sm:$0xff]  ;;  %vm13440_vm5 = vcmask 798368  }
 0x2cf   :  { %5842 = vst.msk [vmem:[#allocation2 + $0x8] sm:$0xf] %vm13427_vm7, %v5838_v34  ;;  %v891_v34 = vrot.slane %v13426_v11, %v8534_v32  ;;  %v4958_v25 = vrot.slane %v4938_v57, %v8601_v43  ;;  %v5597_v24 = vrot.slane %v5577_v23, %v8531_v2  ;;  %vm13439_vm2 = vmmov %vm13430_vm9 }
 0x2d0   :  { %6307 = vst.msk [vmem:[#allocation2 + $0x4] sm:$0xf] %vm824_vm0, %v6302_v17  ;;  %v4835_v62 = vadd.f32 %v4831_v51, %v4192_v30  ;;  %v985_v17 = vrot.slane %v13426_v11, %v8558_v7  ;;  %v914_v30 = vmul.f32 %v907_v15, %v12304_v12  ;;  %v958_v51 = vrot.slane %v938_v58, %v8542_v36  ;;  %v13434_v12 = vld [vmem:[#allocation13_spill] sm:$0xff]  ;;  %vm13441_vm7 = vmmov %vm13433_vm1 }
 0x2d1   :  { %v5880_v44 = vpop.permute.xlu0 %5879  ;;  %v911_v61 = vrot.slane %v891_v34, %v8531_v2  ;;  %v4942_v34 = vrot.slane %v12004_v9, %v8670_v63  ;;  %v1028_v9 = vrot.slane %v13426_v11, %v8601_v43  ;;  %v1672_v15 = vrot.slane %v13434_v12, %v8531_v2 }
 0x2d2   :  { %5884 = vst.msk [vmem:[#allocation2 + $0x8] sm:$0xf] %vm13430_vm9, %v5880_v44  ;;  %v6344_v4 = vpop.permute.xlu1 %6343  ;;  %v4924_v44 = vmul.f32 %v4911_v20, %v12639_v35  ;;  %v962_v19 = vmul.f32 %v958_v51, %v12322_v55  ;;  %v1001_v20 = vrot.slane %v981_v47, %v8548_v37  ;;  %v1005_v14 = vrot.slane %v985_v17, %v8548_v37 }
 0x2d3   :  { %6349 = vst.msk [vmem:[#allocation2 + $0x4] sm:$0xf] %vm867_vm12, %v6344_v4  ;;  %v915_v4 = vmul.f32 %v911_v61, %v12311_v13  ;;  %v5581_v13 = vrot.slane %v12373_v16, %v8534_v32  ;;  %v4882_v55 = vadd.f32 %v4878_v10, %v4835_v62  ;;  %v965_v47 = vadd.f32 %v961_v60, %v914_v30  ;;  %v12690_v10 = vld [vmem:[#allocation6 + $0x208] sm:$0xff]  ;;  %v12692_v62 = vld [vmem:[#allocation6 + $0x60] sm:$0xff] }
 0x2d4   :  { %v1676_v51 = vrot.slane %v13434_v12, %v8534_v32  ;;  %v4928_v26 = vadd.f32 %v4924_v44, %v4881_v46  ;;  %v4962_v57 = vrot.slane %v4942_v34, %v8601_v43  ;;  %v5624_v17 = vrot.slane %v12373_v16, %v8542_v36 }
 0x2d5   :  { %v5922_v8 = vpop.permute.xlu0 %5921  ;;  %v966_v60 = vadd.f32 %v962_v19, %v915_v4  ;;  %v1048_v30 = vrot.slane %v1028_v9, %v8601_v43  ;;  %v1692_v35 = vrot.slane %v1672_v15, %v8531_v2  ;;  %v4971_v34 = vmul.f32 %v4958_v25, %v12679_v31 }
 0x2d6   :  { %5926 = vst.msk [vmem:[#allocation2 + $0x8] sm:$0xf] %vm13433_vm1, %v5922_v8  ;;  %v6578_v58 = vpop.permute.xlu1 %6577  ;;  %v1032_v8 = vrot.slane %v13426_v11, %v8670_v63  ;;  %v1008_v11 = vmul.f32 %v1001_v20, %v12325_v45  ;;  %v5601_v23 = vrot.slane %v5581_v13, %v8531_v2  ;;  %v1009_v46 = vmul.f32 %v1005_v14, %v12334_v59  ;;  %v12715_v13 = vld [vmem:[#allocation6 + $0x68] sm:$0xff]  ;;  %vm13444_vm1 = vmmov %vm13435_vm6 }
 0x2d7   :  { %v1719_v48 = vrot.slane %v13434_v12, %v8542_v36  ;;  %v1696_v20 = vrot.slane %v1676_v51, %v8531_v2  ;;  %v1723_v9 = vrot.slane %v13434_v12, %v8545_v3  ;;  %v4929_v15 = vadd.f32 %v4925_v29, %v4882_v55 }
 0x2d8   :  { %v1012_v45 = vadd.f32 %v1008_v11, %v965_v47  ;;  %v1052_v4 = vrot.slane %v1032_v8, %v8601_v43  ;;  %v4972_v59 = vmul.f32 %v4962_v57, %v12690_v10  ;;  %v5610_v25 = vmul.f32 %v5597_v24, %v12692_v62 }
 0x2d9   :  { %v5964_v61 = vpop.permute.xlu0 %5963  ;;  %v5644_v14 = vrot.slane %v5624_v17, %v8542_v36  ;;  %v1013_v47 = vadd.f32 %v1009_v46, %v966_v60  ;;  %v1055_v8 = vmul.f32 %v1048_v30, %v12341_v54  ;;  %v1699_v51 = vmul.f32 %v1692_v35, %v12353_v1 }
 0x2da   :  { %5968 = vst.msk [vmem:[#allocation2 + $0x8] sm:$0xf] %vm13435_vm6, %v5964_v61  ;;  %v12697_v61 = vld [vmem:[#allocation2] sm:$0xff]  ;;  %v6620_v44 = vpop.permute.xlu1 %6619  ;;  %v1739_v29 = vrot.slane %v1719_v48, %v8542_v36  ;;  %v1766_v24 = vrot.slane %v13434_v12, %v8548_v37  ;;  %v1770_v55 = vrot.slane %v13434_v12, %v8558_v7  ;;  %v1056_v17 = vmul.f32 %v1052_v4, %v12346_v27 }
 0x2db   :  { %6583 = vst.msk [vmem:[#allocation2] sm:$0xf] %vm13436_vm3, %v6578_v58  ;;  %v5628_v58 = vrot.slane %v12373_v16, %v8545_v3  ;;  %v1059_v54 = vadd.f32 %v1055_v8, %v1012_v45  ;;  %v1700_v1 = vmul.f32 %v1696_v20, %v12361_v56  ;;  %v1743_v35 = vrot.slane %v1723_v9, %v8542_v36  ;;  %vm13446_vm3 = vmmov %vm13438_vm10 }
 0x2dc   :  { %6625 = vst.msk [vmem:[#allocation2] sm:$0xf] %vm13437_vm4, %v6620_v44  ;;  %v4975_v44 = vadd.f32 %v4971_v34, %v4928_v26  ;;  %v4976_v26 = vadd.f32 %v4972_v59, %v4929_v15  ;;  %v5611_v48 = vmul.f32 %v5601_v23, %v12715_v13  ;;  %v5671_v30 = vrot.slane %v12373_v16, %v8548_v37  ;;  %v12736_v34 = vld [vmem:[#allocation6 + $0xf8] sm:$0xff]  ;;  %vm13447_vm4 = vmmov %vm13440_vm5 }
 0x2dd   :  { %v6006_v19 = vpop.permute.xlu0 %6005  ;;  %v5648_v60 = vrot.slane %v5628_v58, %v8542_v36  ;;  %v5675_v27 = vrot.slane %v12373_v16, %v8558_v7  ;;  %v1060_v56 = vadd.f32 %v1056_v17, %v1013_v47  ;;  %v1703_v45 = vadd.f32 %v1699_v51, %v1059_v54 }
 0x2de   :  { %6010 = vst.msk [vmem:[#allocation2 + $0x8] sm:$0xf] %vm13438_vm10, %v6006_v19  ;;  %v6662_v11 = vpop.permute.xlu1 %6661  ;;  %v12720_v19 = vld [vmem:[#allocation6 + $0xf0] sm:$0xff]  ;;  %v5718_v20 = vrot.slane %v12373_v16, %v8601_v43  ;;  %v1746_v23 = vmul.f32 %v1739_v29, %v12368_v18  ;;  %v1786_v9 = vrot.slane %v1766_v24, %v8548_v37  ;;  %v1790_v15 = vrot.slane %v1770_v55, %v8548_v37 }
 0x2df   :  { %6667 = vst.msk [vmem:[#allocation2] sm:$0xf] %vm13439_vm2, %v6662_v11  ;;  %v12739_v46 = vmul.f32 %v5644_v14, %v12720_v19  ;;  %v12749_v58 = vadd.f32 %v5610_v25, %v4975_v44  ;;  %v1704_v14 = vadd.f32 %v1700_v1, %v1060_v56  ;;  %v1747_v8 = vmul.f32 %v1743_v35, %v12375_v53  ;;  %v13442_v1 = vld [vmem:[#allocation14_spill] sm:$0xff] }
 0x2e0   :  { %v1813_v47 = vrot.slane %v13434_v12, %v8601_v43  ;;  %v12755_v11 = vmul.f32 %v5648_v60, %v12736_v34  ;;  %v1750_v18 = vadd.f32 %v1746_v23, %v1703_v45  ;;  %v1793_v29 = vmul.f32 %v1786_v9, %v12383_v52 }
 0x2e1   :  { %v6048_v57 = vpop.permute.xlu0 %6047  ;;  %v12759_v24 = vrot.slane %v5671_v30, %v8548_v37  ;;  %v1751_v55 = vadd.f32 %v1747_v8, %v1704_v14  ;;  %v1794_v25 = vmul.f32 %v1790_v15, %v12396_v21  ;;  %v1817_v44 = vrot.slane %v13434_v12, %v8670_v63 }
 0x2e2   :  { %6052 = vst.msk [vmem:[#allocation2 + $0x8] sm:$0xf] %vm13440_vm5, %v6048_v57  ;;  %v6704_v4 = vpop.permute.xlu1 %6703  ;;  %v5722_v57 = vrot.slane %v12373_v16, %v8670_v63  ;;  %v1797_v17 = vadd.f32 %v1793_v29, %v1750_v18  ;;  %v1833_v54 = vrot.slane %v1813_v47, %v8601_v43  ;;  %v2457_v35 = vrot.slane %v13442_v1, %v8531_v2 }
 0x2e3   :  { %6709 = vst.msk [vmem:[#allocation2] sm:$0xf] %vm13441_vm7, %v6704_v4  ;;  %vm13443_vm9 = vcmask 1022976   ;;  %v12771_v30 = vadd.f32 %v5611_v48, %v4976_v26  ;;  %v1798_v21 = vadd.f32 %v1794_v25, %v1751_v55  ;;  %v1837_v12 = vrot.slane %v1817_v44, %v8601_v43 }
 0x2e4   :  { %vm13445_vm6 = vcmask 913168   ;;  %v1840_v56 = vmul.f32 %v1833_v54, %v12401_v41  ;;  %v2461_v45 = vrot.slane %v13442_v1, %v8534_v32  ;;  %v2477_v4 = vrot.slane %v2457_v35, %v8531_v2 }
 0x2e5   :  { %v6174_v59 = vpop.permute.xlu0 %6173  ;;  %v2504_v23 = vrot.slane %v13442_v1, %v8542_v36  ;;  %v1841_v9 = vmul.f32 %v1837_v12, %v12406_v28  ;;  %v2508_v26 = vrot.slane %v13442_v1, %v8545_v3  ;;  %v2551_v48 = vrot.slane %v13442_v1, %v8548_v37  ;;  %vm13450_vm10 = vmmov %vm13445_vm6 }
 0x2e6   :  { %v6176_v51 = vrot.slane %v6174_v59, 4  ;;  %v6746_v53 = vpop.permute.xlu1 %6745  ;;  %v2555_v15 = vrot.slane %v13442_v1, %v8558_v7  ;;  %v2481_v14 = vrot.slane %v2461_v45, %v8531_v2  ;;  %v2484_v8 = vmul.f32 %v2477_v4, %v12421_v38 }
 0x2e7   :  { %6751 = vst.msk [vmem:[#allocation2] sm:$0xf] %vm13444_vm1, %v6746_v53  ;;  %v2524_v47 = vrot.slane %v2504_v23, %v8542_v36  ;;  %v2528_v18 = vrot.slane %v2508_v26, %v8542_v36  ;;  %v2571_v29 = vrot.slane %v2551_v48, %v8548_v37  ;;  %v2598_v38 = vrot.slane %v13442_v1, %v8601_v43 }
 0x2e8   :  { %v6178_v52 = vsel %vm13443_vm9, %v6176_v51, %v6174_v59  ;;  %v1844_v59 = vadd.f32 %v1840_v56, %v1797_v17  ;;  %v1845_v51 = vadd.f32 %v1841_v9, %v1798_v21  ;;  %v2575_v55 = vrot.slane %v2555_v15, %v8548_v37 }
 0x2e9   :  { %v6090_v60 = vpop.permute.xlu0 %6089  ;;  %v2485_v25 = vmul.f32 %v2481_v14, %v12427_v0  ;;  %v2531_v53 = vmul.f32 %v2524_v47, %v12430_v49  ;;  %v5695_v17 = vrot.slane %v5675_v27, %v8548_v37  ;;  %v2532_v54 = vmul.f32 %v2528_v18, %v12436_v22  ;;  %v12807_v0 = vld [vmem:[#allocation6 + $0x180] sm:$0xff] }
 0x2ea   :  { %6094 = vst.msk [vmem:[#allocation2 + $0x8] sm:$0xf] %vm13445_vm6, %v6090_v60  ;;  %v6788_v41 = vpop.permute.xlu1 %6787  ;;  %v2488_v44 = vadd.f32 %v2484_v8, %v1844_v59  ;;  %v2578_v35 = vmul.f32 %v2571_v29, %v12442_v50  ;;  %v2602_v60 = vrot.slane %v13442_v1, %v8670_v63  ;;  %v2618_v56 = vrot.slane %v2598_v38, %v8601_v43  ;;  %v12832_v8 = vld [vmem:[#allocation6 + $0x188] sm:$0xff]  ;;  %vm13480_vm6 = vmmov %vm13446_vm3 }
 0x2eb   :  { %6793 = vst.msk [vmem:[#allocation2] sm:$0xf] %vm13446_vm3, %v6788_v41  ;;  %v2489_v12 = vadd.f32 %v2485_v25, %v1845_v51  ;;  %v3237_v45 = vrot.slane %v11001_v33, %v8531_v2  ;;  %v3241_v50 = vrot.slane %v11001_v33, %v8534_v32  ;;  %v3284_v1 = vrot.slane %v11001_v33, %v8542_v36  ;;  %v13448_v51 = vld [vmem:[#allocation17_spill] sm:$0xff]  ;;  %vm13484_vm3 = vmmov %vm13447_vm4 }
 0x2ec   :  { %v2535_v49 = vadd.f32 %v2531_v53, %v2488_v44  ;;  %v2622_v22 = vrot.slane %v2602_v60, %v8601_v43  ;;  %v2579_v23 = vmul.f32 %v2575_v55, %v12452_v39  ;;  %v5661_v48 = vadd.f32 %v12739_v46, %v12749_v58  ;;  %v12834_v39 = vld [vmem:[#allocation6 + $0x210] sm:$0xff] }
 0x2ed   :  { %v6132_v28 = vpop.permute.xlu0 %6131  ;;  %v2536_v4 = vadd.f32 %v2532_v54, %v2489_v12  ;;  %v3257_v26 = vrot.slane %v3237_v45, %v8531_v2  ;;  %v5704_v15 = vmul.f32 %v12759_v24, %v12807_v0  ;;  %v5738_v41 = vrot.slane %v5718_v20, %v8601_v43  ;;  %v13449_v58 = vld [vmem:[#allocation18_spill] sm:$0xff]  ;;  %v12855_v12 = vld [vmem:[#allocation6 + $0x218] sm:$0xff] }
 0x2ee   :  { %6136 = vst.msk [vmem:[#allocation2 + $0x8] sm:$0xf] %vm645_vm8, %v6132_v28  ;;  %v6830_v21 = vpop.permute.xlu1 %6829  ;;  %v2582_v9 = vadd.f32 %v2578_v35, %v2535_v49  ;;  %v3261_v59 = vrot.slane %v3241_v50, %v8531_v2  ;;  %v2625_v28 = vmul.f32 %v2618_v56, %v12461_v40  ;;  %v2626_v46 = vmul.f32 %v2622_v22, %v13448_v51 }
 0x2ef   :  { %6182 = vst.msk [vmem:[#allocation2 + $0x8] sm:$0xff] %vm9063_vm15, %v6178_v52  ;;  %v3288_v52 = vrot.slane %v11001_v33, %v8545_v3  ;;  %v2583_v47 = vadd.f32 %v2579_v23, %v2536_v4  ;;  %v3264_v18 = vmul.f32 %v3257_v26, %v13449_v58  ;;  %v3304_v55 = vrot.slane %v3284_v1, %v8542_v36 }
 0x2f0   :  { %6835 = vst.msk [vmem:[#allocation2] sm:$0xf] %vm13447_vm4, %v6830_v21  ;;  %v3265_v29 = vmul.f32 %v3261_v59, %v12486_v42  ;;  %v3331_v25 = vrot.slane %v11001_v33, %v8548_v37  ;;  %v5742_v40 = vrot.slane %v5722_v57, %v8601_v43  ;;  %v2629_v44 = vadd.f32 %v2625_v28, %v2582_v9  ;;  %vm13488_vm4 = vmmov %vm13450_vm10 }
 0x2f1   :  { %v6220_v27 = vpop.permute.xlu0 %6219  ;;  %v3308_v20 = vrot.slane %v3288_v52, %v8542_v36  ;;  %v2630_v53 = vadd.f32 %v2626_v46, %v2583_v47  ;;  %v3335_v38 = vrot.slane %v11001_v33, %v8558_v7  ;;  %v5662_v54 = vadd.f32 %v12755_v11, %v12771_v30  ;;  %v13451_v30 = vld [vmem:[#allocation19_spill] sm:$0xff] }
 0x2f2   :  { %6224 = vst.msk [vmem:[#allocation2 + $0xc] sm:$0xf] %vm738_vm11, %v6220_v27  ;;  %v6956_v14 = vpop.permute.xlu1 %6955  ;;  %v5705_v35 = vmul.f32 %v5695_v17, %v12832_v8  ;;  %v5751_v60 = vmul.f32 %v5738_v41, %v12834_v39  ;;  %v6361_v16 = vrot.slane %v12697_v61, %v8531_v2  ;;  %v6365_v57 = vrot.slane %v12697_v61, %v8534_v32  ;;  %v13452_v52 = vld [vmem:[#allocation15_spill] sm:$0xff] }
 0x2f3   :  { %v6959_v42 = vrot.slane %v6956_v14, 4  ;;  %v3268_v49 = vadd.f32 %v3264_v18, %v2629_v44  ;;  %v3269_v56 = vadd.f32 %v3265_v29, %v2630_v53  ;;  %v3311_v11 = vmul.f32 %v3304_v55, %v12501_v6  ;;  %v12891_v29 = vld [vmem:[#allocation6 + $0x78] sm:$0xff]  ;;  %v13454_v55 = vld [vmem:[#allocation21_spill] sm:$0xff] }
 0x2f4   :  { %v3312_v17 = vmul.f32 %v3308_v20, %v13451_v30  ;;  %v3351_v27 = vrot.slane %v3331_v25, %v8548_v37  ;;  %v3378_v22 = vrot.slane %v11001_v33, %v8601_v43  ;;  %v3355_v50 = vrot.slane %v3335_v38, %v8548_v37 }
 0x2f5   :  { %v6262_v24 = vpop.permute.xlu0 %6261  ;;  %v3382_v1 = vrot.slane %v11001_v33, %v8670_v63  ;;  %v4021_v4 = vrot.slane %v13452_v52, %v8531_v2  ;;  %v4025_v6 = vrot.slane %v13452_v52, %v8534_v32  ;;  %v6961_v23 = vsel %vm2264_vm13, %v6959_v42, %v6956_v14 }
 0x2f6   :  { %6266 = vst.msk [vmem:[#allocation2 + $0xc] sm:$0xf] %vm781_vm14, %v6262_v24  ;;  %v6872_v21 = vpop.permute.xlu1 %6871  ;;  %v5708_v9 = vadd.f32 %v5704_v15, %v5661_v48  ;;  %v5709_v26 = vadd.f32 %v5705_v35, %v5662_v54  ;;  %v5752_v41 = vmul.f32 %v5742_v40, %v12855_v12  ;;  %v6408_v47 = vrot.slane %v12697_v61, %v8542_v36  ;;  %v13453_v48 = vld [vmem:[#allocation20_spill] sm:$0xff]  ;;  %v12889_v24 = vld [vmem:[#allocation6 + $0x70] sm:$0xff] }
 0x2f7   :  { %6877 = vst.msk [vmem:[#allocation2] sm:$0xf] %vm13450_vm10, %v6872_v21  ;;  %v6412_v28 = vrot.slane %v12697_v61, %v8545_v3  ;;  %v3315_v33 = vadd.f32 %v3311_v11, %v3268_v49  ;;  %v3316_v51 = vadd.f32 %v3312_v17, %v3269_v56  ;;  %v6381_v58 = vrot.slane %v6361_v16, %v8531_v2  ;;  %v12910_v17 = vld [vmem:[#allocation6 + $0x100] sm:$0xff] }
 0x2f8   :  { %v6385_v14 = vrot.slane %v6365_v57, %v8531_v2  ;;  %v3358_v15 = vmul.f32 %v3351_v27, %v13453_v48  ;;  %v3398_v18 = vrot.slane %v3378_v22, %v8601_v43  ;;  %v3359_v20 = vmul.f32 %v3355_v50, %v13454_v55  ;;  %v12912_v27 = vld [vmem:[#allocation6 + $0x108] sm:$0xff]  ;;  %v13455_v22 = vld [vmem:[#allocation22_spill] sm:$0xff] }
 0x2f9   :  { %v6304_v45 = vpop.permute.xlu0 %6303  ;;  %v3402_v25 = vrot.slane %v3382_v1, %v8601_v43  ;;  %v4041_v40 = vrot.slane %v4021_v4, %v8531_v2  ;;  %v4045_v44 = vrot.slane %v4025_v6, %v8531_v2  ;;  %v5755_v53 = vadd.f32 %v5751_v60, %v5708_v9  ;;  %v13456_v1 = vld [vmem:[#allocation24_spill] sm:$0xff]  ;;  %v13457_v6 = vld [vmem:[#allocation23_spill] sm:$0xff]  ;;  %v13458_v9 = vld [vmem:[#allocation25_spill] sm:$0xff] }
 0x2fa   :  { %6308 = vst.msk [vmem:[#allocation2 + $0xc] sm:$0xf] %vm824_vm0, %v6304_v45  ;;  %v6914_v59 = vpop.permute.xlu1 %6913  ;;  %v5756_v38 = vadd.f32 %v5752_v41, %v5709_v26  ;;  %v6455_v42 = vrot.slane %v12697_v61, %v8548_v37  ;;  %v4068_v54 = vrot.slane %v13452_v52, %v8542_v36  ;;  %v6459_v21 = vrot.slane %v12697_v61, %v8558_v7 }
 0x2fb   :  { %6919 = vst.msk [vmem:[#allocation2] sm:$0xf] %vm645_vm8, %v6914_v59  ;;  %v3362_v16 = vadd.f32 %v3358_v15, %v3315_v33  ;;  %v3363_v57 = vadd.f32 %v3359_v20, %v3316_v51  ;;  %v4072_v49 = vrot.slane %v13452_v52, %v8545_v3  ;;  %v6394_v60 = vmul.f32 %v6381_v58, %v12889_v24 }
 0x2fc   :  { %6965 = vst.msk [vmem:[#allocation2] sm:$0xff] %vm9063_vm15, %v6961_v23  ;;  %v6395_v45 = vmul.f32 %v6385_v14, %v12891_v29  ;;  %v6428_v11 = vrot.slane %v6408_v47, %v8542_v36  ;;  %v6432_v30 = vrot.slane %v6412_v28, %v8542_v36  ;;  %v3405_v50 = vmul.f32 %v3398_v18, %v13455_v22 }
 0x2fd   :  { %v6346_v46 = vpop.permute.xlu0 %6345  ;;  %v3406_v4 = vmul.f32 %v3402_v25, %v13456_v1  ;;  %v4048_v23 = vmul.f32 %v4041_v40, %v13457_v6  ;;  %v4049_v26 = vmul.f32 %v4045_v44, %v13458_v9  ;;  %v6502_v41 = vrot.slane %v12697_v61, %v8601_v43  ;;  %v12936_v44 = vld [vmem:[#allocation6 + $0x190] sm:$0xff] }
 0x2fe   :  { %6350 = vst.msk [vmem:[#allocation2 + $0xc] sm:$0xf] %vm867_vm12, %v6346_v46  ;;  %v7002_v35 = vpop.permute.xlu1 %7001  ;;  %v4088_v59 = vrot.slane %v4068_v54, %v8542_v36  ;;  %v4115_v47 = vrot.slane %v13452_v52, %v8548_v37  ;;  %v4119_v28 = vrot.slane %v13452_v52, %v8558_v7  ;;  %v6506_v51 = vrot.slane %v12697_v61, %v8670_v63  ;;  %v12938_v54 = vld [vmem:[#allocation6 + $0x198] sm:$0xff] }
 0x2ff   :  { %7007 = vst.msk [vmem:[#allocation2 + $0x4] sm:$0xf] %vm738_vm11, %v7002_v35  ;;  %v3409_v46 = vadd.f32 %v3405_v50, %v3362_v16  ;;  %v3410_v58 = vadd.f32 %v3406_v4, %v3363_v57  ;;  %v4092_v14 = vrot.slane %v4072_v49, %v8542_v36  ;;  %v6441_v18 = vmul.f32 %v6428_v11, %v12910_v17  ;;  %v13463_v57 = vld [vmem:[#allocation26_spill] sm:$0xff] }
 0x300   :  { %v6442_v55 = vmul.f32 %v6432_v30, %v12912_v27  ;;  %v6475_v20 = vrot.slane %v6455_v42, %v8548_v37  ;;  %v6479_v25 = vrot.slane %v6459_v21, %v8548_v37  ;;  %vm13459_vm2 = vcmask 109568   ;;  %13460 = vst [vmem:[#allocation13_spill] sm:$0xff] %v12936_v44  ;;  %13461 = vst [vmem:[#allocation14_spill] sm:$0xff] %v12938_v54 }
 0x301   :  { %v6580_v56 = vpop.permute.xlu0 %6579  ;;  %v6398_v61 = vadd.f32 %v6394_v60, %v5755_v53  ;;  %v6399_v40 = vadd.f32 %v6395_v45, %v5756_v38  ;;  %v4052_v35 = vadd.f32 %v4048_v23, %v3409_v46  ;;  %v4053_v16 = vadd.f32 %v4049_v26, %v3410_v58  ;;  %v13464_v53 = vld [vmem:[#allocation27_spill] sm:$0xff]  ;;  %v13465_v45 = vld [vmem:[#allocation16_spill] sm:$0xff]  ;;  %v13470_v58 = vld [vmem:[#allocation29_spill] sm:$0xff] }
 0x302   :  { %v7044_v33 = vpop.permute.xlu1 %7043  ;;  %vm13462_vm5 = vcmask 224368   ;;  %v4095_v49 = vmul.f32 %v4088_v59, %v13463_v57  ;;  %v4135_v11 = vrot.slane %v4115_v47, %v8548_v37  ;;  %v4139_v42 = vrot.slane %v4119_v28, %v8548_v37  ;;  %v12959_v26 = vld [vmem:[#allocation6 + $0x220] sm:$0xff]  ;;  %v12961_v28 = vld [vmem:[#allocation6 + $0x228] sm:$0xff] }
 0x303   :  { %7049 = vst.msk [vmem:[#allocation2 + $0x4] sm:$0xf] %vm781_vm14, %v7044_v33  ;;  %v4162_v21 = vrot.slane %v13452_v52, %v8601_v43  ;;  %v4096_v38 = vmul.f32 %v4092_v14, %v13464_v53  ;;  %v4166_v60 = vrot.slane %v13452_v52, %v8670_v63  ;;  %v4805_v30 = vrot.slane %v13465_v45, %v8531_v2  ;;  %v13469_v33 = vld [vmem:[#allocation28_spill] sm:$0xff] }
 0x304   :  { %v4809_v22 = vrot.slane %v13465_v45, %v8534_v32  ;;  %v6488_v1 = vmul.f32 %v6475_v20, %v12936_v44  ;;  %v6489_v4 = vmul.f32 %v6479_v25, %v12938_v54  ;;  %v6522_v6 = vrot.slane %v6502_v41, %v8601_v43  ;;  %13467 = vst [vmem:[#allocation17_spill] sm:$0xff] %v12959_v26  ;;  %v13487_v44 = vld [vmem:[#allocation38_spill] sm:$0xff] }
 0x305   :  { %v12928_v48 = vld [vmem:[#allocation2 + $0x8] sm:$0xff]  ;;  %v6622_v15 = vpop.permute.xlu0 %6621  ;;  %v6526_v23 = vrot.slane %v6506_v51, %v8601_v43  ;;  %vm13466_vm7 = vcmask 339168   ;;  %v6445_v52 = vadd.f32 %v6441_v18, %v6398_v61  ;;  %v6446_v9 = vadd.f32 %v6442_v55, %v6399_v40  ;;  %13468 = vst [vmem:[#allocation18_spill] sm:$0xff] %v12961_v28  ;;  %v13471_v61 = vld [vmem:[#allocation36_spill] sm:$0xff] }
 0x306   :  { %6584 = vst.msk [vmem:[#allocation2 + $0x8] sm:$0xf] %vm13459_vm2, %v6580_v56  ;;  %v7086_v56 = vpop.permute.xlu1 %7085  ;;  %v4099_v59 = vadd.f32 %v4095_v49, %v4052_v35  ;;  %v4100_v47 = vadd.f32 %v4096_v38, %v4053_v16  ;;  %v4142_v46 = vmul.f32 %v4135_v11, %v13469_v33  ;;  %v4143_v14 = vmul.f32 %v4139_v42, %v13470_v58 }
 0x307   :  { %6626 = vst.msk [vmem:[#allocation2 + $0x8] sm:$0xf] %vm13462_vm5, %v6622_v15  ;;  %v4182_v15 = vrot.slane %v4162_v21, %v8601_v43  ;;  %v4852_v41 = vrot.slane %v13465_v45, %v8542_v36  ;;  %v4186_v20 = vrot.slane %v4166_v60, %v8601_v43  ;;  %v4825_v18 = vrot.slane %v4805_v30, %v8531_v2  ;;  %v13474_v30 = vld [vmem:[#allocation31_spill] sm:$0xff] }
 0x308   :  { %7091 = vst.msk [vmem:[#allocation2 + $0x4] sm:$0xf] %vm824_vm0, %v7086_v56  ;;  %v4829_v55 = vrot.slane %v4809_v22, %v8531_v2  ;;  %v4856_v25 = vrot.slane %v13465_v45, %v8545_v3  ;;  %v260_v40 = vadd.f32 1e-07, %v13471_v61  ;;  %v6535_v16 = vmul.f32 %v6522_v6, %v12959_v26  ;;  %v13473_v56 = vld [vmem:[#allocation30_spill] sm:$0xff]  ;;  %v13486_v26 = vld [vmem:[#allocation37_spill] sm:$0xff] }
 0x309   :  { %v6664_v50 = vpop.permute.xlu0 %6663  ;;  %vm13472_vm9 = vcmask 453968   ;;  %v6492_v57 = vadd.f32 %v6488_v1, %v6445_v52  ;;  %v6536_v49 = vmul.f32 %v6526_v23, %v12961_v28  ;;  %v4146_v11 = vadd.f32 %v4142_v46, %v4099_v59  ;;  %v13476_v6 = vld [vmem:[#allocation34_spill] sm:$0xff] }
 0x30a   :  { %6668 = vst.msk [vmem:[#allocation2 + $0x8] sm:$0xf] %vm13466_vm7, %v6664_v50  ;;  %v7128_v51 = vpop.permute.xlu1 %7127  ;;  %v4147_v42 = vadd.f32 %v4143_v14, %v4100_v47  ;;  %v6493_v21 = vadd.f32 %v6489_v4, %v6446_v9  ;;  %v4189_v53 = vmul.f32 %v4182_v15, %v13473_v56  ;;  %v4872_v38 = vrot.slane %v4852_v41, %v8542_v36  ;;  %v13475_v50 = vld [vmem:[#allocation32_spill] sm:$0xff]  ;;  %v13477_v47 = vld [vmem:[#allocation35_spill] sm:$0xff] }
 0x30b   :  { %7133 = vst.msk [vmem:[#allocation2 + $0x4] sm:$0xf] %vm867_vm12, %v7128_v51  ;;  %v4899_v60 = vrot.slane %v13465_v45, %v8548_v37  ;;  %v4190_v22 = vmul.f32 %v4186_v20, %v13474_v30  ;;  %v4832_v33 = vmul.f32 %v4825_v18, %v13475_v50  ;;  %v4833_v58 = vmul.f32 %v4829_v55, %v13476_v6  ;;  %v13478_v18 = vld [vmem:[#allocation12_spill] sm:$0xff] }
 0x30c   :  { %v4876_v1 = vrot.slane %v4856_v25, %v8542_v36  ;;  %7468 = vrcp.f32 %v260_v40  ;;  %v6539_v4 = vadd.f32 %v6535_v16, %v6492_v57  ;;  %v4193_v23 = vadd.f32 %v4189_v53, %v4146_v11  ;;  %v12994_v40 = vld [vmem:[#allocation6 + $0x80] sm:$0xff]  ;;  %v13001_v11 = vld [vmem:[#allocation6 + $0x88] sm:$0xff] }
 0x30d   :  { %v6706_v35 = vpop.permute.xlu0 %6705  ;;  %v4194_v9 = vadd.f32 %v4190_v22, %v4147_v42  ;;  %v6540_v59 = vadd.f32 %v6536_v49, %v6493_v21  ;;  %v4879_v46 = vmul.f32 %v4872_v38, %v13477_v47  ;;  %v4903_v14 = vrot.slane %v13465_v45, %v8558_v7  ;;  %13479 = vst [vmem:[#allocation19_spill] sm:$0xff] %v12994_v40  ;;  %v13003_v42 = vld [vmem:[#allocation6 + $0x110] sm:$0xff]  ;;  %v13005_v21 = vld [vmem:[#allocation6 + $0x118] sm:$0xff]  ;;  %v13015_v6 = vld [vmem:[#allocation6 + $0x1a0] sm:$0xff] }
 0x30e   :  { %6710 = vst.msk [vmem:[#allocation2 + $0x8] sm:$0xf] %vm13472_vm9, %v6706_v35  ;;  %v4919_v15 = vrot.slane %v4899_v60, %v8548_v37  ;;  %v4836_v51 = vadd.f32 %v4832_v33, %v4193_v23  ;;  %v4880_v55 = vmul.f32 %v4876_v1, %v13478_v18  ;;  %v4946_v25 = vrot.slane %v13465_v45, %v8601_v43 }
 0x30f   :  { %v4837_v20 = vadd.f32 %v4833_v58, %v4194_v9  ;;  %13481 = vst [vmem:[#allocation15_spill] sm:$0xff] %v13001_v11  ;;  %13482 = vst [vmem:[#allocation20_spill] sm:$0xff] %v13003_v42  ;;  %v13017_v58 = vld [vmem:[#allocation6 + $0x1a8] sm:$0xff]  ;;  %vm7342_vm10 = vcmask 556032   ;;  %v6369_v5 = vrot.slane %v12928_v48, %v8531_v2 }
 0x310   :  { %13483 = vst [vmem:[#allocation21_spill] sm:$0xff] %v13005_v21  ;;  %v4926_v54 = vmul.f32 %v4919_v15, %v13486_v26 }
 0x311   :  { %v6748_v52 = vpop.permute.xlu0 %6747 }
 0x312   :  { %6752 = vst.msk [vmem:[#allocation2 + $0x8] sm:$0xf] %vm13444_vm1, %v6748_v52  ;;  %v7135_v41 = vld [vmem:[#allocation2] sm:$0xff] }
 0x313   :  { %v7145_v35 = vrot.slane %v7135_v41, %v8531_v2  ;;  %v7149_v16 = vrot.slane %v7135_v41, %v8534_v32  ;;  %v7192_v57 = vrot.slane %v7135_v41, %v8542_v36  ;;  %v7196_v49 = vrot.slane %v7135_v41, %v8545_v3 }
 0x314   :  { %v7239_v56 = vrot.slane %v7135_v41, %v8548_v37  ;;  %v7243_v53 = vrot.slane %v7135_v41, %v8558_v7  ;;  %v7286_v38 = vrot.slane %v7135_v41, %v8601_v43  ;;  %v7290_v60 = vrot.slane %v7135_v41, %v8670_v63 }
 0x315   :  { %v6790_v61 = vpop.permute.xlu0 %6789  ;;  %v7165_v30 = vrot.slane %v7145_v35, %v8531_v2  ;;  %v7169_v22 = vrot.slane %v7149_v16, %v8531_v2  ;;  %v7212_v50 = vrot.slane %v7192_v57, %v8542_v36  ;;  %v7216_v33 = vrot.slane %v7196_v49, %v8542_v36  ;;  %v13028_v16 = vld [vmem:[#allocation6 + $0x230] sm:$0xff]  ;;  %v13030_v57 = vld [vmem:[#allocation6 + $0x238] sm:$0xff] }
 0x316   :  { %6794 = vst.msk [vmem:[#allocation2 + $0x8] sm:$0xf] %vm13480_vm6, %v6790_v61  ;;  %v7259_v1 = vrot.slane %v7239_v56, %v8548_v37  ;;  %v7263_v52 = vrot.slane %v7243_v53, %v8548_v37  ;;  %v7306_v23 = vrot.slane %v7286_v38, %v8601_v43  ;;  %v7310_v9 = vrot.slane %v7290_v60, %v8601_v43  ;;  %v13485_v53 = vld [vmem:[#allocation33_spill] sm:$0xff] }
 0x317   :  { %v7178_v41 = vmul.f32 %v7165_v30, %v12994_v40  ;;  %v7179_v18 = vmul.f32 %v7169_v22, %v13001_v11  ;;  %v7225_v61 = vmul.f32 %v7212_v50, %v13003_v42  ;;  %v7226_v35 = vmul.f32 %v7216_v33, %v13005_v21 }
 0x318   :  { %v4923_v49 = vrot.slane %v4903_v14, %v8548_v37  ;;  %v4950_v56 = vrot.slane %v13465_v45, %v8670_v63  ;;  %v5585_v38 = vrot.slane %v13485_v53, %v8531_v2  ;;  %v5589_v60 = vrot.slane %v13485_v53, %v8534_v32 }
 0x319   :  { %v6832_v47 = vpop.permute.xlu0 %6831  ;;  %v7182_v30 = vadd.f32 %v7178_v41, %v6539_v4  ;;  %v7183_v22 = vadd.f32 %v7179_v18, %v6540_v59  ;;  %v7272_v50 = vmul.f32 %v7259_v1, %v13015_v6  ;;  %v7273_v33 = vmul.f32 %v7263_v52, %v13017_v58 }
 0x31a   :  { %6836 = vst.msk [vmem:[#allocation2 + $0x8] sm:$0xf] %vm13484_vm3, %v6832_v47  ;;  %v13041_v47 = vpop.eup %7468  ;;  %v4883_v21 = vadd.f32 %v4879_v46, %v4836_v51  ;;  %v4884_v42 = vadd.f32 %v4880_v55, %v4837_v20  ;;  %v7319_v45 = vmul.f32 %v7306_v23, %v13028_v16  ;;  %v7320_v28 = vmul.f32 %v7310_v9, %v13030_v57 }
 0x31b   :  { %v7229_v11 = vadd.f32 %v7225_v61, %v7182_v30  ;;  %v7230_v40 = vadd.f32 %v7226_v35, %v7183_v22  ;;  %v4927_v4 = vmul.f32 %v4923_v49, %v13487_v44  ;;  %v4966_v59 = vrot.slane %v4946_v25, %v8601_v43 }
 0x31c   :  { %v4970_v1 = vrot.slane %v4950_v56, %v8601_v43  ;;  %v5605_v46 = vrot.slane %v5585_v38, %v8531_v2  ;;  %v5609_v51 = vrot.slane %v5589_v60, %v8531_v2  ;;  %v7331_v20 = vrot.slane %v13041_v47, %v8531_v2 }
 0x31d   :  { %v6958_v14 = vpop.permute.xlu0 %6957  ;;  %v7276_v52 = vadd.f32 %v7272_v50, %v7229_v11  ;;  %v7277_v41 = vadd.f32 %v7273_v33, %v7230_v40  ;;  %v5632_v55 = vrot.slane %v13485_v53, %v8542_v36  ;;  %v5636_v26 = vrot.slane %v13485_v53, %v8545_v3 }
 0x31e   :  { %v4930_v23 = vadd.f32 %v4926_v54, %v4883_v21  ;;  %v4931_v9 = vadd.f32 %v4927_v4, %v4884_v42  ;;  %v6960_v11 = vrot.slane %v6958_v14, 4  ;;  %v4973_v40 = vmul.f32 %v4966_v59, %v12679_v31 }
 0x31f   :  { %v7323_v15 = vadd.f32 %v7319_v45, %v7276_v52  ;;  %v7324_v25 = vadd.f32 %v7320_v28, %v7277_v41  ;;  %v4974_v18 = vmul.f32 %v4970_v1, %v12690_v10  ;;  %v5612_v49 = vmul.f32 %v5605_v46, %v12692_v62 }
 0x320   :  { %v5613_v56 = vmul.f32 %v5609_v51, %v12715_v13  ;;  %v5652_v28 = vrot.slane %v5632_v55, %v8542_v36  ;;  %v5656_v54 = vrot.slane %v5636_v26, %v8542_v36  ;;  %v5679_v42 = vrot.slane %v13485_v53, %v8548_v37 }
 0x321   :  { %v6874_v44 = vpop.permute.xlu0 %6873  ;;  %v13060_v61 = vmul.f32 %v7331_v20, %v7323_v15  ;;  %v13062_v35 = vmul.f32 %v7331_v20, %v7324_v25  ;;  %v4977_v10 = vadd.f32 %v4973_v40, %v4930_v23  ;;  %v4978_v38 = vadd.f32 %v4974_v18, %v4931_v9 }
 0x322   :  { %6878 = vst.msk [vmem:[#allocation2 + $0x8] sm:$0xf] %vm13488_vm4, %v6874_v44  ;;  %v5683_v60 = vrot.slane %v13485_v53, %v8558_v7  ;;  %v6962_v62 = vsel %vm2264_vm13, %v6960_v11, %v6958_v14  ;;  %v5659_v50 = vmul.f32 %v5652_v28, %v12720_v19  ;;  %v5660_v33 = vmul.f32 %v5656_v54, %v12736_v34 }
 0x323   :  { %v7343_v31 = vsel %vm7342_vm10, %v13062_v35, 0.0  ;;  %v5616_v30 = vadd.f32 %v5612_v49, %v4977_v10  ;;  %v5617_v22 = vadd.f32 %v5613_v56, %v4978_v38  ;;  %v5699_v45 = vrot.slane %v5679_v42, %v8548_v37 }
 0x324   :  { %v7344_v13 = vadd.f32 %v7343_v31, %v13060_v61  ;;  %v5726_v4 = vrot.slane %v13485_v53, %v8601_v43  ;;  %v5703_v59 = vrot.slane %v5683_v60, %v8548_v37  ;;  %v5730_v1 = vrot.slane %v13485_v53, %v8670_v63 }
 0x325   :  { %v6916_v21 = vpop.permute.xlu0 %6915  ;;  %v6373_v52 = vrot.slane %v12928_v48, %v8534_v32  ;;  %v5663_v19 = vadd.f32 %v5659_v50, %v5616_v30  ;;  %v5664_v34 = vadd.f32 %v5660_v33, %v5617_v22  ;;  %v5706_v41 = vmul.f32 %v5699_v45, %v12807_v0  ;;  %v13489_v50 = vld [vmem:[#allocation13_spill] sm:$0xff]  ;;  %v13490_v45 = vld [vmem:[#allocation14_spill] sm:$0xff] }
 0x326   :  { %6920 = vst.msk [vmem:[#allocation2 + $0x8] sm:$0xf] %vm645_vm8, %v6916_v21  ;;  %7345 = vadd.xlane.f32.xlu1 %v7344_v13  ;;  %v5746_v46 = vrot.slane %v5726_v4, %v8601_v43  ;;  %v5707_v20 = vmul.f32 %v5703_v59, %v12832_v8  ;;  %v5750_v55 = vrot.slane %v5730_v1, %v8601_v43  ;;  %v13491_v59 = vld [vmem:[#allocation17_spill] sm:$0xff]  ;;  %v13492_v1 = vld [vmem:[#allocation18_spill] sm:$0xff] }
 0x327   :  { %6966 = vst.msk [vmem:[#allocation2 + $0x8] sm:$0xff] %vm9063_vm15, %v6962_v62  ;;  %v6389_v53 = vrot.slane %v6369_v5, %v8531_v2  ;;  %v6393_v26 = vrot.slane %v6373_v52, %v8531_v2  ;;  %v6416_v44 = vrot.slane %v12928_v48, %v8542_v36  ;;  %v5710_v15 = vadd.f32 %v5706_v41, %v5663_v19 }
 0x328   :  { %v5711_v25 = vadd.f32 %v5707_v20, %v5664_v34  ;;  %v6420_v0 = vrot.slane %v12928_v48, %v8545_v3  ;;  %v5753_v9 = vmul.f32 %v5746_v46, %v12834_v39  ;;  %v5754_v8 = vmul.f32 %v5750_v55, %v12855_v12 }
 0x329   :  { %v7004_v14 = vpop.permute.xlu0 %7003  ;;  %v6396_v11 = vmul.f32 %v6389_v53, %v12889_v24  ;;  %v6397_v40 = vmul.f32 %v6393_v26, %v12891_v29  ;;  %v6436_v18 = vrot.slane %v6416_v44, %v8542_v36  ;;  %v6463_v49 = vrot.slane %v12928_v48, %v8548_v37 }
 0x32a   :  { %7008 = vst.msk [vmem:[#allocation2 + $0xc] sm:$0xf] %vm738_vm11, %v7004_v14  ;;  %v5757_v56 = vadd.f32 %v5753_v9, %v5710_v15  ;;  %v5758_v28 = vadd.f32 %v5754_v8, %v5711_v25  ;;  %v6440_v54 = vrot.slane %v6420_v0, %v8542_v36  ;;  %v6467_v39 = vrot.slane %v12928_v48, %v8558_v7  ;;  %v13493_v0 = vld [vmem:[#allocation19_spill] sm:$0xff] }
 0x32b   :  { %v6510_v24 = vrot.slane %v12928_v48, %v8601_v43  ;;  %v6514_v29 = vrot.slane %v12928_v48, %v8670_v63  ;;  %v6443_v31 = vmul.f32 %v6436_v18, %v12910_v17  ;;  %v6483_v38 = vrot.slane %v6463_v49, %v8548_v37  ;;  %v13495_v18 = vld [vmem:[#allocation20_spill] sm:$0xff] }
 0x32c   :  { %v6400_v12 = vadd.f32 %v6396_v11, %v5757_v56  ;;  %v6401_v21 = vadd.f32 %v6397_v40, %v5758_v28  ;;  %v6444_v10 = vmul.f32 %v6440_v54, %v12912_v27  ;;  %v6487_v60 = vrot.slane %v6467_v39, %v8548_v37  ;;  %v13496_v56 = vld [vmem:[#allocation21_spill] sm:$0xff] }
 0x32d   :  { %v7046_v51 = vpop.permute.xlu0 %7045  ;;  %v6530_v30 = vrot.slane %v6510_v24, %v8601_v43  ;;  %v6534_v22 = vrot.slane %v6514_v29, %v8601_v43  ;;  %v6490_v33 = vmul.f32 %v6483_v38, %v13489_v50 }
 0x32e   :  { %7050 = vst.msk [vmem:[#allocation2 + $0xc] sm:$0xf] %vm781_vm14, %v7046_v51  ;;  %v6447_v62 = vadd.f32 %v6443_v31, %v6400_v12  ;;  %v6448_v13 = vadd.f32 %v6444_v10, %v6401_v21  ;;  %v6491_v48 = vmul.f32 %v6487_v60, %v13490_v45  ;;  %v7335_v10 = vrot.slane %v13041_v47, %v8542_v36 }
 0x32f   :  { %v6537_v17 = vmul.f32 %v6530_v30, %v13491_v59  ;;  %v6538_v27 = vmul.f32 %v6534_v22, %v13492_v1  ;;  %v7586_v47 = vmov 0  }
 0x330   :  { %v6494_v4 = vadd.f32 %v6490_v33, %v6447_v62  ;;  %v6495_v14 = vadd.f32 %v6491_v48, %v6448_v13  ;;  %v7353_v62 = vmul.f32 %v13062_v35, %v13062_v35  ;;  %7464 = vset.pattern.permute.xlu1 %v7586_v47  ;;  %7465 = vset.pattern.permute.xlu0 %v7586_v47 }
 0x331   :  { %v7088_v23 = vpop.permute.xlu0 %7087 }
 0x332   :  { %7092 = vst.msk [vmem:[#allocation2 + $0xc] sm:$0xf] %vm824_vm0, %v7088_v23  ;;  %v6541_v15 = vadd.f32 %v6537_v17, %v6494_v4  ;;  %v6542_v25 = vadd.f32 %v6538_v27, %v6495_v14  ;;  %v13494_v23 = vld [vmem:[#allocation15_spill] sm:$0xff] }
 0x335   :  { %v7130_v42 = vpop.permute.xlu0 %7129 }
 0x336   :  { %7134 = vst.msk [vmem:[#allocation2 + $0xc] sm:$0xf] %vm867_vm12, %v7130_v42 }
 0x33d   :  { %v7136_v5 = vld [vmem:[#allocation2 + $0x8] sm:$0xff] }
 0x33e   :  { %v7153_v52 = vrot.slane %v7136_v5, %v8531_v2  ;;  %v7157_v19 = vrot.slane %v7136_v5, %v8534_v32  ;;  %v7200_v34 = vrot.slane %v7136_v5, %v8542_v36  ;;  %v7204_v41 = vrot.slane %v7136_v5, %v8545_v3 }
 0x33f   :  { %v7247_v46 = vrot.slane %v7136_v5, %v8548_v37  ;;  %v7251_v51 = vrot.slane %v7136_v5, %v8558_v7  ;;  %v7294_v20 = vrot.slane %v7136_v5, %v8601_v43  ;;  %v7298_v55 = vrot.slane %v7136_v5, %v8670_v63 }
 0x340   :  { %v7173_v53 = vrot.slane %v7153_v52, %v8531_v2  ;;  %v7177_v26 = vrot.slane %v7157_v19, %v8531_v2  ;;  %v7220_v44 = vrot.slane %v7200_v34, %v8542_v36  ;;  %v7224_v32 = vrot.slane %v7204_v41, %v8542_v36  ;;  %v7369_v19 = vld [vmem:[%s13189_s2] sm:$0xff]  ;;  %s7407_s2 = sshll.u32 %s7587_s25, 4  ;;  %s7408_s2 = int_to_ptr.vmem [resolvable:$true] %s7407_s2 }
 0x341   :  { %v7267_v7 = vrot.slane %v7247_v46, %v8548_v37  ;;  %v7271_v8 = vrot.slane %v7251_v51, %v8548_v37  ;;  %v7314_v63 = vrot.slane %v7294_v20, %v8601_v43  ;;  %v7318_v11 = vrot.slane %v7298_v55, %v8601_v43  ;;  %v7373_v46 = vld [vmem:[%s13190_s3] sm:$0xff]  ;;  %s7516_s3 = scalar_lea.vmem %s7408_s2, 512  ;;  %p7521_p3 = scmp.lt.s32.totalorder %s7408_s2, %s7408_s2 }
 0x342   :  { %v7180_v3 = vmul.f32 %v7173_v53, %v13493_v0  ;;  %v7181_v9 = vmul.f32 %v7177_v26, %v13494_v23  ;;  %v7227_v49 = vmul.f32 %v7220_v44, %v13495_v18  ;;  %v7228_v28 = vmul.f32 %v7224_v32, %v13496_v56  ;;  %p7517_p2 = scmp.ne.s32.totalorder %s7408_s2, %s7516_s3  ;;  %p7522_p4 = scmp.lt.s32.totalorder %s7516_s3, %s7516_s3 }
 0x343   :  { %v7274_v42 = vmul.f32 %v7267_v7, %v13015_v6  ;;  %v7275_v12 = vmul.f32 %v7271_v8, %v13017_v58  ;;  %v7321_v37 = vmul.f32 %v7314_v63, %v13028_v16  ;;  %v7322_v29 = vmul.f32 %v7318_v11, %v13030_v57 }
 0x344   :  { %v7184_v40 = vadd.f32 %v7180_v3, %v6541_v15  ;;  %v7185_v2 = vadd.f32 %v7181_v9, %v6542_v25  ;;  %v7352_v58 = vmul.f32 %v13060_v61, %v13060_v61  ;;  %v7356_v16 = vsel %vm7342_vm10, %v7353_v62, 0.0  ;;  %p7523_p5 = por %p7522_p4, %p7521_p3 }
 0x346   :  { %v7231_v54 = vadd.f32 %v7227_v49, %v7184_v40  ;;  %v7232_v39 = vadd.f32 %v7228_v28, %v7185_v2  ;;  %v7357_v57 = vadd.f32 %v7356_v16, %v7352_v58  ;;  %p7524_p6 = pnand %p7523_p5, %p7517_p2 }
 0x348   :  { %v7278_v21 = vadd.f32 %v7274_v42, %v7231_v54  ;;  %v7279_v24 = vadd.f32 %v7275_v12, %v7232_v39 }
 0x34a   :  { %v7325_v31 = vadd.f32 %v7321_v37, %v7278_v21  ;;  %v7326_v43 = vadd.f32 %v7322_v29, %v7279_v24 }
 0x34c   :  { %v7340_v38 = vmul.f32 %v7335_v10, %v7325_v31  ;;  %v7341_v60 = vmul.f32 %v7335_v10, %v7326_v43 }
 0x34e   :  { %v7347_v6 = vsel %vm7342_vm10, %v7341_v60, 0.0  ;;  %v7355_v30 = vmul.f32 %v7341_v60, %v7341_v60  ;;  %v7354_v22 = vmul.f32 %v7340_v38, %v7340_v38 }
 0x34f   :  { %v7348_v13 = vadd.f32 %v7347_v6, %v7340_v38 }
 0x350   :  { %v7360_v50 = vsel %vm7342_vm10, %v7355_v30, 0.0 }
 0x351   :  { %7349 = vadd.xlane.f32.xlu0 %v7348_v13  ;;  %v7361_v36 = vadd.f32 %v7360_v50, %v7354_v22 }
 0x355   :  { %7358 = vadd.xlane.f32.xlu0 %v7357_v57 }
 0x359   :  { %7362 = vadd.xlane.f32.xlu0 %v7361_v36 }
 0x3b3   :  { %v7346_v45 = vpop.xlane.xlu1 %7345 }
 0x3de   :  { %v7350_v33 = vpop.xlane.xlu0 %7349 }
 0x3df   :  { %v7351_v48 = vadd.f32 %v7350_v33, %v7346_v45 }
 0x3e1   :  { %v7365_v14 = vmul.f32 0.0025510204, %v7351_v48 }
 0x3e2   :  { %v7359_v4 = vpop.xlane.xlu0 %7358 }
 0x3e3   :  { %v7367_v1 = vmul.f32 %v7365_v14, %v7365_v14 }
 0x3e6   :  { %v7363_v59 = vpop.xlane.xlu0 %7362 }
 0x3e7   :  { %v7364_v17 = vadd.f32 %v7363_v59, %v7359_v4 }
 0x3e9   :  { %v7366_v27 = vmul.f32 0.0025510204, %v7364_v17 }
 0x3eb   :  { %v7368_v5 = vsub.f32 %v7366_v27, %v7367_v1 }
 0x3ed   :  { %v7370_v52 = vadd.f32 1e-05, %v7368_v5 }
 0x3ef   :  { %7470 = vrsqrt.f32 %v7370_v52 }
 0x3f9   :  { %v7471_v34 = vpop.eup %7470 }
 0x3fa   :  { %v7372_v41 = vmul.f32 %v7471_v34, %v7369_v19 }
 0x3fc   :  { %7378 = vperm.xlu1 %7464, %v7372_v41   ;;  %v7374_v51 = vmul.f32 %v7372_v41, %v7365_v14 }
 0x3fe   :  { %v7375_v20 = vsub.f32 %v7373_v46, %v7374_v51 }
 0x400   :  { %7387 = vperm.xlu0 %7465, %v7375_v20  }
 0x47b   :  { %v7379_v55 = vpop.permute.xlu1 %7378 }
 0x47c   :  { %v7381_v53 = vmul.f32 %v7379_v55, %v13060_v61  ;;  %v7382_v26 = vmul.f32 %v7379_v55, %v13062_v35  ;;  %v7383_v44 = vmul.f32 %v7379_v55, %v7340_v38  ;;  %v7384_v32 = vmul.f32 %v7379_v55, %v7341_v60 }
 0x47f   :  { %v7388_v15 = vpop.permute.xlu0 %7387 }
 0x480   :  { %v7390_v25 = vadd.f32 %v7388_v15, %v7381_v53  ;;  %v7391_v0 = vadd.f32 %v7388_v15, %v7382_v26  ;;  %v7392_v3 = vadd.f32 %v7388_v15, %v7383_v44  ;;  %v7393_v23 = vadd.f32 %v7388_v15, %v7384_v32 }
 0x482   :  { %v7394_v9 = vmax.f32 %v7390_v25, 0.0  ;;  %v7395_v7 = vmax.f32 %v7391_v0, 0.0  ;;  %v7396_v8 = vmax.f32 %v7392_v3, 0.0  ;;  %v7397_v63 = vmax.f32 %v7393_v23, 0.0 }
 0x484   :  { %7398 = vst [vmem:[#allocation8] sm:$0xff] %v7394_v9  ;;  %7400 = vst [vmem:[#allocation8 + $0x10] sm:$0xff] %v7396_v8 }
 0x485   :  { %7399 = vst.msk [vmem:[#allocation8 + $0x8] sm:$0xff] %vm7342_vm10, %v7395_v7  ;;  %7401 = vst.msk [vmem:[#allocation8 + $0x18] sm:$0xff] %vm7342_vm10, %v7397_v63 }
 0x486   :  { %7527 = shalt.err (!%p7524_p6)
}
 0x487   :  { %s7528_s28 = scalar_lea.hbm %s13191_s4, 512 }
 0x488   :  { %p7529_p7 = scmp.ne.s32.totalorder %s13191_s4, %s7528_s28  ;;  %p7532_p8 = scmp.lt.u32.totalorder %s7528_s28, %s13191_s4 }
 0x48a   :  { %p7534_p9 = pnand %p7532_p8, %p7529_p7 }
 0x48c   :  { %7537 = shalt.err (!%p7534_p9)
}
 0x48d   :  { %s13497_s7 = smov 16   ;;  %s13498_s8 = smov 256  }
 0x48e   :  { %7413 = dma.vmem_to_hbm [thread:$0]  %s7408_s2, 512, %s13191_s4, [#allocation5], %s13498_s8, %s13498_s8, %s13497_s7  }
 0x48f   :  { %7542 = dma.done.wait [#allocation5], 512  }
 0x490   :  { %7543 = vsyncadd [#allocation5], 4294966784 }
 0x491   :  { %7417 = vsyncpa [#allocation4], 1 }
 0x492   :  { %7418 = vsyncpa [#allocation7], 1 }
 0x493   :  { %7419 = vsyncpa [#allocation5], 1 }

</bundles_post_ra>
